<compile_context>
chip_gen: v7x
topology: tpu7x:2x2x1
jax: 0.10.0
libtpu: 0.0.40
codegen_flags: <defaults>
</compile_context>

<pallas_src>
import jax
import jax.numpy as jnp
from jax.experimental import pallas as pl
from jax.experimental.pallas import tpu as pltpu

VOCAB = 50
EMB = 32
CONV_HIDDEN = 16                     # per-kernel-size conv channels
LSTM_HIDDEN = 16                     # article bi-LSTM hidden; pointer-net hidden
SEQ_LEN = 12                         # words per sentence
N_HOP = 1
CONV_OUT = 3 * CONV_HIDDEN           # 48  (sentence feature dim)
ENC_OUT = 2 * LSTM_HIDDEN            # 32  (bidirectional enc_out dim = ptr-net input dim)
SENT_BLOCK = 8                       # sentences per conv-encoder grid step


# ----------------------------- shared LSTM cell ------------------------------

def _lstm_gates(x, h, c, wih, whh, b):
    """One LSTM cell step.  Weights are (4, in, H) so gates are picked on a leading
    axis (no lane slicing).  Gate order is PyTorch's (i, f, g, o)."""
    def gate(k):
        return (jnp.dot(x, wih[k], preferred_element_type=jnp.float32)
                + jnp.dot(h, whh[k], preferred_element_type=jnp.float32)
                + b[k])
    i = jax.nn.sigmoid(gate(0))
    f = jax.nn.sigmoid(gate(1))
    g = jnp.tanh(gate(2))
    o = jax.nn.sigmoid(gate(3))
    c_new = f * c + i * g
    h_new = o * jnp.tanh(c_new)
    return h_new, c_new


# ----------------------------- Pallas kernels --------------------------------

def _conv_sent_kernel(x_ref, w_ref, b_ref, mask_ref, out_ref):
    """Block of sentences: fused conv1d(k=3,4,5) + ReLU + max-over-time pooling.

    x_ref:    (S, L+4, E)  embedded words, zero padded by 4 on the time axis
    w_ref:    (5, E, 3C)   the three convs packed (zero-padded) along the shift axis
    b_ref:    (1, 3C)      packed biases
    mask_ref: (L, 3C)      1.0 where the conv position exists for that kernel size
    out_ref:  (S, 3C)
    """
    S, Lp, _ = x_ref.shape
    L = Lp - 4
    w = w_ref[...]
    b = b_ref[...]
    valid = mask_ref[...]
    rows = []
    for s in range(S):                           # static unroll; weights stay resident
        x = x_ref[s]                             # (L+4, E)
        acc = jnp.zeros((L, w.shape[2]), jnp.float32)
        for j in range(5):                       # conv as 5 shifted matmuls
            acc = acc + jnp.dot(x[j:j + L, :], w[j],
                                preferred_element_type=jnp.float32)
        acc = jnp.maximum(acc + b, 0.0) * valid  # ReLU; zero the invalid tail positions
        rows.append(jnp.max(acc, axis=0, keepdims=True))       # max over time -> (1, 3C)
    out_ref[...] = jnp.concatenate(rows, axis=0)                # one (S, 3C) store


def _bilstm_kernel(x_ref, lens_ref, h0_ref, c0_ref,
                   wih_f_ref, whh_f_ref, b_f_ref,
                   wih_b_ref, whh_b_ref, b_b_ref,
                   out_f_ref, out_b_ref):
    """Full bidirectional article LSTM in ONE pallas_call (pack/pad semantics:
    padded steps emit 0 and do not advance the state).

    x_ref: (T, B, IN) time-major;  out_{f,b}_ref: (T, B, H)."""
    T = x_ref.shape[0]
    lens = lens_ref[...]                          # (B, 1) int32
    wih_f = wih_f_ref[...]; whh_f = whh_f_ref[...]; b_f = b_f_ref[...]
    wih_b = wih_b_ref[...]; whh_b = whh_b_ref[...]; b_b = b_b_ref[...]

    # TODO(synk): for long sequences switch the static unroll to lax.fori_loop with
    # dynamic leading-axis loads/stores; T is tiny here.
    h = h0_ref[0]; c = c0_ref[0]                  # forward direction
    for t in range(T):
        hn, cn = _lstm_gates(x_ref[t], h, c, wih_f, whh_f, b_f)
        valid = lens > t                          # (B, 1) bool
        out_f_ref[t] = jnp.where(valid, hn, 0.0)
        h = jnp.where(valid, hn, h)
        c = jnp.where(valid, cn, c)

    h = h0_ref[1]; c = c0_ref[1]                  # backward direction
    for t in range(T - 1, -1, -1):
        hn, cn = _lstm_gates(x_ref[t], h, c, wih_b, whh_b, b_b)
        valid = lens > t
        out_b_ref[t] = jnp.where(valid, hn, 0.0)
        h = jnp.where(valid, hn, h)
        c = jnp.where(valid, cn, c)


def _ptr_extractor_kernel(enc_ref, lstm_in_ref, mask_ref, h0_ref, c0_ref,
                          wih_ref, whh_ref, b_ref,
                          attn_wm_ref, attn_wq_ref, attn_v_ref,
                          hop_wm_ref, hop_wq_ref, hop_v_ref,
                          out_ref):
    """LSTMPointerNet.forward fused: pointer LSTM over all decode steps with
    VMEM-resident weights, then (scorer hoisted out of the recurrence) the hop
    attention + final unnormalized pointer scores for all steps at once.

    enc_ref:     (B, N, D)   article encoding (attention memory)
    lstm_in_ref: (NT, B, D)  [init_i ; gathered target sentence reprs], time-major
    mask_ref:    (B, N)      1.0 for valid sentences (len mask)
    out_ref:     (B, NT, N)  attention scores
    """
    NT, B, _ = lstm_in_ref.shape
    wih = wih_ref[...]; whh = whh_ref[...]; b = b_ref[...]
    attn_wm = attn_wm_ref[...]; attn_wq = attn_wq_ref[...]; attn_v = attn_v_ref[...]
    hop_wm = hop_wm_ref[...]; hop_wq = hop_wq_ref[...]; hop_v = hop_v_ref[...]
    mask = mask_ref[...]

    # ---- serial pointer-LSTM recurrence (only this part is inherently serial) ----
    h = h0_ref[...]
    c = c0_ref[...]
    queries = []
    for t in range(NT):                           # static unroll
        h, c = _lstm_gates(lstm_in_ref[t], h, c, wih, whh, b)
        queries.append(h)                         # (B, H) per step

    # ---- batched attention scoring, per batch element, all decode steps at once ----
    for bi in range(B):
        mem = enc_ref[bi]                                                     # (N, D)
        attn_feat = jnp.dot(mem, attn_wm, preferred_element_type=jnp.float32)  # (N, H)
        hop_feat = jnp.dot(mem, hop_wm, preferred_element_type=jnp.float32)    # (N, H)
        q = jnp.concatenate([qq[bi:bi + 1, :] for qq in queries], axis=0)      # (NT, H)
        m = mask[bi:bi + 1, :]                                                 # (1, N)
        for _ in range(N_HOP):                    # glimpse ("hop") attention
            qw = jnp.dot(q, hop_wq, preferred_element_type=jnp.float32)        # (NT, H)
            e = jnp.tanh(hop_feat[None, :, :] + qw[:, None, :])                # (NT, N, H)
            score = jnp.sum(e * hop_v[None, :, :], axis=-1)                    # (NT, N)
            score = jnp.where(m > 0.5, score, -1e18)                           # len mask
            score = score - jnp.max(score, axis=-1, keepdims=True)
            es = jnp.exp(score)
            norm = es / jnp.sum(es, axis=-1, keepdims=True)
            q = jnp.dot(norm, hop_feat, preferred_element_type=jnp.float32)    # (NT, H)
        qw = jnp.dot(q, attn_wq, preferred_element_type=jnp.float32)
        e = jnp.tanh(attn_feat[None, :, :] + qw[:, None, :])
        out_ref[bi] = jnp.sum(e * attn_v[None, :, :], axis=-1)                 # (NT, N)


# ----------------------------- wrappers ---------------------------------------

def conv_sent_encoder(word_ids, params):
    """word_ids: (Ns, L) int32  ->  (Ns, 3C) float32 sentence features."""
    Ns, L = word_ids.shape
    emb = params['embedding'][word_ids]                     # (Ns, L, E) gather (glue)
    emb = jnp.pad(emb, ((0, (-Ns) % SENT_BLOCK), (0, 4), (0, 0)))
    Np = emb.shape[0]
    # conv position t is valid for kernel size k iff t <= L - k
    k_of_col = jnp.repeat(jnp.arange(3, 6), CONV_HIDDEN)    # (3C,)
    mask = (jnp.arange(L)[:, None] <= (L - k_of_col)[None, :]).astype(jnp.float32)
    out = pl.pallas_call(
        _conv_sent_kernel,
        out_shape=jax.ShapeDtypeStruct((Np, CONV_OUT), jnp.float32),
        grid=(Np // SENT_BLOCK,),
        in_specs=[
            pl.BlockSpec((SENT_BLOCK, L + 4, EMB), lambda n: (n, 0, 0)),
            pl.BlockSpec((5, EMB, CONV_OUT), lambda n: (0, 0, 0)),
            pl.BlockSpec((1, CONV_OUT), lambda n: (0, 0)),
            pl.BlockSpec((L, CONV_OUT), lambda n: (0, 0)),
        ],
        out_specs=pl.BlockSpec((SENT_BLOCK, CONV_OUT), lambda n: (n, 0)),
        compiler_params=pltpu.CompilerParams(dimension_semantics=("parallel",)),
    )(emb, params['conv_w'], params['conv_b'], mask)
    return out[:Ns]


def bilstm_article_encoder(enc_art, sent_lens, params):
    """enc_art: (B, T, 3C); sent_lens: (B,) int32  ->  (B, T, 2H)."""
    B, T, _ = enc_art.shape
    H = LSTM_HIDDEN
    x_tm = jnp.transpose(enc_art, (1, 0, 2))                # time-major (T, B, 3C)
    lens = sent_lens.astype(jnp.int32)[:, None]             # (B, 1)
    h0 = jnp.broadcast_to(params['enc_init_h'][:, None, :], (2, B, H))
    c0 = jnp.broadcast_to(params['enc_init_c'][:, None, :], (2, B, H))
    out_f, out_b = pl.pallas_call(
        _bilstm_kernel,
        out_shape=(jax.ShapeDtypeStruct((T, B, H), jnp.float32),
                   jax.ShapeDtypeStruct((T, B, H), jnp.float32)),
    )(x_tm, lens, h0, c0,
      params['enc_wih_f'], params['enc_whh_f'], params['enc_b_f'],
      params['enc_wih_b'], params['enc_whh_b'], params['enc_b_b'])
    return jnp.transpose(jnp.concatenate([out_f, out_b], axis=-1), (1, 0, 2))


@jax.jit
def ptr_extract_summ_forward(params, word_ids, sent_lens, target):
    """PtrExtractSumm.forward.
    word_ids:  (B, max_n, L) int32 (pad word id 0; all-zero rows for padded sentences)
    sent_lens: (B,) int32 true sentence counts
    target:    (B, nt) int32 indices of target sentences (padded entries may be 0)
    Returns (B, nt+1, max_n) unnormalized pointer scores."""
    B, N, L = word_ids.shape
    nt = target.shape[1]

    # --- _encode: conv sentence features + bi-LSTM over the sentence sequence ---
    feats = conv_sent_encoder(word_ids.reshape(B * N, L), params)
    enc_art = feats.reshape(B, N, CONV_OUT)
    enc_out = bilstm_article_encoder(enc_art, sent_lens, params)    # (B, N, 2H)

    # --- ptr_in = gather(enc_out, dim=1, index=target) ---
    idx = jnp.broadcast_to(target.astype(jnp.int32)[:, :, None], (B, nt, ENC_OUT))
    ptr_in = jnp.take_along_axis(enc_out, idx, axis=1)              # (B, nt, D)
    init_i = jnp.broadcast_to(params['ptr_init_i'][None, None, :], (B, 1, ENC_OUT))
    lstm_in_tm = jnp.transpose(jnp.concatenate([init_i, ptr_in], axis=1), (1, 0, 2))

    mask = (jnp.arange(N)[None, :] < sent_lens[:, None]).astype(jnp.float32)  # (B, N)
    h0 = jnp.broadcast_to(params['ptr_init_h'], (B, LSTM_HIDDEN))
    c0 = jnp.broadcast_to(params['ptr_init_c'], (B, LSTM_HIDDEN))

    return pl.pallas_call(
        _ptr_extractor_kernel,
        out_shape=jax.ShapeDtypeStruct((B, nt + 1, N), jnp.float32),
    )(enc_out, lstm_in_tm, mask, h0, c0,
      params['ptr_wih'], params['ptr_whh'], params['ptr_b'],
      params['attn_wm'], params['attn_wq'], params['attn_v'],
      params['hop_wm'], params['hop_wq'], params['hop_v'])


# ----------------------------- parameters --------------------------------------

def init_params(key):
    ks = jax.random.split(key, 32)

    def u(k, shape, s=0.1):
        return jax.random.uniform(k, shape, jnp.float32, minval=-s, maxval=s)

    C, H, D, IN = CONV_HIDDEN, LSTM_HIDDEN, ENC_OUT, CONV_OUT
    emb = u(ks[0], (VOCAB, EMB)).at[0].set(0.0)              # padding_idx = 0

    # Pack the k=3/4/5 conv weights into one (5, E, 3C) tensor (zero pad where the
    # shift does not exist for that kernel size) so 5 matmuls produce all 3 outputs.
    w3, w4, w5 = u(ks[1], (3, EMB, C)), u(ks[2], (4, EMB, C)), u(ks[3], (5, EMB, C))
    conv_w = jnp.zeros((5, EMB, 3 * C), jnp.float32)
    conv_w = conv_w.at[:3, :, 0:C].set(w3)
    conv_w = conv_w.at[:4, :, C:2 * C].set(w4)
    conv_w = conv_w.at[:, :, 2 * C:3 * C].set(w5)
    conv_b = jnp.concatenate([u(ks[4], (1, C)), u(ks[5], (1, C)), u(ks[6], (1, C))], axis=1)

    return dict(
        embedding=emb, conv_w=conv_w, conv_b=conv_b,
        # article bi-LSTM (1 layer); gate-major weights (4, in, H), order (i, f, g, o)
        enc_wih_f=u(ks[7], (4, IN, H)), enc_whh_f=u(ks[8], (4, H, H)), enc_b_f=u(ks[9], (4, 1, H)),
        enc_wih_b=u(ks[10], (4, IN, H)), enc_whh_b=u(ks[11], (4, H, H)), enc_b_b=u(ks[12], (4, 1, H)),
        enc_init_h=u(ks[13], (2, H), 0.01), enc_init_c=u(ks[14], (2, H), 0.01),   # INI = 0.01
        # LSTMPointerNet
        ptr_init_h=u(ks[15], (1, H), 0.01), ptr_init_c=u(ks[16], (1, H), 0.01),
        ptr_init_i=u(ks[17], (D,), 0.1),
        ptr_wih=u(ks[18], (4, D, H)), ptr_whh=u(ks[19], (4, H, H)), ptr_b=u(ks[20], (4, 1, H)),
        attn_wm=u(ks[21], (D, H)), attn_wq=u(ks[22], (H, H)), attn_v=u(ks[23], (1, H), 0.01),
        hop_wm=u(ks[24], (D, H)), hop_wq=u(ks[25], (H, H)), hop_v=u(ks[26], (1, H), 0.01),
    )


if __name__ == "__main__":
    key = jax.random.PRNGKey(0)
    pkey, dkey = jax.random.split(key)
    params = init_params(pkey)

    B, max_n, nt = 2, 5, 3
    sent_nums = [5, 3]
    lens = jnp.asarray(sent_nums, jnp.int32)

    k1, _ = jax.random.split(dkey)
    word_ids = jax.random.randint(k1, (B, max_n, SEQ_LEN), 1, VOCAB, dtype=jnp.int32)
    word_ids = word_ids.at[:, :, -2:].set(0)                     # some word padding (id 0)
    slot = jnp.arange(max_n)[None, :, None]
    word_ids = jnp.where(slot < lens[:, None, None], word_ids, 0)  # padded sentence slots

    # target sentence indices per decode step (short article padded with index 0;
    # those rows are ignored by the loss in the reference training loop)
    target = jnp.array([[0, 2, 4],
                        [1, 2, 0]], jnp.int32)

    out = ptr_extract_summ_forward(params, word_ids, lens, target)
    jax.block_until_ready(out)
    assert out.shape == (B, nt + 1, max_n)
    assert bool(jnp.all(jnp.isfinite(out)))
    print("KERNEL_OK")
</pallas_src>

<mosaic_0001>
module attributes {stable_mosaic.version = 11 : i64} {
  func.func @_conv_sent_kernel(%arg0: i32, %arg1: memref<8x16x32xf32, #tpu.memory_space<vmem>>, %arg2: memref<5x32x48xf32, #tpu.memory_space<vmem>>, %arg3: memref<1x48xf32, #tpu.memory_space<vmem>>, %arg4: memref<12x48xf32, #tpu.memory_space<vmem>>, %arg5: memref<8x48xf32, #tpu.memory_space<vmem>>) attributes {dimension_semantics = [#tpu.dimension_semantics<parallel>], iteration_bounds = array<i64: 2>, scalar_prefetch = 0 : i64, scratch_operands = 0 : i64, tpu.core_type = #tpu.core_type<tc>, window_params = [{transform_indices = @transform_0, window_bounds = array<i64: 8, 16, 32>}, {pipeline_mode = #tpu.pipeline_mode<synchronous>, transform_indices = @transform_1, window_bounds = array<i64: 5, 32, 48>}, {pipeline_mode = #tpu.pipeline_mode<synchronous>, transform_indices = @transform_2, window_bounds = array<i64: 1, 48>}, {pipeline_mode = #tpu.pipeline_mode<synchronous>, transform_indices = @transform_3, window_bounds = array<i64: 12, 48>}, {transform_indices = @transform_4, window_bounds = array<i64: 8, 48>}]} {
    %c0 = arith.constant 0 : index
    %c0_0 = arith.constant 0 : index
    %c0_1 = arith.constant 0 : index
    %0 = vector.load %arg2[%c0, %c0_0, %c0_1] : memref<5x32x48xf32, #tpu.memory_space<vmem>>, vector<5x32x48xf32>
    %c0_2 = arith.constant 0 : index
    %c0_3 = arith.constant 0 : index
    %1 = vector.load %arg3[%c0_2, %c0_3] : memref<1x48xf32, #tpu.memory_space<vmem>>, vector<1x48xf32>
    %c0_4 = arith.constant 0 : index
    %c0_5 = arith.constant 0 : index
    %2 = vector.load %arg4[%c0_4, %c0_5] : memref<12x48xf32, #tpu.memory_space<vmem>>, vector<12x48xf32>
    %c0_6 = arith.constant 0 : index
    %c0_7 = arith.constant 0 : index
    %c0_8 = arith.constant 0 : index
    %3 = vector.load %arg1[%c0_6, %c0_7, %c0_8] : memref<8x16x32xf32, #tpu.memory_space<vmem>>, vector<1x16x32xf32>
    %4 = vector.shape_cast %3 : vector<1x16x32xf32> to vector<16x32xf32>
    %cst = arith.constant 0.000000e+00 : f32
    %5 = vector.broadcast %cst : f32 to vector<12x48xf32>
    %6 = vector.extract_strided_slice %4 {offsets = [0, 0], sizes = [12, 32], strides = [1, 1]} : vector<16x32xf32> to vector<12x32xf32>
    %7 = vector.extract_strided_slice %0 {offsets = [0, 0, 0], sizes = [1, 32, 48], strides = [1, 1, 1]} : vector<5x32x48xf32> to vector<1x32x48xf32>
    %8 = vector.shape_cast %7 : vector<1x32x48xf32> to vector<32x48xf32>
    %cst_9 = arith.constant dense<0.000000e+00> : vector<12x48xf32>
    %9 = tpu.matmul %6, %8, %cst_9 {dimension_numbers = #tpu.dot_dimension_numbers<[1], [0], [0], [1], [0, 0, 1, 1], [], []>} : vector<12x32xf32>, vector<32x48xf32>, vector<12x48xf32> -> vector<12x48xf32>
    %10 = arith.addf %5, %9 : vector<12x48xf32>
    %11 = vector.extract_strided_slice %4 {offsets = [1, 0], sizes = [12, 32], strides = [1, 1]} : vector<16x32xf32> to vector<12x32xf32>
    %12 = vector.extract_strided_slice %0 {offsets = [1, 0, 0], sizes = [1, 32, 48], strides = [1, 1, 1]} : vector<5x32x48xf32> to vector<1x32x48xf32>
    %13 = vector.shape_cast %12 : vector<1x32x48xf32> to vector<32x48xf32>
    %cst_10 = arith.constant dense<0.000000e+00> : vector<12x48xf32>
    %14 = tpu.matmul %11, %13, %cst_10 {dimension_numbers = #tpu.dot_dimension_numbers<[1], [0], [0], [1], [0, 0, 1, 1], [], []>} : vector<12x32xf32>, vector<32x48xf32>, vector<12x48xf32> -> vector<12x48xf32>
    %15 = arith.addf %10, %14 : vector<12x48xf32>
    %16 = vector.extract_strided_slice %4 {offsets = [2, 0], sizes = [12, 32], strides = [1, 1]} : vector<16x32xf32> to vector<12x32xf32>
    %17 = vector.extract_strided_slice %0 {offsets = [2, 0, 0], sizes = [1, 32, 48], strides = [1, 1, 1]} : vector<5x32x48xf32> to vector<1x32x48xf32>
    %18 = vector.shape_cast %17 : vector<1x32x48xf32> to vector<32x48xf32>
    %cst_11 = arith.constant dense<0.000000e+00> : vector<12x48xf32>
    %19 = tpu.matmul %16, %18, %cst_11 {dimension_numbers = #tpu.dot_dimension_numbers<[1], [0], [0], [1], [0, 0, 1, 1], [], []>} : vector<12x32xf32>, vector<32x48xf32>, vector<12x48xf32> -> vector<12x48xf32>
    %20 = arith.addf %15, %19 : vector<12x48xf32>
    %21 = vector.extract_strided_slice %4 {offsets = [3, 0], sizes = [12, 32], strides = [1, 1]} : vector<16x32xf32> to vector<12x32xf32>
    %22 = vector.extract_strided_slice %0 {offsets = [3, 0, 0], sizes = [1, 32, 48], strides = [1, 1, 1]} : vector<5x32x48xf32> to vector<1x32x48xf32>
    %23 = vector.shape_cast %22 : vector<1x32x48xf32> to vector<32x48xf32>
    %cst_12 = arith.constant dense<0.000000e+00> : vector<12x48xf32>
    %24 = tpu.matmul %21, %23, %cst_12 {dimension_numbers = #tpu.dot_dimension_numbers<[1], [0], [0], [1], [0, 0, 1, 1], [], []>} : vector<12x32xf32>, vector<32x48xf32>, vector<12x48xf32> -> vector<12x48xf32>
    %25 = arith.addf %20, %24 : vector<12x48xf32>
    %26 = vector.extract_strided_slice %4 {offsets = [4, 0], sizes = [12, 32], strides = [1, 1]} : vector<16x32xf32> to vector<12x32xf32>
    %27 = vector.extract_strided_slice %0 {offsets = [4, 0, 0], sizes = [1, 32, 48], strides = [1, 1, 1]} : vector<5x32x48xf32> to vector<1x32x48xf32>
    %28 = vector.shape_cast %27 : vector<1x32x48xf32> to vector<32x48xf32>
    %cst_13 = arith.constant dense<0.000000e+00> : vector<12x48xf32>
    %29 = tpu.matmul %26, %28, %cst_13 {dimension_numbers = #tpu.dot_dimension_numbers<[1], [0], [0], [1], [0, 0, 1, 1], [], []>} : vector<12x32xf32>, vector<32x48xf32>, vector<12x48xf32> -> vector<12x48xf32>
    %30 = arith.addf %25, %29 : vector<12x48xf32>
    %31 = vector.broadcast %1 : vector<1x48xf32> to vector<12x48xf32>
    %32 = arith.addf %30, %31 : vector<12x48xf32>
    %cst_14 = arith.constant 0.000000e+00 : f32
    %33 = vector.broadcast %cst_14 : f32 to vector<12x48xf32>
    %34 = arith.maximumf %32, %33 : vector<12x48xf32>
    %35 = arith.mulf %34, %2 : vector<12x48xf32>
    %cst_15 = arith.constant dense<0xFF800000> : vector<48xf32>
    %36 = vector.multi_reduction <maximumf>, %35, %cst_15 [0] : vector<12x48xf32> to vector<48xf32>
    %37 = vector.shape_cast %36 : vector<48xf32> to vector<1x48xf32>
    %c1 = arith.constant 1 : index
    %c0_16 = arith.constant 0 : index
    %c0_17 = arith.constant 0 : index
    %38 = vector.load %arg1[%c1, %c0_16, %c0_17] : memref<8x16x32xf32, #tpu.memory_space<vmem>>, vector<1x16x32xf32>
    %39 = vector.shape_cast %38 : vector<1x16x32xf32> to vector<16x32xf32>
    %cst_18 = arith.constant 0.000000e+00 : f32
    %40 = vector.broadcast %cst_18 : f32 to vector<12x48xf32>
    %41 = vector.extract_strided_slice %39 {offsets = [0, 0], sizes = [12, 32], strides = [1, 1]} : vector<16x32xf32> to vector<12x32xf32>
    %42 = vector.extract_strided_slice %0 {offsets = [0, 0, 0], sizes = [1, 32, 48], strides = [1, 1, 1]} : vector<5x32x48xf32> to vector<1x32x48xf32>
    %43 = vector.shape_cast %42 : vector<1x32x48xf32> to vector<32x48xf32>
    %cst_19 = arith.constant dense<0.000000e+00> : vector<12x48xf32>
    %44 = tpu.matmul %41, %43, %cst_19 {dimension_numbers = #tpu.dot_dimension_numbers<[1], [0], [0], [1], [0, 0, 1, 1], [], []>} : vector<12x32xf32>, vector<32x48xf32>, vector<12x48xf32> -> vector<12x48xf32>
    %45 = arith.addf %40, %44 : vector<12x48xf32>
    %46 = vector.extract_strided_slice %39 {offsets = [1, 0], sizes = [12, 32], strides = [1, 1]} : vector<16x32xf32> to vector<12x32xf32>
    %47 = vector.extract_strided_slice %0 {offsets = [1, 0, 0], sizes = [1, 32, 48], strides = [1, 1, 1]} : vector<5x32x48xf32> to vector<1x32x48xf32>
    %48 = vector.shape_cast %47 : vector<1x32x48xf32> to vector<32x48xf32>
    %cst_20 = arith.constant dense<0.000000e+00> : vector<12x48xf32>
    %49 = tpu.matmul %46, %48, %cst_20 {dimension_numbers = #tpu.dot_dimension_numbers<[1], [0], [0], [1], [0, 0, 1, 1], [], []>} : vector<12x32xf32>, vector<32x48xf32>, vector<12x48xf32> -> vector<12x48xf32>
    %50 = arith.addf %45, %49 : vector<12x48xf32>
    %51 = vector.extract_strided_slice %39 {offsets = [2, 0], sizes = [12, 32], strides = [1, 1]} : vector<16x32xf32> to vector<12x32xf32>
    %52 = vector.extract_strided_slice %0 {offsets = [2, 0, 0], sizes = [1, 32, 48], strides = [1, 1, 1]} : vector<5x32x48xf32> to vector<1x32x48xf32>
    %53 = vector.shape_cast %52 : vector<1x32x48xf32> to vector<32x48xf32>
    %cst_21 = arith.constant dense<0.000000e+00> : vector<12x48xf32>
    %54 = tpu.matmul %51, %53, %cst_21 {dimension_numbers = #tpu.dot_dimension_numbers<[1], [0], [0], [1], [0, 0, 1, 1], [], []>} : vector<12x32xf32>, vector<32x48xf32>, vector<12x48xf32> -> vector<12x48xf32>
    %55 = arith.addf %50, %54 : vector<12x48xf32>
    %56 = vector.extract_strided_slice %39 {offsets = [3, 0], sizes = [12, 32], strides = [1, 1]} : vector<16x32xf32> to vector<12x32xf32>
    %57 = vector.extract_strided_slice %0 {offsets = [3, 0, 0], sizes = [1, 32, 48], strides = [1, 1, 1]} : vector<5x32x48xf32> to vector<1x32x48xf32>
    %58 = vector.shape_cast %57 : vector<1x32x48xf32> to vector<32x48xf32>
    %cst_22 = arith.constant dense<0.000000e+00> : vector<12x48xf32>
    %59 = tpu.matmul %56, %58, %cst_22 {dimension_numbers = #tpu.dot_dimension_numbers<[1], [0], [0], [1], [0, 0, 1, 1], [], []>} : vector<12x32xf32>, vector<32x48xf32>, vector<12x48xf32> -> vector<12x48xf32>
    %60 = arith.addf %55, %59 : vector<12x48xf32>
    %61 = vector.extract_strided_slice %39 {offsets = [4, 0], sizes = [12, 32], strides = [1, 1]} : vector<16x32xf32> to vector<12x32xf32>
    %62 = vector.extract_strided_slice %0 {offsets = [4, 0, 0], sizes = [1, 32, 48], strides = [1, 1, 1]} : vector<5x32x48xf32> to vector<1x32x48xf32>
    %63 = vector.shape_cast %62 : vector<1x32x48xf32> to vector<32x48xf32>
    %cst_23 = arith.constant dense<0.000000e+00> : vector<12x48xf32>
    %64 = tpu.matmul %61, %63, %cst_23 {dimension_numbers = #tpu.dot_dimension_numbers<[1], [0], [0], [1], [0, 0, 1, 1], [], []>} : vector<12x32xf32>, vector<32x48xf32>, vector<12x48xf32> -> vector<12x48xf32>
    %65 = arith.addf %60, %64 : vector<12x48xf32>
    %66 = vector.broadcast %1 : vector<1x48xf32> to vector<12x48xf32>
    %67 = arith.addf %65, %66 : vector<12x48xf32>
    %cst_24 = arith.constant 0.000000e+00 : f32
    %68 = vector.broadcast %cst_24 : f32 to vector<12x48xf32>
    %69 = arith.maximumf %67, %68 : vector<12x48xf32>
    %70 = arith.mulf %69, %2 : vector<12x48xf32>
    %cst_25 = arith.constant dense<0xFF800000> : vector<48xf32>
    %71 = vector.multi_reduction <maximumf>, %70, %cst_25 [0] : vector<12x48xf32> to vector<48xf32>
    %72 = vector.shape_cast %71 : vector<48xf32> to vector<1x48xf32>
    %c2 = arith.constant 2 : index
    %c0_26 = arith.constant 0 : index
    %c0_27 = arith.constant 0 : index
    %73 = vector.load %arg1[%c2, %c0_26, %c0_27] : memref<8x16x32xf32, #tpu.memory_space<vmem>>, vector<1x16x32xf32>
    %74 = vector.shape_cast %73 : vector<1x16x32xf32> to vector<16x32xf32>
    %cst_28 = arith.constant 0.000000e+00 : f32
    %75 = vector.broadcast %cst_28 : f32 to vector<12x48xf32>
    %76 = vector.extract_strided_slice %74 {offsets = [0, 0], sizes = [12, 32], strides = [1, 1]} : vector<16x32xf32> to vector<12x32xf32>
    %77 = vector.extract_strided_slice %0 {offsets = [0, 0, 0], sizes = [1, 32, 48], strides = [1, 1, 1]} : vector<5x32x48xf32> to vector<1x32x48xf32>
    %78 = vector.shape_cast %77 : vector<1x32x48xf32> to vector<32x48xf32>
    %cst_29 = arith.constant dense<0.000000e+00> : vector<12x48xf32>
    %79 = tpu.matmul %76, %78, %cst_29 {dimension_numbers = #tpu.dot_dimension_numbers<[1], [0], [0], [1], [0, 0, 1, 1], [], []>} : vector<12x32xf32>, vector<32x48xf32>, vector<12x48xf32> -> vector<12x48xf32>
    %80 = arith.addf %75, %79 : vector<12x48xf32>
    %81 = vector.extract_strided_slice %74 {offsets = [1, 0], sizes = [12, 32], strides = [1, 1]} : vector<16x32xf32> to vector<12x32xf32>
    %82 = vector.extract_strided_slice %0 {offsets = [1, 0, 0], sizes = [1, 32, 48], strides = [1, 1, 1]} : vector<5x32x48xf32> to vector<1x32x48xf32>
    %83 = vector.shape_cast %82 : vector<1x32x48xf32> to vector<32x48xf32>
    %cst_30 = arith.constant dense<0.000000e+00> : vector<12x48xf32>
    %84 = tpu.matmul %81, %83, %cst_30 {dimension_numbers = #tpu.dot_dimension_numbers<[1], [0], [0], [1], [0, 0, 1, 1], [], []>} : vector<12x32xf32>, vector<32x48xf32>, vector<12x48xf32> -> vector<12x48xf32>
    %85 = arith.addf %80, %84 : vector<12x48xf32>
    %86 = vector.extract_strided_slice %74 {offsets = [2, 0], sizes = [12, 32], strides = [1, 1]} : vector<16x32xf32> to vector<12x32xf32>
    %87 = vector.extract_strided_slice %0 {offsets = [2, 0, 0], sizes = [1, 32, 48], strides = [1, 1, 1]} : vector<5x32x48xf32> to vector<1x32x48xf32>
    %88 = vector.shape_cast %87 : vector<1x32x48xf32> to vector<32x48xf32>
    %cst_31 = arith.constant dense<0.000000e+00> : vector<12x48xf32>
    %89 = tpu.matmul %86, %88, %cst_31 {dimension_numbers = #tpu.dot_dimension_numbers<[1], [0], [0], [1], [0, 0, 1, 1], [], []>} : vector<12x32xf32>, vector<32x48xf32>, vector<12x48xf32> -> vector<12x48xf32>
    %90 = arith.addf %85, %89 : vector<12x48xf32>
    %91 = vector.extract_strided_slice %74 {offsets = [3, 0], sizes = [12, 32], strides = [1, 1]} : vector<16x32xf32> to vector<12x32xf32>
    %92 = vector.extract_strided_slice %0 {offsets = [3, 0, 0], sizes = [1, 32, 48], strides = [1, 1, 1]} : vector<5x32x48xf32> to vector<1x32x48xf32>
    %93 = vector.shape_cast %92 : vector<1x32x48xf32> to vector<32x48xf32>
    %cst_32 = arith.constant dense<0.000000e+00> : vector<12x48xf32>
    %94 = tpu.matmul %91, %93, %cst_32 {dimension_numbers = #tpu.dot_dimension_numbers<[1], [0], [0], [1], [0, 0, 1, 1], [], []>} : vector<12x32xf32>, vector<32x48xf32>, vector<12x48xf32> -> vector<12x48xf32>
    %95 = arith.addf %90, %94 : vector<12x48xf32>
    %96 = vector.extract_strided_slice %74 {offsets = [4, 0], sizes = [12, 32], strides = [1, 1]} : vector<16x32xf32> to vector<12x32xf32>
    %97 = vector.extract_strided_slice %0 {offsets = [4, 0, 0], sizes = [1, 32, 48], strides = [1, 1, 1]} : vector<5x32x48xf32> to vector<1x32x48xf32>
    %98 = vector.shape_cast %97 : vector<1x32x48xf32> to vector<32x48xf32>
    %cst_33 = arith.constant dense<0.000000e+00> : vector<12x48xf32>
    %99 = tpu.matmul %96, %98, %cst_33 {dimension_numbers = #tpu.dot_dimension_numbers<[1], [0], [0], [1], [0, 0, 1, 1], [], []>} : vector<12x32xf32>, vector<32x48xf32>, vector<12x48xf32> -> vector<12x48xf32>
    %100 = arith.addf %95, %99 : vector<12x48xf32>
    %101 = vector.broadcast %1 : vector<1x48xf32> to vector<12x48xf32>
    %102 = arith.addf %100, %101 : vector<12x48xf32>
    %cst_34 = arith.constant 0.000000e+00 : f32
    %103 = vector.broadcast %cst_34 : f32 to vector<12x48xf32>
    %104 = arith.maximumf %102, %103 : vector<12x48xf32>
    %105 = arith.mulf %104, %2 : vector<12x48xf32>
    %cst_35 = arith.constant dense<0xFF800000> : vector<48xf32>
    %106 = vector.multi_reduction <maximumf>, %105, %cst_35 [0] : vector<12x48xf32> to vector<48xf32>
    %107 = vector.shape_cast %106 : vector<48xf32> to vector<1x48xf32>
    %c3 = arith.constant 3 : index
    %c0_36 = arith.constant 0 : index
    %c0_37 = arith.constant 0 : index
    %108 = vector.load %arg1[%c3, %c0_36, %c0_37] : memref<8x16x32xf32, #tpu.memory_space<vmem>>, vector<1x16x32xf32>
    %109 = vector.shape_cast %108 : vector<1x16x32xf32> to vector<16x32xf32>
    %cst_38 = arith.constant 0.000000e+00 : f32
    %110 = vector.broadcast %cst_38 : f32 to vector<12x48xf32>
    %111 = vector.extract_strided_slice %109 {offsets = [0, 0], sizes = [12, 32], strides = [1, 1]} : vector<16x32xf32> to vector<12x32xf32>
    %112 = vector.extract_strided_slice %0 {offsets = [0, 0, 0], sizes = [1, 32, 48], strides = [1, 1, 1]} : vector<5x32x48xf32> to vector<1x32x48xf32>
    %113 = vector.shape_cast %112 : vector<1x32x48xf32> to vector<32x48xf32>
    %cst_39 = arith.constant dense<0.000000e+00> : vector<12x48xf32>
    %114 = tpu.matmul %111, %113, %cst_39 {dimension_numbers = #tpu.dot_dimension_numbers<[1], [0], [0], [1], [0, 0, 1, 1], [], []>} : vector<12x32xf32>, vector<32x48xf32>, vector<12x48xf32> -> vector<12x48xf32>
    %115 = arith.addf %110, %114 : vector<12x48xf32>
    %116 = vector.extract_strided_slice %109 {offsets = [1, 0], sizes = [12, 32], strides = [1, 1]} : vector<16x32xf32> to vector<12x32xf32>
    %117 = vector.extract_strided_slice %0 {offsets = [1, 0, 0], sizes = [1, 32, 48], strides = [1, 1, 1]} : vector<5x32x48xf32> to vector<1x32x48xf32>
    %118 = vector.shape_cast %117 : vector<1x32x48xf32> to vector<32x48xf32>
    %cst_40 = arith.constant dense<0.000000e+00> : vector<12x48xf32>
    %119 = tpu.matmul %116, %118, %cst_40 {dimension_numbers = #tpu.dot_dimension_numbers<[1], [0], [0], [1], [0, 0, 1, 1], [], []>} : vector<12x32xf32>, vector<32x48xf32>, vector<12x48xf32> -> vector<12x48xf32>
    %120 = arith.addf %115, %119 : vector<12x48xf32>
    %121 = vector.extract_strided_slice %109 {offsets = [2, 0], sizes = [12, 32], strides = [1, 1]} : vector<16x32xf32> to vector<12x32xf32>
    %122 = vector.extract_strided_slice %0 {offsets = [2, 0, 0], sizes = [1, 32, 48], strides = [1, 1, 1]} : vector<5x32x48xf32> to vector<1x32x48xf32>
    %123 = vector.shape_cast %122 : vector<1x32x48xf32> to vector<32x48xf32>
    %cst_41 = arith.constant dense<0.000000e+00> : vector<12x48xf32>
    %124 = tpu.matmul %121, %123, %cst_41 {dimension_numbers = #tpu.dot_dimension_numbers<[1], [0], [0], [1], [0, 0, 1, 1], [], []>} : vector<12x32xf32>, vector<32x48xf32>, vector<12x48xf32> -> vector<12x48xf32>
    %125 = arith.addf %120, %124 : vector<12x48xf32>
    %126 = vector.extract_strided_slice %109 {offsets = [3, 0], sizes = [12, 32], strides = [1, 1]} : vector<16x32xf32> to vector<12x32xf32>
    %127 = vector.extract_strided_slice %0 {offsets = [3, 0, 0], sizes = [1, 32, 48], strides = [1, 1, 1]} : vector<5x32x48xf32> to vector<1x32x48xf32>
    %128 = vector.shape_cast %127 : vector<1x32x48xf32> to vector<32x48xf32>
    %cst_42 = arith.constant dense<0.000000e+00> : vector<12x48xf32>
    %129 = tpu.matmul %126, %128, %cst_42 {dimension_numbers = #tpu.dot_dimension_numbers<[1], [0], [0], [1], [0, 0, 1, 1], [], []>} : vector<12x32xf32>, vector<32x48xf32>, vector<12x48xf32> -> vector<12x48xf32>
    %130 = arith.addf %125, %129 : vector<12x48xf32>
    %131 = vector.extract_strided_slice %109 {offsets = [4, 0], sizes = [12, 32], strides = [1, 1]} : vector<16x32xf32> to vector<12x32xf32>
    %132 = vector.extract_strided_slice %0 {offsets = [4, 0, 0], sizes = [1, 32, 48], strides = [1, 1, 1]} : vector<5x32x48xf32> to vector<1x32x48xf32>
    %133 = vector.shape_cast %132 : vector<1x32x48xf32> to vector<32x48xf32>
    %cst_43 = arith.constant dense<0.000000e+00> : vector<12x48xf32>
    %134 = tpu.matmul %131, %133, %cst_43 {dimension_numbers = #tpu.dot_dimension_numbers<[1], [0], [0], [1], [0, 0, 1, 1], [], []>} : vector<12x32xf32>, vector<32x48xf32>, vector<12x48xf32> -> vector<12x48xf32>
    %135 = arith.addf %130, %134 : vector<12x48xf32>
    %136 = vector.broadcast %1 : vector<1x48xf32> to vector<12x48xf32>
    %137 = arith.addf %135, %136 : vector<12x48xf32>
    %cst_44 = arith.constant 0.000000e+00 : f32
    %138 = vector.broadcast %cst_44 : f32 to vector<12x48xf32>
    %139 = arith.maximumf %137, %138 : vector<12x48xf32>
    %140 = arith.mulf %139, %2 : vector<12x48xf32>
    %cst_45 = arith.constant dense<0xFF800000> : vector<48xf32>
    %141 = vector.multi_reduction <maximumf>, %140, %cst_45 [0] : vector<12x48xf32> to vector<48xf32>
    %142 = vector.shape_cast %141 : vector<48xf32> to vector<1x48xf32>
    %c4 = arith.constant 4 : index
    %c0_46 = arith.constant 0 : index
    %c0_47 = arith.constant 0 : index
    %143 = vector.load %arg1[%c4, %c0_46, %c0_47] : memref<8x16x32xf32, #tpu.memory_space<vmem>>, vector<1x16x32xf32>
    %144 = vector.shape_cast %143 : vector<1x16x32xf32> to vector<16x32xf32>
    %cst_48 = arith.constant 0.000000e+00 : f32
    %145 = vector.broadcast %cst_48 : f32 to vector<12x48xf32>
    %146 = vector.extract_strided_slice %144 {offsets = [0, 0], sizes = [12, 32], strides = [1, 1]} : vector<16x32xf32> to vector<12x32xf32>
    %147 = vector.extract_strided_slice %0 {offsets = [0, 0, 0], sizes = [1, 32, 48], strides = [1, 1, 1]} : vector<5x32x48xf32> to vector<1x32x48xf32>
    %148 = vector.shape_cast %147 : vector<1x32x48xf32> to vector<32x48xf32>
    %cst_49 = arith.constant dense<0.000000e+00> : vector<12x48xf32>
    %149 = tpu.matmul %146, %148, %cst_49 {dimension_numbers = #tpu.dot_dimension_numbers<[1], [0], [0], [1], [0, 0, 1, 1], [], []>} : vector<12x32xf32>, vector<32x48xf32>, vector<12x48xf32> -> vector<12x48xf32>
    %150 = arith.addf %145, %149 : vector<12x48xf32>
    %151 = vector.extract_strided_slice %144 {offsets = [1, 0], sizes = [12, 32], strides = [1, 1]} : vector<16x32xf32> to vector<12x32xf32>
    %152 = vector.extract_strided_slice %0 {offsets = [1, 0, 0], sizes = [1, 32, 48], strides = [1, 1, 1]} : vector<5x32x48xf32> to vector<1x32x48xf32>
    %153 = vector.shape_cast %152 : vector<1x32x48xf32> to vector<32x48xf32>
    %cst_50 = arith.constant dense<0.000000e+00> : vector<12x48xf32>
    %154 = tpu.matmul %151, %153, %cst_50 {dimension_numbers = #tpu.dot_dimension_numbers<[1], [0], [0], [1], [0, 0, 1, 1], [], []>} : vector<12x32xf32>, vector<32x48xf32>, vector<12x48xf32> -> vector<12x48xf32>
    %155 = arith.addf %150, %154 : vector<12x48xf32>
    %156 = vector.extract_strided_slice %144 {offsets = [2, 0], sizes = [12, 32], strides = [1, 1]} : vector<16x32xf32> to vector<12x32xf32>
    %157 = vector.extract_strided_slice %0 {offsets = [2, 0, 0], sizes = [1, 32, 48], strides = [1, 1, 1]} : vector<5x32x48xf32> to vector<1x32x48xf32>
    %158 = vector.shape_cast %157 : vector<1x32x48xf32> to vector<32x48xf32>
    %cst_51 = arith.constant dense<0.000000e+00> : vector<12x48xf32>
    %159 = tpu.matmul %156, %158, %cst_51 {dimension_numbers = #tpu.dot_dimension_numbers<[1], [0], [0], [1], [0, 0, 1, 1], [], []>} : vector<12x32xf32>, vector<32x48xf32>, vector<12x48xf32> -> vector<12x48xf32>
    %160 = arith.addf %155, %159 : vector<12x48xf32>
    %161 = vector.extract_strided_slice %144 {offsets = [3, 0], sizes = [12, 32], strides = [1, 1]} : vector<16x32xf32> to vector<12x32xf32>
    %162 = vector.extract_strided_slice %0 {offsets = [3, 0, 0], sizes = [1, 32, 48], strides = [1, 1, 1]} : vector<5x32x48xf32> to vector<1x32x48xf32>
    %163 = vector.shape_cast %162 : vector<1x32x48xf32> to vector<32x48xf32>
    %cst_52 = arith.constant dense<0.000000e+00> : vector<12x48xf32>
    %164 = tpu.matmul %161, %163, %cst_52 {dimension_numbers = #tpu.dot_dimension_numbers<[1], [0], [0], [1], [0, 0, 1, 1], [], []>} : vector<12x32xf32>, vector<32x48xf32>, vector<12x48xf32> -> vector<12x48xf32>
    %165 = arith.addf %160, %164 : vector<12x48xf32>
    %166 = vector.extract_strided_slice %144 {offsets = [4, 0], sizes = [12, 32], strides = [1, 1]} : vector<16x32xf32> to vector<12x32xf32>
    %167 = vector.extract_strided_slice %0 {offsets = [4, 0, 0], sizes = [1, 32, 48], strides = [1, 1, 1]} : vector<5x32x48xf32> to vector<1x32x48xf32>
    %168 = vector.shape_cast %167 : vector<1x32x48xf32> to vector<32x48xf32>
    %cst_53 = arith.constant dense<0.000000e+00> : vector<12x48xf32>
    %169 = tpu.matmul %166, %168, %cst_53 {dimension_numbers = #tpu.dot_dimension_numbers<[1], [0], [0], [1], [0, 0, 1, 1], [], []>} : vector<12x32xf32>, vector<32x48xf32>, vector<12x48xf32> -> vector<12x48xf32>
    %170 = arith.addf %165, %169 : vector<12x48xf32>
    %171 = vector.broadcast %1 : vector<1x48xf32> to vector<12x48xf32>
    %172 = arith.addf %170, %171 : vector<12x48xf32>
    %cst_54 = arith.constant 0.000000e+00 : f32
    %173 = vector.broadcast %cst_54 : f32 to vector<12x48xf32>
    %174 = arith.maximumf %172, %173 : vector<12x48xf32>
    %175 = arith.mulf %174, %2 : vector<12x48xf32>
    %cst_55 = arith.constant dense<0xFF800000> : vector<48xf32>
    %176 = vector.multi_reduction <maximumf>, %175, %cst_55 [0] : vector<12x48xf32> to vector<48xf32>
    %177 = vector.shape_cast %176 : vector<48xf32> to vector<1x48xf32>
    %c5 = arith.constant 5 : index
    %c0_56 = arith.constant 0 : index
    %c0_57 = arith.constant 0 : index
    %178 = vector.load %arg1[%c5, %c0_56, %c0_57] : memref<8x16x32xf32, #tpu.memory_space<vmem>>, vector<1x16x32xf32>
    %179 = vector.shape_cast %178 : vector<1x16x32xf32> to vector<16x32xf32>
    %cst_58 = arith.constant 0.000000e+00 : f32
    %180 = vector.broadcast %cst_58 : f32 to vector<12x48xf32>
    %181 = vector.extract_strided_slice %179 {offsets = [0, 0], sizes = [12, 32], strides = [1, 1]} : vector<16x32xf32> to vector<12x32xf32>
    %182 = vector.extract_strided_slice %0 {offsets = [0, 0, 0], sizes = [1, 32, 48], strides = [1, 1, 1]} : vector<5x32x48xf32> to vector<1x32x48xf32>
    %183 = vector.shape_cast %182 : vector<1x32x48xf32> to vector<32x48xf32>
    %cst_59 = arith.constant dense<0.000000e+00> : vector<12x48xf32>
    %184 = tpu.matmul %181, %183, %cst_59 {dimension_numbers = #tpu.dot_dimension_numbers<[1], [0], [0], [1], [0, 0, 1, 1], [], []>} : vector<12x32xf32>, vector<32x48xf32>, vector<12x48xf32> -> vector<12x48xf32>
    %185 = arith.addf %180, %184 : vector<12x48xf32>
    %186 = vector.extract_strided_slice %179 {offsets = [1, 0], sizes = [12, 32], strides = [1, 1]} : vector<16x32xf32> to vector<12x32xf32>
    %187 = vector.extract_strided_slice %0 {offsets = [1, 0, 0], sizes = [1, 32, 48], strides = [1, 1, 1]} : vector<5x32x48xf32> to vector<1x32x48xf32>
    %188 = vector.shape_cast %187 : vector<1x32x48xf32> to vector<32x48xf32>
    %cst_60 = arith.constant dense<0.000000e+00> : vector<12x48xf32>
    %189 = tpu.matmul %186, %188, %cst_60 {dimension_numbers = #tpu.dot_dimension_numbers<[1], [0], [0], [1], [0, 0, 1, 1], [], []>} : vector<12x32xf32>, vector<32x48xf32>, vector<12x48xf32> -> vector<12x48xf32>
    %190 = arith.addf %185, %189 : vector<12x48xf32>
    %191 = vector.extract_strided_slice %179 {offsets = [2, 0], sizes = [12, 32], strides = [1, 1]} : vector<16x32xf32> to vector<12x32xf32>
    %192 = vector.extract_strided_slice %0 {offsets = [2, 0, 0], sizes = [1, 32, 48], strides = [1, 1, 1]} : vector<5x32x48xf32> to vector<1x32x48xf32>
    %193 = vector.shape_cast %192 : vector<1x32x48xf32> to vector<32x48xf32>
    %cst_61 = arith.constant dense<0.000000e+00> : vector<12x48xf32>
    %194 = tpu.matmul %191, %193, %cst_61 {dimension_numbers = #tpu.dot_dimension_numbers<[1], [0], [0], [1], [0, 0, 1, 1], [], []>} : vector<12x32xf32>, vector<32x48xf32>, vector<12x48xf32> -> vector<12x48xf32>
    %195 = arith.addf %190, %194 : vector<12x48xf32>
    %196 = vector.extract_strided_slice %179 {offsets = [3, 0], sizes = [12, 32], strides = [1, 1]} : vector<16x32xf32> to vector<12x32xf32>
    %197 = vector.extract_strided_slice %0 {offsets = [3, 0, 0], sizes = [1, 32, 48], strides = [1, 1, 1]} : vector<5x32x48xf32> to vector<1x32x48xf32>
    %198 = vector.shape_cast %197 : vector<1x32x48xf32> to vector<32x48xf32>
    %cst_62 = arith.constant dense<0.000000e+00> : vector<12x48xf32>
    %199 = tpu.matmul %196, %198, %cst_62 {dimension_numbers = #tpu.dot_dimension_numbers<[1], [0], [0], [1], [0, 0, 1, 1], [], []>} : vector<12x32xf32>, vector<32x48xf32>, vector<12x48xf32> -> vector<12x48xf32>
    %200 = arith.addf %195, %199 : vector<12x48xf32>
    %201 = vector.extract_strided_slice %179 {offsets = [4, 0], sizes = [12, 32], strides = [1, 1]} : vector<16x32xf32> to vector<12x32xf32>
    %202 = vector.extract_strided_slice %0 {offsets = [4, 0, 0], sizes = [1, 32, 48], strides = [1, 1, 1]} : vector<5x32x48xf32> to vector<1x32x48xf32>
    %203 = vector.shape_cast %202 : vector<1x32x48xf32> to vector<32x48xf32>
    %cst_63 = arith.constant dense<0.000000e+00> : vector<12x48xf32>
    %204 = tpu.matmul %201, %203, %cst_63 {dimension_numbers = #tpu.dot_dimension_numbers<[1], [0], [0], [1], [0, 0, 1, 1], [], []>} : vector<12x32xf32>, vector<32x48xf32>, vector<12x48xf32> -> vector<12x48xf32>
    %205 = arith.addf %200, %204 : vector<12x48xf32>
    %206 = vector.broadcast %1 : vector<1x48xf32> to vector<12x48xf32>
    %207 = arith.addf %205, %206 : vector<12x48xf32>
    %cst_64 = arith.constant 0.000000e+00 : f32
    %208 = vector.broadcast %cst_64 : f32 to vector<12x48xf32>
    %209 = arith.maximumf %207, %208 : vector<12x48xf32>
    %210 = arith.mulf %209, %2 : vector<12x48xf32>
    %cst_65 = arith.constant dense<0xFF800000> : vector<48xf32>
    %211 = vector.multi_reduction <maximumf>, %210, %cst_65 [0] : vector<12x48xf32> to vector<48xf32>
    %212 = vector.shape_cast %211 : vector<48xf32> to vector<1x48xf32>
    %c6 = arith.constant 6 : index
    %c0_66 = arith.constant 0 : index
    %c0_67 = arith.constant 0 : index
    %213 = vector.load %arg1[%c6, %c0_66, %c0_67] : memref<8x16x32xf32, #tpu.memory_space<vmem>>, vector<1x16x32xf32>
    %214 = vector.shape_cast %213 : vector<1x16x32xf32> to vector<16x32xf32>
    %cst_68 = arith.constant 0.000000e+00 : f32
    %215 = vector.broadcast %cst_68 : f32 to vector<12x48xf32>
    %216 = vector.extract_strided_slice %214 {offsets = [0, 0], sizes = [12, 32], strides = [1, 1]} : vector<16x32xf32> to vector<12x32xf32>
    %217 = vector.extract_strided_slice %0 {offsets = [0, 0, 0], sizes = [1, 32, 48], strides = [1, 1, 1]} : vector<5x32x48xf32> to vector<1x32x48xf32>
    %218 = vector.shape_cast %217 : vector<1x32x48xf32> to vector<32x48xf32>
    %cst_69 = arith.constant dense<0.000000e+00> : vector<12x48xf32>
    %219 = tpu.matmul %216, %218, %cst_69 {dimension_numbers = #tpu.dot_dimension_numbers<[1], [0], [0], [1], [0, 0, 1, 1], [], []>} : vector<12x32xf32>, vector<32x48xf32>, vector<12x48xf32> -> vector<12x48xf32>
    %220 = arith.addf %215, %219 : vector<12x48xf32>
    %221 = vector.extract_strided_slice %214 {offsets = [1, 0], sizes = [12, 32], strides = [1, 1]} : vector<16x32xf32> to vector<12x32xf32>
    %222 = vector.extract_strided_slice %0 {offsets = [1, 0, 0], sizes = [1, 32, 48], strides = [1, 1, 1]} : vector<5x32x48xf32> to vector<1x32x48xf32>
    %223 = vector.shape_cast %222 : vector<1x32x48xf32> to vector<32x48xf32>
    %cst_70 = arith.constant dense<0.000000e+00> : vector<12x48xf32>
    %224 = tpu.matmul %221, %223, %cst_70 {dimension_numbers = #tpu.dot_dimension_numbers<[1], [0], [0], [1], [0, 0, 1, 1], [], []>} : vector<12x32xf32>, vector<32x48xf32>, vector<12x48xf32> -> vector<12x48xf32>
    %225 = arith.addf %220, %224 : vector<12x48xf32>
    %226 = vector.extract_strided_slice %214 {offsets = [2, 0], sizes = [12, 32], strides = [1, 1]} : vector<16x32xf32> to vector<12x32xf32>
    %227 = vector.extract_strided_slice %0 {offsets = [2, 0, 0], sizes = [1, 32, 48], strides = [1, 1, 1]} : vector<5x32x48xf32> to vector<1x32x48xf32>
    %228 = vector.shape_cast %227 : vector<1x32x48xf32> to vector<32x48xf32>
    %cst_71 = arith.constant dense<0.000000e+00> : vector<12x48xf32>
    %229 = tpu.matmul %226, %228, %cst_71 {dimension_numbers = #tpu.dot_dimension_numbers<[1], [0], [0], [1], [0, 0, 1, 1], [], []>} : vector<12x32xf32>, vector<32x48xf32>, vector<12x48xf32> -> vector<12x48xf32>
    %230 = arith.addf %225, %229 : vector<12x48xf32>
    %231 = vector.extract_strided_slice %214 {offsets = [3, 0], sizes = [12, 32], strides = [1, 1]} : vector<16x32xf32> to vector<12x32xf32>
    %232 = vector.extract_strided_slice %0 {offsets = [3, 0, 0], sizes = [1, 32, 48], strides = [1, 1, 1]} : vector<5x32x48xf32> to vector<1x32x48xf32>
    %233 = vector.shape_cast %232 : vector<1x32x48xf32> to vector<32x48xf32>
    %cst_72 = arith.constant dense<0.000000e+00> : vector<12x48xf32>
    %234 = tpu.matmul %231, %233, %cst_72 {dimension_numbers = #tpu.dot_dimension_numbers<[1], [0], [0], [1], [0, 0, 1, 1], [], []>} : vector<12x32xf32>, vector<32x48xf32>, vector<12x48xf32> -> vector<12x48xf32>
    %235 = arith.addf %230, %234 : vector<12x48xf32>
    %236 = vector.extract_strided_slice %214 {offsets = [4, 0], sizes = [12, 32], strides = [1, 1]} : vector<16x32xf32> to vector<12x32xf32>
    %237 = vector.extract_strided_slice %0 {offsets = [4, 0, 0], sizes = [1, 32, 48], strides = [1, 1, 1]} : vector<5x32x48xf32> to vector<1x32x48xf32>
    %238 = vector.shape_cast %237 : vector<1x32x48xf32> to vector<32x48xf32>
    %cst_73 = arith.constant dense<0.000000e+00> : vector<12x48xf32>
    %239 = tpu.matmul %236, %238, %cst_73 {dimension_numbers = #tpu.dot_dimension_numbers<[1], [0], [0], [1], [0, 0, 1, 1], [], []>} : vector<12x32xf32>, vector<32x48xf32>, vector<12x48xf32> -> vector<12x48xf32>
    %240 = arith.addf %235, %239 : vector<12x48xf32>
    %241 = vector.broadcast %1 : vector<1x48xf32> to vector<12x48xf32>
    %242 = arith.addf %240, %241 : vector<12x48xf32>
    %cst_74 = arith.constant 0.000000e+00 : f32
    %243 = vector.broadcast %cst_74 : f32 to vector<12x48xf32>
    %244 = arith.maximumf %242, %243 : vector<12x48xf32>
    %245 = arith.mulf %244, %2 : vector<12x48xf32>
    %cst_75 = arith.constant dense<0xFF800000> : vector<48xf32>
    %246 = vector.multi_reduction <maximumf>, %245, %cst_75 [0] : vector<12x48xf32> to vector<48xf32>
    %247 = vector.shape_cast %246 : vector<48xf32> to vector<1x48xf32>
    %c7 = arith.constant 7 : index
    %c0_76 = arith.constant 0 : index
    %c0_77 = arith.constant 0 : index
    %248 = vector.load %arg1[%c7, %c0_76, %c0_77] : memref<8x16x32xf32, #tpu.memory_space<vmem>>, vector<1x16x32xf32>
    %249 = vector.shape_cast %248 : vector<1x16x32xf32> to vector<16x32xf32>
    %cst_78 = arith.constant 0.000000e+00 : f32
    %250 = vector.broadcast %cst_78 : f32 to vector<12x48xf32>
    %251 = vector.extract_strided_slice %249 {offsets = [0, 0], sizes = [12, 32], strides = [1, 1]} : vector<16x32xf32> to vector<12x32xf32>
    %252 = vector.extract_strided_slice %0 {offsets = [0, 0, 0], sizes = [1, 32, 48], strides = [1, 1, 1]} : vector<5x32x48xf32> to vector<1x32x48xf32>
    %253 = vector.shape_cast %252 : vector<1x32x48xf32> to vector<32x48xf32>
    %cst_79 = arith.constant dense<0.000000e+00> : vector<12x48xf32>
    %254 = tpu.matmul %251, %253, %cst_79 {dimension_numbers = #tpu.dot_dimension_numbers<[1], [0], [0], [1], [0, 0, 1, 1], [], []>} : vector<12x32xf32>, vector<32x48xf32>, vector<12x48xf32> -> vector<12x48xf32>
    %255 = arith.addf %250, %254 : vector<12x48xf32>
    %256 = vector.extract_strided_slice %249 {offsets = [1, 0], sizes = [12, 32], strides = [1, 1]} : vector<16x32xf32> to vector<12x32xf32>
    %257 = vector.extract_strided_slice %0 {offsets = [1, 0, 0], sizes = [1, 32, 48], strides = [1, 1, 1]} : vector<5x32x48xf32> to vector<1x32x48xf32>
    %258 = vector.shape_cast %257 : vector<1x32x48xf32> to vector<32x48xf32>
    %cst_80 = arith.constant dense<0.000000e+00> : vector<12x48xf32>
    %259 = tpu.matmul %256, %258, %cst_80 {dimension_numbers = #tpu.dot_dimension_numbers<[1], [0], [0], [1], [0, 0, 1, 1], [], []>} : vector<12x32xf32>, vector<32x48xf32>, vector<12x48xf32> -> vector<12x48xf32>
    %260 = arith.addf %255, %259 : vector<12x48xf32>
    %261 = vector.extract_strided_slice %249 {offsets = [2, 0], sizes = [12, 32], strides = [1, 1]} : vector<16x32xf32> to vector<12x32xf32>
    %262 = vector.extract_strided_slice %0 {offsets = [2, 0, 0], sizes = [1, 32, 48], strides = [1, 1, 1]} : vector<5x32x48xf32> to vector<1x32x48xf32>
    %263 = vector.shape_cast %262 : vector<1x32x48xf32> to vector<32x48xf32>
    %cst_81 = arith.constant dense<0.000000e+00> : vector<12x48xf32>
    %264 = tpu.matmul %261, %263, %cst_81 {dimension_numbers = #tpu.dot_dimension_numbers<[1], [0], [0], [1], [0, 0, 1, 1], [], []>} : vector<12x32xf32>, vector<32x48xf32>, vector<12x48xf32> -> vector<12x48xf32>
    %265 = arith.addf %260, %264 : vector<12x48xf32>
    %266 = vector.extract_strided_slice %249 {offsets = [3, 0], sizes = [12, 32], strides = [1, 1]} : vector<16x32xf32> to vector<12x32xf32>
    %267 = vector.extract_strided_slice %0 {offsets = [3, 0, 0], sizes = [1, 32, 48], strides = [1, 1, 1]} : vector<5x32x48xf32> to vector<1x32x48xf32>
    %268 = vector.shape_cast %267 : vector<1x32x48xf32> to vector<32x48xf32>
    %cst_82 = arith.constant dense<0.000000e+00> : vector<12x48xf32>
    %269 = tpu.matmul %266, %268, %cst_82 {dimension_numbers = #tpu.dot_dimension_numbers<[1], [0], [0], [1], [0, 0, 1, 1], [], []>} : vector<12x32xf32>, vector<32x48xf32>, vector<12x48xf32> -> vector<12x48xf32>
    %270 = arith.addf %265, %269 : vector<12x48xf32>
    %271 = vector.extract_strided_slice %249 {offsets = [4, 0], sizes = [12, 32], strides = [1, 1]} : vector<16x32xf32> to vector<12x32xf32>
    %272 = vector.extract_strided_slice %0 {offsets = [4, 0, 0], sizes = [1, 32, 48], strides = [1, 1, 1]} : vector<5x32x48xf32> to vector<1x32x48xf32>
    %273 = vector.shape_cast %272 : vector<1x32x48xf32> to vector<32x48xf32>
    %cst_83 = arith.constant dense<0.000000e+00> : vector<12x48xf32>
    %274 = tpu.matmul %271, %273, %cst_83 {dimension_numbers = #tpu.dot_dimension_numbers<[1], [0], [0], [1], [0, 0, 1, 1], [], []>} : vector<12x32xf32>, vector<32x48xf32>, vector<12x48xf32> -> vector<12x48xf32>
    %275 = arith.addf %270, %274 : vector<12x48xf32>
    %276 = vector.broadcast %1 : vector<1x48xf32> to vector<12x48xf32>
    %277 = arith.addf %275, %276 : vector<12x48xf32>
    %cst_84 = arith.constant 0.000000e+00 : f32
    %278 = vector.broadcast %cst_84 : f32 to vector<12x48xf32>
    %279 = arith.maximumf %277, %278 : vector<12x48xf32>
    %280 = arith.mulf %279, %2 : vector<12x48xf32>
    %cst_85 = arith.constant dense<0xFF800000> : vector<48xf32>
    %281 = vector.multi_reduction <maximumf>, %280, %cst_85 [0] : vector<12x48xf32> to vector<48xf32>
    %282 = vector.shape_cast %281 : vector<48xf32> to vector<1x48xf32>
    %283 = tpu.concatenate %37, %72, %107, %142, %177, %212, %247, %282 in 0 : vector<1x48xf32>, vector<1x48xf32>, vector<1x48xf32>, vector<1x48xf32>, vector<1x48xf32>, vector<1x48xf32>, vector<1x48xf32>, vector<1x48xf32> -> vector<8x48xf32>
    %c0_86 = arith.constant 0 : index
    %c0_87 = arith.constant 0 : index
    %284 = vector.load %arg5[%c0_86, %c0_87] : memref<8x48xf32, #tpu.memory_space<vmem>>, vector<8x48xf32>
    tpu.vector_store %arg5[%c0_86, %c0_87], %283 {strides = array<i32>} : memref<8x48xf32, #tpu.memory_space<vmem>>, vector<8x48xf32>,
    return
  }
  func.func @transform_0(%arg0: i32) -> (i32, i32, i32) {
    %c0_i32 = arith.constant 0 : i32
    %c0_i32_0 = arith.constant 0 : i32
    %c0_i32_1 = arith.constant 0 : i32
    return %arg0, %c0_i32, %c0_i32_0 : i32, i32, i32
  }
  func.func @transform_1(%arg0: i32) -> (i32, i32, i32) {
    %c0_i32 = arith.constant 0 : i32
    %c0_i32_0 = arith.constant 0 : i32
    %c0_i32_1 = arith.constant 0 : i32
    %c0_i32_2 = arith.constant 0 : i32
    return %c0_i32, %c0_i32_0, %c0_i32_1 : i32, i32, i32
  }
  func.func @transform_2(%arg0: i32) -> (i32, i32) {
    %c0_i32 = arith.constant 0 : i32
    %c0_i32_0 = arith.constant 0 : i32
    %c0_i32_1 = arith.constant 0 : i32
    return %c0_i32, %c0_i32_0 : i32, i32
  }
  func.func @transform_3(%arg0: i32) -> (i32, i32) {
    %c0_i32 = arith.constant 0 : i32
    %c0_i32_0 = arith.constant 0 : i32
    %c0_i32_1 = arith.constant 0 : i32
    return %c0_i32, %c0_i32_0 : i32, i32
  }
  func.func @transform_4(%arg0: i32) -> (i32, i32) {
    %c0_i32 = arith.constant 0 : i32
    %c0_i32_0 = arith.constant 0 : i32
    return %arg0, %c0_i32 : i32, i32
  }
}

module attributes {stable_mosaic.version = 11 : i64} {
  func.func @_bilstm_kernel(%arg0: memref<5x2x48xf32, #tpu.memory_space<vmem>>, %arg1: memref<2x1xi32, #tpu.memory_space<vmem>>, %arg2: memref<2x2x16xf32, #tpu.memory_space<vmem>>, %arg3: memref<2x2x16xf32, #tpu.memory_space<vmem>>, %arg4: memref<4x48x16xf32, #tpu.memory_space<vmem>>, %arg5: memref<4x16x16xf32, #tpu.memory_space<vmem>>, %arg6: memref<4x1x16xf32, #tpu.memory_space<vmem>>, %arg7: memref<4x48x16xf32, #tpu.memory_space<vmem>>, %arg8: memref<4x16x16xf32, #tpu.memory_space<vmem>>, %arg9: memref<4x1x16xf32, #tpu.memory_space<vmem>>, %arg10: memref<5x2x16xf32, #tpu.memory_space<vmem>>, %arg11: memref<5x2x16xf32, #tpu.memory_space<vmem>>) attributes {dimension_semantics = [], scalar_prefetch = 0 : i64, scratch_operands = 0 : i64, tpu.core_type = #tpu.core_type<tc>} {
    %c0 = arith.constant 0 : index
    %c0_0 = arith.constant 0 : index
    %0 = vector.load %arg1[%c0, %c0_0] : memref<2x1xi32, #tpu.memory_space<vmem>>, vector<2x1xi32>
    %c0_1 = arith.constant 0 : index
    %c0_2 = arith.constant 0 : index
    %c0_3 = arith.constant 0 : index
    %1 = vector.load %arg4[%c0_1, %c0_2, %c0_3] : memref<4x48x16xf32, #tpu.memory_space<vmem>>, vector<4x48x16xf32>
    %c0_4 = arith.constant 0 : index
    %c0_5 = arith.constant 0 : index
    %c0_6 = arith.constant 0 : index
    %2 = vector.load %arg5[%c0_4, %c0_5, %c0_6] : memref<4x16x16xf32, #tpu.memory_space<vmem>>, vector<4x16x16xf32>
    %c0_7 = arith.constant 0 : index
    %c0_8 = arith.constant 0 : index
    %c0_9 = arith.constant 0 : index
    %3 = vector.load %arg6[%c0_7, %c0_8, %c0_9] : memref<4x1x16xf32, #tpu.memory_space<vmem>>, vector<4x1x16xf32>
    %c0_10 = arith.constant 0 : index
    %c0_11 = arith.constant 0 : index
    %c0_12 = arith.constant 0 : index
    %4 = vector.load %arg7[%c0_10, %c0_11, %c0_12] : memref<4x48x16xf32, #tpu.memory_space<vmem>>, vector<4x48x16xf32>
    %c0_13 = arith.constant 0 : index
    %c0_14 = arith.constant 0 : index
    %c0_15 = arith.constant 0 : index
    %5 = vector.load %arg8[%c0_13, %c0_14, %c0_15] : memref<4x16x16xf32, #tpu.memory_space<vmem>>, vector<4x16x16xf32>
    %c0_16 = arith.constant 0 : index
    %c0_17 = arith.constant 0 : index
    %c0_18 = arith.constant 0 : index
    %6 = vector.load %arg9[%c0_16, %c0_17, %c0_18] : memref<4x1x16xf32, #tpu.memory_space<vmem>>, vector<4x1x16xf32>
    %c0_19 = arith.constant 0 : index
    %c0_20 = arith.constant 0 : index
    %c0_21 = arith.constant 0 : index
    %7 = vector.load %arg2[%c0_19, %c0_20, %c0_21] : memref<2x2x16xf32, #tpu.memory_space<vmem>>, vector<1x2x16xf32>
    %8 = vector.shape_cast %7 : vector<1x2x16xf32> to vector<2x16xf32>
    %c0_22 = arith.constant 0 : index
    %c0_23 = arith.constant 0 : index
    %c0_24 = arith.constant 0 : index
    %9 = vector.load %arg3[%c0_22, %c0_23, %c0_24] : memref<2x2x16xf32, #tpu.memory_space<vmem>>, vector<1x2x16xf32>
    %10 = vector.shape_cast %9 : vector<1x2x16xf32> to vector<2x16xf32>
    %c0_25 = arith.constant 0 : index
    %c0_26 = arith.constant 0 : index
    %c0_27 = arith.constant 0 : index
    %11 = vector.load %arg0[%c0_25, %c0_26, %c0_27] : memref<5x2x48xf32, #tpu.memory_space<vmem>>, vector<1x2x48xf32>
    %12 = vector.shape_cast %11 : vector<1x2x48xf32> to vector<2x48xf32>
    %13 = vector.extract_strided_slice %1 {offsets = [0, 0, 0], sizes = [1, 48, 16], strides = [1, 1, 1]} : vector<4x48x16xf32> to vector<1x48x16xf32>
    %14 = vector.shape_cast %13 : vector<1x48x16xf32> to vector<48x16xf32>
    %cst = arith.constant dense<0.000000e+00> : vector<2x16xf32>
    %15 = tpu.matmul %12, %14, %cst {dimension_numbers = #tpu.dot_dimension_numbers<[1], [0], [0], [1], [0, 0, 1, 1], [], []>} : vector<2x48xf32>, vector<48x16xf32>, vector<2x16xf32> -> vector<2x16xf32>
    %16 = vector.extract_strided_slice %2 {offsets = [0, 0, 0], sizes = [1, 16, 16], strides = [1, 1, 1]} : vector<4x16x16xf32> to vector<1x16x16xf32>
    %17 = vector.shape_cast %16 : vector<1x16x16xf32> to vector<16x16xf32>
    %cst_28 = arith.constant dense<0.000000e+00> : vector<2x16xf32>
    %18 = tpu.matmul %8, %17, %cst_28 {dimension_numbers = #tpu.dot_dimension_numbers<[1], [0], [0], [1], [0, 0, 1, 1], [], []>} : vector<2x16xf32>, vector<16x16xf32>, vector<2x16xf32> -> vector<2x16xf32>
    %19 = arith.addf %15, %18 : vector<2x16xf32>
    %20 = vector.extract_strided_slice %3 {offsets = [0, 0, 0], sizes = [1, 1, 16], strides = [1, 1, 1]} : vector<4x1x16xf32> to vector<1x1x16xf32>
    %21 = vector.shape_cast %20 : vector<1x1x16xf32> to vector<1x16xf32>
    %22 = vector.broadcast %21 : vector<1x16xf32> to vector<2x16xf32>
    %23 = arith.addf %19, %22 : vector<2x16xf32>
    %24 = arith.negf %23 : vector<2x16xf32>
    %25 = math.exp %24 : vector<2x16xf32>
    %cst_29 = arith.constant 1.000000e+00 : f32
    %26 = vector.broadcast %cst_29 : f32 to vector<2x16xf32>
    %27 = arith.addf %26, %25 : vector<2x16xf32>
    %28 = arith.divf %26, %27 : vector<2x16xf32>
    %29 = vector.extract_strided_slice %1 {offsets = [1, 0, 0], sizes = [1, 48, 16], strides = [1, 1, 1]} : vector<4x48x16xf32> to vector<1x48x16xf32>
    %30 = vector.shape_cast %29 : vector<1x48x16xf32> to vector<48x16xf32>
    %cst_30 = arith.constant dense<0.000000e+00> : vector<2x16xf32>
    %31 = tpu.matmul %12, %30, %cst_30 {dimension_numbers = #tpu.dot_dimension_numbers<[1], [0], [0], [1], [0, 0, 1, 1], [], []>} : vector<2x48xf32>, vector<48x16xf32>, vector<2x16xf32> -> vector<2x16xf32>
    %32 = vector.extract_strided_slice %2 {offsets = [1, 0, 0], sizes = [1, 16, 16], strides = [1, 1, 1]} : vector<4x16x16xf32> to vector<1x16x16xf32>
    %33 = vector.shape_cast %32 : vector<1x16x16xf32> to vector<16x16xf32>
    %cst_31 = arith.constant dense<0.000000e+00> : vector<2x16xf32>
    %34 = tpu.matmul %8, %33, %cst_31 {dimension_numbers = #tpu.dot_dimension_numbers<[1], [0], [0], [1], [0, 0, 1, 1], [], []>} : vector<2x16xf32>, vector<16x16xf32>, vector<2x16xf32> -> vector<2x16xf32>
    %35 = arith.addf %31, %34 : vector<2x16xf32>
    %36 = vector.extract_strided_slice %3 {offsets = [1, 0, 0], sizes = [1, 1, 16], strides = [1, 1, 1]} : vector<4x1x16xf32> to vector<1x1x16xf32>
    %37 = vector.shape_cast %36 : vector<1x1x16xf32> to vector<1x16xf32>
    %38 = vector.broadcast %37 : vector<1x16xf32> to vector<2x16xf32>
    %39 = arith.addf %35, %38 : vector<2x16xf32>
    %40 = arith.negf %39 : vector<2x16xf32>
    %41 = math.exp %40 : vector<2x16xf32>
    %cst_32 = arith.constant 1.000000e+00 : f32
    %42 = vector.broadcast %cst_32 : f32 to vector<2x16xf32>
    %43 = arith.addf %42, %41 : vector<2x16xf32>
    %44 = arith.divf %42, %43 : vector<2x16xf32>
    %45 = vector.extract_strided_slice %1 {offsets = [2, 0, 0], sizes = [1, 48, 16], strides = [1, 1, 1]} : vector<4x48x16xf32> to vector<1x48x16xf32>
    %46 = vector.shape_cast %45 : vector<1x48x16xf32> to vector<48x16xf32>
    %cst_33 = arith.constant dense<0.000000e+00> : vector<2x16xf32>
    %47 = tpu.matmul %12, %46, %cst_33 {dimension_numbers = #tpu.dot_dimension_numbers<[1], [0], [0], [1], [0, 0, 1, 1], [], []>} : vector<2x48xf32>, vector<48x16xf32>, vector<2x16xf32> -> vector<2x16xf32>
    %48 = vector.extract_strided_slice %2 {offsets = [2, 0, 0], sizes = [1, 16, 16], strides = [1, 1, 1]} : vector<4x16x16xf32> to vector<1x16x16xf32>
    %49 = vector.shape_cast %48 : vector<1x16x16xf32> to vector<16x16xf32>
    %cst_34 = arith.constant dense<0.000000e+00> : vector<2x16xf32>
    %50 = tpu.matmul %8, %49, %cst_34 {dimension_numbers = #tpu.dot_dimension_numbers<[1], [0], [0], [1], [0, 0, 1, 1], [], []>} : vector<2x16xf32>, vector<16x16xf32>, vector<2x16xf32> -> vector<2x16xf32>
    %51 = arith.addf %47, %50 : vector<2x16xf32>
    %52 = vector.extract_strided_slice %3 {offsets = [2, 0, 0], sizes = [1, 1, 16], strides = [1, 1, 1]} : vector<4x1x16xf32> to vector<1x1x16xf32>
    %53 = vector.shape_cast %52 : vector<1x1x16xf32> to vector<1x16xf32>
    %54 = vector.broadcast %53 : vector<1x16xf32> to vector<2x16xf32>
    %55 = arith.addf %51, %54 : vector<2x16xf32>
    %56 = math.tanh %55 : vector<2x16xf32>
    %57 = vector.extract_strided_slice %1 {offsets = [3, 0, 0], sizes = [1, 48, 16], strides = [1, 1, 1]} : vector<4x48x16xf32> to vector<1x48x16xf32>
    %58 = vector.shape_cast %57 : vector<1x48x16xf32> to vector<48x16xf32>
    %cst_35 = arith.constant dense<0.000000e+00> : vector<2x16xf32>
    %59 = tpu.matmul %12, %58, %cst_35 {dimension_numbers = #tpu.dot_dimension_numbers<[1], [0], [0], [1], [0, 0, 1, 1], [], []>} : vector<2x48xf32>, vector<48x16xf32>, vector<2x16xf32> -> vector<2x16xf32>
    %60 = vector.extract_strided_slice %2 {offsets = [3, 0, 0], sizes = [1, 16, 16], strides = [1, 1, 1]} : vector<4x16x16xf32> to vector<1x16x16xf32>
    %61 = vector.shape_cast %60 : vector<1x16x16xf32> to vector<16x16xf32>
    %cst_36 = arith.constant dense<0.000000e+00> : vector<2x16xf32>
    %62 = tpu.matmul %8, %61, %cst_36 {dimension_numbers = #tpu.dot_dimension_numbers<[1], [0], [0], [1], [0, 0, 1, 1], [], []>} : vector<2x16xf32>, vector<16x16xf32>, vector<2x16xf32> -> vector<2x16xf32>
    %63 = arith.addf %59, %62 : vector<2x16xf32>
    %64 = vector.extract_strided_slice %3 {offsets = [3, 0, 0], sizes = [1, 1, 16], strides = [1, 1, 1]} : vector<4x1x16xf32> to vector<1x1x16xf32>
    %65 = vector.shape_cast %64 : vector<1x1x16xf32> to vector<1x16xf32>
    %66 = vector.broadcast %65 : vector<1x16xf32> to vector<2x16xf32>
    %67 = arith.addf %63, %66 : vector<2x16xf32>
    %68 = arith.negf %67 : vector<2x16xf32>
    %69 = math.exp %68 : vector<2x16xf32>
    %cst_37 = arith.constant 1.000000e+00 : f32
    %70 = vector.broadcast %cst_37 : f32 to vector<2x16xf32>
    %71 = arith.addf %70, %69 : vector<2x16xf32>
    %72 = arith.divf %70, %71 : vector<2x16xf32>
    %73 = arith.mulf %44, %10 : vector<2x16xf32>
    %74 = arith.mulf %28, %56 : vector<2x16xf32>
    %75 = arith.addf %73, %74 : vector<2x16xf32>
    %76 = math.tanh %75 : vector<2x16xf32>
    %77 = arith.mulf %72, %76 : vector<2x16xf32>
    %c0_i32 = arith.constant 0 : i32
    %78 = vector.broadcast %c0_i32 : i32 to vector<2x1xi32>
    %79 = arith.cmpi sgt, %0, %78 : vector<2x1xi32>
    %cst_38 = arith.constant 0.000000e+00 : f32
    %80 = vector.shape_cast %79 : vector<2x1xi1> to vector<2x1xi1>
    %81 = vector.broadcast %80 : vector<2x1xi1> to vector<2x16xi1>
    %82 = vector.broadcast %cst_38 : f32 to vector<2x16xf32>
    %83 = arith.select %81, %77, %82 : vector<2x16xi1>, vector<2x16xf32>
    %c0_39 = arith.constant 0 : index
    %c0_40 = arith.constant 0 : index
    %c0_41 = arith.constant 0 : index
    %84 = vector.load %arg10[%c0_39, %c0_40, %c0_41] : memref<5x2x16xf32, #tpu.memory_space<vmem>>, vector<1x2x16xf32>
    %85 = vector.shape_cast %84 : vector<1x2x16xf32> to vector<2x16xf32>
    %86 = vector.shape_cast %83 : vector<2x16xf32> to vector<1x2x16xf32>
    tpu.vector_store %arg10[%c0_39, %c0_40, %c0_41], %86 {strides = array<i32>} : memref<5x2x16xf32, #tpu.memory_space<vmem>>, vector<1x2x16xf32>,
    %87 = vector.shape_cast %79 : vector<2x1xi1> to vector<2x1xi1>
    %88 = vector.broadcast %87 : vector<2x1xi1> to vector<2x16xi1>
    %89 = arith.select %88, %77, %8 : vector<2x16xi1>, vector<2x16xf32>
    %90 = vector.shape_cast %79 : vector<2x1xi1> to vector<2x1xi1>
    %91 = vector.broadcast %90 : vector<2x1xi1> to vector<2x16xi1>
    %92 = arith.select %91, %75, %10 : vector<2x16xi1>, vector<2x16xf32>
    %c1 = arith.constant 1 : index
    %c0_42 = arith.constant 0 : index
    %c0_43 = arith.constant 0 : index
    %93 = vector.load %arg0[%c1, %c0_42, %c0_43] : memref<5x2x48xf32, #tpu.memory_space<vmem>>, vector<1x2x48xf32>
    %94 = vector.shape_cast %93 : vector<1x2x48xf32> to vector<2x48xf32>
    %95 = vector.extract_strided_slice %1 {offsets = [0, 0, 0], sizes = [1, 48, 16], strides = [1, 1, 1]} : vector<4x48x16xf32> to vector<1x48x16xf32>
    %96 = vector.shape_cast %95 : vector<1x48x16xf32> to vector<48x16xf32>
    %cst_44 = arith.constant dense<0.000000e+00> : vector<2x16xf32>
    %97 = tpu.matmul %94, %96, %cst_44 {dimension_numbers = #tpu.dot_dimension_numbers<[1], [0], [0], [1], [0, 0, 1, 1], [], []>} : vector<2x48xf32>, vector<48x16xf32>, vector<2x16xf32> -> vector<2x16xf32>
    %98 = vector.extract_strided_slice %2 {offsets = [0, 0, 0], sizes = [1, 16, 16], strides = [1, 1, 1]} : vector<4x16x16xf32> to vector<1x16x16xf32>
    %99 = vector.shape_cast %98 : vector<1x16x16xf32> to vector<16x16xf32>
    %cst_45 = arith.constant dense<0.000000e+00> : vector<2x16xf32>
    %100 = tpu.matmul %89, %99, %cst_45 {dimension_numbers = #tpu.dot_dimension_numbers<[1], [0], [0], [1], [0, 0, 1, 1], [], []>} : vector<2x16xf32>, vector<16x16xf32>, vector<2x16xf32> -> vector<2x16xf32>
    %101 = arith.addf %97, %100 : vector<2x16xf32>
    %102 = vector.extract_strided_slice %3 {offsets = [0, 0, 0], sizes = [1, 1, 16], strides = [1, 1, 1]} : vector<4x1x16xf32> to vector<1x1x16xf32>
    %103 = vector.shape_cast %102 : vector<1x1x16xf32> to vector<1x16xf32>
    %104 = vector.broadcast %103 : vector<1x16xf32> to vector<2x16xf32>
    %105 = arith.addf %101, %104 : vector<2x16xf32>
    %106 = arith.negf %105 : vector<2x16xf32>
    %107 = math.exp %106 : vector<2x16xf32>
    %cst_46 = arith.constant 1.000000e+00 : f32
    %108 = vector.broadcast %cst_46 : f32 to vector<2x16xf32>
    %109 = arith.addf %108, %107 : vector<2x16xf32>
    %110 = arith.divf %108, %109 : vector<2x16xf32>
    %111 = vector.extract_strided_slice %1 {offsets = [1, 0, 0], sizes = [1, 48, 16], strides = [1, 1, 1]} : vector<4x48x16xf32> to vector<1x48x16xf32>
    %112 = vector.shape_cast %111 : vector<1x48x16xf32> to vector<48x16xf32>
    %cst_47 = arith.constant dense<0.000000e+00> : vector<2x16xf32>
    %113 = tpu.matmul %94, %112, %cst_47 {dimension_numbers = #tpu.dot_dimension_numbers<[1], [0], [0], [1], [0, 0, 1, 1], [], []>} : vector<2x48xf32>, vector<48x16xf32>, vector<2x16xf32> -> vector<2x16xf32>
    %114 = vector.extract_strided_slice %2 {offsets = [1, 0, 0], sizes = [1, 16, 16], strides = [1, 1, 1]} : vector<4x16x16xf32> to vector<1x16x16xf32>
    %115 = vector.shape_cast %114 : vector<1x16x16xf32> to vector<16x16xf32>
    %cst_48 = arith.constant dense<0.000000e+00> : vector<2x16xf32>
    %116 = tpu.matmul %89, %115, %cst_48 {dimension_numbers = #tpu.dot_dimension_numbers<[1], [0], [0], [1], [0, 0, 1, 1], [], []>} : vector<2x16xf32>, vector<16x16xf32>, vector<2x16xf32> -> vector<2x16xf32>
    %117 = arith.addf %113, %116 : vector<2x16xf32>
    %118 = vector.extract_strided_slice %3 {offsets = [1, 0, 0], sizes = [1, 1, 16], strides = [1, 1, 1]} : vector<4x1x16xf32> to vector<1x1x16xf32>
    %119 = vector.shape_cast %118 : vector<1x1x16xf32> to vector<1x16xf32>
    %120 = vector.broadcast %119 : vector<1x16xf32> to vector<2x16xf32>
    %121 = arith.addf %117, %120 : vector<2x16xf32>
    %122 = arith.negf %121 : vector<2x16xf32>
    %123 = math.exp %122 : vector<2x16xf32>
    %cst_49 = arith.constant 1.000000e+00 : f32
    %124 = vector.broadcast %cst_49 : f32 to vector<2x16xf32>
    %125 = arith.addf %124, %123 : vector<2x16xf32>
    %126 = arith.divf %124, %125 : vector<2x16xf32>
    %127 = vector.extract_strided_slice %1 {offsets = [2, 0, 0], sizes = [1, 48, 16], strides = [1, 1, 1]} : vector<4x48x16xf32> to vector<1x48x16xf32>
    %128 = vector.shape_cast %127 : vector<1x48x16xf32> to vector<48x16xf32>
    %cst_50 = arith.constant dense<0.000000e+00> : vector<2x16xf32>
    %129 = tpu.matmul %94, %128, %cst_50 {dimension_numbers = #tpu.dot_dimension_numbers<[1], [0], [0], [1], [0, 0, 1, 1], [], []>} : vector<2x48xf32>, vector<48x16xf32>, vector<2x16xf32> -> vector<2x16xf32>
    %130 = vector.extract_strided_slice %2 {offsets = [2, 0, 0], sizes = [1, 16, 16], strides = [1, 1, 1]} : vector<4x16x16xf32> to vector<1x16x16xf32>
    %131 = vector.shape_cast %130 : vector<1x16x16xf32> to vector<16x16xf32>
    %cst_51 = arith.constant dense<0.000000e+00> : vector<2x16xf32>
    %132 = tpu.matmul %89, %131, %cst_51 {dimension_numbers = #tpu.dot_dimension_numbers<[1], [0], [0], [1], [0, 0, 1, 1], [], []>} : vector<2x16xf32>, vector<16x16xf32>, vector<2x16xf32> -> vector<2x16xf32>
    %133 = arith.addf %129, %132 : vector<2x16xf32>
    %134 = vector.extract_strided_slice %3 {offsets = [2, 0, 0], sizes = [1, 1, 16], strides = [1, 1, 1]} : vector<4x1x16xf32> to vector<1x1x16xf32>
    %135 = vector.shape_cast %134 : vector<1x1x16xf32> to vector<1x16xf32>
    %136 = vector.broadcast %135 : vector<1x16xf32> to vector<2x16xf32>
    %137 = arith.addf %133, %136 : vector<2x16xf32>
    %138 = math.tanh %137 : vector<2x16xf32>
    %139 = vector.extract_strided_slice %1 {offsets = [3, 0, 0], sizes = [1, 48, 16], strides = [1, 1, 1]} : vector<4x48x16xf32> to vector<1x48x16xf32>
    %140 = vector.shape_cast %139 : vector<1x48x16xf32> to vector<48x16xf32>
    %cst_52 = arith.constant dense<0.000000e+00> : vector<2x16xf32>
    %141 = tpu.matmul %94, %140, %cst_52 {dimension_numbers = #tpu.dot_dimension_numbers<[1], [0], [0], [1], [0, 0, 1, 1], [], []>} : vector<2x48xf32>, vector<48x16xf32>, vector<2x16xf32> -> vector<2x16xf32>
    %142 = vector.extract_strided_slice %2 {offsets = [3, 0, 0], sizes = [1, 16, 16], strides = [1, 1, 1]} : vector<4x16x16xf32> to vector<1x16x16xf32>
    %143 = vector.shape_cast %142 : vector<1x16x16xf32> to vector<16x16xf32>
    %cst_53 = arith.constant dense<0.000000e+00> : vector<2x16xf32>
    %144 = tpu.matmul %89, %143, %cst_53 {dimension_numbers = #tpu.dot_dimension_numbers<[1], [0], [0], [1], [0, 0, 1, 1], [], []>} : vector<2x16xf32>, vector<16x16xf32>, vector<2x16xf32> -> vector<2x16xf32>
    %145 = arith.addf %141, %144 : vector<2x16xf32>
    %146 = vector.extract_strided_slice %3 {offsets = [3, 0, 0], sizes = [1, 1, 16], strides = [1, 1, 1]} : vector<4x1x16xf32> to vector<1x1x16xf32>
    %147 = vector.shape_cast %146 : vector<1x1x16xf32> to vector<1x16xf32>
    %148 = vector.broadcast %147 : vector<1x16xf32> to vector<2x16xf32>
    %149 = arith.addf %145, %148 : vector<2x16xf32>
    %150 = arith.negf %149 : vector<2x16xf32>
    %151 = math.exp %150 : vector<2x16xf32>
    %cst_54 = arith.constant 1.000000e+00 : f32
    %152 = vector.broadcast %cst_54 : f32 to vector<2x16xf32>
    %153 = arith.addf %152, %151 : vector<2x16xf32>
    %154 = arith.divf %152, %153 : vector<2x16xf32>
    %155 = arith.mulf %126, %92 : vector<2x16xf32>
    %156 = arith.mulf %110, %138 : vector<2x16xf32>
    %157 = arith.addf %155, %156 : vector<2x16xf32>
    %158 = math.tanh %157 : vector<2x16xf32>
    %159 = arith.mulf %154, %158 : vector<2x16xf32>
    %c1_i32 = arith.constant 1 : i32
    %160 = vector.broadcast %c1_i32 : i32 to vector<2x1xi32>
    %161 = arith.cmpi sgt, %0, %160 : vector<2x1xi32>
    %cst_55 = arith.constant 0.000000e+00 : f32
    %162 = vector.shape_cast %161 : vector<2x1xi1> to vector<2x1xi1>
    %163 = vector.broadcast %162 : vector<2x1xi1> to vector<2x16xi1>
    %164 = vector.broadcast %cst_55 : f32 to vector<2x16xf32>
    %165 = arith.select %163, %159, %164 : vector<2x16xi1>, vector<2x16xf32>
    %c1_56 = arith.constant 1 : index
    %c0_57 = arith.constant 0 : index
    %c0_58 = arith.constant 0 : index
    %166 = vector.load %arg10[%c1_56, %c0_57, %c0_58] : memref<5x2x16xf32, #tpu.memory_space<vmem>>, vector<1x2x16xf32>
    %167 = vector.shape_cast %166 : vector<1x2x16xf32> to vector<2x16xf32>
    %168 = vector.shape_cast %165 : vector<2x16xf32> to vector<1x2x16xf32>
    tpu.vector_store %arg10[%c1_56, %c0_57, %c0_58], %168 {strides = array<i32>} : memref<5x2x16xf32, #tpu.memory_space<vmem>>, vector<1x2x16xf32>,
    %169 = vector.shape_cast %161 : vector<2x1xi1> to vector<2x1xi1>
    %170 = vector.broadcast %169 : vector<2x1xi1> to vector<2x16xi1>
    %171 = arith.select %170, %159, %89 : vector<2x16xi1>, vector<2x16xf32>
    %172 = vector.shape_cast %161 : vector<2x1xi1> to vector<2x1xi1>
    %173 = vector.broadcast %172 : vector<2x1xi1> to vector<2x16xi1>
    %174 = arith.select %173, %157, %92 : vector<2x16xi1>, vector<2x16xf32>
    %c2 = arith.constant 2 : index
    %c0_59 = arith.constant 0 : index
    %c0_60 = arith.constant 0 : index
    %175 = vector.load %arg0[%c2, %c0_59, %c0_60] : memref<5x2x48xf32, #tpu.memory_space<vmem>>, vector<1x2x48xf32>
    %176 = vector.shape_cast %175 : vector<1x2x48xf32> to vector<2x48xf32>
    %177 = vector.extract_strided_slice %1 {offsets = [0, 0, 0], sizes = [1, 48, 16], strides = [1, 1, 1]} : vector<4x48x16xf32> to vector<1x48x16xf32>
    %178 = vector.shape_cast %177 : vector<1x48x16xf32> to vector<48x16xf32>
    %cst_61 = arith.constant dense<0.000000e+00> : vector<2x16xf32>
    %179 = tpu.matmul %176, %178, %cst_61 {dimension_numbers = #tpu.dot_dimension_numbers<[1], [0], [0], [1], [0, 0, 1, 1], [], []>} : vector<2x48xf32>, vector<48x16xf32>, vector<2x16xf32> -> vector<2x16xf32>
    %180 = vector.extract_strided_slice %2 {offsets = [0, 0, 0], sizes = [1, 16, 16], strides = [1, 1, 1]} : vector<4x16x16xf32> to vector<1x16x16xf32>
    %181 = vector.shape_cast %180 : vector<1x16x16xf32> to vector<16x16xf32>
    %cst_62 = arith.constant dense<0.000000e+00> : vector<2x16xf32>
    %182 = tpu.matmul %171, %181, %cst_62 {dimension_numbers = #tpu.dot_dimension_numbers<[1], [0], [0], [1], [0, 0, 1, 1], [], []>} : vector<2x16xf32>, vector<16x16xf32>, vector<2x16xf32> -> vector<2x16xf32>
    %183 = arith.addf %179, %182 : vector<2x16xf32>
    %184 = vector.extract_strided_slice %3 {offsets = [0, 0, 0], sizes = [1, 1, 16], strides = [1, 1, 1]} : vector<4x1x16xf32> to vector<1x1x16xf32>
    %185 = vector.shape_cast %184 : vector<1x1x16xf32> to vector<1x16xf32>
    %186 = vector.broadcast %185 : vector<1x16xf32> to vector<2x16xf32>
    %187 = arith.addf %183, %186 : vector<2x16xf32>
    %188 = arith.negf %187 : vector<2x16xf32>
    %189 = math.exp %188 : vector<2x16xf32>
    %cst_63 = arith.constant 1.000000e+00 : f32
    %190 = vector.broadcast %cst_63 : f32 to vector<2x16xf32>
    %191 = arith.addf %190, %189 : vector<2x16xf32>
    %192 = arith.divf %190, %191 : vector<2x16xf32>
    %193 = vector.extract_strided_slice %1 {offsets = [1, 0, 0], sizes = [1, 48, 16], strides = [1, 1, 1]} : vector<4x48x16xf32> to vector<1x48x16xf32>
    %194 = vector.shape_cast %193 : vector<1x48x16xf32> to vector<48x16xf32>
    %cst_64 = arith.constant dense<0.000000e+00> : vector<2x16xf32>
    %195 = tpu.matmul %176, %194, %cst_64 {dimension_numbers = #tpu.dot_dimension_numbers<[1], [0], [0], [1], [0, 0, 1, 1], [], []>} : vector<2x48xf32>, vector<48x16xf32>, vector<2x16xf32> -> vector<2x16xf32>
    %196 = vector.extract_strided_slice %2 {offsets = [1, 0, 0], sizes = [1, 16, 16], strides = [1, 1, 1]} : vector<4x16x16xf32> to vector<1x16x16xf32>
    %197 = vector.shape_cast %196 : vector<1x16x16xf32> to vector<16x16xf32>
    %cst_65 = arith.constant dense<0.000000e+00> : vector<2x16xf32>
    %198 = tpu.matmul %171, %197, %cst_65 {dimension_numbers = #tpu.dot_dimension_numbers<[1], [0], [0], [1], [0, 0, 1, 1], [], []>} : vector<2x16xf32>, vector<16x16xf32>, vector<2x16xf32> -> vector<2x16xf32>
    %199 = arith.addf %195, %198 : vector<2x16xf32>
    %200 = vector.extract_strided_slice %3 {offsets = [1, 0, 0], sizes = [1, 1, 16], strides = [1, 1, 1]} : vector<4x1x16xf32> to vector<1x1x16xf32>
    %201 = vector.shape_cast %200 : vector<1x1x16xf32> to vector<1x16xf32>
    %202 = vector.broadcast %201 : vector<1x16xf32> to vector<2x16xf32>
    %203 = arith.addf %199, %202 : vector<2x16xf32>
    %204 = arith.negf %203 : vector<2x16xf32>
    %205 = math.exp %204 : vector<2x16xf32>
    %cst_66 = arith.constant 1.000000e+00 : f32
    %206 = vector.broadcast %cst_66 : f32 to vector<2x16xf32>
    %207 = arith.addf %206, %205 : vector<2x16xf32>
    %208 = arith.divf %206, %207 : vector<2x16xf32>
    %209 = vector.extract_strided_slice %1 {offsets = [2, 0, 0], sizes = [1, 48, 16], strides = [1, 1, 1]} : vector<4x48x16xf32> to vector<1x48x16xf32>
    %210 = vector.shape_cast %209 : vector<1x48x16xf32> to vector<48x16xf32>
    %cst_67 = arith.constant dense<0.000000e+00> : vector<2x16xf32>
    %211 = tpu.matmul %176, %210, %cst_67 {dimension_numbers = #tpu.dot_dimension_numbers<[1], [0], [0], [1], [0, 0, 1, 1], [], []>} : vector<2x48xf32>, vector<48x16xf32>, vector<2x16xf32> -> vector<2x16xf32>
    %212 = vector.extract_strided_slice %2 {offsets = [2, 0, 0], sizes = [1, 16, 16], strides = [1, 1, 1]} : vector<4x16x16xf32> to vector<1x16x16xf32>
    %213 = vector.shape_cast %212 : vector<1x16x16xf32> to vector<16x16xf32>
    %cst_68 = arith.constant dense<0.000000e+00> : vector<2x16xf32>
    %214 = tpu.matmul %171, %213, %cst_68 {dimension_numbers = #tpu.dot_dimension_numbers<[1], [0], [0], [1], [0, 0, 1, 1], [], []>} : vector<2x16xf32>, vector<16x16xf32>, vector<2x16xf32> -> vector<2x16xf32>
    %215 = arith.addf %211, %214 : vector<2x16xf32>
    %216 = vector.extract_strided_slice %3 {offsets = [2, 0, 0], sizes = [1, 1, 16], strides = [1, 1, 1]} : vector<4x1x16xf32> to vector<1x1x16xf32>
    %217 = vector.shape_cast %216 : vector<1x1x16xf32> to vector<1x16xf32>
    %218 = vector.broadcast %217 : vector<1x16xf32> to vector<2x16xf32>
    %219 = arith.addf %215, %218 : vector<2x16xf32>
    %220 = math.tanh %219 : vector<2x16xf32>
    %221 = vector.extract_strided_slice %1 {offsets = [3, 0, 0], sizes = [1, 48, 16], strides = [1, 1, 1]} : vector<4x48x16xf32> to vector<1x48x16xf32>
    %222 = vector.shape_cast %221 : vector<1x48x16xf32> to vector<48x16xf32>
    %cst_69 = arith.constant dense<0.000000e+00> : vector<2x16xf32>
    %223 = tpu.matmul %176, %222, %cst_69 {dimension_numbers = #tpu.dot_dimension_numbers<[1], [0], [0], [1], [0, 0, 1, 1], [], []>} : vector<2x48xf32>, vector<48x16xf32>, vector<2x16xf32> -> vector<2x16xf32>
    %224 = vector.extract_strided_slice %2 {offsets = [3, 0, 0], sizes = [1, 16, 16], strides = [1, 1, 1]} : vector<4x16x16xf32> to vector<1x16x16xf32>
    %225 = vector.shape_cast %224 : vector<1x16x16xf32> to vector<16x16xf32>
    %cst_70 = arith.constant dense<0.000000e+00> : vector<2x16xf32>
    %226 = tpu.matmul %171, %225, %cst_70 {dimension_numbers = #tpu.dot_dimension_numbers<[1], [0], [0], [1], [0, 0, 1, 1], [], []>} : vector<2x16xf32>, vector<16x16xf32>, vector<2x16xf32> -> vector<2x16xf32>
    %227 = arith.addf %223, %226 : vector<2x16xf32>
    %228 = vector.extract_strided_slice %3 {offsets = [3, 0, 0], sizes = [1, 1, 16], strides = [1, 1, 1]} : vector<4x1x16xf32> to vector<1x1x16xf32>
    %229 = vector.shape_cast %228 : vector<1x1x16xf32> to vector<1x16xf32>
    %230 = vector.broadcast %229 : vector<1x16xf32> to vector<2x16xf32>
    %231 = arith.addf %227, %230 : vector<2x16xf32>
    %232 = arith.negf %231 : vector<2x16xf32>
    %233 = math.exp %232 : vector<2x16xf32>
    %cst_71 = arith.constant 1.000000e+00 : f32
    %234 = vector.broadcast %cst_71 : f32 to vector<2x16xf32>
    %235 = arith.addf %234, %233 : vector<2x16xf32>
    %236 = arith.divf %234, %235 : vector<2x16xf32>
    %237 = arith.mulf %208, %174 : vector<2x16xf32>
    %238 = arith.mulf %192, %220 : vector<2x16xf32>
    %239 = arith.addf %237, %238 : vector<2x16xf32>
    %240 = math.tanh %239 : vector<2x16xf32>
    %241 = arith.mulf %236, %240 : vector<2x16xf32>
    %c2_i32 = arith.constant 2 : i32
    %242 = vector.broadcast %c2_i32 : i32 to vector<2x1xi32>
    %243 = arith.cmpi sgt, %0, %242 : vector<2x1xi32>
    %cst_72 = arith.constant 0.000000e+00 : f32
    %244 = vector.shape_cast %243 : vector<2x1xi1> to vector<2x1xi1>
    %245 = vector.broadcast %244 : vector<2x1xi1> to vector<2x16xi1>
    %246 = vector.broadcast %cst_72 : f32 to vector<2x16xf32>
    %247 = arith.select %245, %241, %246 : vector<2x16xi1>, vector<2x16xf32>
    %c2_73 = arith.constant 2 : index
    %c0_74 = arith.constant 0 : index
    %c0_75 = arith.constant 0 : index
    %248 = vector.load %arg10[%c2_73, %c0_74, %c0_75] : memref<5x2x16xf32, #tpu.memory_space<vmem>>, vector<1x2x16xf32>
    %249 = vector.shape_cast %248 : vector<1x2x16xf32> to vector<2x16xf32>
    %250 = vector.shape_cast %247 : vector<2x16xf32> to vector<1x2x16xf32>
    tpu.vector_store %arg10[%c2_73, %c0_74, %c0_75], %250 {strides = array<i32>} : memref<5x2x16xf32, #tpu.memory_space<vmem>>, vector<1x2x16xf32>,
    %251 = vector.shape_cast %243 : vector<2x1xi1> to vector<2x1xi1>
    %252 = vector.broadcast %251 : vector<2x1xi1> to vector<2x16xi1>
    %253 = arith.select %252, %241, %171 : vector<2x16xi1>, vector<2x16xf32>
    %254 = vector.shape_cast %243 : vector<2x1xi1> to vector<2x1xi1>
    %255 = vector.broadcast %254 : vector<2x1xi1> to vector<2x16xi1>
    %256 = arith.select %255, %239, %174 : vector<2x16xi1>, vector<2x16xf32>
    %c3 = arith.constant 3 : index
    %c0_76 = arith.constant 0 : index
    %c0_77 = arith.constant 0 : index
    %257 = vector.load %arg0[%c3, %c0_76, %c0_77] : memref<5x2x48xf32, #tpu.memory_space<vmem>>, vector<1x2x48xf32>
    %258 = vector.shape_cast %257 : vector<1x2x48xf32> to vector<2x48xf32>
    %259 = vector.extract_strided_slice %1 {offsets = [0, 0, 0], sizes = [1, 48, 16], strides = [1, 1, 1]} : vector<4x48x16xf32> to vector<1x48x16xf32>
    %260 = vector.shape_cast %259 : vector<1x48x16xf32> to vector<48x16xf32>
    %cst_78 = arith.constant dense<0.000000e+00> : vector<2x16xf32>
    %261 = tpu.matmul %258, %260, %cst_78 {dimension_numbers = #tpu.dot_dimension_numbers<[1], [0], [0], [1], [0, 0, 1, 1], [], []>} : vector<2x48xf32>, vector<48x16xf32>, vector<2x16xf32> -> vector<2x16xf32>
    %262 = vector.extract_strided_slice %2 {offsets = [0, 0, 0], sizes = [1, 16, 16], strides = [1, 1, 1]} : vector<4x16x16xf32> to vector<1x16x16xf32>
    %263 = vector.shape_cast %262 : vector<1x16x16xf32> to vector<16x16xf32>
    %cst_79 = arith.constant dense<0.000000e+00> : vector<2x16xf32>
    %264 = tpu.matmul %253, %263, %cst_79 {dimension_numbers = #tpu.dot_dimension_numbers<[1], [0], [0], [1], [0, 0, 1, 1], [], []>} : vector<2x16xf32>, vector<16x16xf32>, vector<2x16xf32> -> vector<2x16xf32>
    %265 = arith.addf %261, %264 : vector<2x16xf32>
    %266 = vector.extract_strided_slice %3 {offsets = [0, 0, 0], sizes = [1, 1, 16], strides = [1, 1, 1]} : vector<4x1x16xf32> to vector<1x1x16xf32>
    %267 = vector.shape_cast %266 : vector<1x1x16xf32> to vector<1x16xf32>
    %268 = vector.broadcast %267 : vector<1x16xf32> to vector<2x16xf32>
    %269 = arith.addf %265, %268 : vector<2x16xf32>
    %270 = arith.negf %269 : vector<2x16xf32>
    %271 = math.exp %270 : vector<2x16xf32>
    %cst_80 = arith.constant 1.000000e+00 : f32
    %272 = vector.broadcast %cst_80 : f32 to vector<2x16xf32>
    %273 = arith.addf %272, %271 : vector<2x16xf32>
    %274 = arith.divf %272, %273 : vector<2x16xf32>
    %275 = vector.extract_strided_slice %1 {offsets = [1, 0, 0], sizes = [1, 48, 16], strides = [1, 1, 1]} : vector<4x48x16xf32> to vector<1x48x16xf32>
    %276 = vector.shape_cast %275 : vector<1x48x16xf32> to vector<48x16xf32>
    %cst_81 = arith.constant dense<0.000000e+00> : vector<2x16xf32>
    %277 = tpu.matmul %258, %276, %cst_81 {dimension_numbers = #tpu.dot_dimension_numbers<[1], [0], [0], [1], [0, 0, 1, 1], [], []>} : vector<2x48xf32>, vector<48x16xf32>, vector<2x16xf32> -> vector<2x16xf32>
    %278 = vector.extract_strided_slice %2 {offsets = [1, 0, 0], sizes = [1, 16, 16], strides = [1, 1, 1]} : vector<4x16x16xf32> to vector<1x16x16xf32>
    %279 = vector.shape_cast %278 : vector<1x16x16xf32> to vector<16x16xf32>
    %cst_82 = arith.constant dense<0.000000e+00> : vector<2x16xf32>
    %280 = tpu.matmul %253, %279, %cst_82 {dimension_numbers = #tpu.dot_dimension_numbers<[1], [0], [0], [1], [0, 0, 1, 1], [], []>} : vector<2x16xf32>, vector<16x16xf32>, vector<2x16xf32> -> vector<2x16xf32>
    %281 = arith.addf %277, %280 : vector<2x16xf32>
    %282 = vector.extract_strided_slice %3 {offsets = [1, 0, 0], sizes = [1, 1, 16], strides = [1, 1, 1]} : vector<4x1x16xf32> to vector<1x1x16xf32>
    %283 = vector.shape_cast %282 : vector<1x1x16xf32> to vector<1x16xf32>
    %284 = vector.broadcast %283 : vector<1x16xf32> to vector<2x16xf32>
    %285 = arith.addf %281, %284 : vector<2x16xf32>
    %286 = arith.negf %285 : vector<2x16xf32>
    %287 = math.exp %286 : vector<2x16xf32>
    %cst_83 = arith.constant 1.000000e+00 : f32
    %288 = vector.broadcast %cst_83 : f32 to vector<2x16xf32>
    %289 = arith.addf %288, %287 : vector<2x16xf32>
    %290 = arith.divf %288, %289 : vector<2x16xf32>
    %291 = vector.extract_strided_slice %1 {offsets = [2, 0, 0], sizes = [1, 48, 16], strides = [1, 1, 1]} : vector<4x48x16xf32> to vector<1x48x16xf32>
    %292 = vector.shape_cast %291 : vector<1x48x16xf32> to vector<48x16xf32>
    %cst_84 = arith.constant dense<0.000000e+00> : vector<2x16xf32>
    %293 = tpu.matmul %258, %292, %cst_84 {dimension_numbers = #tpu.dot_dimension_numbers<[1], [0], [0], [1], [0, 0, 1, 1], [], []>} : vector<2x48xf32>, vector<48x16xf32>, vector<2x16xf32> -> vector<2x16xf32>
    %294 = vector.extract_strided_slice %2 {offsets = [2, 0, 0], sizes = [1, 16, 16], strides = [1, 1, 1]} : vector<4x16x16xf32> to vector<1x16x16xf32>
    %295 = vector.shape_cast %294 : vector<1x16x16xf32> to vector<16x16xf32>
    %cst_85 = arith.constant dense<0.000000e+00> : vector<2x16xf32>
    %296 = tpu.matmul %253, %295, %cst_85 {dimension_numbers = #tpu.dot_dimension_numbers<[1], [0], [0], [1], [0, 0, 1, 1], [], []>} : vector<2x16xf32>, vector<16x16xf32>, vector<2x16xf32> -> vector<2x16xf32>
    %297 = arith.addf %293, %296 : vector<2x16xf32>
    %298 = vector.extract_strided_slice %3 {offsets = [2, 0, 0], sizes = [1, 1, 16], strides = [1, 1, 1]} : vector<4x1x16xf32> to vector<1x1x16xf32>
    %299 = vector.shape_cast %298 : vector<1x1x16xf32> to vector<1x16xf32>
    %300 = vector.broadcast %299 : vector<1x16xf32> to vector<2x16xf32>
    %301 = arith.addf %297, %300 : vector<2x16xf32>
    %302 = math.tanh %301 : vector<2x16xf32>
    %303 = vector.extract_strided_slice %1 {offsets = [3, 0, 0], sizes = [1, 48, 16], strides = [1, 1, 1]} : vector<4x48x16xf32> to vector<1x48x16xf32>
    %304 = vector.shape_cast %303 : vector<1x48x16xf32> to vector<48x16xf32>
    %cst_86 = arith.constant dense<0.000000e+00> : vector<2x16xf32>
    %305 = tpu.matmul %258, %304, %cst_86 {dimension_numbers = #tpu.dot_dimension_numbers<[1], [0], [0], [1], [0, 0, 1, 1], [], []>} : vector<2x48xf32>, vector<48x16xf32>, vector<2x16xf32> -> vector<2x16xf32>
    %306 = vector.extract_strided_slice %2 {offsets = [3, 0, 0], sizes = [1, 16, 16], strides = [1, 1, 1]} : vector<4x16x16xf32> to vector<1x16x16xf32>
    %307 = vector.shape_cast %306 : vector<1x16x16xf32> to vector<16x16xf32>
    %cst_87 = arith.constant dense<0.000000e+00> : vector<2x16xf32>
    %308 = tpu.matmul %253, %307, %cst_87 {dimension_numbers = #tpu.dot_dimension_numbers<[1], [0], [0], [1], [0, 0, 1, 1], [], []>} : vector<2x16xf32>, vector<16x16xf32>, vector<2x16xf32> -> vector<2x16xf32>
    %309 = arith.addf %305, %308 : vector<2x16xf32>
    %310 = vector.extract_strided_slice %3 {offsets = [3, 0, 0], sizes = [1, 1, 16], strides = [1, 1, 1]} : vector<4x1x16xf32> to vector<1x1x16xf32>
    %311 = vector.shape_cast %310 : vector<1x1x16xf32> to vector<1x16xf32>
    %312 = vector.broadcast %311 : vector<1x16xf32> to vector<2x16xf32>
    %313 = arith.addf %309, %312 : vector<2x16xf32>
    %314 = arith.negf %313 : vector<2x16xf32>
    %315 = math.exp %314 : vector<2x16xf32>
    %cst_88 = arith.constant 1.000000e+00 : f32
    %316 = vector.broadcast %cst_88 : f32 to vector<2x16xf32>
    %317 = arith.addf %316, %315 : vector<2x16xf32>
    %318 = arith.divf %316, %317 : vector<2x16xf32>
    %319 = arith.mulf %290, %256 : vector<2x16xf32>
    %320 = arith.mulf %274, %302 : vector<2x16xf32>
    %321 = arith.addf %319, %320 : vector<2x16xf32>
    %322 = math.tanh %321 : vector<2x16xf32>
    %323 = arith.mulf %318, %322 : vector<2x16xf32>
    %c3_i32 = arith.constant 3 : i32
    %324 = vector.broadcast %c3_i32 : i32 to vector<2x1xi32>
    %325 = arith.cmpi sgt, %0, %324 : vector<2x1xi32>
    %cst_89 = arith.constant 0.000000e+00 : f32
    %326 = vector.shape_cast %325 : vector<2x1xi1> to vector<2x1xi1>
    %327 = vector.broadcast %326 : vector<2x1xi1> to vector<2x16xi1>
    %328 = vector.broadcast %cst_89 : f32 to vector<2x16xf32>
    %329 = arith.select %327, %323, %328 : vector<2x16xi1>, vector<2x16xf32>
    %c3_90 = arith.constant 3 : index
    %c0_91 = arith.constant 0 : index
    %c0_92 = arith.constant 0 : index
    %330 = vector.load %arg10[%c3_90, %c0_91, %c0_92] : memref<5x2x16xf32, #tpu.memory_space<vmem>>, vector<1x2x16xf32>
    %331 = vector.shape_cast %330 : vector<1x2x16xf32> to vector<2x16xf32>
    %332 = vector.shape_cast %329 : vector<2x16xf32> to vector<1x2x16xf32>
    tpu.vector_store %arg10[%c3_90, %c0_91, %c0_92], %332 {strides = array<i32>} : memref<5x2x16xf32, #tpu.memory_space<vmem>>, vector<1x2x16xf32>,
    %333 = vector.shape_cast %325 : vector<2x1xi1> to vector<2x1xi1>
    %334 = vector.broadcast %333 : vector<2x1xi1> to vector<2x16xi1>
    %335 = arith.select %334, %323, %253 : vector<2x16xi1>, vector<2x16xf32>
    %336 = vector.shape_cast %325 : vector<2x1xi1> to vector<2x1xi1>
    %337 = vector.broadcast %336 : vector<2x1xi1> to vector<2x16xi1>
    %338 = arith.select %337, %321, %256 : vector<2x16xi1>, vector<2x16xf32>
    %c4 = arith.constant 4 : index
    %c0_93 = arith.constant 0 : index
    %c0_94 = arith.constant 0 : index
    %339 = vector.load %arg0[%c4, %c0_93, %c0_94] : memref<5x2x48xf32, #tpu.memory_space<vmem>>, vector<1x2x48xf32>
    %340 = vector.shape_cast %339 : vector<1x2x48xf32> to vector<2x48xf32>
    %341 = vector.extract_strided_slice %1 {offsets = [0, 0, 0], sizes = [1, 48, 16], strides = [1, 1, 1]} : vector<4x48x16xf32> to vector<1x48x16xf32>
    %342 = vector.shape_cast %341 : vector<1x48x16xf32> to vector<48x16xf32>
    %cst_95 = arith.constant dense<0.000000e+00> : vector<2x16xf32>
    %343 = tpu.matmul %340, %342, %cst_95 {dimension_numbers = #tpu.dot_dimension_numbers<[1], [0], [0], [1], [0, 0, 1, 1], [], []>} : vector<2x48xf32>, vector<48x16xf32>, vector<2x16xf32> -> vector<2x16xf32>
    %344 = vector.extract_strided_slice %2 {offsets = [0, 0, 0], sizes = [1, 16, 16], strides = [1, 1, 1]} : vector<4x16x16xf32> to vector<1x16x16xf32>
    %345 = vector.shape_cast %344 : vector<1x16x16xf32> to vector<16x16xf32>
    %cst_96 = arith.constant dense<0.000000e+00> : vector<2x16xf32>
    %346 = tpu.matmul %335, %345, %cst_96 {dimension_numbers = #tpu.dot_dimension_numbers<[1], [0], [0], [1], [0, 0, 1, 1], [], []>} : vector<2x16xf32>, vector<16x16xf32>, vector<2x16xf32> -> vector<2x16xf32>
    %347 = arith.addf %343, %346 : vector<2x16xf32>
    %348 = vector.extract_strided_slice %3 {offsets = [0, 0, 0], sizes = [1, 1, 16], strides = [1, 1, 1]} : vector<4x1x16xf32> to vector<1x1x16xf32>
    %349 = vector.shape_cast %348 : vector<1x1x16xf32> to vector<1x16xf32>
    %350 = vector.broadcast %349 : vector<1x16xf32> to vector<2x16xf32>
    %351 = arith.addf %347, %350 : vector<2x16xf32>
    %352 = arith.negf %351 : vector<2x16xf32>
    %353 = math.exp %352 : vector<2x16xf32>
    %cst_97 = arith.constant 1.000000e+00 : f32
    %354 = vector.broadcast %cst_97 : f32 to vector<2x16xf32>
    %355 = arith.addf %354, %353 : vector<2x16xf32>
    %356 = arith.divf %354, %355 : vector<2x16xf32>
    %357 = vector.extract_strided_slice %1 {offsets = [1, 0, 0], sizes = [1, 48, 16], strides = [1, 1, 1]} : vector<4x48x16xf32> to vector<1x48x16xf32>
    %358 = vector.shape_cast %357 : vector<1x48x16xf32> to vector<48x16xf32>
    %cst_98 = arith.constant dense<0.000000e+00> : vector<2x16xf32>
    %359 = tpu.matmul %340, %358, %cst_98 {dimension_numbers = #tpu.dot_dimension_numbers<[1], [0], [0], [1], [0, 0, 1, 1], [], []>} : vector<2x48xf32>, vector<48x16xf32>, vector<2x16xf32> -> vector<2x16xf32>
    %360 = vector.extract_strided_slice %2 {offsets = [1, 0, 0], sizes = [1, 16, 16], strides = [1, 1, 1]} : vector<4x16x16xf32> to vector<1x16x16xf32>
    %361 = vector.shape_cast %360 : vector<1x16x16xf32> to vector<16x16xf32>
    %cst_99 = arith.constant dense<0.000000e+00> : vector<2x16xf32>
    %362 = tpu.matmul %335, %361, %cst_99 {dimension_numbers = #tpu.dot_dimension_numbers<[1], [0], [0], [1], [0, 0, 1, 1], [], []>} : vector<2x16xf32>, vector<16x16xf32>, vector<2x16xf32> -> vector<2x16xf32>
    %363 = arith.addf %359, %362 : vector<2x16xf32>
    %364 = vector.extract_strided_slice %3 {offsets = [1, 0, 0], sizes = [1, 1, 16], strides = [1, 1, 1]} : vector<4x1x16xf32> to vector<1x1x16xf32>
    %365 = vector.shape_cast %364 : vector<1x1x16xf32> to vector<1x16xf32>
    %366 = vector.broadcast %365 : vector<1x16xf32> to vector<2x16xf32>
    %367 = arith.addf %363, %366 : vector<2x16xf32>
    %368 = arith.negf %367 : vector<2x16xf32>
    %369 = math.exp %368 : vector<2x16xf32>
    %cst_100 = arith.constant 1.000000e+00 : f32
    %370 = vector.broadcast %cst_100 : f32 to vector<2x16xf32>
    %371 = arith.addf %370, %369 : vector<2x16xf32>
    %372 = arith.divf %370, %371 : vector<2x16xf32>
    %373 = vector.extract_strided_slice %1 {offsets = [2, 0, 0], sizes = [1, 48, 16], strides = [1, 1, 1]} : vector<4x48x16xf32> to vector<1x48x16xf32>
    %374 = vector.shape_cast %373 : vector<1x48x16xf32> to vector<48x16xf32>
    %cst_101 = arith.constant dense<0.000000e+00> : vector<2x16xf32>
    %375 = tpu.matmul %340, %374, %cst_101 {dimension_numbers = #tpu.dot_dimension_numbers<[1], [0], [0], [1], [0, 0, 1, 1], [], []>} : vector<2x48xf32>, vector<48x16xf32>, vector<2x16xf32> -> vector<2x16xf32>
    %376 = vector.extract_strided_slice %2 {offsets = [2, 0, 0], sizes = [1, 16, 16], strides = [1, 1, 1]} : vector<4x16x16xf32> to vector<1x16x16xf32>
    %377 = vector.shape_cast %376 : vector<1x16x16xf32> to vector<16x16xf32>
    %cst_102 = arith.constant dense<0.000000e+00> : vector<2x16xf32>
    %378 = tpu.matmul %335, %377, %cst_102 {dimension_numbers = #tpu.dot_dimension_numbers<[1], [0], [0], [1], [0, 0, 1, 1], [], []>} : vector<2x16xf32>, vector<16x16xf32>, vector<2x16xf32> -> vector<2x16xf32>
    %379 = arith.addf %375, %378 : vector<2x16xf32>
    %380 = vector.extract_strided_slice %3 {offsets = [2, 0, 0], sizes = [1, 1, 16], strides = [1, 1, 1]} : vector<4x1x16xf32> to vector<1x1x16xf32>
    %381 = vector.shape_cast %380 : vector<1x1x16xf32> to vector<1x16xf32>
    %382 = vector.broadcast %381 : vector<1x16xf32> to vector<2x16xf32>
    %383 = arith.addf %379, %382 : vector<2x16xf32>
    %384 = math.tanh %383 : vector<2x16xf32>
    %385 = vector.extract_strided_slice %1 {offsets = [3, 0, 0], sizes = [1, 48, 16], strides = [1, 1, 1]} : vector<4x48x16xf32> to vector<1x48x16xf32>
    %386 = vector.shape_cast %385 : vector<1x48x16xf32> to vector<48x16xf32>
    %cst_103 = arith.constant dense<0.000000e+00> : vector<2x16xf32>
    %387 = tpu.matmul %340, %386, %cst_103 {dimension_numbers = #tpu.dot_dimension_numbers<[1], [0], [0], [1], [0, 0, 1, 1], [], []>} : vector<2x48xf32>, vector<48x16xf32>, vector<2x16xf32> -> vector<2x16xf32>
    %388 = vector.extract_strided_slice %2 {offsets = [3, 0, 0], sizes = [1, 16, 16], strides = [1, 1, 1]} : vector<4x16x16xf32> to vector<1x16x16xf32>
    %389 = vector.shape_cast %388 : vector<1x16x16xf32> to vector<16x16xf32>
    %cst_104 = arith.constant dense<0.000000e+00> : vector<2x16xf32>
    %390 = tpu.matmul %335, %389, %cst_104 {dimension_numbers = #tpu.dot_dimension_numbers<[1], [0], [0], [1], [0, 0, 1, 1], [], []>} : vector<2x16xf32>, vector<16x16xf32>, vector<2x16xf32> -> vector<2x16xf32>
    %391 = arith.addf %387, %390 : vector<2x16xf32>
    %392 = vector.extract_strided_slice %3 {offsets = [3, 0, 0], sizes = [1, 1, 16], strides = [1, 1, 1]} : vector<4x1x16xf32> to vector<1x1x16xf32>
    %393 = vector.shape_cast %392 : vector<1x1x16xf32> to vector<1x16xf32>
    %394 = vector.broadcast %393 : vector<1x16xf32> to vector<2x16xf32>
    %395 = arith.addf %391, %394 : vector<2x16xf32>
    %396 = arith.negf %395 : vector<2x16xf32>
    %397 = math.exp %396 : vector<2x16xf32>
    %cst_105 = arith.constant 1.000000e+00 : f32
    %398 = vector.broadcast %cst_105 : f32 to vector<2x16xf32>
    %399 = arith.addf %398, %397 : vector<2x16xf32>
    %400 = arith.divf %398, %399 : vector<2x16xf32>
    %401 = arith.mulf %372, %338 : vector<2x16xf32>
    %402 = arith.mulf %356, %384 : vector<2x16xf32>
    %403 = arith.addf %401, %402 : vector<2x16xf32>
    %404 = math.tanh %403 : vector<2x16xf32>
    %405 = arith.mulf %400, %404 : vector<2x16xf32>
    %c4_i32 = arith.constant 4 : i32
    %406 = vector.broadcast %c4_i32 : i32 to vector<2x1xi32>
    %407 = arith.cmpi sgt, %0, %406 : vector<2x1xi32>
    %cst_106 = arith.constant 0.000000e+00 : f32
    %408 = vector.shape_cast %407 : vector<2x1xi1> to vector<2x1xi1>
    %409 = vector.broadcast %408 : vector<2x1xi1> to vector<2x16xi1>
    %410 = vector.broadcast %cst_106 : f32 to vector<2x16xf32>
    %411 = arith.select %409, %405, %410 : vector<2x16xi1>, vector<2x16xf32>
    %c4_107 = arith.constant 4 : index
    %c0_108 = arith.constant 0 : index
    %c0_109 = arith.constant 0 : index
    %412 = vector.load %arg10[%c4_107, %c0_108, %c0_109] : memref<5x2x16xf32, #tpu.memory_space<vmem>>, vector<1x2x16xf32>
    %413 = vector.shape_cast %412 : vector<1x2x16xf32> to vector<2x16xf32>
    %414 = vector.shape_cast %411 : vector<2x16xf32> to vector<1x2x16xf32>
    tpu.vector_store %arg10[%c4_107, %c0_108, %c0_109], %414 {strides = array<i32>} : memref<5x2x16xf32, #tpu.memory_space<vmem>>, vector<1x2x16xf32>,
    %c1_110 = arith.constant 1 : index
    %c0_111 = arith.constant 0 : index
    %c0_112 = arith.constant 0 : index
    %415 = vector.load %arg2[%c1_110, %c0_111, %c0_112] : memref<2x2x16xf32, #tpu.memory_space<vmem>>, vector<1x2x16xf32>
    %416 = vector.shape_cast %415 : vector<1x2x16xf32> to vector<2x16xf32>
    %c1_113 = arith.constant 1 : index
    %c0_114 = arith.constant 0 : index
    %c0_115 = arith.constant 0 : index
    %417 = vector.load %arg3[%c1_113, %c0_114, %c0_115] : memref<2x2x16xf32, #tpu.memory_space<vmem>>, vector<1x2x16xf32>
    %418 = vector.shape_cast %417 : vector<1x2x16xf32> to vector<2x16xf32>
    %c4_116 = arith.constant 4 : index
    %c0_117 = arith.constant 0 : index
    %c0_118 = arith.constant 0 : index
    %419 = vector.load %arg0[%c4_116, %c0_117, %c0_118] : memref<5x2x48xf32, #tpu.memory_space<vmem>>, vector<1x2x48xf32>
    %420 = vector.shape_cast %419 : vector<1x2x48xf32> to vector<2x48xf32>
    %421 = vector.extract_strided_slice %4 {offsets = [0, 0, 0], sizes = [1, 48, 16], strides = [1, 1, 1]} : vector<4x48x16xf32> to vector<1x48x16xf32>
    %422 = vector.shape_cast %421 : vector<1x48x16xf32> to vector<48x16xf32>
    %cst_119 = arith.constant dense<0.000000e+00> : vector<2x16xf32>
    %423 = tpu.matmul %420, %422, %cst_119 {dimension_numbers = #tpu.dot_dimension_numbers<[1], [0], [0], [1], [0, 0, 1, 1], [], []>} : vector<2x48xf32>, vector<48x16xf32>, vector<2x16xf32> -> vector<2x16xf32>
    %424 = vector.extract_strided_slice %5 {offsets = [0, 0, 0], sizes = [1, 16, 16], strides = [1, 1, 1]} : vector<4x16x16xf32> to vector<1x16x16xf32>
    %425 = vector.shape_cast %424 : vector<1x16x16xf32> to vector<16x16xf32>
    %cst_120 = arith.constant dense<0.000000e+00> : vector<2x16xf32>
    %426 = tpu.matmul %416, %425, %cst_120 {dimension_numbers = #tpu.dot_dimension_numbers<[1], [0], [0], [1], [0, 0, 1, 1], [], []>} : vector<2x16xf32>, vector<16x16xf32>, vector<2x16xf32> -> vector<2x16xf32>
    %427 = arith.addf %423, %426 : vector<2x16xf32>
    %428 = vector.extract_strided_slice %6 {offsets = [0, 0, 0], sizes = [1, 1, 16], strides = [1, 1, 1]} : vector<4x1x16xf32> to vector<1x1x16xf32>
    %429 = vector.shape_cast %428 : vector<1x1x16xf32> to vector<1x16xf32>
    %430 = vector.broadcast %429 : vector<1x16xf32> to vector<2x16xf32>
    %431 = arith.addf %427, %430 : vector<2x16xf32>
    %432 = arith.negf %431 : vector<2x16xf32>
    %433 = math.exp %432 : vector<2x16xf32>
    %cst_121 = arith.constant 1.000000e+00 : f32
    %434 = vector.broadcast %cst_121 : f32 to vector<2x16xf32>
    %435 = arith.addf %434, %433 : vector<2x16xf32>
    %436 = arith.divf %434, %435 : vector<2x16xf32>
    %437 = vector.extract_strided_slice %4 {offsets = [1, 0, 0], sizes = [1, 48, 16], strides = [1, 1, 1]} : vector<4x48x16xf32> to vector<1x48x16xf32>
    %438 = vector.shape_cast %437 : vector<1x48x16xf32> to vector<48x16xf32>
    %cst_122 = arith.constant dense<0.000000e+00> : vector<2x16xf32>
    %439 = tpu.matmul %420, %438, %cst_122 {dimension_numbers = #tpu.dot_dimension_numbers<[1], [0], [0], [1], [0, 0, 1, 1], [], []>} : vector<2x48xf32>, vector<48x16xf32>, vector<2x16xf32> -> vector<2x16xf32>
    %440 = vector.extract_strided_slice %5 {offsets = [1, 0, 0], sizes = [1, 16, 16], strides = [1, 1, 1]} : vector<4x16x16xf32> to vector<1x16x16xf32>
    %441 = vector.shape_cast %440 : vector<1x16x16xf32> to vector<16x16xf32>
    %cst_123 = arith.constant dense<0.000000e+00> : vector<2x16xf32>
    %442 = tpu.matmul %416, %441, %cst_123 {dimension_numbers = #tpu.dot_dimension_numbers<[1], [0], [0], [1], [0, 0, 1, 1], [], []>} : vector<2x16xf32>, vector<16x16xf32>, vector<2x16xf32> -> vector<2x16xf32>
    %443 = arith.addf %439, %442 : vector<2x16xf32>
    %444 = vector.extract_strided_slice %6 {offsets = [1, 0, 0], sizes = [1, 1, 16], strides = [1, 1, 1]} : vector<4x1x16xf32> to vector<1x1x16xf32>
    %445 = vector.shape_cast %444 : vector<1x1x16xf32> to vector<1x16xf32>
    %446 = vector.broadcast %445 : vector<1x16xf32> to vector<2x16xf32>
    %447 = arith.addf %443, %446 : vector<2x16xf32>
    %448 = arith.negf %447 : vector<2x16xf32>
    %449 = math.exp %448 : vector<2x16xf32>
    %cst_124 = arith.constant 1.000000e+00 : f32
    %450 = vector.broadcast %cst_124 : f32 to vector<2x16xf32>
    %451 = arith.addf %450, %449 : vector<2x16xf32>
    %452 = arith.divf %450, %451 : vector<2x16xf32>
    %453 = vector.extract_strided_slice %4 {offsets = [2, 0, 0], sizes = [1, 48, 16], strides = [1, 1, 1]} : vector<4x48x16xf32> to vector<1x48x16xf32>
    %454 = vector.shape_cast %453 : vector<1x48x16xf32> to vector<48x16xf32>
    %cst_125 = arith.constant dense<0.000000e+00> : vector<2x16xf32>
    %455 = tpu.matmul %420, %454, %cst_125 {dimension_numbers = #tpu.dot_dimension_numbers<[1], [0], [0], [1], [0, 0, 1, 1], [], []>} : vector<2x48xf32>, vector<48x16xf32>, vector<2x16xf32> -> vector<2x16xf32>
    %456 = vector.extract_strided_slice %5 {offsets = [2, 0, 0], sizes = [1, 16, 16], strides = [1, 1, 1]} : vector<4x16x16xf32> to vector<1x16x16xf32>
    %457 = vector.shape_cast %456 : vector<1x16x16xf32> to vector<16x16xf32>
    %cst_126 = arith.constant dense<0.000000e+00> : vector<2x16xf32>
    %458 = tpu.matmul %416, %457, %cst_126 {dimension_numbers = #tpu.dot_dimension_numbers<[1], [0], [0], [1], [0, 0, 1, 1], [], []>} : vector<2x16xf32>, vector<16x16xf32>, vector<2x16xf32> -> vector<2x16xf32>
    %459 = arith.addf %455, %458 : vector<2x16xf32>
    %460 = vector.extract_strided_slice %6 {offsets = [2, 0, 0], sizes = [1, 1, 16], strides = [1, 1, 1]} : vector<4x1x16xf32> to vector<1x1x16xf32>
    %461 = vector.shape_cast %460 : vector<1x1x16xf32> to vector<1x16xf32>
    %462 = vector.broadcast %461 : vector<1x16xf32> to vector<2x16xf32>
    %463 = arith.addf %459, %462 : vector<2x16xf32>
    %464 = math.tanh %463 : vector<2x16xf32>
    %465 = vector.extract_strided_slice %4 {offsets = [3, 0, 0], sizes = [1, 48, 16], strides = [1, 1, 1]} : vector<4x48x16xf32> to vector<1x48x16xf32>
    %466 = vector.shape_cast %465 : vector<1x48x16xf32> to vector<48x16xf32>
    %cst_127 = arith.constant dense<0.000000e+00> : vector<2x16xf32>
    %467 = tpu.matmul %420, %466, %cst_127 {dimension_numbers = #tpu.dot_dimension_numbers<[1], [0], [0], [1], [0, 0, 1, 1], [], []>} : vector<2x48xf32>, vector<48x16xf32>, vector<2x16xf32> -> vector<2x16xf32>
    %468 = vector.extract_strided_slice %5 {offsets = [3, 0, 0], sizes = [1, 16, 16], strides = [1, 1, 1]} : vector<4x16x16xf32> to vector<1x16x16xf32>
    %469 = vector.shape_cast %468 : vector<1x16x16xf32> to vector<16x16xf32>
    %cst_128 = arith.constant dense<0.000000e+00> : vector<2x16xf32>
    %470 = tpu.matmul %416, %469, %cst_128 {dimension_numbers = #tpu.dot_dimension_numbers<[1], [0], [0], [1], [0, 0, 1, 1], [], []>} : vector<2x16xf32>, vector<16x16xf32>, vector<2x16xf32> -> vector<2x16xf32>
    %471 = arith.addf %467, %470 : vector<2x16xf32>
    %472 = vector.extract_strided_slice %6 {offsets = [3, 0, 0], sizes = [1, 1, 16], strides = [1, 1, 1]} : vector<4x1x16xf32> to vector<1x1x16xf32>
    %473 = vector.shape_cast %472 : vector<1x1x16xf32> to vector<1x16xf32>
    %474 = vector.broadcast %473 : vector<1x16xf32> to vector<2x16xf32>
    %475 = arith.addf %471, %474 : vector<2x16xf32>
    %476 = arith.negf %475 : vector<2x16xf32>
    %477 = math.exp %476 : vector<2x16xf32>
    %cst_129 = arith.constant 1.000000e+00 : f32
    %478 = vector.broadcast %cst_129 : f32 to vector<2x16xf32>
    %479 = arith.addf %478, %477 : vector<2x16xf32>
    %480 = arith.divf %478, %479 : vector<2x16xf32>
    %481 = arith.mulf %452, %418 : vector<2x16xf32>
    %482 = arith.mulf %436, %464 : vector<2x16xf32>
    %483 = arith.addf %481, %482 : vector<2x16xf32>
    %484 = math.tanh %483 : vector<2x16xf32>
    %485 = arith.mulf %480, %484 : vector<2x16xf32>
    %c4_i32_130 = arith.constant 4 : i32
    %486 = vector.broadcast %c4_i32_130 : i32 to vector<2x1xi32>
    %487 = arith.cmpi sgt, %0, %486 : vector<2x1xi32>
    %cst_131 = arith.constant 0.000000e+00 : f32
    %488 = vector.shape_cast %487 : vector<2x1xi1> to vector<2x1xi1>
    %489 = vector.broadcast %488 : vector<2x1xi1> to vector<2x16xi1>
    %490 = vector.broadcast %cst_131 : f32 to vector<2x16xf32>
    %491 = arith.select %489, %485, %490 : vector<2x16xi1>, vector<2x16xf32>
    %c4_132 = arith.constant 4 : index
    %c0_133 = arith.constant 0 : index
    %c0_134 = arith.constant 0 : index
    %492 = vector.load %arg11[%c4_132, %c0_133, %c0_134] : memref<5x2x16xf32, #tpu.memory_space<vmem>>, vector<1x2x16xf32>
    %493 = vector.shape_cast %492 : vector<1x2x16xf32> to vector<2x16xf32>
    %494 = vector.shape_cast %491 : vector<2x16xf32> to vector<1x2x16xf32>
    tpu.vector_store %arg11[%c4_132, %c0_133, %c0_134], %494 {strides = array<i32>} : memref<5x2x16xf32, #tpu.memory_space<vmem>>, vector<1x2x16xf32>,
    %495 = vector.shape_cast %487 : vector<2x1xi1> to vector<2x1xi1>
    %496 = vector.broadcast %495 : vector<2x1xi1> to vector<2x16xi1>
    %497 = arith.select %496, %485, %416 : vector<2x16xi1>, vector<2x16xf32>
    %498 = vector.shape_cast %487 : vector<2x1xi1> to vector<2x1xi1>
    %499 = vector.broadcast %498 : vector<2x1xi1> to vector<2x16xi1>
    %500 = arith.select %499, %483, %418 : vector<2x16xi1>, vector<2x16xf32>
    %c3_135 = arith.constant 3 : index
    %c0_136 = arith.constant 0 : index
    %c0_137 = arith.constant 0 : index
    %501 = vector.load %arg0[%c3_135, %c0_136, %c0_137] : memref<5x2x48xf32, #tpu.memory_space<vmem>>, vector<1x2x48xf32>
    %502 = vector.shape_cast %501 : vector<1x2x48xf32> to vector<2x48xf32>
    %503 = vector.extract_strided_slice %4 {offsets = [0, 0, 0], sizes = [1, 48, 16], strides = [1, 1, 1]} : vector<4x48x16xf32> to vector<1x48x16xf32>
    %504 = vector.shape_cast %503 : vector<1x48x16xf32> to vector<48x16xf32>
    %cst_138 = arith.constant dense<0.000000e+00> : vector<2x16xf32>
    %505 = tpu.matmul %502, %504, %cst_138 {dimension_numbers = #tpu.dot_dimension_numbers<[1], [0], [0], [1], [0, 0, 1, 1], [], []>} : vector<2x48xf32>, vector<48x16xf32>, vector<2x16xf32> -> vector<2x16xf32>
    %506 = vector.extract_strided_slice %5 {offsets = [0, 0, 0], sizes = [1, 16, 16], strides = [1, 1, 1]} : vector<4x16x16xf32> to vector<1x16x16xf32>
    %507 = vector.shape_cast %506 : vector<1x16x16xf32> to vector<16x16xf32>
    %cst_139 = arith.constant dense<0.000000e+00> : vector<2x16xf32>
    %508 = tpu.matmul %497, %507, %cst_139 {dimension_numbers = #tpu.dot_dimension_numbers<[1], [0], [0], [1], [0, 0, 1, 1], [], []>} : vector<2x16xf32>, vector<16x16xf32>, vector<2x16xf32> -> vector<2x16xf32>
    %509 = arith.addf %505, %508 : vector<2x16xf32>
    %510 = vector.extract_strided_slice %6 {offsets = [0, 0, 0], sizes = [1, 1, 16], strides = [1, 1, 1]} : vector<4x1x16xf32> to vector<1x1x16xf32>
    %511 = vector.shape_cast %510 : vector<1x1x16xf32> to vector<1x16xf32>
    %512 = vector.broadcast %511 : vector<1x16xf32> to vector<2x16xf32>
    %513 = arith.addf %509, %512 : vector<2x16xf32>
    %514 = arith.negf %513 : vector<2x16xf32>
    %515 = math.exp %514 : vector<2x16xf32>
    %cst_140 = arith.constant 1.000000e+00 : f32
    %516 = vector.broadcast %cst_140 : f32 to vector<2x16xf32>
    %517 = arith.addf %516, %515 : vector<2x16xf32>
    %518 = arith.divf %516, %517 : vector<2x16xf32>
    %519 = vector.extract_strided_slice %4 {offsets = [1, 0, 0], sizes = [1, 48, 16], strides = [1, 1, 1]} : vector<4x48x16xf32> to vector<1x48x16xf32>
    %520 = vector.shape_cast %519 : vector<1x48x16xf32> to vector<48x16xf32>
    %cst_141 = arith.constant dense<0.000000e+00> : vector<2x16xf32>
    %521 = tpu.matmul %502, %520, %cst_141 {dimension_numbers = #tpu.dot_dimension_numbers<[1], [0], [0], [1], [0, 0, 1, 1], [], []>} : vector<2x48xf32>, vector<48x16xf32>, vector<2x16xf32> -> vector<2x16xf32>
    %522 = vector.extract_strided_slice %5 {offsets = [1, 0, 0], sizes = [1, 16, 16], strides = [1, 1, 1]} : vector<4x16x16xf32> to vector<1x16x16xf32>
    %523 = vector.shape_cast %522 : vector<1x16x16xf32> to vector<16x16xf32>
    %cst_142 = arith.constant dense<0.000000e+00> : vector<2x16xf32>
    %524 = tpu.matmul %497, %523, %cst_142 {dimension_numbers = #tpu.dot_dimension_numbers<[1], [0], [0], [1], [0, 0, 1, 1], [], []>} : vector<2x16xf32>, vector<16x16xf32>, vector<2x16xf32> -> vector<2x16xf32>
    %525 = arith.addf %521, %524 : vector<2x16xf32>
    %526 = vector.extract_strided_slice %6 {offsets = [1, 0, 0], sizes = [1, 1, 16], strides = [1, 1, 1]} : vector<4x1x16xf32> to vector<1x1x16xf32>
    %527 = vector.shape_cast %526 : vector<1x1x16xf32> to vector<1x16xf32>
    %528 = vector.broadcast %527 : vector<1x16xf32> to vector<2x16xf32>
    %529 = arith.addf %525, %528 : vector<2x16xf32>
    %530 = arith.negf %529 : vector<2x16xf32>
    %531 = math.exp %530 : vector<2x16xf32>
    %cst_143 = arith.constant 1.000000e+00 : f32
    %532 = vector.broadcast %cst_143 : f32 to vector<2x16xf32>
    %533 = arith.addf %532, %531 : vector<2x16xf32>
    %534 = arith.divf %532, %533 : vector<2x16xf32>
    %535 = vector.extract_strided_slice %4 {offsets = [2, 0, 0], sizes = [1, 48, 16], strides = [1, 1, 1]} : vector<4x48x16xf32> to vector<1x48x16xf32>
    %536 = vector.shape_cast %535 : vector<1x48x16xf32> to vector<48x16xf32>
    %cst_144 = arith.constant dense<0.000000e+00> : vector<2x16xf32>
    %537 = tpu.matmul %502, %536, %cst_144 {dimension_numbers = #tpu.dot_dimension_numbers<[1], [0], [0], [1], [0, 0, 1, 1], [], []>} : vector<2x48xf32>, vector<48x16xf32>, vector<2x16xf32> -> vector<2x16xf32>
    %538 = vector.extract_strided_slice %5 {offsets = [2, 0, 0], sizes = [1, 16, 16], strides = [1, 1, 1]} : vector<4x16x16xf32> to vector<1x16x16xf32>
    %539 = vector.shape_cast %538 : vector<1x16x16xf32> to vector<16x16xf32>
    %cst_145 = arith.constant dense<0.000000e+00> : vector<2x16xf32>
    %540 = tpu.matmul %497, %539, %cst_145 {dimension_numbers = #tpu.dot_dimension_numbers<[1], [0], [0], [1], [0, 0, 1, 1], [], []>} : vector<2x16xf32>, vector<16x16xf32>, vector<2x16xf32> -> vector<2x16xf32>
    %541 = arith.addf %537, %540 : vector<2x16xf32>
    %542 = vector.extract_strided_slice %6 {offsets = [2, 0, 0], sizes = [1, 1, 16], strides = [1, 1, 1]} : vector<4x1x16xf32> to vector<1x1x16xf32>
    %543 = vector.shape_cast %542 : vector<1x1x16xf32> to vector<1x16xf32>
    %544 = vector.broadcast %543 : vector<1x16xf32> to vector<2x16xf32>
    %545 = arith.addf %541, %544 : vector<2x16xf32>
    %546 = math.tanh %545 : vector<2x16xf32>
    %547 = vector.extract_strided_slice %4 {offsets = [3, 0, 0], sizes = [1, 48, 16], strides = [1, 1, 1]} : vector<4x48x16xf32> to vector<1x48x16xf32>
    %548 = vector.shape_cast %547 : vector<1x48x16xf32> to vector<48x16xf32>
    %cst_146 = arith.constant dense<0.000000e+00> : vector<2x16xf32>
    %549 = tpu.matmul %502, %548, %cst_146 {dimension_numbers = #tpu.dot_dimension_numbers<[1], [0], [0], [1], [0, 0, 1, 1], [], []>} : vector<2x48xf32>, vector<48x16xf32>, vector<2x16xf32> -> vector<2x16xf32>
    %550 = vector.extract_strided_slice %5 {offsets = [3, 0, 0], sizes = [1, 16, 16], strides = [1, 1, 1]} : vector<4x16x16xf32> to vector<1x16x16xf32>
    %551 = vector.shape_cast %550 : vector<1x16x16xf32> to vector<16x16xf32>
    %cst_147 = arith.constant dense<0.000000e+00> : vector<2x16xf32>
    %552 = tpu.matmul %497, %551, %cst_147 {dimension_numbers = #tpu.dot_dimension_numbers<[1], [0], [0], [1], [0, 0, 1, 1], [], []>} : vector<2x16xf32>, vector<16x16xf32>, vector<2x16xf32> -> vector<2x16xf32>
    %553 = arith.addf %549, %552 : vector<2x16xf32>
    %554 = vector.extract_strided_slice %6 {offsets = [3, 0, 0], sizes = [1, 1, 16], strides = [1, 1, 1]} : vector<4x1x16xf32> to vector<1x1x16xf32>
    %555 = vector.shape_cast %554 : vector<1x1x16xf32> to vector<1x16xf32>
    %556 = vector.broadcast %555 : vector<1x16xf32> to vector<2x16xf32>
    %557 = arith.addf %553, %556 : vector<2x16xf32>
    %558 = arith.negf %557 : vector<2x16xf32>
    %559 = math.exp %558 : vector<2x16xf32>
    %cst_148 = arith.constant 1.000000e+00 : f32
    %560 = vector.broadcast %cst_148 : f32 to vector<2x16xf32>
    %561 = arith.addf %560, %559 : vector<2x16xf32>
    %562 = arith.divf %560, %561 : vector<2x16xf32>
    %563 = arith.mulf %534, %500 : vector<2x16xf32>
    %564 = arith.mulf %518, %546 : vector<2x16xf32>
    %565 = arith.addf %563, %564 : vector<2x16xf32>
    %566 = math.tanh %565 : vector<2x16xf32>
    %567 = arith.mulf %562, %566 : vector<2x16xf32>
    %c3_i32_149 = arith.constant 3 : i32
    %568 = vector.broadcast %c3_i32_149 : i32 to vector<2x1xi32>
    %569 = arith.cmpi sgt, %0, %568 : vector<2x1xi32>
    %cst_150 = arith.constant 0.000000e+00 : f32
    %570 = vector.shape_cast %569 : vector<2x1xi1> to vector<2x1xi1>
    %571 = vector.broadcast %570 : vector<2x1xi1> to vector<2x16xi1>
    %572 = vector.broadcast %cst_150 : f32 to vector<2x16xf32>
    %573 = arith.select %571, %567, %572 : vector<2x16xi1>, vector<2x16xf32>
    %c3_151 = arith.constant 3 : index
    %c0_152 = arith.constant 0 : index
    %c0_153 = arith.constant 0 : index
    %574 = vector.load %arg11[%c3_151, %c0_152, %c0_153] : memref<5x2x16xf32, #tpu.memory_space<vmem>>, vector<1x2x16xf32>
    %575 = vector.shape_cast %574 : vector<1x2x16xf32> to vector<2x16xf32>
    %576 = vector.shape_cast %573 : vector<2x16xf32> to vector<1x2x16xf32>
    tpu.vector_store %arg11[%c3_151, %c0_152, %c0_153], %576 {strides = array<i32>} : memref<5x2x16xf32, #tpu.memory_space<vmem>>, vector<1x2x16xf32>,
    %577 = vector.shape_cast %569 : vector<2x1xi1> to vector<2x1xi1>
    %578 = vector.broadcast %577 : vector<2x1xi1> to vector<2x16xi1>
    %579 = arith.select %578, %567, %497 : vector<2x16xi1>, vector<2x16xf32>
    %580 = vector.shape_cast %569 : vector<2x1xi1> to vector<2x1xi1>
    %581 = vector.broadcast %580 : vector<2x1xi1> to vector<2x16xi1>
    %582 = arith.select %581, %565, %500 : vector<2x16xi1>, vector<2x16xf32>
    %c2_154 = arith.constant 2 : index
    %c0_155 = arith.constant 0 : index
    %c0_156 = arith.constant 0 : index
    %583 = vector.load %arg0[%c2_154, %c0_155, %c0_156] : memref<5x2x48xf32, #tpu.memory_space<vmem>>, vector<1x2x48xf32>
    %584 = vector.shape_cast %583 : vector<1x2x48xf32> to vector<2x48xf32>
    %585 = vector.extract_strided_slice %4 {offsets = [0, 0, 0], sizes = [1, 48, 16], strides = [1, 1, 1]} : vector<4x48x16xf32> to vector<1x48x16xf32>
    %586 = vector.shape_cast %585 : vector<1x48x16xf32> to vector<48x16xf32>
    %cst_157 = arith.constant dense<0.000000e+00> : vector<2x16xf32>
    %587 = tpu.matmul %584, %586, %cst_157 {dimension_numbers = #tpu.dot_dimension_numbers<[1], [0], [0], [1], [0, 0, 1, 1], [], []>} : vector<2x48xf32>, vector<48x16xf32>, vector<2x16xf32> -> vector<2x16xf32>
    %588 = vector.extract_strided_slice %5 {offsets = [0, 0, 0], sizes = [1, 16, 16], strides = [1, 1, 1]} : vector<4x16x16xf32> to vector<1x16x16xf32>
    %589 = vector.shape_cast %588 : vector<1x16x16xf32> to vector<16x16xf32>
    %cst_158 = arith.constant dense<0.000000e+00> : vector<2x16xf32>
    %590 = tpu.matmul %579, %589, %cst_158 {dimension_numbers = #tpu.dot_dimension_numbers<[1], [0], [0], [1], [0, 0, 1, 1], [], []>} : vector<2x16xf32>, vector<16x16xf32>, vector<2x16xf32> -> vector<2x16xf32>
    %591 = arith.addf %587, %590 : vector<2x16xf32>
    %592 = vector.extract_strided_slice %6 {offsets = [0, 0, 0], sizes = [1, 1, 16], strides = [1, 1, 1]} : vector<4x1x16xf32> to vector<1x1x16xf32>
    %593 = vector.shape_cast %592 : vector<1x1x16xf32> to vector<1x16xf32>
    %594 = vector.broadcast %593 : vector<1x16xf32> to vector<2x16xf32>
    %595 = arith.addf %591, %594 : vector<2x16xf32>
    %596 = arith.negf %595 : vector<2x16xf32>
    %597 = math.exp %596 : vector<2x16xf32>
    %cst_159 = arith.constant 1.000000e+00 : f32
    %598 = vector.broadcast %cst_159 : f32 to vector<2x16xf32>
    %599 = arith.addf %598, %597 : vector<2x16xf32>
    %600 = arith.divf %598, %599 : vector<2x16xf32>
    %601 = vector.extract_strided_slice %4 {offsets = [1, 0, 0], sizes = [1, 48, 16], strides = [1, 1, 1]} : vector<4x48x16xf32> to vector<1x48x16xf32>
    %602 = vector.shape_cast %601 : vector<1x48x16xf32> to vector<48x16xf32>
    %cst_160 = arith.constant dense<0.000000e+00> : vector<2x16xf32>
    %603 = tpu.matmul %584, %602, %cst_160 {dimension_numbers = #tpu.dot_dimension_numbers<[1], [0], [0], [1], [0, 0, 1, 1], [], []>} : vector<2x48xf32>, vector<48x16xf32>, vector<2x16xf32> -> vector<2x16xf32>
    %604 = vector.extract_strided_slice %5 {offsets = [1, 0, 0], sizes = [1, 16, 16], strides = [1, 1, 1]} : vector<4x16x16xf32> to vector<1x16x16xf32>
    %605 = vector.shape_cast %604 : vector<1x16x16xf32> to vector<16x16xf32>
    %cst_161 = arith.constant dense<0.000000e+00> : vector<2x16xf32>
    %606 = tpu.matmul %579, %605, %cst_161 {dimension_numbers = #tpu.dot_dimension_numbers<[1], [0], [0], [1], [0, 0, 1, 1], [], []>} : vector<2x16xf32>, vector<16x16xf32>, vector<2x16xf32> -> vector<2x16xf32>
    %607 = arith.addf %603, %606 : vector<2x16xf32>
    %608 = vector.extract_strided_slice %6 {offsets = [1, 0, 0], sizes = [1, 1, 16], strides = [1, 1, 1]} : vector<4x1x16xf32> to vector<1x1x16xf32>
    %609 = vector.shape_cast %608 : vector<1x1x16xf32> to vector<1x16xf32>
    %610 = vector.broadcast %609 : vector<1x16xf32> to vector<2x16xf32>
    %611 = arith.addf %607, %610 : vector<2x16xf32>
    %612 = arith.negf %611 : vector<2x16xf32>
    %613 = math.exp %612 : vector<2x16xf32>
    %cst_162 = arith.constant 1.000000e+00 : f32
    %614 = vector.broadcast %cst_162 : f32 to vector<2x16xf32>
    %615 = arith.addf %614, %613 : vector<2x16xf32>
    %616 = arith.divf %614, %615 : vector<2x16xf32>
    %617 = vector.extract_strided_slice %4 {offsets = [2, 0, 0], sizes = [1, 48, 16], strides = [1, 1, 1]} : vector<4x48x16xf32> to vector<1x48x16xf32>
    %618 = vector.shape_cast %617 : vector<1x48x16xf32> to vector<48x16xf32>
    %cst_163 = arith.constant dense<0.000000e+00> : vector<2x16xf32>
    %619 = tpu.matmul %584, %618, %cst_163 {dimension_numbers = #tpu.dot_dimension_numbers<[1], [0], [0], [1], [0, 0, 1, 1], [], []>} : vector<2x48xf32>, vector<48x16xf32>, vector<2x16xf32> -> vector<2x16xf32>
    %620 = vector.extract_strided_slice %5 {offsets = [2, 0, 0], sizes = [1, 16, 16], strides = [1, 1, 1]} : vector<4x16x16xf32> to vector<1x16x16xf32>
    %621 = vector.shape_cast %620 : vector<1x16x16xf32> to vector<16x16xf32>
    %cst_164 = arith.constant dense<0.000000e+00> : vector<2x16xf32>
    %622 = tpu.matmul %579, %621, %cst_164 {dimension_numbers = #tpu.dot_dimension_numbers<[1], [0], [0], [1], [0, 0, 1, 1], [], []>} : vector<2x16xf32>, vector<16x16xf32>, vector<2x16xf32> -> vector<2x16xf32>
    %623 = arith.addf %619, %622 : vector<2x16xf32>
    %624 = vector.extract_strided_slice %6 {offsets = [2, 0, 0], sizes = [1, 1, 16], strides = [1, 1, 1]} : vector<4x1x16xf32> to vector<1x1x16xf32>
    %625 = vector.shape_cast %624 : vector<1x1x16xf32> to vector<1x16xf32>
    %626 = vector.broadcast %625 : vector<1x16xf32> to vector<2x16xf32>
    %627 = arith.addf %623, %626 : vector<2x16xf32>
    %628 = math.tanh %627 : vector<2x16xf32>
    %629 = vector.extract_strided_slice %4 {offsets = [3, 0, 0], sizes = [1, 48, 16], strides = [1, 1, 1]} : vector<4x48x16xf32> to vector<1x48x16xf32>
    %630 = vector.shape_cast %629 : vector<1x48x16xf32> to vector<48x16xf32>
    %cst_165 = arith.constant dense<0.000000e+00> : vector<2x16xf32>
    %631 = tpu.matmul %584, %630, %cst_165 {dimension_numbers = #tpu.dot_dimension_numbers<[1], [0], [0], [1], [0, 0, 1, 1], [], []>} : vector<2x48xf32>, vector<48x16xf32>, vector<2x16xf32> -> vector<2x16xf32>
    %632 = vector.extract_strided_slice %5 {offsets = [3, 0, 0], sizes = [1, 16, 16], strides = [1, 1, 1]} : vector<4x16x16xf32> to vector<1x16x16xf32>
    %633 = vector.shape_cast %632 : vector<1x16x16xf32> to vector<16x16xf32>
    %cst_166 = arith.constant dense<0.000000e+00> : vector<2x16xf32>
    %634 = tpu.matmul %579, %633, %cst_166 {dimension_numbers = #tpu.dot_dimension_numbers<[1], [0], [0], [1], [0, 0, 1, 1], [], []>} : vector<2x16xf32>, vector<16x16xf32>, vector<2x16xf32> -> vector<2x16xf32>
    %635 = arith.addf %631, %634 : vector<2x16xf32>
    %636 = vector.extract_strided_slice %6 {offsets = [3, 0, 0], sizes = [1, 1, 16], strides = [1, 1, 1]} : vector<4x1x16xf32> to vector<1x1x16xf32>
    %637 = vector.shape_cast %636 : vector<1x1x16xf32> to vector<1x16xf32>
    %638 = vector.broadcast %637 : vector<1x16xf32> to vector<2x16xf32>
    %639 = arith.addf %635, %638 : vector<2x16xf32>
    %640 = arith.negf %639 : vector<2x16xf32>
    %641 = math.exp %640 : vector<2x16xf32>
    %cst_167 = arith.constant 1.000000e+00 : f32
    %642 = vector.broadcast %cst_167 : f32 to vector<2x16xf32>
    %643 = arith.addf %642, %641 : vector<2x16xf32>
    %644 = arith.divf %642, %643 : vector<2x16xf32>
    %645 = arith.mulf %616, %582 : vector<2x16xf32>
    %646 = arith.mulf %600, %628 : vector<2x16xf32>
    %647 = arith.addf %645, %646 : vector<2x16xf32>
    %648 = math.tanh %647 : vector<2x16xf32>
    %649 = arith.mulf %644, %648 : vector<2x16xf32>
    %c2_i32_168 = arith.constant 2 : i32
    %650 = vector.broadcast %c2_i32_168 : i32 to vector<2x1xi32>
    %651 = arith.cmpi sgt, %0, %650 : vector<2x1xi32>
    %cst_169 = arith.constant 0.000000e+00 : f32
    %652 = vector.shape_cast %651 : vector<2x1xi1> to vector<2x1xi1>
    %653 = vector.broadcast %652 : vector<2x1xi1> to vector<2x16xi1>
    %654 = vector.broadcast %cst_169 : f32 to vector<2x16xf32>
    %655 = arith.select %653, %649, %654 : vector<2x16xi1>, vector<2x16xf32>
    %c2_170 = arith.constant 2 : index
    %c0_171 = arith.constant 0 : index
    %c0_172 = arith.constant 0 : index
    %656 = vector.load %arg11[%c2_170, %c0_171, %c0_172] : memref<5x2x16xf32, #tpu.memory_space<vmem>>, vector<1x2x16xf32>
    %657 = vector.shape_cast %656 : vector<1x2x16xf32> to vector<2x16xf32>
    %658 = vector.shape_cast %655 : vector<2x16xf32> to vector<1x2x16xf32>
    tpu.vector_store %arg11[%c2_170, %c0_171, %c0_172], %658 {strides = array<i32>} : memref<5x2x16xf32, #tpu.memory_space<vmem>>, vector<1x2x16xf32>,
    %659 = vector.shape_cast %651 : vector<2x1xi1> to vector<2x1xi1>
    %660 = vector.broadcast %659 : vector<2x1xi1> to vector<2x16xi1>
    %661 = arith.select %660, %649, %579 : vector<2x16xi1>, vector<2x16xf32>
    %662 = vector.shape_cast %651 : vector<2x1xi1> to vector<2x1xi1>
    %663 = vector.broadcast %662 : vector<2x1xi1> to vector<2x16xi1>
    %664 = arith.select %663, %647, %582 : vector<2x16xi1>, vector<2x16xf32>
    %c1_173 = arith.constant 1 : index
    %c0_174 = arith.constant 0 : index
    %c0_175 = arith.constant 0 : index
    %665 = vector.load %arg0[%c1_173, %c0_174, %c0_175] : memref<5x2x48xf32, #tpu.memory_space<vmem>>, vector<1x2x48xf32>
    %666 = vector.shape_cast %665 : vector<1x2x48xf32> to vector<2x48xf32>
    %667 = vector.extract_strided_slice %4 {offsets = [0, 0, 0], sizes = [1, 48, 16], strides = [1, 1, 1]} : vector<4x48x16xf32> to vector<1x48x16xf32>
    %668 = vector.shape_cast %667 : vector<1x48x16xf32> to vector<48x16xf32>
    %cst_176 = arith.constant dense<0.000000e+00> : vector<2x16xf32>
    %669 = tpu.matmul %666, %668, %cst_176 {dimension_numbers = #tpu.dot_dimension_numbers<[1], [0], [0], [1], [0, 0, 1, 1], [], []>} : vector<2x48xf32>, vector<48x16xf32>, vector<2x16xf32> -> vector<2x16xf32>
    %670 = vector.extract_strided_slice %5 {offsets = [0, 0, 0], sizes = [1, 16, 16], strides = [1, 1, 1]} : vector<4x16x16xf32> to vector<1x16x16xf32>
    %671 = vector.shape_cast %670 : vector<1x16x16xf32> to vector<16x16xf32>
    %cst_177 = arith.constant dense<0.000000e+00> : vector<2x16xf32>
    %672 = tpu.matmul %661, %671, %cst_177 {dimension_numbers = #tpu.dot_dimension_numbers<[1], [0], [0], [1], [0, 0, 1, 1], [], []>} : vector<2x16xf32>, vector<16x16xf32>, vector<2x16xf32> -> vector<2x16xf32>
    %673 = arith.addf %669, %672 : vector<2x16xf32>
    %674 = vector.extract_strided_slice %6 {offsets = [0, 0, 0], sizes = [1, 1, 16], strides = [1, 1, 1]} : vector<4x1x16xf32> to vector<1x1x16xf32>
    %675 = vector.shape_cast %674 : vector<1x1x16xf32> to vector<1x16xf32>
    %676 = vector.broadcast %675 : vector<1x16xf32> to vector<2x16xf32>
    %677 = arith.addf %673, %676 : vector<2x16xf32>
    %678 = arith.negf %677 : vector<2x16xf32>
    %679 = math.exp %678 : vector<2x16xf32>
    %cst_178 = arith.constant 1.000000e+00 : f32
    %680 = vector.broadcast %cst_178 : f32 to vector<2x16xf32>
    %681 = arith.addf %680, %679 : vector<2x16xf32>
    %682 = arith.divf %680, %681 : vector<2x16xf32>
    %683 = vector.extract_strided_slice %4 {offsets = [1, 0, 0], sizes = [1, 48, 16], strides = [1, 1, 1]} : vector<4x48x16xf32> to vector<1x48x16xf32>
    %684 = vector.shape_cast %683 : vector<1x48x16xf32> to vector<48x16xf32>
    %cst_179 = arith.constant dense<0.000000e+00> : vector<2x16xf32>
    %685 = tpu.matmul %666, %684, %cst_179 {dimension_numbers = #tpu.dot_dimension_numbers<[1], [0], [0], [1], [0, 0, 1, 1], [], []>} : vector<2x48xf32>, vector<48x16xf32>, vector<2x16xf32> -> vector<2x16xf32>
    %686 = vector.extract_strided_slice %5 {offsets = [1, 0, 0], sizes = [1, 16, 16], strides = [1, 1, 1]} : vector<4x16x16xf32> to vector<1x16x16xf32>
    %687 = vector.shape_cast %686 : vector<1x16x16xf32> to vector<16x16xf32>
    %cst_180 = arith.constant dense<0.000000e+00> : vector<2x16xf32>
    %688 = tpu.matmul %661, %687, %cst_180 {dimension_numbers = #tpu.dot_dimension_numbers<[1], [0], [0], [1], [0, 0, 1, 1], [], []>} : vector<2x16xf32>, vector<16x16xf32>, vector<2x16xf32> -> vector<2x16xf32>
    %689 = arith.addf %685, %688 : vector<2x16xf32>
    %690 = vector.extract_strided_slice %6 {offsets = [1, 0, 0], sizes = [1, 1, 16], strides = [1, 1, 1]} : vector<4x1x16xf32> to vector<1x1x16xf32>
    %691 = vector.shape_cast %690 : vector<1x1x16xf32> to vector<1x16xf32>
    %692 = vector.broadcast %691 : vector<1x16xf32> to vector<2x16xf32>
    %693 = arith.addf %689, %692 : vector<2x16xf32>
    %694 = arith.negf %693 : vector<2x16xf32>
    %695 = math.exp %694 : vector<2x16xf32>
    %cst_181 = arith.constant 1.000000e+00 : f32
    %696 = vector.broadcast %cst_181 : f32 to vector<2x16xf32>
    %697 = arith.addf %696, %695 : vector<2x16xf32>
    %698 = arith.divf %696, %697 : vector<2x16xf32>
    %699 = vector.extract_strided_slice %4 {offsets = [2, 0, 0], sizes = [1, 48, 16], strides = [1, 1, 1]} : vector<4x48x16xf32> to vector<1x48x16xf32>
    %700 = vector.shape_cast %699 : vector<1x48x16xf32> to vector<48x16xf32>
    %cst_182 = arith.constant dense<0.000000e+00> : vector<2x16xf32>
    %701 = tpu.matmul %666, %700, %cst_182 {dimension_numbers = #tpu.dot_dimension_numbers<[1], [0], [0], [1], [0, 0, 1, 1], [], []>} : vector<2x48xf32>, vector<48x16xf32>, vector<2x16xf32> -> vector<2x16xf32>
    %702 = vector.extract_strided_slice %5 {offsets = [2, 0, 0], sizes = [1, 16, 16], strides = [1, 1, 1]} : vector<4x16x16xf32> to vector<1x16x16xf32>
    %703 = vector.shape_cast %702 : vector<1x16x16xf32> to vector<16x16xf32>
    %cst_183 = arith.constant dense<0.000000e+00> : vector<2x16xf32>
    %704 = tpu.matmul %661, %703, %cst_183 {dimension_numbers = #tpu.dot_dimension_numbers<[1], [0], [0], [1], [0, 0, 1, 1], [], []>} : vector<2x16xf32>, vector<16x16xf32>, vector<2x16xf32> -> vector<2x16xf32>
    %705 = arith.addf %701, %704 : vector<2x16xf32>
    %706 = vector.extract_strided_slice %6 {offsets = [2, 0, 0], sizes = [1, 1, 16], strides = [1, 1, 1]} : vector<4x1x16xf32> to vector<1x1x16xf32>
    %707 = vector.shape_cast %706 : vector<1x1x16xf32> to vector<1x16xf32>
    %708 = vector.broadcast %707 : vector<1x16xf32> to vector<2x16xf32>
    %709 = arith.addf %705, %708 : vector<2x16xf32>
    %710 = math.tanh %709 : vector<2x16xf32>
    %711 = vector.extract_strided_slice %4 {offsets = [3, 0, 0], sizes = [1, 48, 16], strides = [1, 1, 1]} : vector<4x48x16xf32> to vector<1x48x16xf32>
    %712 = vector.shape_cast %711 : vector<1x48x16xf32> to vector<48x16xf32>
    %cst_184 = arith.constant dense<0.000000e+00> : vector<2x16xf32>
    %713 = tpu.matmul %666, %712, %cst_184 {dimension_numbers = #tpu.dot_dimension_numbers<[1], [0], [0], [1], [0, 0, 1, 1], [], []>} : vector<2x48xf32>, vector<48x16xf32>, vector<2x16xf32> -> vector<2x16xf32>
    %714 = vector.extract_strided_slice %5 {offsets = [3, 0, 0], sizes = [1, 16, 16], strides = [1, 1, 1]} : vector<4x16x16xf32> to vector<1x16x16xf32>
    %715 = vector.shape_cast %714 : vector<1x16x16xf32> to vector<16x16xf32>
    %cst_185 = arith.constant dense<0.000000e+00> : vector<2x16xf32>
    %716 = tpu.matmul %661, %715, %cst_185 {dimension_numbers = #tpu.dot_dimension_numbers<[1], [0], [0], [1], [0, 0, 1, 1], [], []>} : vector<2x16xf32>, vector<16x16xf32>, vector<2x16xf32> -> vector<2x16xf32>
    %717 = arith.addf %713, %716 : vector<2x16xf32>
    %718 = vector.extract_strided_slice %6 {offsets = [3, 0, 0], sizes = [1, 1, 16], strides = [1, 1, 1]} : vector<4x1x16xf32> to vector<1x1x16xf32>
    %719 = vector.shape_cast %718 : vector<1x1x16xf32> to vector<1x16xf32>
    %720 = vector.broadcast %719 : vector<1x16xf32> to vector<2x16xf32>
    %721 = arith.addf %717, %720 : vector<2x16xf32>
    %722 = arith.negf %721 : vector<2x16xf32>
    %723 = math.exp %722 : vector<2x16xf32>
    %cst_186 = arith.constant 1.000000e+00 : f32
    %724 = vector.broadcast %cst_186 : f32 to vector<2x16xf32>
    %725 = arith.addf %724, %723 : vector<2x16xf32>
    %726 = arith.divf %724, %725 : vector<2x16xf32>
    %727 = arith.mulf %698, %664 : vector<2x16xf32>
    %728 = arith.mulf %682, %710 : vector<2x16xf32>
    %729 = arith.addf %727, %728 : vector<2x16xf32>
    %730 = math.tanh %729 : vector<2x16xf32>
    %731 = arith.mulf %726, %730 : vector<2x16xf32>
    %c1_i32_187 = arith.constant 1 : i32
    %732 = vector.broadcast %c1_i32_187 : i32 to vector<2x1xi32>
    %733 = arith.cmpi sgt, %0, %732 : vector<2x1xi32>
    %cst_188 = arith.constant 0.000000e+00 : f32
    %734 = vector.shape_cast %733 : vector<2x1xi1> to vector<2x1xi1>
    %735 = vector.broadcast %734 : vector<2x1xi1> to vector<2x16xi1>
    %736 = vector.broadcast %cst_188 : f32 to vector<2x16xf32>
    %737 = arith.select %735, %731, %736 : vector<2x16xi1>, vector<2x16xf32>
    %c1_189 = arith.constant 1 : index
    %c0_190 = arith.constant 0 : index
    %c0_191 = arith.constant 0 : index
    %738 = vector.load %arg11[%c1_189, %c0_190, %c0_191] : memref<5x2x16xf32, #tpu.memory_space<vmem>>, vector<1x2x16xf32>
    %739 = vector.shape_cast %738 : vector<1x2x16xf32> to vector<2x16xf32>
    %740 = vector.shape_cast %737 : vector<2x16xf32> to vector<1x2x16xf32>
    tpu.vector_store %arg11[%c1_189, %c0_190, %c0_191], %740 {strides = array<i32>} : memref<5x2x16xf32, #tpu.memory_space<vmem>>, vector<1x2x16xf32>,
    %741 = vector.shape_cast %733 : vector<2x1xi1> to vector<2x1xi1>
    %742 = vector.broadcast %741 : vector<2x1xi1> to vector<2x16xi1>
    %743 = arith.select %742, %731, %661 : vector<2x16xi1>, vector<2x16xf32>
    %744 = vector.shape_cast %733 : vector<2x1xi1> to vector<2x1xi1>
    %745 = vector.broadcast %744 : vector<2x1xi1> to vector<2x16xi1>
    %746 = arith.select %745, %729, %664 : vector<2x16xi1>, vector<2x16xf32>
    %c0_192 = arith.constant 0 : index
    %c0_193 = arith.constant 0 : index
    %c0_194 = arith.constant 0 : index
    %747 = vector.load %arg0[%c0_192, %c0_193, %c0_194] : memref<5x2x48xf32, #tpu.memory_space<vmem>>, vector<1x2x48xf32>
    %748 = vector.shape_cast %747 : vector<1x2x48xf32> to vector<2x48xf32>
    %749 = vector.extract_strided_slice %4 {offsets = [0, 0, 0], sizes = [1, 48, 16], strides = [1, 1, 1]} : vector<4x48x16xf32> to vector<1x48x16xf32>
    %750 = vector.shape_cast %749 : vector<1x48x16xf32> to vector<48x16xf32>
    %cst_195 = arith.constant dense<0.000000e+00> : vector<2x16xf32>
    %751 = tpu.matmul %748, %750, %cst_195 {dimension_numbers = #tpu.dot_dimension_numbers<[1], [0], [0], [1], [0, 0, 1, 1], [], []>} : vector<2x48xf32>, vector<48x16xf32>, vector<2x16xf32> -> vector<2x16xf32>
    %752 = vector.extract_strided_slice %5 {offsets = [0, 0, 0], sizes = [1, 16, 16], strides = [1, 1, 1]} : vector<4x16x16xf32> to vector<1x16x16xf32>
    %753 = vector.shape_cast %752 : vector<1x16x16xf32> to vector<16x16xf32>
    %cst_196 = arith.constant dense<0.000000e+00> : vector<2x16xf32>
    %754 = tpu.matmul %743, %753, %cst_196 {dimension_numbers = #tpu.dot_dimension_numbers<[1], [0], [0], [1], [0, 0, 1, 1], [], []>} : vector<2x16xf32>, vector<16x16xf32>, vector<2x16xf32> -> vector<2x16xf32>
    %755 = arith.addf %751, %754 : vector<2x16xf32>
    %756 = vector.extract_strided_slice %6 {offsets = [0, 0, 0], sizes = [1, 1, 16], strides = [1, 1, 1]} : vector<4x1x16xf32> to vector<1x1x16xf32>
    %757 = vector.shape_cast %756 : vector<1x1x16xf32> to vector<1x16xf32>
    %758 = vector.broadcast %757 : vector<1x16xf32> to vector<2x16xf32>
    %759 = arith.addf %755, %758 : vector<2x16xf32>
    %760 = arith.negf %759 : vector<2x16xf32>
    %761 = math.exp %760 : vector<2x16xf32>
    %cst_197 = arith.constant 1.000000e+00 : f32
    %762 = vector.broadcast %cst_197 : f32 to vector<2x16xf32>
    %763 = arith.addf %762, %761 : vector<2x16xf32>
    %764 = arith.divf %762, %763 : vector<2x16xf32>
    %765 = vector.extract_strided_slice %4 {offsets = [1, 0, 0], sizes = [1, 48, 16], strides = [1, 1, 1]} : vector<4x48x16xf32> to vector<1x48x16xf32>
    %766 = vector.shape_cast %765 : vector<1x48x16xf32> to vector<48x16xf32>
    %cst_198 = arith.constant dense<0.000000e+00> : vector<2x16xf32>
    %767 = tpu.matmul %748, %766, %cst_198 {dimension_numbers = #tpu.dot_dimension_numbers<[1], [0], [0], [1], [0, 0, 1, 1], [], []>} : vector<2x48xf32>, vector<48x16xf32>, vector<2x16xf32> -> vector<2x16xf32>
    %768 = vector.extract_strided_slice %5 {offsets = [1, 0, 0], sizes = [1, 16, 16], strides = [1, 1, 1]} : vector<4x16x16xf32> to vector<1x16x16xf32>
    %769 = vector.shape_cast %768 : vector<1x16x16xf32> to vector<16x16xf32>
    %cst_199 = arith.constant dense<0.000000e+00> : vector<2x16xf32>
    %770 = tpu.matmul %743, %769, %cst_199 {dimension_numbers = #tpu.dot_dimension_numbers<[1], [0], [0], [1], [0, 0, 1, 1], [], []>} : vector<2x16xf32>, vector<16x16xf32>, vector<2x16xf32> -> vector<2x16xf32>
    %771 = arith.addf %767, %770 : vector<2x16xf32>
    %772 = vector.extract_strided_slice %6 {offsets = [1, 0, 0], sizes = [1, 1, 16], strides = [1, 1, 1]} : vector<4x1x16xf32> to vector<1x1x16xf32>
    %773 = vector.shape_cast %772 : vector<1x1x16xf32> to vector<1x16xf32>
    %774 = vector.broadcast %773 : vector<1x16xf32> to vector<2x16xf32>
    %775 = arith.addf %771, %774 : vector<2x16xf32>
    %776 = arith.negf %775 : vector<2x16xf32>
    %777 = math.exp %776 : vector<2x16xf32>
    %cst_200 = arith.constant 1.000000e+00 : f32
    %778 = vector.broadcast %cst_200 : f32 to vector<2x16xf32>
    %779 = arith.addf %778, %777 : vector<2x16xf32>
    %780 = arith.divf %778, %779 : vector<2x16xf32>
    %781 = vector.extract_strided_slice %4 {offsets = [2, 0, 0], sizes = [1, 48, 16], strides = [1, 1, 1]} : vector<4x48x16xf32> to vector<1x48x16xf32>
    %782 = vector.shape_cast %781 : vector<1x48x16xf32> to vector<48x16xf32>
    %cst_201 = arith.constant dense<0.000000e+00> : vector<2x16xf32>
    %783 = tpu.matmul %748, %782, %cst_201 {dimension_numbers = #tpu.dot_dimension_numbers<[1], [0], [0], [1], [0, 0, 1, 1], [], []>} : vector<2x48xf32>, vector<48x16xf32>, vector<2x16xf32> -> vector<2x16xf32>
    %784 = vector.extract_strided_slice %5 {offsets = [2, 0, 0], sizes = [1, 16, 16], strides = [1, 1, 1]} : vector<4x16x16xf32> to vector<1x16x16xf32>
    %785 = vector.shape_cast %784 : vector<1x16x16xf32> to vector<16x16xf32>
    %cst_202 = arith.constant dense<0.000000e+00> : vector<2x16xf32>
    %786 = tpu.matmul %743, %785, %cst_202 {dimension_numbers = #tpu.dot_dimension_numbers<[1], [0], [0], [1], [0, 0, 1, 1], [], []>} : vector<2x16xf32>, vector<16x16xf32>, vector<2x16xf32> -> vector<2x16xf32>
    %787 = arith.addf %783, %786 : vector<2x16xf32>
    %788 = vector.extract_strided_slice %6 {offsets = [2, 0, 0], sizes = [1, 1, 16], strides = [1, 1, 1]} : vector<4x1x16xf32> to vector<1x1x16xf32>
    %789 = vector.shape_cast %788 : vector<1x1x16xf32> to vector<1x16xf32>
    %790 = vector.broadcast %789 : vector<1x16xf32> to vector<2x16xf32>
    %791 = arith.addf %787, %790 : vector<2x16xf32>
    %792 = math.tanh %791 : vector<2x16xf32>
    %793 = vector.extract_strided_slice %4 {offsets = [3, 0, 0], sizes = [1, 48, 16], strides = [1, 1, 1]} : vector<4x48x16xf32> to vector<1x48x16xf32>
    %794 = vector.shape_cast %793 : vector<1x48x16xf32> to vector<48x16xf32>
    %cst_203 = arith.constant dense<0.000000e+00> : vector<2x16xf32>
    %795 = tpu.matmul %748, %794, %cst_203 {dimension_numbers = #tpu.dot_dimension_numbers<[1], [0], [0], [1], [0, 0, 1, 1], [], []>} : vector<2x48xf32>, vector<48x16xf32>, vector<2x16xf32> -> vector<2x16xf32>
    %796 = vector.extract_strided_slice %5 {offsets = [3, 0, 0], sizes = [1, 16, 16], strides = [1, 1, 1]} : vector<4x16x16xf32> to vector<1x16x16xf32>
    %797 = vector.shape_cast %796 : vector<1x16x16xf32> to vector<16x16xf32>
    %cst_204 = arith.constant dense<0.000000e+00> : vector<2x16xf32>
    %798 = tpu.matmul %743, %797, %cst_204 {dimension_numbers = #tpu.dot_dimension_numbers<[1], [0], [0], [1], [0, 0, 1, 1], [], []>} : vector<2x16xf32>, vector<16x16xf32>, vector<2x16xf32> -> vector<2x16xf32>
    %799 = arith.addf %795, %798 : vector<2x16xf32>
    %800 = vector.extract_strided_slice %6 {offsets = [3, 0, 0], sizes = [1, 1, 16], strides = [1, 1, 1]} : vector<4x1x16xf32> to vector<1x1x16xf32>
    %801 = vector.shape_cast %800 : vector<1x1x16xf32> to vector<1x16xf32>
    %802 = vector.broadcast %801 : vector<1x16xf32> to vector<2x16xf32>
    %803 = arith.addf %799, %802 : vector<2x16xf32>
    %804 = arith.negf %803 : vector<2x16xf32>
    %805 = math.exp %804 : vector<2x16xf32>
    %cst_205 = arith.constant 1.000000e+00 : f32
    %806 = vector.broadcast %cst_205 : f32 to vector<2x16xf32>
    %807 = arith.addf %806, %805 : vector<2x16xf32>
    %808 = arith.divf %806, %807 : vector<2x16xf32>
    %809 = arith.mulf %780, %746 : vector<2x16xf32>
    %810 = arith.mulf %764, %792 : vector<2x16xf32>
    %811 = arith.addf %809, %810 : vector<2x16xf32>
    %812 = math.tanh %811 : vector<2x16xf32>
    %813 = arith.mulf %808, %812 : vector<2x16xf32>
    %c0_i32_206 = arith.constant 0 : i32
    %814 = vector.broadcast %c0_i32_206 : i32 to vector<2x1xi32>
    %815 = arith.cmpi sgt, %0, %814 : vector<2x1xi32>
    %cst_207 = arith.constant 0.000000e+00 : f32
    %816 = vector.shape_cast %815 : vector<2x1xi1> to vector<2x1xi1>
    %817 = vector.broadcast %816 : vector<2x1xi1> to vector<2x16xi1>
    %818 = vector.broadcast %cst_207 : f32 to vector<2x16xf32>
    %819 = arith.select %817, %813, %818 : vector<2x16xi1>, vector<2x16xf32>
    %c0_208 = arith.constant 0 : index
    %c0_209 = arith.constant 0 : index
    %c0_210 = arith.constant 0 : index
    %820 = vector.load %arg11[%c0_208, %c0_209, %c0_210] : memref<5x2x16xf32, #tpu.memory_space<vmem>>, vector<1x2x16xf32>
    %821 = vector.shape_cast %820 : vector<1x2x16xf32> to vector<2x16xf32>
    %822 = vector.shape_cast %819 : vector<2x16xf32> to vector<1x2x16xf32>
    tpu.vector_store %arg11[%c0_208, %c0_209, %c0_210], %822 {strides = array<i32>} : memref<5x2x16xf32, #tpu.memory_space<vmem>>, vector<1x2x16xf32>,
    return
  }
}

module attributes {stable_mosaic.version = 11 : i64} {
  func.func @_ptr_extractor_kernel(%arg0: memref<2x5x32xf32, #tpu.memory_space<vmem>>, %arg1: memref<4x2x32xf32, #tpu.memory_space<vmem>>, %arg2: memref<2x5xf32, #tpu.memory_space<vmem>>, %arg3: memref<2x16xf32, #tpu.memory_space<vmem>>, %arg4: memref<2x16xf32, #tpu.memory_space<vmem>>, %arg5: memref<4x32x16xf32, #tpu.memory_space<vmem>>, %arg6: memref<4x16x16xf32, #tpu.memory_space<vmem>>, %arg7: memref<4x1x16xf32, #tpu.memory_space<vmem>>, %arg8: memref<32x16xf32, #tpu.memory_space<vmem>>, %arg9: memref<16x16xf32, #tpu.memory_space<vmem>>, %arg10: memref<1x16xf32, #tpu.memory_space<vmem>>, %arg11: memref<32x16xf32, #tpu.memory_space<vmem>>, %arg12: memref<16x16xf32, #tpu.memory_space<vmem>>, %arg13: memref<1x16xf32, #tpu.memory_space<vmem>>, %arg14: memref<2x4x5xf32, #tpu.memory_space<vmem>>) attributes {dimension_semantics = [], scalar_prefetch = 0 : i64, scratch_operands = 0 : i64, tpu.core_type = #tpu.core_type<tc>} {
    %c0 = arith.constant 0 : index
    %c0_0 = arith.constant 0 : index
    %c0_1 = arith.constant 0 : index
    %0 = vector.load %arg5[%c0, %c0_0, %c0_1] : memref<4x32x16xf32, #tpu.memory_space<vmem>>, vector<4x32x16xf32>
    %c0_2 = arith.constant 0 : index
    %c0_3 = arith.constant 0 : index
    %c0_4 = arith.constant 0 : index
    %1 = vector.load %arg6[%c0_2, %c0_3, %c0_4] : memref<4x16x16xf32, #tpu.memory_space<vmem>>, vector<4x16x16xf32>
    %c0_5 = arith.constant 0 : index
    %c0_6 = arith.constant 0 : index
    %c0_7 = arith.constant 0 : index
    %2 = vector.load %arg7[%c0_5, %c0_6, %c0_7] : memref<4x1x16xf32, #tpu.memory_space<vmem>>, vector<4x1x16xf32>
    %c0_8 = arith.constant 0 : index
    %c0_9 = arith.constant 0 : index
    %3 = vector.load %arg8[%c0_8, %c0_9] : memref<32x16xf32, #tpu.memory_space<vmem>>, vector<32x16xf32>
    %c0_10 = arith.constant 0 : index
    %c0_11 = arith.constant 0 : index
    %4 = vector.load %arg9[%c0_10, %c0_11] : memref<16x16xf32, #tpu.memory_space<vmem>>, vector<16x16xf32>
    %c0_12 = arith.constant 0 : index
    %c0_13 = arith.constant 0 : index
    %5 = vector.load %arg10[%c0_12, %c0_13] : memref<1x16xf32, #tpu.memory_space<vmem>>, vector<1x16xf32>
    %c0_14 = arith.constant 0 : index
    %c0_15 = arith.constant 0 : index
    %6 = vector.load %arg11[%c0_14, %c0_15] : memref<32x16xf32, #tpu.memory_space<vmem>>, vector<32x16xf32>
    %c0_16 = arith.constant 0 : index
    %c0_17 = arith.constant 0 : index
    %7 = vector.load %arg12[%c0_16, %c0_17] : memref<16x16xf32, #tpu.memory_space<vmem>>, vector<16x16xf32>
    %c0_18 = arith.constant 0 : index
    %c0_19 = arith.constant 0 : index
    %8 = vector.load %arg13[%c0_18, %c0_19] : memref<1x16xf32, #tpu.memory_space<vmem>>, vector<1x16xf32>
    %c0_20 = arith.constant 0 : index
    %c0_21 = arith.constant 0 : index
    %9 = vector.load %arg2[%c0_20, %c0_21] : memref<2x5xf32, #tpu.memory_space<vmem>>, vector<2x5xf32>
    %c0_22 = arith.constant 0 : index
    %c0_23 = arith.constant 0 : index
    %10 = vector.load %arg3[%c0_22, %c0_23] : memref<2x16xf32, #tpu.memory_space<vmem>>, vector<2x16xf32>
    %c0_24 = arith.constant 0 : index
    %c0_25 = arith.constant 0 : index
    %11 = vector.load %arg4[%c0_24, %c0_25] : memref<2x16xf32, #tpu.memory_space<vmem>>, vector<2x16xf32>
    %c0_26 = arith.constant 0 : index
    %c0_27 = arith.constant 0 : index
    %c0_28 = arith.constant 0 : index
    %12 = vector.load %arg1[%c0_26, %c0_27, %c0_28] : memref<4x2x32xf32, #tpu.memory_space<vmem>>, vector<1x2x32xf32>
    %13 = vector.shape_cast %12 : vector<1x2x32xf32> to vector<2x32xf32>
    %14 = vector.extract_strided_slice %0 {offsets = [0, 0, 0], sizes = [1, 32, 16], strides = [1, 1, 1]} : vector<4x32x16xf32> to vector<1x32x16xf32>
    %15 = vector.shape_cast %14 : vector<1x32x16xf32> to vector<32x16xf32>
    %cst = arith.constant dense<0.000000e+00> : vector<2x16xf32>
    %16 = tpu.matmul %13, %15, %cst {dimension_numbers = #tpu.dot_dimension_numbers<[1], [0], [0], [1], [0, 0, 1, 1], [], []>} : vector<2x32xf32>, vector<32x16xf32>, vector<2x16xf32> -> vector<2x16xf32>
    %17 = vector.extract_strided_slice %1 {offsets = [0, 0, 0], sizes = [1, 16, 16], strides = [1, 1, 1]} : vector<4x16x16xf32> to vector<1x16x16xf32>
    %18 = vector.shape_cast %17 : vector<1x16x16xf32> to vector<16x16xf32>
    %cst_29 = arith.constant dense<0.000000e+00> : vector<2x16xf32>
    %19 = tpu.matmul %10, %18, %cst_29 {dimension_numbers = #tpu.dot_dimension_numbers<[1], [0], [0], [1], [0, 0, 1, 1], [], []>} : vector<2x16xf32>, vector<16x16xf32>, vector<2x16xf32> -> vector<2x16xf32>
    %20 = arith.addf %16, %19 : vector<2x16xf32>
    %21 = vector.extract_strided_slice %2 {offsets = [0, 0, 0], sizes = [1, 1, 16], strides = [1, 1, 1]} : vector<4x1x16xf32> to vector<1x1x16xf32>
    %22 = vector.shape_cast %21 : vector<1x1x16xf32> to vector<1x16xf32>
    %23 = vector.broadcast %22 : vector<1x16xf32> to vector<2x16xf32>
    %24 = arith.addf %20, %23 : vector<2x16xf32>
    %25 = arith.negf %24 : vector<2x16xf32>
    %26 = math.exp %25 : vector<2x16xf32>
    %cst_30 = arith.constant 1.000000e+00 : f32
    %27 = vector.broadcast %cst_30 : f32 to vector<2x16xf32>
    %28 = arith.addf %27, %26 : vector<2x16xf32>
    %29 = arith.divf %27, %28 : vector<2x16xf32>
    %30 = vector.extract_strided_slice %0 {offsets = [1, 0, 0], sizes = [1, 32, 16], strides = [1, 1, 1]} : vector<4x32x16xf32> to vector<1x32x16xf32>
    %31 = vector.shape_cast %30 : vector<1x32x16xf32> to vector<32x16xf32>
    %cst_31 = arith.constant dense<0.000000e+00> : vector<2x16xf32>
    %32 = tpu.matmul %13, %31, %cst_31 {dimension_numbers = #tpu.dot_dimension_numbers<[1], [0], [0], [1], [0, 0, 1, 1], [], []>} : vector<2x32xf32>, vector<32x16xf32>, vector<2x16xf32> -> vector<2x16xf32>
    %33 = vector.extract_strided_slice %1 {offsets = [1, 0, 0], sizes = [1, 16, 16], strides = [1, 1, 1]} : vector<4x16x16xf32> to vector<1x16x16xf32>
    %34 = vector.shape_cast %33 : vector<1x16x16xf32> to vector<16x16xf32>
    %cst_32 = arith.constant dense<0.000000e+00> : vector<2x16xf32>
    %35 = tpu.matmul %10, %34, %cst_32 {dimension_numbers = #tpu.dot_dimension_numbers<[1], [0], [0], [1], [0, 0, 1, 1], [], []>} : vector<2x16xf32>, vector<16x16xf32>, vector<2x16xf32> -> vector<2x16xf32>
    %36 = arith.addf %32, %35 : vector<2x16xf32>
    %37 = vector.extract_strided_slice %2 {offsets = [1, 0, 0], sizes = [1, 1, 16], strides = [1, 1, 1]} : vector<4x1x16xf32> to vector<1x1x16xf32>
    %38 = vector.shape_cast %37 : vector<1x1x16xf32> to vector<1x16xf32>
    %39 = vector.broadcast %38 : vector<1x16xf32> to vector<2x16xf32>
    %40 = arith.addf %36, %39 : vector<2x16xf32>
    %41 = arith.negf %40 : vector<2x16xf32>
    %42 = math.exp %41 : vector<2x16xf32>
    %cst_33 = arith.constant 1.000000e+00 : f32
    %43 = vector.broadcast %cst_33 : f32 to vector<2x16xf32>
    %44 = arith.addf %43, %42 : vector<2x16xf32>
    %45 = arith.divf %43, %44 : vector<2x16xf32>
    %46 = vector.extract_strided_slice %0 {offsets = [2, 0, 0], sizes = [1, 32, 16], strides = [1, 1, 1]} : vector<4x32x16xf32> to vector<1x32x16xf32>
    %47 = vector.shape_cast %46 : vector<1x32x16xf32> to vector<32x16xf32>
    %cst_34 = arith.constant dense<0.000000e+00> : vector<2x16xf32>
    %48 = tpu.matmul %13, %47, %cst_34 {dimension_numbers = #tpu.dot_dimension_numbers<[1], [0], [0], [1], [0, 0, 1, 1], [], []>} : vector<2x32xf32>, vector<32x16xf32>, vector<2x16xf32> -> vector<2x16xf32>
    %49 = vector.extract_strided_slice %1 {offsets = [2, 0, 0], sizes = [1, 16, 16], strides = [1, 1, 1]} : vector<4x16x16xf32> to vector<1x16x16xf32>
    %50 = vector.shape_cast %49 : vector<1x16x16xf32> to vector<16x16xf32>
    %cst_35 = arith.constant dense<0.000000e+00> : vector<2x16xf32>
    %51 = tpu.matmul %10, %50, %cst_35 {dimension_numbers = #tpu.dot_dimension_numbers<[1], [0], [0], [1], [0, 0, 1, 1], [], []>} : vector<2x16xf32>, vector<16x16xf32>, vector<2x16xf32> -> vector<2x16xf32>
    %52 = arith.addf %48, %51 : vector<2x16xf32>
    %53 = vector.extract_strided_slice %2 {offsets = [2, 0, 0], sizes = [1, 1, 16], strides = [1, 1, 1]} : vector<4x1x16xf32> to vector<1x1x16xf32>
    %54 = vector.shape_cast %53 : vector<1x1x16xf32> to vector<1x16xf32>
    %55 = vector.broadcast %54 : vector<1x16xf32> to vector<2x16xf32>
    %56 = arith.addf %52, %55 : vector<2x16xf32>
    %57 = math.tanh %56 : vector<2x16xf32>
    %58 = vector.extract_strided_slice %0 {offsets = [3, 0, 0], sizes = [1, 32, 16], strides = [1, 1, 1]} : vector<4x32x16xf32> to vector<1x32x16xf32>
    %59 = vector.shape_cast %58 : vector<1x32x16xf32> to vector<32x16xf32>
    %cst_36 = arith.constant dense<0.000000e+00> : vector<2x16xf32>
    %60 = tpu.matmul %13, %59, %cst_36 {dimension_numbers = #tpu.dot_dimension_numbers<[1], [0], [0], [1], [0, 0, 1, 1], [], []>} : vector<2x32xf32>, vector<32x16xf32>, vector<2x16xf32> -> vector<2x16xf32>
    %61 = vector.extract_strided_slice %1 {offsets = [3, 0, 0], sizes = [1, 16, 16], strides = [1, 1, 1]} : vector<4x16x16xf32> to vector<1x16x16xf32>
    %62 = vector.shape_cast %61 : vector<1x16x16xf32> to vector<16x16xf32>
    %cst_37 = arith.constant dense<0.000000e+00> : vector<2x16xf32>
    %63 = tpu.matmul %10, %62, %cst_37 {dimension_numbers = #tpu.dot_dimension_numbers<[1], [0], [0], [1], [0, 0, 1, 1], [], []>} : vector<2x16xf32>, vector<16x16xf32>, vector<2x16xf32> -> vector<2x16xf32>
    %64 = arith.addf %60, %63 : vector<2x16xf32>
    %65 = vector.extract_strided_slice %2 {offsets = [3, 0, 0], sizes = [1, 1, 16], strides = [1, 1, 1]} : vector<4x1x16xf32> to vector<1x1x16xf32>
    %66 = vector.shape_cast %65 : vector<1x1x16xf32> to vector<1x16xf32>
    %67 = vector.broadcast %66 : vector<1x16xf32> to vector<2x16xf32>
    %68 = arith.addf %64, %67 : vector<2x16xf32>
    %69 = arith.negf %68 : vector<2x16xf32>
    %70 = math.exp %69 : vector<2x16xf32>
    %cst_38 = arith.constant 1.000000e+00 : f32
    %71 = vector.broadcast %cst_38 : f32 to vector<2x16xf32>
    %72 = arith.addf %71, %70 : vector<2x16xf32>
    %73 = arith.divf %71, %72 : vector<2x16xf32>
    %74 = arith.mulf %45, %11 : vector<2x16xf32>
    %75 = arith.mulf %29, %57 : vector<2x16xf32>
    %76 = arith.addf %74, %75 : vector<2x16xf32>
    %77 = math.tanh %76 : vector<2x16xf32>
    %78 = arith.mulf %73, %77 : vector<2x16xf32>
    %c1 = arith.constant 1 : index
    %c0_39 = arith.constant 0 : index
    %c0_40 = arith.constant 0 : index
    %79 = vector.load %arg1[%c1, %c0_39, %c0_40] : memref<4x2x32xf32, #tpu.memory_space<vmem>>, vector<1x2x32xf32>
    %80 = vector.shape_cast %79 : vector<1x2x32xf32> to vector<2x32xf32>
    %81 = vector.extract_strided_slice %0 {offsets = [0, 0, 0], sizes = [1, 32, 16], strides = [1, 1, 1]} : vector<4x32x16xf32> to vector<1x32x16xf32>
    %82 = vector.shape_cast %81 : vector<1x32x16xf32> to vector<32x16xf32>
    %cst_41 = arith.constant dense<0.000000e+00> : vector<2x16xf32>
    %83 = tpu.matmul %80, %82, %cst_41 {dimension_numbers = #tpu.dot_dimension_numbers<[1], [0], [0], [1], [0, 0, 1, 1], [], []>} : vector<2x32xf32>, vector<32x16xf32>, vector<2x16xf32> -> vector<2x16xf32>
    %84 = vector.extract_strided_slice %1 {offsets = [0, 0, 0], sizes = [1, 16, 16], strides = [1, 1, 1]} : vector<4x16x16xf32> to vector<1x16x16xf32>
    %85 = vector.shape_cast %84 : vector<1x16x16xf32> to vector<16x16xf32>
    %cst_42 = arith.constant dense<0.000000e+00> : vector<2x16xf32>
    %86 = tpu.matmul %78, %85, %cst_42 {dimension_numbers = #tpu.dot_dimension_numbers<[1], [0], [0], [1], [0, 0, 1, 1], [], []>} : vector<2x16xf32>, vector<16x16xf32>, vector<2x16xf32> -> vector<2x16xf32>
    %87 = arith.addf %83, %86 : vector<2x16xf32>
    %88 = vector.extract_strided_slice %2 {offsets = [0, 0, 0], sizes = [1, 1, 16], strides = [1, 1, 1]} : vector<4x1x16xf32> to vector<1x1x16xf32>
    %89 = vector.shape_cast %88 : vector<1x1x16xf32> to vector<1x16xf32>
    %90 = vector.broadcast %89 : vector<1x16xf32> to vector<2x16xf32>
    %91 = arith.addf %87, %90 : vector<2x16xf32>
    %92 = arith.negf %91 : vector<2x16xf32>
    %93 = math.exp %92 : vector<2x16xf32>
    %cst_43 = arith.constant 1.000000e+00 : f32
    %94 = vector.broadcast %cst_43 : f32 to vector<2x16xf32>
    %95 = arith.addf %94, %93 : vector<2x16xf32>
    %96 = arith.divf %94, %95 : vector<2x16xf32>
    %97 = vector.extract_strided_slice %0 {offsets = [1, 0, 0], sizes = [1, 32, 16], strides = [1, 1, 1]} : vector<4x32x16xf32> to vector<1x32x16xf32>
    %98 = vector.shape_cast %97 : vector<1x32x16xf32> to vector<32x16xf32>
    %cst_44 = arith.constant dense<0.000000e+00> : vector<2x16xf32>
    %99 = tpu.matmul %80, %98, %cst_44 {dimension_numbers = #tpu.dot_dimension_numbers<[1], [0], [0], [1], [0, 0, 1, 1], [], []>} : vector<2x32xf32>, vector<32x16xf32>, vector<2x16xf32> -> vector<2x16xf32>
    %100 = vector.extract_strided_slice %1 {offsets = [1, 0, 0], sizes = [1, 16, 16], strides = [1, 1, 1]} : vector<4x16x16xf32> to vector<1x16x16xf32>
    %101 = vector.shape_cast %100 : vector<1x16x16xf32> to vector<16x16xf32>
    %cst_45 = arith.constant dense<0.000000e+00> : vector<2x16xf32>
    %102 = tpu.matmul %78, %101, %cst_45 {dimension_numbers = #tpu.dot_dimension_numbers<[1], [0], [0], [1], [0, 0, 1, 1], [], []>} : vector<2x16xf32>, vector<16x16xf32>, vector<2x16xf32> -> vector<2x16xf32>
    %103 = arith.addf %99, %102 : vector<2x16xf32>
    %104 = vector.extract_strided_slice %2 {offsets = [1, 0, 0], sizes = [1, 1, 16], strides = [1, 1, 1]} : vector<4x1x16xf32> to vector<1x1x16xf32>
    %105 = vector.shape_cast %104 : vector<1x1x16xf32> to vector<1x16xf32>
    %106 = vector.broadcast %105 : vector<1x16xf32> to vector<2x16xf32>
    %107 = arith.addf %103, %106 : vector<2x16xf32>
    %108 = arith.negf %107 : vector<2x16xf32>
    %109 = math.exp %108 : vector<2x16xf32>
    %cst_46 = arith.constant 1.000000e+00 : f32
    %110 = vector.broadcast %cst_46 : f32 to vector<2x16xf32>
    %111 = arith.addf %110, %109 : vector<2x16xf32>
    %112 = arith.divf %110, %111 : vector<2x16xf32>
    %113 = vector.extract_strided_slice %0 {offsets = [2, 0, 0], sizes = [1, 32, 16], strides = [1, 1, 1]} : vector<4x32x16xf32> to vector<1x32x16xf32>
    %114 = vector.shape_cast %113 : vector<1x32x16xf32> to vector<32x16xf32>
    %cst_47 = arith.constant dense<0.000000e+00> : vector<2x16xf32>
    %115 = tpu.matmul %80, %114, %cst_47 {dimension_numbers = #tpu.dot_dimension_numbers<[1], [0], [0], [1], [0, 0, 1, 1], [], []>} : vector<2x32xf32>, vector<32x16xf32>, vector<2x16xf32> -> vector<2x16xf32>
    %116 = vector.extract_strided_slice %1 {offsets = [2, 0, 0], sizes = [1, 16, 16], strides = [1, 1, 1]} : vector<4x16x16xf32> to vector<1x16x16xf32>
    %117 = vector.shape_cast %116 : vector<1x16x16xf32> to vector<16x16xf32>
    %cst_48 = arith.constant dense<0.000000e+00> : vector<2x16xf32>
    %118 = tpu.matmul %78, %117, %cst_48 {dimension_numbers = #tpu.dot_dimension_numbers<[1], [0], [0], [1], [0, 0, 1, 1], [], []>} : vector<2x16xf32>, vector<16x16xf32>, vector<2x16xf32> -> vector<2x16xf32>
    %119 = arith.addf %115, %118 : vector<2x16xf32>
    %120 = vector.extract_strided_slice %2 {offsets = [2, 0, 0], sizes = [1, 1, 16], strides = [1, 1, 1]} : vector<4x1x16xf32> to vector<1x1x16xf32>
    %121 = vector.shape_cast %120 : vector<1x1x16xf32> to vector<1x16xf32>
    %122 = vector.broadcast %121 : vector<1x16xf32> to vector<2x16xf32>
    %123 = arith.addf %119, %122 : vector<2x16xf32>
    %124 = math.tanh %123 : vector<2x16xf32>
    %125 = vector.extract_strided_slice %0 {offsets = [3, 0, 0], sizes = [1, 32, 16], strides = [1, 1, 1]} : vector<4x32x16xf32> to vector<1x32x16xf32>
    %126 = vector.shape_cast %125 : vector<1x32x16xf32> to vector<32x16xf32>
    %cst_49 = arith.constant dense<0.000000e+00> : vector<2x16xf32>
    %127 = tpu.matmul %80, %126, %cst_49 {dimension_numbers = #tpu.dot_dimension_numbers<[1], [0], [0], [1], [0, 0, 1, 1], [], []>} : vector<2x32xf32>, vector<32x16xf32>, vector<2x16xf32> -> vector<2x16xf32>
    %128 = vector.extract_strided_slice %1 {offsets = [3, 0, 0], sizes = [1, 16, 16], strides = [1, 1, 1]} : vector<4x16x16xf32> to vector<1x16x16xf32>
    %129 = vector.shape_cast %128 : vector<1x16x16xf32> to vector<16x16xf32>
    %cst_50 = arith.constant dense<0.000000e+00> : vector<2x16xf32>
    %130 = tpu.matmul %78, %129, %cst_50 {dimension_numbers = #tpu.dot_dimension_numbers<[1], [0], [0], [1], [0, 0, 1, 1], [], []>} : vector<2x16xf32>, vector<16x16xf32>, vector<2x16xf32> -> vector<2x16xf32>
    %131 = arith.addf %127, %130 : vector<2x16xf32>
    %132 = vector.extract_strided_slice %2 {offsets = [3, 0, 0], sizes = [1, 1, 16], strides = [1, 1, 1]} : vector<4x1x16xf32> to vector<1x1x16xf32>
    %133 = vector.shape_cast %132 : vector<1x1x16xf32> to vector<1x16xf32>
    %134 = vector.broadcast %133 : vector<1x16xf32> to vector<2x16xf32>
    %135 = arith.addf %131, %134 : vector<2x16xf32>
    %136 = arith.negf %135 : vector<2x16xf32>
    %137 = math.exp %136 : vector<2x16xf32>
    %cst_51 = arith.constant 1.000000e+00 : f32
    %138 = vector.broadcast %cst_51 : f32 to vector<2x16xf32>
    %139 = arith.addf %138, %137 : vector<2x16xf32>
    %140 = arith.divf %138, %139 : vector<2x16xf32>
    %141 = arith.mulf %112, %76 : vector<2x16xf32>
    %142 = arith.mulf %96, %124 : vector<2x16xf32>
    %143 = arith.addf %141, %142 : vector<2x16xf32>
    %144 = math.tanh %143 : vector<2x16xf32>
    %145 = arith.mulf %140, %144 : vector<2x16xf32>
    %c2 = arith.constant 2 : index
    %c0_52 = arith.constant 0 : index
    %c0_53 = arith.constant 0 : index
    %146 = vector.load %arg1[%c2, %c0_52, %c0_53] : memref<4x2x32xf32, #tpu.memory_space<vmem>>, vector<1x2x32xf32>
    %147 = vector.shape_cast %146 : vector<1x2x32xf32> to vector<2x32xf32>
    %148 = vector.extract_strided_slice %0 {offsets = [0, 0, 0], sizes = [1, 32, 16], strides = [1, 1, 1]} : vector<4x32x16xf32> to vector<1x32x16xf32>
    %149 = vector.shape_cast %148 : vector<1x32x16xf32> to vector<32x16xf32>
    %cst_54 = arith.constant dense<0.000000e+00> : vector<2x16xf32>
    %150 = tpu.matmul %147, %149, %cst_54 {dimension_numbers = #tpu.dot_dimension_numbers<[1], [0], [0], [1], [0, 0, 1, 1], [], []>} : vector<2x32xf32>, vector<32x16xf32>, vector<2x16xf32> -> vector<2x16xf32>
    %151 = vector.extract_strided_slice %1 {offsets = [0, 0, 0], sizes = [1, 16, 16], strides = [1, 1, 1]} : vector<4x16x16xf32> to vector<1x16x16xf32>
    %152 = vector.shape_cast %151 : vector<1x16x16xf32> to vector<16x16xf32>
    %cst_55 = arith.constant dense<0.000000e+00> : vector<2x16xf32>
    %153 = tpu.matmul %145, %152, %cst_55 {dimension_numbers = #tpu.dot_dimension_numbers<[1], [0], [0], [1], [0, 0, 1, 1], [], []>} : vector<2x16xf32>, vector<16x16xf32>, vector<2x16xf32> -> vector<2x16xf32>
    %154 = arith.addf %150, %153 : vector<2x16xf32>
    %155 = vector.extract_strided_slice %2 {offsets = [0, 0, 0], sizes = [1, 1, 16], strides = [1, 1, 1]} : vector<4x1x16xf32> to vector<1x1x16xf32>
    %156 = vector.shape_cast %155 : vector<1x1x16xf32> to vector<1x16xf32>
    %157 = vector.broadcast %156 : vector<1x16xf32> to vector<2x16xf32>
    %158 = arith.addf %154, %157 : vector<2x16xf32>
    %159 = arith.negf %158 : vector<2x16xf32>
    %160 = math.exp %159 : vector<2x16xf32>
    %cst_56 = arith.constant 1.000000e+00 : f32
    %161 = vector.broadcast %cst_56 : f32 to vector<2x16xf32>
    %162 = arith.addf %161, %160 : vector<2x16xf32>
    %163 = arith.divf %161, %162 : vector<2x16xf32>
    %164 = vector.extract_strided_slice %0 {offsets = [1, 0, 0], sizes = [1, 32, 16], strides = [1, 1, 1]} : vector<4x32x16xf32> to vector<1x32x16xf32>
    %165 = vector.shape_cast %164 : vector<1x32x16xf32> to vector<32x16xf32>
    %cst_57 = arith.constant dense<0.000000e+00> : vector<2x16xf32>
    %166 = tpu.matmul %147, %165, %cst_57 {dimension_numbers = #tpu.dot_dimension_numbers<[1], [0], [0], [1], [0, 0, 1, 1], [], []>} : vector<2x32xf32>, vector<32x16xf32>, vector<2x16xf32> -> vector<2x16xf32>
    %167 = vector.extract_strided_slice %1 {offsets = [1, 0, 0], sizes = [1, 16, 16], strides = [1, 1, 1]} : vector<4x16x16xf32> to vector<1x16x16xf32>
    %168 = vector.shape_cast %167 : vector<1x16x16xf32> to vector<16x16xf32>
    %cst_58 = arith.constant dense<0.000000e+00> : vector<2x16xf32>
    %169 = tpu.matmul %145, %168, %cst_58 {dimension_numbers = #tpu.dot_dimension_numbers<[1], [0], [0], [1], [0, 0, 1, 1], [], []>} : vector<2x16xf32>, vector<16x16xf32>, vector<2x16xf32> -> vector<2x16xf32>
    %170 = arith.addf %166, %169 : vector<2x16xf32>
    %171 = vector.extract_strided_slice %2 {offsets = [1, 0, 0], sizes = [1, 1, 16], strides = [1, 1, 1]} : vector<4x1x16xf32> to vector<1x1x16xf32>
    %172 = vector.shape_cast %171 : vector<1x1x16xf32> to vector<1x16xf32>
    %173 = vector.broadcast %172 : vector<1x16xf32> to vector<2x16xf32>
    %174 = arith.addf %170, %173 : vector<2x16xf32>
    %175 = arith.negf %174 : vector<2x16xf32>
    %176 = math.exp %175 : vector<2x16xf32>
    %cst_59 = arith.constant 1.000000e+00 : f32
    %177 = vector.broadcast %cst_59 : f32 to vector<2x16xf32>
    %178 = arith.addf %177, %176 : vector<2x16xf32>
    %179 = arith.divf %177, %178 : vector<2x16xf32>
    %180 = vector.extract_strided_slice %0 {offsets = [2, 0, 0], sizes = [1, 32, 16], strides = [1, 1, 1]} : vector<4x32x16xf32> to vector<1x32x16xf32>
    %181 = vector.shape_cast %180 : vector<1x32x16xf32> to vector<32x16xf32>
    %cst_60 = arith.constant dense<0.000000e+00> : vector<2x16xf32>
    %182 = tpu.matmul %147, %181, %cst_60 {dimension_numbers = #tpu.dot_dimension_numbers<[1], [0], [0], [1], [0, 0, 1, 1], [], []>} : vector<2x32xf32>, vector<32x16xf32>, vector<2x16xf32> -> vector<2x16xf32>
    %183 = vector.extract_strided_slice %1 {offsets = [2, 0, 0], sizes = [1, 16, 16], strides = [1, 1, 1]} : vector<4x16x16xf32> to vector<1x16x16xf32>
    %184 = vector.shape_cast %183 : vector<1x16x16xf32> to vector<16x16xf32>
    %cst_61 = arith.constant dense<0.000000e+00> : vector<2x16xf32>
    %185 = tpu.matmul %145, %184, %cst_61 {dimension_numbers = #tpu.dot_dimension_numbers<[1], [0], [0], [1], [0, 0, 1, 1], [], []>} : vector<2x16xf32>, vector<16x16xf32>, vector<2x16xf32> -> vector<2x16xf32>
    %186 = arith.addf %182, %185 : vector<2x16xf32>
    %187 = vector.extract_strided_slice %2 {offsets = [2, 0, 0], sizes = [1, 1, 16], strides = [1, 1, 1]} : vector<4x1x16xf32> to vector<1x1x16xf32>
    %188 = vector.shape_cast %187 : vector<1x1x16xf32> to vector<1x16xf32>
    %189 = vector.broadcast %188 : vector<1x16xf32> to vector<2x16xf32>
    %190 = arith.addf %186, %189 : vector<2x16xf32>
    %191 = math.tanh %190 : vector<2x16xf32>
    %192 = vector.extract_strided_slice %0 {offsets = [3, 0, 0], sizes = [1, 32, 16], strides = [1, 1, 1]} : vector<4x32x16xf32> to vector<1x32x16xf32>
    %193 = vector.shape_cast %192 : vector<1x32x16xf32> to vector<32x16xf32>
    %cst_62 = arith.constant dense<0.000000e+00> : vector<2x16xf32>
    %194 = tpu.matmul %147, %193, %cst_62 {dimension_numbers = #tpu.dot_dimension_numbers<[1], [0], [0], [1], [0, 0, 1, 1], [], []>} : vector<2x32xf32>, vector<32x16xf32>, vector<2x16xf32> -> vector<2x16xf32>
    %195 = vector.extract_strided_slice %1 {offsets = [3, 0, 0], sizes = [1, 16, 16], strides = [1, 1, 1]} : vector<4x16x16xf32> to vector<1x16x16xf32>
    %196 = vector.shape_cast %195 : vector<1x16x16xf32> to vector<16x16xf32>
    %cst_63 = arith.constant dense<0.000000e+00> : vector<2x16xf32>
    %197 = tpu.matmul %145, %196, %cst_63 {dimension_numbers = #tpu.dot_dimension_numbers<[1], [0], [0], [1], [0, 0, 1, 1], [], []>} : vector<2x16xf32>, vector<16x16xf32>, vector<2x16xf32> -> vector<2x16xf32>
    %198 = arith.addf %194, %197 : vector<2x16xf32>
    %199 = vector.extract_strided_slice %2 {offsets = [3, 0, 0], sizes = [1, 1, 16], strides = [1, 1, 1]} : vector<4x1x16xf32> to vector<1x1x16xf32>
    %200 = vector.shape_cast %199 : vector<1x1x16xf32> to vector<1x16xf32>
    %201 = vector.broadcast %200 : vector<1x16xf32> to vector<2x16xf32>
    %202 = arith.addf %198, %201 : vector<2x16xf32>
    %203 = arith.negf %202 : vector<2x16xf32>
    %204 = math.exp %203 : vector<2x16xf32>
    %cst_64 = arith.constant 1.000000e+00 : f32
    %205 = vector.broadcast %cst_64 : f32 to vector<2x16xf32>
    %206 = arith.addf %205, %204 : vector<2x16xf32>
    %207 = arith.divf %205, %206 : vector<2x16xf32>
    %208 = arith.mulf %179, %143 : vector<2x16xf32>
    %209 = arith.mulf %163, %191 : vector<2x16xf32>
    %210 = arith.addf %208, %209 : vector<2x16xf32>
    %211 = math.tanh %210 : vector<2x16xf32>
    %212 = arith.mulf %207, %211 : vector<2x16xf32>
    %c3 = arith.constant 3 : index
    %c0_65 = arith.constant 0 : index
    %c0_66 = arith.constant 0 : index
    %213 = vector.load %arg1[%c3, %c0_65, %c0_66] : memref<4x2x32xf32, #tpu.memory_space<vmem>>, vector<1x2x32xf32>
    %214 = vector.shape_cast %213 : vector<1x2x32xf32> to vector<2x32xf32>
    %215 = vector.extract_strided_slice %0 {offsets = [0, 0, 0], sizes = [1, 32, 16], strides = [1, 1, 1]} : vector<4x32x16xf32> to vector<1x32x16xf32>
    %216 = vector.shape_cast %215 : vector<1x32x16xf32> to vector<32x16xf32>
    %cst_67 = arith.constant dense<0.000000e+00> : vector<2x16xf32>
    %217 = tpu.matmul %214, %216, %cst_67 {dimension_numbers = #tpu.dot_dimension_numbers<[1], [0], [0], [1], [0, 0, 1, 1], [], []>} : vector<2x32xf32>, vector<32x16xf32>, vector<2x16xf32> -> vector<2x16xf32>
    %218 = vector.extract_strided_slice %1 {offsets = [0, 0, 0], sizes = [1, 16, 16], strides = [1, 1, 1]} : vector<4x16x16xf32> to vector<1x16x16xf32>
    %219 = vector.shape_cast %218 : vector<1x16x16xf32> to vector<16x16xf32>
    %cst_68 = arith.constant dense<0.000000e+00> : vector<2x16xf32>
    %220 = tpu.matmul %212, %219, %cst_68 {dimension_numbers = #tpu.dot_dimension_numbers<[1], [0], [0], [1], [0, 0, 1, 1], [], []>} : vector<2x16xf32>, vector<16x16xf32>, vector<2x16xf32> -> vector<2x16xf32>
    %221 = arith.addf %217, %220 : vector<2x16xf32>
    %222 = vector.extract_strided_slice %2 {offsets = [0, 0, 0], sizes = [1, 1, 16], strides = [1, 1, 1]} : vector<4x1x16xf32> to vector<1x1x16xf32>
    %223 = vector.shape_cast %222 : vector<1x1x16xf32> to vector<1x16xf32>
    %224 = vector.broadcast %223 : vector<1x16xf32> to vector<2x16xf32>
    %225 = arith.addf %221, %224 : vector<2x16xf32>
    %226 = arith.negf %225 : vector<2x16xf32>
    %227 = math.exp %226 : vector<2x16xf32>
    %cst_69 = arith.constant 1.000000e+00 : f32
    %228 = vector.broadcast %cst_69 : f32 to vector<2x16xf32>
    %229 = arith.addf %228, %227 : vector<2x16xf32>
    %230 = arith.divf %228, %229 : vector<2x16xf32>
    %231 = vector.extract_strided_slice %0 {offsets = [1, 0, 0], sizes = [1, 32, 16], strides = [1, 1, 1]} : vector<4x32x16xf32> to vector<1x32x16xf32>
    %232 = vector.shape_cast %231 : vector<1x32x16xf32> to vector<32x16xf32>
    %cst_70 = arith.constant dense<0.000000e+00> : vector<2x16xf32>
    %233 = tpu.matmul %214, %232, %cst_70 {dimension_numbers = #tpu.dot_dimension_numbers<[1], [0], [0], [1], [0, 0, 1, 1], [], []>} : vector<2x32xf32>, vector<32x16xf32>, vector<2x16xf32> -> vector<2x16xf32>
    %234 = vector.extract_strided_slice %1 {offsets = [1, 0, 0], sizes = [1, 16, 16], strides = [1, 1, 1]} : vector<4x16x16xf32> to vector<1x16x16xf32>
    %235 = vector.shape_cast %234 : vector<1x16x16xf32> to vector<16x16xf32>
    %cst_71 = arith.constant dense<0.000000e+00> : vector<2x16xf32>
    %236 = tpu.matmul %212, %235, %cst_71 {dimension_numbers = #tpu.dot_dimension_numbers<[1], [0], [0], [1], [0, 0, 1, 1], [], []>} : vector<2x16xf32>, vector<16x16xf32>, vector<2x16xf32> -> vector<2x16xf32>
    %237 = arith.addf %233, %236 : vector<2x16xf32>
    %238 = vector.extract_strided_slice %2 {offsets = [1, 0, 0], sizes = [1, 1, 16], strides = [1, 1, 1]} : vector<4x1x16xf32> to vector<1x1x16xf32>
    %239 = vector.shape_cast %238 : vector<1x1x16xf32> to vector<1x16xf32>
    %240 = vector.broadcast %239 : vector<1x16xf32> to vector<2x16xf32>
    %241 = arith.addf %237, %240 : vector<2x16xf32>
    %242 = arith.negf %241 : vector<2x16xf32>
    %243 = math.exp %242 : vector<2x16xf32>
    %cst_72 = arith.constant 1.000000e+00 : f32
    %244 = vector.broadcast %cst_72 : f32 to vector<2x16xf32>
    %245 = arith.addf %244, %243 : vector<2x16xf32>
    %246 = arith.divf %244, %245 : vector<2x16xf32>
    %247 = vector.extract_strided_slice %0 {offsets = [2, 0, 0], sizes = [1, 32, 16], strides = [1, 1, 1]} : vector<4x32x16xf32> to vector<1x32x16xf32>
    %248 = vector.shape_cast %247 : vector<1x32x16xf32> to vector<32x16xf32>
    %cst_73 = arith.constant dense<0.000000e+00> : vector<2x16xf32>
    %249 = tpu.matmul %214, %248, %cst_73 {dimension_numbers = #tpu.dot_dimension_numbers<[1], [0], [0], [1], [0, 0, 1, 1], [], []>} : vector<2x32xf32>, vector<32x16xf32>, vector<2x16xf32> -> vector<2x16xf32>
    %250 = vector.extract_strided_slice %1 {offsets = [2, 0, 0], sizes = [1, 16, 16], strides = [1, 1, 1]} : vector<4x16x16xf32> to vector<1x16x16xf32>
    %251 = vector.shape_cast %250 : vector<1x16x16xf32> to vector<16x16xf32>
    %cst_74 = arith.constant dense<0.000000e+00> : vector<2x16xf32>
    %252 = tpu.matmul %212, %251, %cst_74 {dimension_numbers = #tpu.dot_dimension_numbers<[1], [0], [0], [1], [0, 0, 1, 1], [], []>} : vector<2x16xf32>, vector<16x16xf32>, vector<2x16xf32> -> vector<2x16xf32>
    %253 = arith.addf %249, %252 : vector<2x16xf32>
    %254 = vector.extract_strided_slice %2 {offsets = [2, 0, 0], sizes = [1, 1, 16], strides = [1, 1, 1]} : vector<4x1x16xf32> to vector<1x1x16xf32>
    %255 = vector.shape_cast %254 : vector<1x1x16xf32> to vector<1x16xf32>
    %256 = vector.broadcast %255 : vector<1x16xf32> to vector<2x16xf32>
    %257 = arith.addf %253, %256 : vector<2x16xf32>
    %258 = math.tanh %257 : vector<2x16xf32>
    %259 = vector.extract_strided_slice %0 {offsets = [3, 0, 0], sizes = [1, 32, 16], strides = [1, 1, 1]} : vector<4x32x16xf32> to vector<1x32x16xf32>
    %260 = vector.shape_cast %259 : vector<1x32x16xf32> to vector<32x16xf32>
    %cst_75 = arith.constant dense<0.000000e+00> : vector<2x16xf32>
    %261 = tpu.matmul %214, %260, %cst_75 {dimension_numbers = #tpu.dot_dimension_numbers<[1], [0], [0], [1], [0, 0, 1, 1], [], []>} : vector<2x32xf32>, vector<32x16xf32>, vector<2x16xf32> -> vector<2x16xf32>
    %262 = vector.extract_strided_slice %1 {offsets = [3, 0, 0], sizes = [1, 16, 16], strides = [1, 1, 1]} : vector<4x16x16xf32> to vector<1x16x16xf32>
    %263 = vector.shape_cast %262 : vector<1x16x16xf32> to vector<16x16xf32>
    %cst_76 = arith.constant dense<0.000000e+00> : vector<2x16xf32>
    %264 = tpu.matmul %212, %263, %cst_76 {dimension_numbers = #tpu.dot_dimension_numbers<[1], [0], [0], [1], [0, 0, 1, 1], [], []>} : vector<2x16xf32>, vector<16x16xf32>, vector<2x16xf32> -> vector<2x16xf32>
    %265 = arith.addf %261, %264 : vector<2x16xf32>
    %266 = vector.extract_strided_slice %2 {offsets = [3, 0, 0], sizes = [1, 1, 16], strides = [1, 1, 1]} : vector<4x1x16xf32> to vector<1x1x16xf32>
    %267 = vector.shape_cast %266 : vector<1x1x16xf32> to vector<1x16xf32>
    %268 = vector.broadcast %267 : vector<1x16xf32> to vector<2x16xf32>
    %269 = arith.addf %265, %268 : vector<2x16xf32>
    %270 = arith.negf %269 : vector<2x16xf32>
    %271 = math.exp %270 : vector<2x16xf32>
    %cst_77 = arith.constant 1.000000e+00 : f32
    %272 = vector.broadcast %cst_77 : f32 to vector<2x16xf32>
    %273 = arith.addf %272, %271 : vector<2x16xf32>
    %274 = arith.divf %272, %273 : vector<2x16xf32>
    %275 = arith.mulf %246, %210 : vector<2x16xf32>
    %276 = arith.mulf %230, %258 : vector<2x16xf32>
    %277 = arith.addf %275, %276 : vector<2x16xf32>
    %278 = math.tanh %277 : vector<2x16xf32>
    %279 = arith.mulf %274, %278 : vector<2x16xf32>
    %c0_78 = arith.constant 0 : index
    %c0_79 = arith.constant 0 : index
    %c0_80 = arith.constant 0 : index
    %280 = vector.load %arg0[%c0_78, %c0_79, %c0_80] : memref<2x5x32xf32, #tpu.memory_space<vmem>>, vector<1x5x32xf32>
    %281 = vector.shape_cast %280 : vector<1x5x32xf32> to vector<5x32xf32>
    %cst_81 = arith.constant dense<0.000000e+00> : vector<5x16xf32>
    %282 = tpu.matmul %281, %3, %cst_81 {dimension_numbers = #tpu.dot_dimension_numbers<[1], [0], [0], [1], [0, 0, 1, 1], [], []>} : vector<5x32xf32>, vector<32x16xf32>, vector<5x16xf32> -> vector<5x16xf32>
    %cst_82 = arith.constant dense<0.000000e+00> : vector<5x16xf32>
    %283 = tpu.matmul %281, %6, %cst_82 {dimension_numbers = #tpu.dot_dimension_numbers<[1], [0], [0], [1], [0, 0, 1, 1], [], []>} : vector<5x32xf32>, vector<32x16xf32>, vector<5x16xf32> -> vector<5x16xf32>
    %284 = vector.extract_strided_slice %78 {offsets = [0, 0], sizes = [1, 16], strides = [1, 1]} : vector<2x16xf32> to vector<1x16xf32>
    %285 = vector.extract_strided_slice %145 {offsets = [0, 0], sizes = [1, 16], strides = [1, 1]} : vector<2x16xf32> to vector<1x16xf32>
    %286 = vector.extract_strided_slice %212 {offsets = [0, 0], sizes = [1, 16], strides = [1, 1]} : vector<2x16xf32> to vector<1x16xf32>
    %287 = vector.extract_strided_slice %279 {offsets = [0, 0], sizes = [1, 16], strides = [1, 1]} : vector<2x16xf32> to vector<1x16xf32>
    %288 = tpu.concatenate %284, %285, %286, %287 in 0 : vector<1x16xf32>, vector<1x16xf32>, vector<1x16xf32>, vector<1x16xf32> -> vector<4x16xf32>
    %289 = vector.extract_strided_slice %9 {offsets = [0, 0], sizes = [1, 5], strides = [1, 1]} : vector<2x5xf32> to vector<1x5xf32>
    %cst_83 = arith.constant dense<0.000000e+00> : vector<4x16xf32>
    %290 = tpu.matmul %288, %7, %cst_83 {dimension_numbers = #tpu.dot_dimension_numbers<[1], [0], [0], [1], [0, 0, 1, 1], [], []>} : vector<4x16xf32>, vector<16x16xf32>, vector<4x16xf32> -> vector<4x16xf32>
    %291 = vector.shape_cast %283 : vector<5x16xf32> to vector<1x5x16xf32>
    %292 = vector.shape_cast %290 : vector<4x16xf32> to vector<4x1x16xf32>
    %293 = vector.broadcast %291 : vector<1x5x16xf32> to vector<4x5x16xf32>
    %294 = vector.broadcast %292 : vector<4x1x16xf32> to vector<4x5x16xf32>
    %295 = arith.addf %293, %294 : vector<4x5x16xf32>
    %296 = math.tanh %295 : vector<4x5x16xf32>
    %297 = vector.shape_cast %8 : vector<1x16xf32> to vector<1x1x16xf32>
    %298 = vector.broadcast %297 : vector<1x1x16xf32> to vector<4x5x16xf32>
    %299 = arith.mulf %296, %298 : vector<4x5x16xf32>
    %cst_84 = arith.constant dense<0.000000e+00> : vector<4x5xf32>
    %300 = vector.multi_reduction <add>, %299, %cst_84 [2] : vector<4x5x16xf32> to vector<4x5xf32>
    %cst_85 = arith.constant 5.000000e-01 : f32
    %301 = vector.broadcast %cst_85 : f32 to vector<1x5xf32>
    %302 = arith.cmpf ogt, %289, %301 : vector<1x5xf32>
    %cst_86 = arith.constant -9.99999984E+17 : f32
    %303 = vector.shape_cast %302 : vector<1x5xi1> to vector<1x5xi1>
    %304 = vector.broadcast %303 : vector<1x5xi1> to vector<4x5xi1>
    %305 = vector.broadcast %cst_86 : f32 to vector<4x5xf32>
    %306 = arith.select %304, %300, %305 : vector<4x5xi1>, vector<4x5xf32>
    %cst_87 = arith.constant dense<0xFF800000> : vector<4xf32>
    %307 = vector.multi_reduction <maximumf>, %306, %cst_87 [1] : vector<4x5xf32> to vector<4xf32>
    %308 = vector.shape_cast %307 : vector<4xf32> to vector<4x1xf32>
    %309 = vector.broadcast %308 : vector<4x1xf32> to vector<4x5xf32>
    %310 = arith.subf %306, %309 : vector<4x5xf32>
    %311 = math.exp %310 : vector<4x5xf32>
    %cst_88 = arith.constant dense<0.000000e+00> : vector<4xf32>
    %312 = vector.multi_reduction <add>, %311, %cst_88 [1] : vector<4x5xf32> to vector<4xf32>
    %313 = vector.shape_cast %312 : vector<4xf32> to vector<4x1xf32>
    %314 = vector.broadcast %313 : vector<4x1xf32> to vector<4x5xf32>
    %315 = arith.divf %311, %314 : vector<4x5xf32>
    %cst_89 = arith.constant dense<0.000000e+00> : vector<4x16xf32>
    %316 = tpu.matmul %315, %283, %cst_89 {dimension_numbers = #tpu.dot_dimension_numbers<[1], [0], [0], [1], [0, 0, 1, 1], [], []>} : vector<4x5xf32>, vector<5x16xf32>, vector<4x16xf32> -> vector<4x16xf32>
    %cst_90 = arith.constant dense<0.000000e+00> : vector<4x16xf32>
    %317 = tpu.matmul %316, %4, %cst_90 {dimension_numbers = #tpu.dot_dimension_numbers<[1], [0], [0], [1], [0, 0, 1, 1], [], []>} : vector<4x16xf32>, vector<16x16xf32>, vector<4x16xf32> -> vector<4x16xf32>
    %318 = vector.shape_cast %282 : vector<5x16xf32> to vector<1x5x16xf32>
    %319 = vector.shape_cast %317 : vector<4x16xf32> to vector<4x1x16xf32>
    %320 = vector.broadcast %318 : vector<1x5x16xf32> to vector<4x5x16xf32>
    %321 = vector.broadcast %319 : vector<4x1x16xf32> to vector<4x5x16xf32>
    %322 = arith.addf %320, %321 : vector<4x5x16xf32>
    %323 = math.tanh %322 : vector<4x5x16xf32>
    %324 = vector.shape_cast %5 : vector<1x16xf32> to vector<1x1x16xf32>
    %325 = vector.broadcast %324 : vector<1x1x16xf32> to vector<4x5x16xf32>
    %326 = arith.mulf %323, %325 : vector<4x5x16xf32>
    %cst_91 = arith.constant dense<0.000000e+00> : vector<4x5xf32>
    %327 = vector.multi_reduction <add>, %326, %cst_91 [2] : vector<4x5x16xf32> to vector<4x5xf32>
    %c0_92 = arith.constant 0 : index
    %c0_93 = arith.constant 0 : index
    %c0_94 = arith.constant 0 : index
    %328 = vector.load %arg14[%c0_92, %c0_93, %c0_94] : memref<2x4x5xf32, #tpu.memory_space<vmem>>, vector<1x4x5xf32>
    %329 = vector.shape_cast %328 : vector<1x4x5xf32> to vector<4x5xf32>
    %330 = vector.shape_cast %327 : vector<4x5xf32> to vector<1x4x5xf32>
    tpu.vector_store %arg14[%c0_92, %c0_93, %c0_94], %330 {strides = array<i32>} : memref<2x4x5xf32, #tpu.memory_space<vmem>>, vector<1x4x5xf32>,
    %c1_95 = arith.constant 1 : index
    %c0_96 = arith.constant 0 : index
    %c0_97 = arith.constant 0 : index
    %331 = vector.load %arg0[%c1_95, %c0_96, %c0_97] : memref<2x5x32xf32, #tpu.memory_space<vmem>>, vector<1x5x32xf32>
    %332 = vector.shape_cast %331 : vector<1x5x32xf32> to vector<5x32xf32>
    %cst_98 = arith.constant dense<0.000000e+00> : vector<5x16xf32>
    %333 = tpu.matmul %332, %3, %cst_98 {dimension_numbers = #tpu.dot_dimension_numbers<[1], [0], [0], [1], [0, 0, 1, 1], [], []>} : vector<5x32xf32>, vector<32x16xf32>, vector<5x16xf32> -> vector<5x16xf32>
    %cst_99 = arith.constant dense<0.000000e+00> : vector<5x16xf32>
    %334 = tpu.matmul %332, %6, %cst_99 {dimension_numbers = #tpu.dot_dimension_numbers<[1], [0], [0], [1], [0, 0, 1, 1], [], []>} : vector<5x32xf32>, vector<32x16xf32>, vector<5x16xf32> -> vector<5x16xf32>
    %335 = vector.extract_strided_slice %78 {offsets = [1, 0], sizes = [1, 16], strides = [1, 1]} : vector<2x16xf32> to vector<1x16xf32>
    %336 = vector.extract_strided_slice %145 {offsets = [1, 0], sizes = [1, 16], strides = [1, 1]} : vector<2x16xf32> to vector<1x16xf32>
    %337 = vector.extract_strided_slice %212 {offsets = [1, 0], sizes = [1, 16], strides = [1, 1]} : vector<2x16xf32> to vector<1x16xf32>
    %338 = vector.extract_strided_slice %279 {offsets = [1, 0], sizes = [1, 16], strides = [1, 1]} : vector<2x16xf32> to vector<1x16xf32>
    %339 = tpu.concatenate %335, %336, %337, %338 in 0 : vector<1x16xf32>, vector<1x16xf32>, vector<1x16xf32>, vector<1x16xf32> -> vector<4x16xf32>
    %340 = vector.extract_strided_slice %9 {offsets = [1, 0], sizes = [1, 5], strides = [1, 1]} : vector<2x5xf32> to vector<1x5xf32>
    %cst_100 = arith.constant dense<0.000000e+00> : vector<4x16xf32>
    %341 = tpu.matmul %339, %7, %cst_100 {dimension_numbers = #tpu.dot_dimension_numbers<[1], [0], [0], [1], [0, 0, 1, 1], [], []>} : vector<4x16xf32>, vector<16x16xf32>, vector<4x16xf32> -> vector<4x16xf32>
    %342 = vector.shape_cast %334 : vector<5x16xf32> to vector<1x5x16xf32>
    %343 = vector.shape_cast %341 : vector<4x16xf32> to vector<4x1x16xf32>
    %344 = vector.broadcast %342 : vector<1x5x16xf32> to vector<4x5x16xf32>
    %345 = vector.broadcast %343 : vector<4x1x16xf32> to vector<4x5x16xf32>
    %346 = arith.addf %344, %345 : vector<4x5x16xf32>
    %347 = math.tanh %346 : vector<4x5x16xf32>
    %348 = vector.shape_cast %8 : vector<1x16xf32> to vector<1x1x16xf32>
    %349 = vector.broadcast %348 : vector<1x1x16xf32> to vector<4x5x16xf32>
    %350 = arith.mulf %347, %349 : vector<4x5x16xf32>
    %cst_101 = arith.constant dense<0.000000e+00> : vector<4x5xf32>
    %351 = vector.multi_reduction <add>, %350, %cst_101 [2] : vector<4x5x16xf32> to vector<4x5xf32>
    %cst_102 = arith.constant 5.000000e-01 : f32
    %352 = vector.broadcast %cst_102 : f32 to vector<1x5xf32>
    %353 = arith.cmpf ogt, %340, %352 : vector<1x5xf32>
    %cst_103 = arith.constant -9.99999984E+17 : f32
    %354 = vector.shape_cast %353 : vector<1x5xi1> to vector<1x5xi1>
    %355 = vector.broadcast %354 : vector<1x5xi1> to vector<4x5xi1>
    %356 = vector.broadcast %cst_103 : f32 to vector<4x5xf32>
    %357 = arith.select %355, %351, %356 : vector<4x5xi1>, vector<4x5xf32>
    %cst_104 = arith.constant dense<0xFF800000> : vector<4xf32>
    %358 = vector.multi_reduction <maximumf>, %357, %cst_104 [1] : vector<4x5xf32> to vector<4xf32>
    %359 = vector.shape_cast %358 : vector<4xf32> to vector<4x1xf32>
    %360 = vector.broadcast %359 : vector<4x1xf32> to vector<4x5xf32>
    %361 = arith.subf %357, %360 : vector<4x5xf32>
    %362 = math.exp %361 : vector<4x5xf32>
    %cst_105 = arith.constant dense<0.000000e+00> : vector<4xf32>
    %363 = vector.multi_reduction <add>, %362, %cst_105 [1] : vector<4x5xf32> to vector<4xf32>
    %364 = vector.shape_cast %363 : vector<4xf32> to vector<4x1xf32>
    %365 = vector.broadcast %364 : vector<4x1xf32> to vector<4x5xf32>
    %366 = arith.divf %362, %365 : vector<4x5xf32>
    %cst_106 = arith.constant dense<0.000000e+00> : vector<4x16xf32>
    %367 = tpu.matmul %366, %334, %cst_106 {dimension_numbers = #tpu.dot_dimension_numbers<[1], [0], [0], [1], [0, 0, 1, 1], [], []>} : vector<4x5xf32>, vector<5x16xf32>, vector<4x16xf32> -> vector<4x16xf32>
    %cst_107 = arith.constant dense<0.000000e+00> : vector<4x16xf32>
    %368 = tpu.matmul %367, %4, %cst_107 {dimension_numbers = #tpu.dot_dimension_numbers<[1], [0], [0], [1], [0, 0, 1, 1], [], []>} : vector<4x16xf32>, vector<16x16xf32>, vector<4x16xf32> -> vector<4x16xf32>
    %369 = vector.shape_cast %333 : vector<5x16xf32> to vector<1x5x16xf32>
    %370 = vector.shape_cast %368 : vector<4x16xf32> to vector<4x1x16xf32>
    %371 = vector.broadcast %369 : vector<1x5x16xf32> to vector<4x5x16xf32>
    %372 = vector.broadcast %370 : vector<4x1x16xf32> to vector<4x5x16xf32>
    %373 = arith.addf %371, %372 : vector<4x5x16xf32>
    %374 = math.tanh %373 : vector<4x5x16xf32>
    %375 = vector.shape_cast %5 : vector<1x16xf32> to vector<1x1x16xf32>
    %376 = vector.broadcast %375 : vector<1x1x16xf32> to vector<4x5x16xf32>
    %377 = arith.mulf %374, %376 : vector<4x5x16xf32>
    %cst_108 = arith.constant dense<0.000000e+00> : vector<4x5xf32>
    %378 = vector.multi_reduction <add>, %377, %cst_108 [2] : vector<4x5x16xf32> to vector<4x5xf32>
    %c1_109 = arith.constant 1 : index
    %c0_110 = arith.constant 0 : index
    %c0_111 = arith.constant 0 : index
    %379 = vector.load %arg14[%c1_109, %c0_110, %c0_111] : memref<2x4x5xf32, #tpu.memory_space<vmem>>, vector<1x4x5xf32>
    %380 = vector.shape_cast %379 : vector<1x4x5xf32> to vector<4x5xf32>
    %381 = vector.shape_cast %378 : vector<4x5xf32> to vector<1x4x5xf32>
    tpu.vector_store %arg14[%c1_109, %c0_110, %c0_111], %381 {strides = array<i32>} : memref<2x4x5xf32, #tpu.memory_space<vmem>>, vector<1x4x5xf32>,
    return
  }
}

</mosaic_0001>

<bundles_post_ra>
// kernel: ptr_extract_summ_forward.3
= control target key start
LH: loop header
LB: loop body
LE: loop exit
PB: predicated region body
PF: predicated region fallthrough
CT: control target
= control target key end

     0   :  { %s4976_s15 = smov 0   ;;  %s5548_s0 = inlined_call_operand.vmem [shape: f32[16,16,32], index: 0, kind: input, shape index: {}]   ;;  %s5549_s1 = inlined_call_operand.vmem [shape: f32[5,32,48], index: 1, kind: input, shape index: {}]   ;;  %s5550_s2 = inlined_call_operand.vmem [shape: f32[1,48], index: 2, kind: input, shape index: {}]   ;;  %s5551_s3 = inlined_call_operand.vmem [shape: f32[12,48], index: 3, kind: input, shape index: {}]   ;;  %s5552_s4 = inlined_call_operand.vmem [shape: f32[16,48], index: 4, kind: output, shape index: {}]  }
   0x1 LB: > { %s4982_s16 = sadd.s32 4294967295, %s4949_s15   ;;  %p3768_p0 = scmp.ge.s32.totalorder %s4949_s15, 1  ;;  %s4949_s15 = sphi %s4976_s15, %s14_s15  }
   0x2   : > { %p164_p1 = scmp.lt.s32.totalorder %s4949_s15, 3 }
   0x4   : > { %p165_p2 = pnand %p3768_p0, %p164_p1 }
   0x5   : > { %v205_v0 = vld [vmem:[%s5549_s1 + $0x20] sm:$0xff] (!%p165_p2)  ;;  %v206_v1 = vld [vmem:[%s5549_s1 + $0x28] sm:$0xff] (!%p165_p2)  ;;  %v207_v2 = vld [vmem:[%s5549_s1 + $0x30] sm:$0xff] (!%p165_p2)  ;;  %s3769_s23 = sshll.u32 (!%p165_p2), %s4982_s16, 3  ;;  %vm228_vm0 = vcmask (!%p165_p2), 1046528   ;;  %vm232_vm1 = vcmask (!%p165_p2), 261120  }
   0x6   : > { %168 = sbr.rel (%p165_p2) target bundleno = 410 (0x19a), region = 36  ;;  %v4996_v3 = vpack.c.bf16 (!%p165_p2), %v206_v1, %v205_v0  ;;  %v208_v4 = vld [vmem:[%s5549_s1 + $0x38] sm:$0xff] (!%p165_p2)  ;;  %p191_p3 = scmp.lt.s32.totalorder (!%p165_p2), %s3769_s23, 15  ;;  %v201_v6 = vld [vmem:[%s5549_s1] sm:$0xff] (!%p165_p2)  ;;  %v202_v7 = vld [vmem:[%s5549_s1 + $0x8] sm:$0xff] (!%p165_p2)  ;;  %vm391_vm2 = vcmask (!%p165_p2), 1045504  }
   0x7   : > { %v5001_v5 = vpack.c.bf16 (!%p165_p2), %v208_v4, %v207_v2  ;;  %v5015_v8 = vpack.c.bf16 (!%p165_p2), %v202_v7, %v201_v6  ;;  %v203_v9 = vld [vmem:[%s5549_s1 + $0x10] sm:$0xff] (!%p165_p2)  ;;  %v204_v10 = vld [vmem:[%s5549_s1 + $0x18] sm:$0xff] (!%p165_p2)  ;;  %v209_v22 = vld [vmem:[%s5549_s1 + $0x40] sm:$0xff] (!%p165_p2)  ;;  %vm476_vm3 = vcmask (!%p165_p2), 1044480   ;;  %vm561_vm4 = vcmask (!%p165_p2), 1043456   ;;  %p197_p4 = scmp.lt.s32.totalorder (!%p165_p2), %s4982_s16, 1 }
   0x8   : > { %4552 = vmatprep.subr.bf16.mxu0 (!%p165_p2), %v4996_v3  ;;  %4592 = vmatprep.subr.bf16.mxu1 (!%p165_p2), %v4996_v3  ;;  %v5049_v20 = vpack.c.bf16 (!%p165_p2), %v204_v10, %v203_v9  ;;  %v210_v23 = vld [vmem:[%s5549_s1 + $0x48] sm:$0xff] (!%p165_p2)  ;;  %v211_v25 = vld [vmem:[%s5549_s1 + $0x50] sm:$0xff] (!%p165_p2)  ;;  %v212_v26 = vld [vmem:[%s5549_s1 + $0x58] sm:$0xff] (!%p165_p2)  ;;  %vm660_vm5 = vcmask (!%p165_p2), 388096   ;;  %vm658_vm6 = vcmask (!%p165_p2), 392192   ;;  %vm3700_vm7 = vcmask (!%p165_p2), 1040384  }
   0x9   : > { %4554 = vmatpush3.bf16.msra.mxu0 (!%p165_p2), %v4996_v3  ;;  %4594 = vmatpush3.bf16.msra.mxu1 (!%p165_p2), %v4996_v3  ;;  %v5065_v24 = vpack.c.bf16 (!%p165_p2), %v210_v23, %v209_v22  ;;  %v5085_v31 = vpack.c.bf16 (!%p165_p2), %v212_v26, %v211_v25  ;;  %v213_v32 = vld [vmem:[%s5549_s1 + $0x60] sm:$0xff] (!%p165_p2)  ;;  %v214_v33 = vld [vmem:[%s5549_s1 + $0x68] sm:$0xff] (!%p165_p2)  ;;  %v215_v37 = vld [vmem:[%s5549_s1 + $0x70] sm:$0xff] (!%p165_p2)  ;;  %vm3702_vm8 = vcmask (!%p165_p2), 1041408   ;;  %vm3704_vm9 = vcmask (!%p165_p2), 1042432  }
   0xa   : > { %4556 = vmatprep.subr.bf16.mxu0 (!%p165_p2), %v5001_v5  ;;  %4596 = vmatprep.subr.bf16.mxu1 (!%p165_p2), %v5001_v5  ;;  %v5103_v36 = vpack.c.bf16 (!%p165_p2), %v214_v33, %v213_v32  ;;  %v216_v38 = vld [vmem:[%s5549_s1 + $0x78] sm:$0xff] (!%p165_p2)  ;;  %v217_v44 = vld [vmem:[%s5549_s1 + $0x80] sm:$0xff] (!%p165_p2)  ;;  %v218_v45 = vld [vmem:[%s5549_s1 + $0x88] sm:$0xff] (!%p165_p2) }
   0xb   : > { %v5121_v43 = vpack.c.bf16 (!%p165_p2), %v216_v38, %v215_v37  ;;  %v5137_v48 = vpack.c.bf16 (!%p165_p2), %v218_v45, %v217_v44  ;;  %v219_v49 = vld [vmem:[%s5549_s1 + $0x90] sm:$0xff] (!%p165_p2)  ;;  %v220_v50 = vld [vmem:[%s5549_s1 + $0x98] sm:$0xff] (!%p165_p2) }
   0xc   : > { %v5155_v55 = vpack.c.bf16 (!%p165_p2), %v220_v50, %v219_v49 }
   0xd   : > { %s5554_s23 = smov (!%p191_p3, %s3769_s23), 15  ;;  %4558 = vmatpush3.bf16.msra.mxu0 %v5001_v5  ;;  %4598 = vmatpush3.bf16.msra.mxu1 %v5001_v5  ;;  %s5556_s16 = smov (!%p197_p4, %s4982_s16), 1 }
   0xe   : > { %s3870_s30 = sshll.u32 %s5554_s23, 4  ;;  %4560 = vmatprep.subr.bf16.mxu0 %v5015_v8  ;;  %4600 = vmatprep.subr.bf16.mxu1 %v5015_v8  ;;  %s3772_s20 = sshll.u32 %s5556_s16, 3 }
   0xf   : > { %s5020_s7 = scalar_lea.vmem %s5548_s0, %s3870_s30  ;;  %s200_s23 = scalar_lea.vmem %s5552_s4, %s3772_s20 }
  0x10   : > { %v5029_v11 = vld [vmem:[%s5020_s7] sm:$0xff]  ;;  %v5032_v12 = vld [vmem:[%s5020_s7 + $0x8] sm:$0xff]  ;;  %v5035_v13 = vld [vmem:[%s5020_s7 + $0x10] sm:$0xff] }
  0x11   : > { %v229_v14 = vrot.slane %v5029_v11, 1  ;;  %v230_v15 = vrot.slane %v5032_v12, 1  ;;  %v5042_v16 = vld [vmem:[%s5020_s7 + $0x18] sm:$0xff]  ;;  %v674_v17 = vrot.slane %v5035_v13, 1  ;;  %v392_v27 = vrot.slane %v5029_v11, 2  ;;  %v5164_v58 = vld [vmem:[%s5020_s7 + $0x20] sm:$0xff] }
  0x12   : > { %v675_v18 = vrot.slane %v5042_v16, 1  ;;  %v393_v28 = vrot.slane %v5032_v12, 2  ;;  %v835_v29 = vrot.slane %v5035_v13, 2  ;;  %v836_v30 = vrot.slane %v5042_v16, 2  ;;  %v5167_v59 = vld [vmem:[%s5020_s7 + $0x28] sm:$0xff]  ;;  %v5172_v60 = vld [vmem:[%s5020_s7 + $0x30] sm:$0xff] }
  0x13   : > { %v231_v19 = vsel %vm228_vm0, %v229_v14, %v230_v15  ;;  %v477_v39 = vrot.slane %v5029_v11, 3  ;;  %v478_v40 = vrot.slane %v5032_v12, 3  ;;  %v919_v41 = vrot.slane %v5035_v13, 3  ;;  %v5175_v61 = vld [vmem:[%s5020_s7 + $0x38] sm:$0xff] }
  0x14   : > { %4119 = vmatprep.mubr.msk.f32.mxu0 %vm232_vm1, %v231_v19  ;;  %v676_v21 = vsel %vm228_vm0, %v674_v17, %v675_v18  ;;  %v394_v34 = vsel %vm391_vm2, %v392_v27, %v393_v28  ;;  %v837_v35 = vsel %vm391_vm2, %v835_v29, %v836_v30  ;;  %v920_v42 = vrot.slane %v5042_v16, 3  ;;  %v5264_v27 = vld [vmem:[%s5020_s7 + $0x40] sm:$0xff]  ;;  %v5272_v29 = vld [vmem:[%s5020_s7 + $0x50] sm:$0xff] }
  0x15   : > { %4174 = vmatprep.mubr.msk.f32.mxu1 %vm232_vm1, %v676_v21  ;;  %4120 = vmatmul.mubr.msk.f32.vlgmr.msra.gmra.mrb[0].mxu0 %vm232_vm1, %v230_v15  ;;  %v479_v46 = vsel %vm476_vm3, %v477_v39, %v478_v40  ;;  %v562_v51 = vrot.slane %v5029_v11, 4  ;;  %v563_v52 = vrot.slane %v5032_v12, 4  ;;  %v1003_v53 = vrot.slane %v5035_v13, 4 }
  0x16   : > { %4562 = vmatpush3.bf16.msra.mxu0 %v5015_v8  ;;  %4175 = vmatmul.mubr.msk.f32.vlgmr.msra.gmra.mrb[0].mxu1 %vm232_vm1, %v675_v18  ;;  %v921_v47 = vsel %vm476_vm3, %v919_v41, %v920_v42  ;;  %v1004_v54 = vrot.slane %v5042_v16, 4  ;;  %v1107_v62 = vrot.slane %v5164_v58, 1  ;;  %v1108_v63 = vrot.slane %v5167_v59, 1 }
  0x17   : > { %4602 = vmatpush3.bf16.msra.mxu1 %v5015_v8  ;;  %4564 = vmatprep.subr.bf16.mxu0 %v5049_v20  ;;  %v564_v56 = vsel %vm561_vm4, %v562_v51, %v563_v52  ;;  %v1540_v0 = vrot.slane %v5172_v60, 1  ;;  %v1541_v1 = vrot.slane %v5175_v61, 1  ;;  %v1268_v6 = vrot.slane %v5164_v58, 2 }
  0x18   : > { %4604 = vmatprep.subr.bf16.mxu1 %v5049_v20  ;;  %4130 = vmatprep.mubr.msk.f32.mxu0 %vm232_vm1, %v5029_v11  ;;  %v1005_v57 = vsel %vm561_vm4, %v1003_v53, %v1004_v54  ;;  %v1109_v2 = vsel %vm228_vm0, %v1107_v62, %v1108_v63  ;;  %v1269_v7 = vrot.slane %v5167_v59, 2  ;;  %v1701_v9 = vrot.slane %v5172_v60, 2  ;;  %v5372_v62 = vld [vmem:[%s5020_s7 + $0x70] sm:$0xff] }
  0x19   : > { %4185 = vmatprep.mubr.msk.f32.mxu1 %vm232_vm1, %v5035_v13  ;;  %v1542_v4 = vsel %vm228_vm0, %v1540_v0, %v1541_v1  ;;  %v1702_v10 = vrot.slane %v5175_v61, 2  ;;  %v1352_v13 = vrot.slane %v5164_v58, 3  ;;  %v1353_v14 = vrot.slane %v5167_v59, 3 }
  0x1a   : > { %4566 = vmatpush3.bf16.msra.mxu0 %v5049_v20  ;;  %v1270_v11 = vsel %vm391_vm2, %v1268_v6, %v1269_v7  ;;  %v1785_v15 = vrot.slane %v5172_v60, 3  ;;  %v1436_v19 = vrot.slane %v5164_v58, 4  ;;  %v1437_v21 = vrot.slane %v5167_v59, 4 }
  0x1b   : > { %4606 = vmatpush3.bf16.msra.mxu1 %v5049_v20  ;;  %4568 = vmatprep.subr.bf16.mxu0 %v5065_v24  ;;  %v1354_v17 = vsel %vm476_vm3, %v1352_v13, %v1353_v14  ;;  %v1869_v22 = vrot.slane %v5172_v60, 4  ;;  %v1870_v23 = vrot.slane %v5175_v61, 4  ;;  %v1973_v32 = vrot.slane %v5264_v27, 1 }
  0x1c   : > { %4608 = vmatprep.subr.bf16.mxu1 %v5065_v24  ;;  %v1438_v25 = vsel %vm561_vm4, %v1436_v19, %v1437_v21  ;;  %v2134_v39 = vrot.slane %v5264_v27, 2  ;;  %v2567_v41 = vrot.slane %v5272_v29, 2  ;;  %v2651_v49 = vrot.slane %v5272_v29, 3 }
  0x1d   : > { %4131 = vmatmul.mubr.msk.f32.vlgmr.msra.gmra.mrb[0].mxu0 %vm232_vm1, %v5032_v12  ;;  %v1703_v12 = vsel %vm391_vm2, %v1701_v9, %v1702_v10  ;;  %v1871_v26 = vsel %vm561_vm4, %v1869_v22, %v1870_v23  ;;  %v2302_v53 = vrot.slane %v5264_v27, 4  ;;  %v3433_v9 = vrot.slane %v5372_v62, 2 }
  0x1e   : > { %4570 = vmatpush3.bf16.msra.mxu0 %v5065_v24  ;;  %4186 = vmatmul.mubr.msk.f32.vlgmr.msra.gmra.mrb[0].mxu1 %vm232_vm1, %v5042_v16  ;;  %v1786_v16 = vrot.slane %v5175_v61, 3  ;;  %v3517_v13 = vrot.slane %v5372_v62, 3 }
  0x1f   : > { %4610 = vmatpush3.bf16.msra.mxu1 %v5065_v24  ;;  %4572 = vmatprep.subr.bf16.mxu0 %v5085_v31 }
  0x20   : > { %4612 = vmatprep.subr.bf16.mxu1 %v5085_v31  ;;  %4141 = vmatprep.mubr.msk.f32.mxu0 %vm232_vm1, %v394_v34  ;;  %v1787_v18 = vsel %vm476_vm3, %v1785_v15, %v1786_v16  ;;  %v2406_v34 = vrot.slane %v5272_v29, 1 }
  0x21   : > { %4196 = vmatprep.mubr.msk.f32.mxu1 %vm232_vm1, %v837_v35 }
  0x22   : > { %4574 = vmatpush3.bf16.msra.mxu0 %v5085_v31 }
  0x23   : > { %4614 = vmatpush3.bf16.msra.mxu1 %v5085_v31  ;;  %4576 = vmatprep.subr.bf16.mxu0 %v5103_v36 }
  0x24   : > { %4616 = vmatprep.subr.bf16.mxu1 %v5103_v36 }
  0x25   : > { %4142 = vmatmul.mubr.msk.f32.vlgmr.msra.gmra.mrb[0].mxu0 %vm232_vm1, %v393_v28  ;;  %v5267_v28 = vld [vmem:[%s5020_s7 + $0x48] sm:$0xff] }
  0x26   : > { %4578 = vmatpush3.bf16.msra.mxu0 %v5103_v36  ;;  %4197 = vmatmul.mubr.msk.f32.vlgmr.msra.gmra.mrb[0].mxu1 %vm232_vm1, %v836_v30  ;;  %v5275_v30 = vld [vmem:[%s5020_s7 + $0x58] sm:$0xff]  ;;  %v1974_v33 = vrot.slane %v5267_v28, 1 }
  0x27   : > { %4618 = vmatpush3.bf16.msra.mxu1 %v5103_v36  ;;  %4580 = vmatprep.subr.bf16.mxu0 %v5121_v43  ;;  %v2407_v35 = vrot.slane %v5275_v30, 1  ;;  %v2652_v50 = vrot.slane %v5275_v30, 3 }
  0x28   : > { %4620 = vmatprep.subr.bf16.mxu1 %v5121_v43  ;;  %4152 = vmatprep.mubr.msk.f32.mxu0 %vm232_vm1, %v479_v46  ;;  %v1975_v37 = vsel %vm228_vm0, %v1973_v32, %v1974_v33  ;;  %v2218_v46 = vrot.slane %v5264_v27, 3 }
  0x29   : > { %4207 = vmatprep.mubr.msk.f32.mxu1 %vm232_vm1, %v921_v47  ;;  %v2408_v38 = vsel %vm228_vm0, %v2406_v34, %v2407_v35  ;;  %v2219_v47 = vrot.slane %v5267_v28, 3 }
  0x2a   : > { %4582 = vmatpush3.bf16.msra.mxu0 %v5121_v43 }
  0x2b   : > { %4622 = vmatpush3.bf16.msra.mxu1 %v5121_v43  ;;  %4584 = vmatprep.subr.bf16.mxu0 %v5137_v48  ;;  %v2220_v51 = vsel %vm476_vm3, %v2218_v46, %v2219_v47 }
  0x2c   : > { %4624 = vmatprep.subr.bf16.mxu1 %v5137_v48 }
  0x2d   : > { %4153 = vmatmul.mubr.msk.f32.vlgmr.msra.gmra.mrb[0].mxu0 %vm232_vm1, %v478_v40  ;;  %v2135_v40 = vrot.slane %v5267_v28, 2 }
  0x2e   : > { %4586 = vmatpush3.bf16.msra.mxu0 %v5137_v48  ;;  %4208 = vmatmul.mubr.msk.f32.vlgmr.msra.gmra.mrb[0].mxu1 %vm232_vm1, %v920_v42  ;;  %v2568_v42 = vrot.slane %v5275_v30, 2 }
  0x2f   : > { %4626 = vmatpush3.bf16.msra.mxu1 %v5137_v48  ;;  %4588 = vmatprep.subr.bf16.mxu0 %v5155_v55  ;;  %v2136_v44 = vsel %vm391_vm2, %v2134_v39, %v2135_v40 }
  0x30   : > { %4628 = vmatprep.subr.bf16.mxu1 %v5155_v55  ;;  %4163 = vmatprep.mubr.msk.f32.mxu0 %vm232_vm1, %v564_v56  ;;  %v2569_v45 = vsel %vm391_vm2, %v2567_v41, %v2568_v42  ;;  %v2735_v56 = vrot.slane %v5272_v29, 4 }
  0x31   : > { %4218 = vmatprep.mubr.msk.f32.mxu1 %vm232_vm1, %v1005_v57  ;;  %v2736_v57 = vrot.slane %v5275_v30, 4 }
  0x32   : > { %4590 = vmatpush3.bf16.msra.mxu0 %v5155_v55 }
  0x33   : > { %4630 = vmatpush3.bf16.msra.mxu1 %v5155_v55  ;;  %4632 = vmatprep.subr.bf16.mxu0 %v4996_v3 }
  0x34   : > { %4672 = vmatprep.subr.bf16.mxu1 %v4996_v3 }
  0x35   : > { %4164 = vmatmul.mubr.msk.f32.vlgmr.msra.gmra.mrb[0].mxu0 %vm232_vm1, %v563_v52  ;;  %v2653_v52 = vsel %vm476_vm3, %v2651_v49, %v2652_v50 }
  0x36   : > { %4219 = vmatmul.mubr.msk.f32.vlgmr.msra.gmra.mrb[0].mxu1 %vm232_vm1, %v1004_v54  ;;  %4634 = vmatpush3.bf16.msra.mxu0 %v4996_v3  ;;  %v2303_v54 = vrot.slane %v5267_v28, 4 }
  0x37   : > { %4674 = vmatpush3.bf16.msra.mxu1 %v4996_v3  ;;  %4636 = vmatprep.subr.bf16.mxu0 %v5001_v5 }
  0x38   : > { %4676 = vmatprep.subr.bf16.mxu1 %v5001_v5  ;;  %4229 = vmatprep.mubr.msk.f32.mxu0 %vm232_vm1, %v1109_v2  ;;  %v3272_v2 = vrot.slane %v5372_v62, 1 }
  0x39   : > { %4284 = vmatprep.mubr.msk.f32.mxu1 %vm232_vm1, %v1542_v4 }
  0x3a   : > { %4638 = vmatpush3.bf16.msra.mxu0 %v5001_v5 }
  0x3b   : > { %4678 = vmatpush3.bf16.msra.mxu1 %v5001_v5  ;;  %4640 = vmatprep.subr.bf16.mxu0 %v5015_v8 }
  0x3c   : > { %4680 = vmatprep.subr.bf16.mxu1 %v5015_v8 }
  0x3d   : > { %4230 = vmatmul.mubr.msk.f32.vlgmr.msra.gmra.mrb[2].mxu0 %vm232_vm1, %v1108_v63  ;;  %v5375_v63 = vld [vmem:[%s5020_s7 + $0x78] sm:$0xff] }
  0x3e   : > { %4285 = vmatmul.mubr.msk.f32.vlgmr.msra.gmra.mrb[2].mxu1 %vm232_vm1, %v1541_v1  ;;  %4642 = vmatpush3.bf16.msra.mxu0 %v5015_v8  ;;  %v3273_v4 = vrot.slane %v5375_v63, 1 }
  0x3f   : > { %4682 = vmatpush3.bf16.msra.mxu1 %v5015_v8  ;;  %4644 = vmatprep.subr.bf16.mxu0 %v5049_v20 }
  0x40   : > { %4684 = vmatprep.subr.bf16.mxu1 %v5049_v20  ;;  %4240 = vmatprep.mubr.msk.f32.mxu0 %vm232_vm1, %v5164_v58  ;;  %v2304_v58 = vsel %vm561_vm4, %v2302_v53, %v2303_v54 }
  0x41   : > { %4295 = vmatprep.mubr.msk.f32.mxu1 %vm232_vm1, %v5172_v60  ;;  %v5364_v60 = vld [vmem:[%s5020_s7 + $0x60] sm:$0xff] }
  0x42   : > { %4646 = vmatpush3.bf16.msra.mxu0 %v5049_v20  ;;  %v2839_v0 = vrot.slane %v5364_v60, 1 }
  0x43   : > { %4686 = vmatpush3.bf16.msra.mxu1 %v5049_v20  ;;  %4648 = vmatprep.subr.bf16.mxu0 %v5065_v24 }
  0x44   : > { %4688 = vmatprep.subr.bf16.mxu1 %v5065_v24 }
  0x45   : > { %4241 = vmatmul.mubr.msk.f32.vlgmr.msra.gmra.mrb[2].mxu0 %vm232_vm1, %v5167_v59  ;;  %v2737_v59 = vsel %vm561_vm4, %v2735_v56, %v2736_v57 }
  0x46   : > { %4296 = vmatmul.mubr.msk.f32.vlgmr.msra.gmra.mrb[2].mxu1 %vm232_vm1, %v5175_v61  ;;  %4650 = vmatpush3.bf16.msra.mxu0 %v5065_v24  ;;  %v5367_v61 = vld [vmem:[%s5020_s7 + $0x68] sm:$0xff] }
  0x47   : > { %4690 = vmatpush3.bf16.msra.mxu1 %v5065_v24  ;;  %4652 = vmatprep.subr.bf16.mxu0 %v5085_v31  ;;  %v2840_v1 = vrot.slane %v5367_v61, 1 }
  0x48   : > { %4692 = vmatprep.subr.bf16.mxu1 %v5085_v31  ;;  %4251 = vmatprep.mubr.msk.f32.mxu0 %vm232_vm1, %v1270_v11 }
  0x49   : > { %4306 = vmatprep.mubr.msk.f32.mxu1 %vm232_vm1, %v1703_v12  ;;  %v2841_v6 = vsel %vm228_vm0, %v2839_v0, %v2840_v1  ;;  %v3085_v12 = vrot.slane %v5367_v61, 3 }
  0x4a   : > { %4654 = vmatpush3.bf16.msra.mxu0 %v5085_v31 }
  0x4b   : > { %4694 = vmatpush3.bf16.msra.mxu1 %v5085_v31  ;;  %4656 = vmatprep.subr.bf16.mxu0 %v5103_v36 }
  0x4c   : > { %4696 = vmatprep.subr.bf16.mxu1 %v5103_v36 }
  0x4d   : > { %4252 = vmatmul.mubr.msk.f32.vlgmr.msra.gmra.mrb[2].mxu0 %vm232_vm1, %v1269_v7  ;;  %v3274_v7 = vsel %vm228_vm0, %v3272_v2, %v3273_v4 }
  0x4e   : > { %4307 = vmatmul.mubr.msk.f32.vlgmr.msra.gmra.mrb[2].mxu1 %vm232_vm1, %v1702_v10  ;;  %4658 = vmatpush3.bf16.msra.mxu0 %v5103_v36 }
  0x4f   : > { %4698 = vmatpush3.bf16.msra.mxu1 %v5103_v36  ;;  %4660 = vmatprep.subr.bf16.mxu0 %v5121_v43 }
  0x50   : > { %4700 = vmatprep.subr.bf16.mxu1 %v5121_v43  ;;  %4262 = vmatprep.mubr.msk.f32.mxu0 %vm232_vm1, %v1354_v17  ;;  %v3601_v17 = vrot.slane %v5372_v62, 4 }
  0x51   : > { %4317 = vmatprep.mubr.msk.f32.mxu1 %vm232_vm1, %v1787_v18  ;;  %v3602_v18 = vrot.slane %v5375_v63, 4 }
  0x52   : > { %4662 = vmatpush3.bf16.msra.mxu0 %v5121_v43 }
  0x53   : > { %4702 = vmatpush3.bf16.msra.mxu1 %v5121_v43  ;;  %4664 = vmatprep.subr.bf16.mxu0 %v5137_v48  ;;  %v3603_v19 = vsel %vm561_vm4, %v3601_v17, %v3602_v18 }
  0x54   : > { %4704 = vmatprep.subr.bf16.mxu1 %v5137_v48 }
  0x55   : > { %4263 = vmatmul.mubr.msk.f32.vlgmr.msra.gmra.mrb[2].mxu0 %vm232_vm1, %v1353_v14  ;;  %v3518_v14 = vrot.slane %v5375_v63, 3 }
  0x56   : > { %4318 = vmatmul.mubr.msk.f32.vlgmr.msra.gmra.mrb[2].mxu1 %vm232_vm1, %v1786_v16  ;;  %4666 = vmatpush3.bf16.msra.mxu0 %v5137_v48  ;;  %v3169_v16 = vrot.slane %v5367_v61, 4 }
  0x57   : > { %4706 = vmatpush3.bf16.msra.mxu1 %v5137_v48  ;;  %4668 = vmatprep.subr.bf16.mxu0 %v5155_v55  ;;  %v3519_v15 = vsel %vm476_vm3, %v3517_v13, %v3518_v14 }
  0x58   : > { %4708 = vmatprep.subr.bf16.mxu1 %v5155_v55  ;;  %4273 = vmatprep.mubr.msk.f32.mxu0 %vm232_vm1, %v1438_v25  ;;  %v5481_v25 = vld [vmem:[%s5551_s3 + $0x8] sm:$0xf] }
  0x59   : > { %4328 = vmatprep.mubr.msk.f32.mxu1 %vm232_vm1, %v1871_v26 }
  0x5a   : > { %4670 = vmatpush3.bf16.msra.mxu0 %v5155_v55 }
  0x5b   : > { %4710 = vmatpush3.bf16.msra.mxu1 %v5155_v55  ;;  %4712 = vmatprep.subr.bf16.mxu0 %v4996_v3 }
  0x5c   : > { %4752 = vmatprep.subr.bf16.mxu1 %v4996_v3 }
  0x5d   : > { %4274 = vmatmul.mubr.msk.f32.vlgmr.msra.gmra.mrb[2].mxu0 %vm232_vm1, %v1437_v21 }
  0x5e   : > { %4329 = vmatmul.mubr.msk.f32.vlgmr.msra.gmra.mrb[2].mxu1 %vm232_vm1, %v1870_v23  ;;  %4714 = vmatpush3.bf16.msra.mxu0 %v4996_v3 }
  0x5f   : > { %4754 = vmatpush3.bf16.msra.mxu1 %v4996_v3  ;;  %4716 = vmatprep.subr.bf16.mxu0 %v5001_v5 }
  0x60   : > { %4756 = vmatprep.subr.bf16.mxu1 %v5001_v5  ;;  %4339 = vmatprep.mubr.msk.f32.mxu0 %vm232_vm1, %v1975_v37 }
  0x61   : > { %4394 = vmatprep.mubr.msk.f32.mxu1 %vm232_vm1, %v2408_v38 }
  0x62   : > { %4718 = vmatpush3.bf16.msra.mxu0 %v5001_v5 }
  0x63   : > { %4758 = vmatpush3.bf16.msra.mxu1 %v5001_v5  ;;  %4720 = vmatprep.subr.bf16.mxu0 %v5015_v8 }
  0x64   : > { %4760 = vmatprep.subr.bf16.mxu1 %v5015_v8 }
  0x65   : > { %4340 = vmatmul.mubr.msk.f32.vlgmr.msra.gmra.mrb[4].mxu0 %vm232_vm1, %v1974_v33 }
  0x66   : > { %4395 = vmatmul.mubr.msk.f32.vlgmr.msra.gmra.mrb[4].mxu1 %vm232_vm1, %v2407_v35  ;;  %4722 = vmatpush3.bf16.msra.mxu0 %v5015_v8 }
  0x67   : > { %4762 = vmatpush3.bf16.msra.mxu1 %v5015_v8  ;;  %4724 = vmatprep.subr.bf16.mxu0 %v5049_v20 }
  0x68   : > { %4764 = vmatprep.subr.bf16.mxu1 %v5049_v20  ;;  %4350 = vmatprep.mubr.msk.f32.mxu0 %vm232_vm1, %v5264_v27 }
  0x69   : > { %4405 = vmatprep.mubr.msk.f32.mxu1 %vm232_vm1, %v5272_v29  ;;  %v5488_v29 = vld [vmem:[%s5551_s3] sm:$0xff] }
  0x6a   : > { %4726 = vmatpush3.bf16.msra.mxu0 %v5049_v20 }
  0x6b   : > { %4766 = vmatpush3.bf16.msra.mxu1 %v5049_v20  ;;  %4728 = vmatprep.subr.bf16.mxu0 %v5065_v24 }
  0x6c   : > { %4768 = vmatprep.subr.bf16.mxu1 %v5065_v24 }
  0x6d   : > { %4351 = vmatmul.mubr.msk.f32.vlgmr.msra.gmra.mrb[4].mxu0 %vm232_vm1, %v5267_v28 }
  0x6e   : > { %4406 = vmatmul.mubr.msk.f32.vlgmr.msra.gmra.mrb[4].mxu1 %vm232_vm1, %v5275_v30  ;;  %4730 = vmatpush3.bf16.msra.mxu0 %v5065_v24 }
  0x6f   : > { %4770 = vmatpush3.bf16.msra.mxu1 %v5065_v24  ;;  %4732 = vmatprep.subr.bf16.mxu0 %v5085_v31 }
  0x70   : > { %4772 = vmatprep.subr.bf16.mxu1 %v5085_v31  ;;  %4361 = vmatprep.mubr.msk.f32.mxu0 %vm232_vm1, %v2136_v44 }
  0x71   : > { %4416 = vmatprep.mubr.msk.f32.mxu1 %vm232_vm1, %v2569_v45 }
  0x72   : > { %4734 = vmatpush3.bf16.msra.mxu0 %v5085_v31 }
  0x73   : > { %4774 = vmatpush3.bf16.msra.mxu1 %v5085_v31  ;;  %4736 = vmatprep.subr.bf16.mxu0 %v5103_v36 }
  0x74   : > { %4776 = vmatprep.subr.bf16.mxu1 %v5103_v36 }
  0x75   : > { %4362 = vmatmul.mubr.msk.f32.vlgmr.msra.gmra.mrb[4].mxu0 %vm232_vm1, %v2135_v40 }
  0x76   : > { %4417 = vmatmul.mubr.msk.f32.vlgmr.msra.gmra.mrb[4].mxu1 %vm232_vm1, %v2568_v42  ;;  %4738 = vmatpush3.bf16.msra.mxu0 %v5103_v36 }
  0x77   : > { %4778 = vmatpush3.bf16.msra.mxu1 %v5103_v36  ;;  %4740 = vmatprep.subr.bf16.mxu0 %v5121_v43 }
  0x78   : > { %4780 = vmatprep.subr.bf16.mxu1 %v5121_v43  ;;  %4372 = vmatprep.mubr.msk.f32.mxu0 %vm232_vm1, %v2220_v51 }
  0x79   : > { %4427 = vmatprep.mubr.msk.f32.mxu1 %vm232_vm1, %v2653_v52 }
  0x7a   : > { %4742 = vmatpush3.bf16.msra.mxu0 %v5121_v43 }
  0x7b   : > { %4782 = vmatpush3.bf16.msra.mxu1 %v5121_v43  ;;  %4744 = vmatprep.subr.bf16.mxu0 %v5137_v48 }
  0x7c   : > { %4784 = vmatprep.subr.bf16.mxu1 %v5137_v48 }
  0x7d   : > { %4373 = vmatmul.mubr.msk.f32.vlgmr.msra.gmra.mrb[4].mxu0 %vm232_vm1, %v2219_v47 }
  0x7e   : > { %4428 = vmatmul.mubr.msk.f32.vlgmr.msra.gmra.mrb[4].mxu1 %vm232_vm1, %v2652_v50  ;;  %4746 = vmatpush3.bf16.msra.mxu0 %v5137_v48 }
  0x7f   : > { %4786 = vmatpush3.bf16.msra.mxu1 %v5137_v48  ;;  %4748 = vmatprep.subr.bf16.mxu0 %v5155_v55 }
  0x80   : > { %4788 = vmatprep.subr.bf16.mxu1 %v5155_v55  ;;  %4383 = vmatprep.mubr.msk.f32.mxu0 %vm232_vm1, %v2304_v58 }
  0x81   : > { %4438 = vmatprep.mubr.msk.f32.mxu1 %vm232_vm1, %v2737_v59 }
  0x82   : > { %4750 = vmatpush3.bf16.msra.mxu0 %v5155_v55 }
  0x83   : > { %4790 = vmatpush3.bf16.msra.mxu1 %v5155_v55  ;;  %4792 = vmatprep.subr.bf16.mxu0 %v4996_v3 }
  0x84   : > { %4832 = vmatprep.subr.bf16.mxu1 %v4996_v3 }
  0x85   : > { %4384 = vmatmul.mubr.msk.f32.vlgmr.msra.gmra.mrb[4].mxu0 %vm232_vm1, %v2303_v54 }
  0x86   : > { %4439 = vmatmul.mubr.msk.f32.vlgmr.msra.gmra.mrb[4].mxu1 %vm232_vm1, %v2736_v57  ;;  %4794 = vmatpush3.bf16.msra.mxu0 %v4996_v3 }
  0x87   : > { %4834 = vmatpush3.bf16.msra.mxu1 %v4996_v3  ;;  %4796 = vmatprep.subr.bf16.mxu0 %v5001_v5  ;;  %v3000_v3 = vrot.slane %v5364_v60, 2 }
  0x88   : > { %4836 = vmatprep.subr.bf16.mxu1 %v5001_v5  ;;  %4449 = vmatprep.mubr.msk.f32.mxu0 %vm232_vm1, %v2841_v6 }
  0x89   : > { %4504 = vmatprep.mubr.msk.f32.mxu1 %vm232_vm1, %v3274_v7 }
  0x8a   : > { %4798 = vmatpush3.bf16.msra.mxu0 %v5001_v5 }
  0x8b   : > { %4838 = vmatpush3.bf16.msra.mxu1 %v5001_v5  ;;  %4800 = vmatprep.subr.bf16.mxu0 %v5015_v8  ;;  %v3001_v5 = vrot.slane %v5367_v61, 2 }
  0x8c   : > { %4840 = vmatprep.subr.bf16.mxu1 %v5015_v8 }
  0x8d   : > { %4450 = vmatmul.mubr.msk.f32.vlgmr.msra.gmra.mrb[6].mxu0 %vm232_vm1, %v2840_v1  ;;  %v3002_v10 = vsel %vm391_vm2, %v3000_v3, %v3001_v5 }
  0x8e   : > { %4505 = vmatmul.mubr.msk.f32.vlgmr.msra.gmra.mrb[6].mxu1 %vm232_vm1, %v3273_v4  ;;  %4802 = vmatpush3.bf16.msra.mxu0 %v5015_v8 }
  0x8f   : > { %4842 = vmatpush3.bf16.msra.mxu1 %v5015_v8  ;;  %4804 = vmatprep.subr.bf16.mxu0 %v5049_v20  ;;  %v3434_v8 = vrot.slane %v5375_v63, 2 }
  0x90   : > { %4844 = vmatprep.subr.bf16.mxu1 %v5049_v20  ;;  %4460 = vmatprep.mubr.msk.f32.mxu0 %vm232_vm1, %v5364_v60 }
  0x91   : > { %4515 = vmatprep.mubr.msk.f32.mxu1 %vm232_vm1, %v5372_v62  ;;  %v3435_v11 = vsel %vm391_vm2, %v3433_v9, %v3434_v8 }
  0x92   : > { %4806 = vmatpush3.bf16.msra.mxu0 %v5049_v20 }
  0x93   : > { %4846 = vmatpush3.bf16.msra.mxu1 %v5049_v20  ;;  %4808 = vmatprep.subr.bf16.mxu0 %v5065_v24  ;;  %v3084_v20 = vrot.slane %v5364_v60, 3 }
  0x94   : > { %4848 = vmatprep.subr.bf16.mxu1 %v5065_v24 }
  0x95   : > { %4461 = vmatmul.mubr.msk.f32.vlgmr.msra.gmra.mrb[6].mxu0 %vm232_vm1, %v5367_v61 }
  0x96   : > { %4516 = vmatmul.mubr.msk.f32.vlgmr.msra.gmra.mrb[6].mxu1 %vm232_vm1, %v5375_v63  ;;  %4810 = vmatpush3.bf16.msra.mxu0 %v5065_v24 }
  0x97   : > { %4850 = vmatpush3.bf16.msra.mxu1 %v5065_v24  ;;  %4812 = vmatprep.subr.bf16.mxu0 %v5085_v31  ;;  %v3086_v24 = vsel %vm476_vm3, %v3084_v20, %v3085_v12 }
  0x98   : > { %4852 = vmatprep.subr.bf16.mxu1 %v5085_v31  ;;  %4471 = vmatprep.mubr.msk.f32.mxu0 %vm232_vm1, %v3002_v10 }
  0x99   : > { %4526 = vmatprep.mubr.msk.f32.mxu1 %vm232_vm1, %v3435_v11 }
  0x9a   : > { %4814 = vmatpush3.bf16.msra.mxu0 %v5085_v31 }
  0x9b   : > { %4854 = vmatpush3.bf16.msra.mxu1 %v5085_v31  ;;  %4816 = vmatprep.subr.bf16.mxu0 %v5103_v36  ;;  %v3168_v31 = vrot.slane %v5364_v60, 4 }
  0x9c   : > { %4856 = vmatprep.subr.bf16.mxu1 %v5103_v36 }
  0x9d   : > { %4472 = vmatmul.mubr.msk.f32.vlgmr.msra.gmra.mrb[6].mxu0 %vm232_vm1, %v3001_v5 }
  0x9e   : > { %4527 = vmatmul.mubr.msk.f32.vlgmr.msra.gmra.mrb[6].mxu1 %vm232_vm1, %v3434_v8  ;;  %4818 = vmatpush3.bf16.msra.mxu0 %v5103_v36 }
  0x9f   : > { %4858 = vmatpush3.bf16.msra.mxu1 %v5103_v36  ;;  %4820 = vmatprep.subr.bf16.mxu0 %v5121_v43  ;;  %v3170_v36 = vsel %vm561_vm4, %v3168_v31, %v3169_v16 }
  0xa0   : > { %4860 = vmatprep.subr.bf16.mxu1 %v5121_v43  ;;  %4482 = vmatprep.mubr.msk.f32.mxu0 %vm232_vm1, %v3086_v24 }
  0xa1   : > { %4537 = vmatprep.mubr.msk.f32.mxu1 %vm232_vm1, %v3519_v15 }
  0xa2   : > { %4822 = vmatpush3.bf16.msra.mxu0 %v5121_v43 }
  0xa3   : > { %4862 = vmatpush3.bf16.msra.mxu1 %v5121_v43  ;;  %4824 = vmatprep.subr.bf16.mxu0 %v5137_v48  ;;  %v5475_v43 = vld [vmem:[%s5550_s2] ss:$0 sm:$0xff] }
  0xa4   : > { %4864 = vmatprep.subr.bf16.mxu1 %v5137_v48 }
  0xa5   : > { %4483 = vmatmul.mubr.msk.f32.vlgmr.msra.gmra.mrb[6].mxu0 %vm232_vm1, %v3085_v12 }
  0xa6   : > { %4538 = vmatmul.mubr.msk.f32.vlgmr.msra.gmra.mrb[6].mxu1 %vm232_vm1, %v3518_v14  ;;  %4826 = vmatpush3.bf16.msra.mxu0 %v5137_v48 }
  0xa7   : > { %4866 = vmatpush3.bf16.msra.mxu1 %v5137_v48  ;;  %4828 = vmatprep.subr.bf16.mxu0 %v5155_v55 }
  0xa8   : > { %4868 = vmatprep.subr.bf16.mxu1 %v5155_v55  ;;  %4493 = vmatprep.mubr.msk.f32.mxu0 %vm232_vm1, %v3170_v36 }
  0xa9   : > { %4548 = vmatprep.mubr.msk.f32.mxu1 %vm232_vm1, %v3603_v19 }
  0xaa   : > { %4830 = vmatpush3.bf16.msra.mxu0 %v5155_v55 }
  0xab   : > { %4870 = vmatpush3.bf16.msra.mxu1 %v5155_v55 }
  0xad   : > { %4494 = vmatmul.mubr.msk.f32.vlgmr.msra.gmra.mrb[6].mxu0 %vm232_vm1, %v3169_v16 }
  0xae   : > { %4549 = vmatmul.mubr.msk.f32.vlgmr.msra.gmra.mrb[6].mxu1 %vm232_vm1, %v3602_v18 }
 0x108   : > { %v4165_v48 = vpop.f32.mrb[0].mxu0 }
 0x109   : > { %v653_v21 = vadd.f32 %v4165_v48, %v5475_v43  ;;  %v4220_v22 = vpop.f32.mrb[0].mxu1  ;;  %v635_v23 = vpop.f32.mrb[1].mxu0 }
 0x10a   : > { %v1088_v55 = vadd.f32 %v4220_v22, %v5475_v43  ;;  %v652_v26 = vadd.f32 %v5475_v43, %v635_v23  ;;  %v1076_v27 = vpop.f32.mrb[1].mxu1 }
 0x10b   : > { %v655_v28 = vmax.f32 %v653_v21, 0.0  ;;  %v1087_v30 = vadd.f32 %v5475_v43, %v1076_v27 }
 0x10c   : > { %v1090_v32 = vmax.f32 %v1088_v55, 0.0  ;;  %v654_v33 = vmax.f32 %v652_v26, 0.0 }
 0x10d   : > { %v657_v34 = vmul.f32 %v655_v28, %v5481_v25  ;;  %v1089_v35 = vmax.f32 %v1087_v30, 0.0 }
 0x10e   : > { %v1092_v37 = vmul.f32 %v1090_v32, %v5481_v25  ;;  %v656_v38 = vmul.f32 %v654_v33, %v5488_v29 }
 0x10f   : > { %v661_v39 = vsel %vm660_vm5, %v657_v34, -inf  ;;  %v1091_v40 = vmul.f32 %v1089_v35, %v5488_v29 }
 0x110   : > { %v1094_v41 = vsel %vm660_vm5, %v1092_v37, -inf  ;;  %v659_v42 = vsel %vm658_vm6, %v656_v38, -inf }
 0x111   : > { %v662_v44 = vmax.f32 %v659_v42, %v661_v39  ;;  %v1093_v45 = vsel %vm658_vm6, %v1091_v40, -inf }
 0x112   : > { %v1095_v46 = vmax.f32 %v1093_v45, %v1094_v41 }
 0x113   : > { %v663_v47 = vrot.slane %v662_v44, 4 }
 0x114   : > { %v1096_v49 = vrot.slane %v1095_v46, 4 }
 0x115   : > { %v664_v50 = vmax.f32 %v662_v44, %v663_v47 }
 0x116   : > { %v1097_v51 = vmax.f32 %v1095_v46, %v1096_v49 }
 0x117   : > { %v665_v52 = vrot.slane %v664_v50, 2 }
 0x118   : > { %v1098_v53 = vrot.slane %v1097_v51, 2 }
 0x119   : > { %v666_v54 = vmax.f32 %v664_v50, %v665_v52 }
 0x11a   : > { %v1099_v56 = vmax.f32 %v1097_v51, %v1098_v53 }
 0x11b   : > { %v667_v57 = vrot.slane %v666_v54, 1 }
 0x11c   : > { %v1100_v58 = vrot.slane %v1099_v56, 1 }
 0x11d   : > { %v668_v59 = vmax.f32 %v666_v54, %v667_v57 }
 0x11e   : > { %v1101_v60 = vmax.f32 %v1099_v56, %v1100_v58 }
 0x120   : > { %v3701_v61 = vsel %vm3700_vm7, %v668_v59, %v1101_v60 }
 0x130   : > { %v4275_v62 = vpop.f32.mrb[2].mxu0 }
 0x131   : > { %v1521_v63 = vadd.f32 %v4275_v62, %v5475_v43  ;;  %v4330_v0 = vpop.f32.mrb[2].mxu1  ;;  %v1509_v1 = vpop.f32.mrb[3].mxu0 }
 0x132   : > { %v1954_v2 = vadd.f32 %v4330_v0, %v5475_v43  ;;  %v1520_v4 = vadd.f32 %v5475_v43, %v1509_v1  ;;  %v1942_v6 = vpop.f32.mrb[3].mxu1 }
 0x133   : > { %v1523_v7 = vmax.f32 %v1521_v63, 0.0  ;;  %v1953_v3 = vadd.f32 %v5475_v43, %v1942_v6 }
 0x134   : > { %v1956_v5 = vmax.f32 %v1954_v2, 0.0  ;;  %v1522_v9 = vmax.f32 %v1520_v4, 0.0 }
 0x135   : > { %v1525_v8 = vmul.f32 %v1523_v7, %v5481_v25  ;;  %v1955_v10 = vmax.f32 %v1953_v3, 0.0 }
 0x136   : > { %v1958_v11 = vmul.f32 %v1956_v5, %v5481_v25  ;;  %v1524_v20 = vmul.f32 %v1522_v9, %v5488_v29 }
 0x137   : > { %v1527_v12 = vsel %vm660_vm5, %v1525_v8, -inf  ;;  %v1957_v13 = vmul.f32 %v1955_v10, %v5488_v29 }
 0x138   : > { %v1960_v14 = vsel %vm660_vm5, %v1958_v11, -inf  ;;  %v1526_v24 = vsel %vm658_vm6, %v1524_v20, -inf }
 0x139   : > { %v1528_v15 = vmax.f32 %v1526_v24, %v1527_v12  ;;  %v1959_v31 = vsel %vm658_vm6, %v1957_v13, -inf }
 0x13a   : > { %v1961_v16 = vmax.f32 %v1959_v31, %v1960_v14 }
 0x13b   : > { %v1529_v17 = vrot.slane %v1528_v15, 4 }
 0x13c   : > { %v1962_v18 = vrot.slane %v1961_v16, 4 }
 0x13d   : > { %v1530_v36 = vmax.f32 %v1528_v15, %v1529_v17 }
 0x13e   : > { %v1963_v19 = vmax.f32 %v1961_v16, %v1962_v18 }
 0x13f   : > { %v1531_v48 = vrot.slane %v1530_v36, 2 }
 0x140   : > { %v1964_v21 = vrot.slane %v1963_v19, 2 }
 0x141   : > { %v1532_v22 = vmax.f32 %v1530_v36, %v1531_v48 }
 0x142   : > { %v1965_v23 = vmax.f32 %v1963_v19, %v1964_v21 }
 0x143   : > { %v1533_v55 = vrot.slane %v1532_v22, 1 }
 0x144   : > { %v1966_v26 = vrot.slane %v1965_v23, 1 }
 0x145   : > { %v1534_v27 = vmax.f32 %v1532_v22, %v1533_v55 }
 0x146   : > { %v1967_v28 = vmax.f32 %v1965_v23, %v1966_v26 }
 0x147   : > { %v3703_v30 = vsel %vm3702_vm8, %v3701_v61, %v1534_v27 }
 0x148   : > { %v3705_v32 = vsel %vm3704_vm9, %v3703_v30, %v1967_v28 }
 0x158   : > { %v4385_v33 = vpop.f32.mrb[4].mxu0 }
 0x159   : > { %v2387_v34 = vadd.f32 %v4385_v33, %v5475_v43  ;;  %v4440_v35 = vpop.f32.mrb[4].mxu1  ;;  %v2375_v37 = vpop.f32.mrb[5].mxu0 }
 0x15a   : > { %v2820_v38 = vadd.f32 %v4440_v35, %v5475_v43  ;;  %v2386_v39 = vadd.f32 %v5475_v43, %v2375_v37  ;;  %v2808_v40 = vpop.f32.mrb[5].mxu1 }
 0x15b   : > { %v2389_v41 = vmax.f32 %v2387_v34, 0.0  ;;  %v2819_v42 = vadd.f32 %v5475_v43, %v2808_v40 }
 0x15c   : > { %v2822_v44 = vmax.f32 %v2820_v38, 0.0  ;;  %v2388_v45 = vmax.f32 %v2386_v39, 0.0 }
 0x15d   : > { %v2391_v46 = vmul.f32 %v2389_v41, %v5481_v25  ;;  %v2821_v47 = vmax.f32 %v2819_v42, 0.0 }
 0x15e   : > { %v2824_v49 = vmul.f32 %v2822_v44, %v5481_v25  ;;  %v2390_v50 = vmul.f32 %v2388_v45, %v5488_v29 }
 0x15f   : > { %v2393_v51 = vsel %vm660_vm5, %v2391_v46, -inf  ;;  %v2823_v52 = vmul.f32 %v2821_v47, %v5488_v29 }
 0x160   : > { %v2826_v53 = vsel %vm660_vm5, %v2824_v49, -inf  ;;  %v2392_v54 = vsel %vm658_vm6, %v2390_v50, -inf }
 0x161   : > { %v2394_v56 = vmax.f32 %v2392_v54, %v2393_v51  ;;  %v2825_v57 = vsel %vm658_vm6, %v2823_v52, -inf }
 0x162   : > { %v2827_v58 = vmax.f32 %v2825_v57, %v2826_v53 }
 0x163   : > { %v2395_v59 = vrot.slane %v2394_v56, 4 }
 0x164   : > { %v2828_v60 = vrot.slane %v2827_v58, 4 }
 0x165   : > { %v2396_v61 = vmax.f32 %v2394_v56, %v2395_v59 }
 0x166   : > { %v2829_v62 = vmax.f32 %v2827_v58, %v2828_v60 }
 0x167   : > { %v2397_v63 = vrot.slane %v2396_v61, 2 }
 0x168   : > { %v2830_v0 = vrot.slane %v2829_v62, 2 }
 0x169   : > { %v2398_v1 = vmax.f32 %v2396_v61, %v2397_v63 }
 0x16a   : > { %v2831_v2 = vmax.f32 %v2829_v62, %v2830_v0 }
 0x16b   : > { %v2399_v4 = vrot.slane %v2398_v1, 1 }
 0x16c   : > { %v2832_v6 = vrot.slane %v2831_v2, 1 }
 0x16d   : > { %v2400_v7 = vmax.f32 %v2398_v1, %v2399_v4 }
 0x16e   : > { %v2833_v3 = vmax.f32 %v2831_v2, %v2832_v6 }
 0x16f   : > { %v3706_v5 = vsel %vm561_vm4, %v3705_v32, %v2400_v7 }
 0x170   : > { %v3707_v9 = vsel %vm476_vm3, %v3706_v5, %v2833_v3 }
 0x180   : > { %v4495_v8 = vpop.f32.mrb[6].mxu0 }
 0x181   : > { %v3253_v10 = vadd.f32 %v4495_v8, %v5475_v43  ;;  %v4550_v11 = vpop.f32.mrb[6].mxu1  ;;  %v3241_v20 = vpop.f32.mrb[7].mxu0 }
 0x182   : > { %v3686_v12 = vadd.f32 %v4550_v11, %v5475_v43  ;;  %v3252_v13 = vadd.f32 %v5475_v43, %v3241_v20  ;;  %v3674_v14 = vpop.f32.mrb[7].mxu1 }
 0x183   : > { %v3255_v24 = vmax.f32 %v3253_v10, 0.0  ;;  %v3685_v15 = vadd.f32 %v5475_v43, %v3674_v14 }
 0x184   : > { %v3688_v31 = vmax.f32 %v3686_v12, 0.0  ;;  %v3254_v16 = vmax.f32 %v3252_v13, 0.0 }
 0x185   : > { %v3257_v17 = vmul.f32 %v3255_v24, %v5481_v25  ;;  %v3687_v18 = vmax.f32 %v3685_v15, 0.0 }
 0x186   : > { %v3690_v36 = vmul.f32 %v3688_v31, %v5481_v25  ;;  %v3256_v19 = vmul.f32 %v3254_v16, %v5488_v29 }
 0x187   : > { %v3259_v48 = vsel %vm660_vm5, %v3257_v17, -inf  ;;  %v3689_v21 = vmul.f32 %v3687_v18, %v5488_v29 }
 0x188   : > { %v3692_v22 = vsel %vm660_vm5, %v3690_v36, -inf  ;;  %v3258_v23 = vsel %vm658_vm6, %v3256_v19, -inf }
 0x189   : > { %v3260_v55 = vmax.f32 %v3258_v23, %v3259_v48  ;;  %v3691_v43 = vsel %vm658_vm6, %v3689_v21, -inf }
 0x18a   : > { %v3693_v26 = vmax.f32 %v3691_v43, %v3692_v22 }
 0x18b   : > { %v3261_v27 = vrot.slane %v3260_v55, 4 }
 0x18c   : > { %v3694_v28 = vrot.slane %v3693_v26, 4 }
 0x18d   : > { %v3262_v30 = vmax.f32 %v3260_v55, %v3261_v27 }
 0x18e   : > { %v3695_v32 = vmax.f32 %v3693_v26, %v3694_v28 }
 0x18f   : > { %v3263_v25 = vrot.slane %v3262_v30, 2 }
 0x190   : > { %v3696_v33 = vrot.slane %v3695_v32, 2 }
 0x191   : > { %v3264_v34 = vmax.f32 %v3262_v30, %v3263_v25 }
 0x192   : > { %v3697_v35 = vmax.f32 %v3695_v32, %v3696_v33 }
 0x193   : > { %v3265_v37 = vrot.slane %v3264_v34, 1 }
 0x194   : > { %v3698_v29 = vrot.slane %v3697_v35, 1 }
 0x195   : > { %v3266_v38 = vmax.f32 %v3264_v34, %v3265_v37 }
 0x196   : > { %v3699_v39 = vmax.f32 %v3697_v35, %v3698_v29 }
 0x197   : > { %v3708_v40 = vsel %vm391_vm2, %v3707_v9, %v3266_v38 }
 0x198   : > { %v3709_v41 = vsel %vm228_vm0, %v3708_v40, %v3699_v39 }
 0x199   : > { %3710 = vst.msk [vmem:[%s200_s23] sm:$0xff] %vm658_vm6, %v3709_v41 }
 0x19a PF: > { %s14_s15 = sadd.s32 1, %s4949_s15  }
 0x19b   : > { %p11_p5 = scmp.ge.s32.totalorder %s14_s15, 4  }
 0x19d   :  { %13 = sbr.rel (!%p11_p5) target bundleno = 1 (0x1), region = 73 }

// kernel: ptr_extract_summ_forward.5
= control target key start
LH: loop header
LB: loop body
LE: loop exit
PB: predicated region body
PF: predicated region fallthrough
CT: control target
= control target key end

     0   :  { %v4621_v3 = vmov 0.0|0.0   ;;  %vm4622_vm0 = vmmov 0   ;;  %v4623_v8 = vmov 0.0   ;;  %vm94_vm1 = vcmask 130048   ;;  %s5347_s0 = inlined_call_operand.vmem [shape: f32[2,5,32], index: 0, kind: input, shape index: {}]   ;;  %s5348_s1 = inlined_call_operand.vmem [shape: f32[4,2,32], index: 1, kind: input, shape index: {}]   ;;  %s5349_s2 = inlined_call_operand.vmem [shape: f32[2,5], index: 2, kind: input, shape index: {}]   ;;  %s5350_s3 = inlined_call_operand.vmem [shape: f32[2,16], index: 3, kind: input, shape index: {}]   ;;  %s5351_s4 = inlined_call_operand.vmem [shape: f32[2,16], index: 4, kind: input, shape index: {}]   ;;  %s5352_s5 = inlined_call_operand.vmem [shape: f32[4,32,16], index: 5, kind: input, shape index: {}]   ;;  %s5353_s6 = inlined_call_operand.vmem [shape: f32[4,16,16], index: 6, kind: input, shape index: {}]   ;;  %s5354_s7 = inlined_call_operand.vmem [shape: f32[4,1,16], index: 7, kind: input, shape index: {}]   ;;  %s5355_s8 = inlined_call_operand.vmem [shape: f32[32,16], index: 8, kind: input, shape index: {}]   ;;  %s5356_s9 = inlined_call_operand.vmem [shape: f32[16,16], index: 9, kind: input, shape index: {}]   ;;  %s5357_s10 = inlined_call_operand.vmem [shape: f32[1,16], index: 10, kind: input, shape index: {}]   ;;  %s5358_s11 = inlined_call_operand.vmem [shape: f32[32,16], index: 11, kind: input, shape index: {}]   ;;  %s5359_s12 = inlined_call_operand.vmem [shape: f32[16,16], index: 12, kind: input, shape index: {}]   ;;  %s5360_s13 = inlined_call_operand.vmem [shape: f32[1,16], index: 13, kind: input, shape index: {}]   ;;  %s5361_s14 = inlined_call_operand.hbm [shape: f32[2,4,5], index: 14, kind: output, shape index: {}]  }
   0x1   :  { %v64_v0 = vld [vmem:[%s5353_s6] sm:$0xff]  ;;  %v65_v1 = vld [vmem:[%s5353_s6 + $0x8] sm:$0xff]  ;;  %4305 = vmatprep.subr.bf16.mxu0 %v4621_v3  ;;  %4308 = vmatprep.subr.bf16.mxu1 %v4621_v3  ;;  %v50_v6 = vld [vmem:[%s5352_s5 + $0x10] sm:$0xff]  ;;  %vm168_vm2 = vcmask 261120  }
   0x2   :  { %v48_v2 = vld [vmem:[%s5352_s5] sm:$0xff]  ;;  %v4715_v4 = vpack.c.bf16 %v65_v1, %v64_v0  ;;  %v49_v5 = vld [vmem:[%s5352_s5 + $0x8] sm:$0xff]  ;;  %3939 = vmatprep.mubr.msk.f32.mxu0 %vm4622_vm0, %v4623_v8  ;;  %v51_v9 = vld [vmem:[%s5352_s5 + $0x18] sm:$0xff]  ;;  %3950 = vmatprep.mubr.msk.f32.mxu1 %vm4622_vm0, %v4623_v8 }
   0x3   :  { %v4723_v7 = vpack.c.bf16 %v49_v5, %v48_v2  ;;  %v66_v10 = vld [vmem:[%s5353_s6 + $0x10] sm:$0xff]  ;;  %v67_v11 = vld [vmem:[%s5353_s6 + $0x18] sm:$0xff]  ;;  %v91_v12 = vld [vmem:[%s5350_s3] sm:$0x3]  ;;  %v4746_v14 = vpack.c.bf16 %v51_v9, %v50_v6 }
   0x4   :  { %4307 = vmatpush3.bf16.msra.mxu0 %v4715_v4  ;;  %v4742_v13 = vpack.c.bf16 %v67_v11, %v66_v10  ;;  %v52_v15 = vld [vmem:[%s5352_s5 + $0x20] sm:$0xff]  ;;  %v53_v16 = vld [vmem:[%s5352_s5 + $0x28] sm:$0xff]  ;;  %v54_v22 = vld [vmem:[%s5352_s5 + $0x30] sm:$0xff] }
   0x5   :  { %4310 = vmatpush3.bf16.msra.mxu1 %v4723_v7  ;;  %4314 = vmatprep.subr.bf16.mxu0 %v4621_v3  ;;  %v68_v17 = vld [vmem:[%s5353_s6 + $0x20] sm:$0xff]  ;;  %v69_v18 = vld [vmem:[%s5353_s6 + $0x28] sm:$0xff]  ;;  %v4768_v20 = vpack.c.bf16 %v53_v16, %v52_v15  ;;  %v55_v23 = vld [vmem:[%s5352_s5 + $0x38] sm:$0xff] }
   0x6   :  { %4311 = vmatprep.subr.bf16.mxu1 %v4621_v3  ;;  %v93_v19 = vld [vmem:[%s5348_s1] sm:$0x3]  ;;  %v4772_v21 = vpack.c.bf16 %v69_v18, %v68_v17 }
   0x7   :  { %3940 = vmatmul.mubr.msk.f32.vlgmr.msra.gmra.mrb[0].mxu0 %vm94_vm1, %v91_v12 }
   0x8   :  { %4316 = vmatpush3.bf16.msra.mxu0 %v4742_v13  ;;  %3957 = vmatprep.mubr.msk.f32.mxu0 %vm4622_vm0, %v4623_v8 }
   0x9   :  { %4313 = vmatpush3.bf16.msra.mxu1 %v4746_v14  ;;  %4317 = vmatprep.subr.bf16.mxu0 %v4621_v3 }
   0xa   :  { %19 = vsyncpa [#allocation3], 0  ;;  %4323 = vmatprep.subr.bf16.mxu1 %v4621_v3  ;;  %v56_v24 = vld [vmem:[%s5352_s5 + $0x40] sm:$0xff]  ;;  %v57_v25 = vld [vmem:[%s5352_s5 + $0x48] sm:$0xff]  ;;  %v4790_v26 = vpack.c.bf16 %v55_v23, %v54_v22  ;;  %vm2653_vm3 = vcmask 1040384   ;;  %vm2655_vm4 = vcmask 1041408  }
   0xb   :  { %3958 = vmatmul.mubr.msk.f32.vlgmr.msra.gmra.mrb[2].mxu0 %vm94_vm1, %v91_v12  ;;  %v4794_v27 = vpack.c.bf16 %v57_v25, %v56_v24  ;;  %v70_v28 = vld [vmem:[%s5353_s6 + $0x30] sm:$0xff]  ;;  %v71_v29 = vld [vmem:[%s5353_s6 + $0x38] sm:$0xff]  ;;  %v60_v34 = vld [vmem:[%s5352_s5 + $0x60] sm:$0xff]  ;;  %vm2657_vm5 = vcmask 1042432   ;;  %vm2861_vm6 = vcmask 1044480   ;;  %vm2795_vm7 = vcmask 126976  }
   0xc   :  { %3951 = vmatmul.mubr.msk.f32.vlgmr.msra.gmra.mrb[0].mxu1 %vm168_vm2, %v93_v19  ;;  %4319 = vmatpush3.bf16.msra.mxu0 %v4768_v20  ;;  %v58_v30 = vld [vmem:[%s5352_s5 + $0x50] sm:$0xff]  ;;  %v59_v31 = vld [vmem:[%s5352_s5 + $0x58] sm:$0xff]  ;;  %v4815_v32 = vpack.c.bf16 %v71_v29, %v70_v28  ;;  %v61_v35 = vld [vmem:[%s5352_s5 + $0x68] sm:$0xff]  ;;  %vm2837_vm9 = vcmask 1041409   ;;  %vm2839_vm10 = vcmask 1042434   ;;  %vm2841_vm11 = vcmask 1043459  }
   0xd   :  { %4320 = vmatprep.subr.bf16.mxu0 %v4621_v3  ;;  %4325 = vmatpush3.bf16.msra.mxu1 %v4772_v21  ;;  %v4819_v33 = vpack.c.bf16 %v59_v31, %v58_v30  ;;  %v4834_v36 = vpack.c.bf16 %v61_v35, %v60_v34  ;;  %v62_v37 = vld [vmem:[%s5352_s5 + $0x70] sm:$0xff]  ;;  %v63_v38 = vld [vmem:[%s5352_s5 + $0x78] sm:$0xff]  ;;  %v4867_v43 = vld [vmem:[%s5354_s7] ss:$0 sm:$0xff]  ;;  %vm2845_vm13 = vcmask 35840   ;;  %vm2857_vm14 = vcmask 39936  }
   0xe   :  { %3968 = vmatprep.mubr.msk.f32.mxu0 %vm4622_vm0, %v4623_v8  ;;  %3975 = vmatprep.mubr.msk.f32.mxu1 %vm4622_vm0, %v4623_v8  ;;  %v4848_v39 = vpack.c.bf16 %v63_v38, %v62_v37  ;;  %v4873_v52 = vld [vmem:[%s5354_s7 + $0x1] ss:$0 sm:$0xff]  ;;  %v4879_v59 = vld [vmem:[%s5354_s7 + $0x2] ss:$0 sm:$0xff]  ;;  %v4885_v5 = vld [vmem:[%s5354_s7 + $0x3] ss:$0 sm:$0xff] }
   0xf   :  { %4326 = vmatprep.subr.bf16.mxu1 %v4621_v3  ;;  %v92_v22 = vld [vmem:[%s5351_s4] sm:$0x3]  ;;  %v3720_v35 = vld [vmem:[%s5348_s1 + $0x2] sm:$0x3] }
  0x10   :  { %4322 = vmatpush3.bf16.msra.mxu0 %v4790_v26  ;;  %3976 = vmatmul.mubr.msk.f32.vlgmr.msra.gmra.mrb[2].mxu1 %vm94_vm1, %v91_v12 }
  0x11   :  { %4328 = vmatpush3.bf16.msra.mxu1 %v4794_v27  ;;  %4332 = vmatprep.subr.bf16.mxu0 %v4621_v3 }
  0x12   :  { %4329 = vmatprep.subr.bf16.mxu1 %v4621_v3  ;;  %3986 = vmatprep.mubr.msk.f32.mxu1 %vm4622_vm0, %v4623_v8 }
  0x13   :  { %3969 = vmatmul.mubr.msk.f32.vlgmr.msra.gmra.mrb[4].mxu0 %vm168_vm2, %v93_v19 }
  0x14   :  { %4334 = vmatpush3.bf16.msra.mxu0 %v4815_v32  ;;  %3993 = vmatprep.mubr.msk.f32.mxu0 %vm4622_vm0, %v4623_v8 }
  0x15   :  { %4331 = vmatpush3.bf16.msra.mxu1 %v4819_v33  ;;  %4335 = vmatprep.subr.bf16.mxu0 %v4621_v3 }
  0x16   :  { %4341 = vmatprep.subr.bf16.mxu1 %v4621_v3 }
  0x17   :  { %3994 = vmatmul.mubr.msk.f32.vlgmr.msra.gmra.mrb[6].mxu0 %vm94_vm1, %v91_v12 }
  0x18   :  { %4337 = vmatpush3.bf16.msra.mxu0 %v4834_v36  ;;  %3987 = vmatmul.mubr.msk.f32.vlgmr.msra.gmra.mrb[4].mxu1 %vm168_vm2, %v93_v19 }
  0x19   :  { %4338 = vmatprep.subr.bf16.mxu0 %v4621_v3  ;;  %4004 = vmatprep.mubr.msk.f32.mxu0 %vm4622_vm0, %v4623_v8 }
  0x1a   :  { %4343 = vmatpush3.bf16.msra.mxu1 %v4715_v4  ;;  %4011 = vmatprep.mubr.msk.f32.mxu1 %vm4622_vm0, %v4623_v8 }
  0x1b   :  { %4344 = vmatprep.subr.bf16.mxu1 %v4621_v3 }
  0x1c   :  { %4340 = vmatpush3.bf16.msra.mxu0 %v4848_v39 }
  0x1d   :  { %4350 = vmatprep.subr.bf16.mxu0 %v4621_v3 }
  0x1f   :  { %4005 = vmatmul.mubr.msk.f32.vlgmr.msra.gmra.mrb[8].mxu0 %vm168_vm2, %v93_v19 }
  0x20   :  { %4352 = vmatpush3.bf16.msra.mxu0 %v4742_v13  ;;  %4029 = vmatprep.mubr.msk.f32.mxu0 %vm4622_vm0, %v4623_v8 }
  0x21   :  { %4353 = vmatprep.subr.bf16.mxu0 %v4621_v3 }
  0xda   :  { %v164_v40 = vpop.f32.mrb[0].mxu0 }
  0xdb   :  { %v3941_v41 = vpop.f32.mrb[1].mxu0 }
  0xde   :  { %v321_v42 = vpop.f32.mrb[2].mxu0 }
  0xdf   :  { %v238_v44 = vpop.f32.mrb[0].mxu1  ;;  %v3959_v45 = vpop.f32.mrb[3].mxu0 }
  0xe0   :  { %v239_v46 = vadd.f32 %v238_v44, %v164_v40  ;;  %v3952_v47 = vpop.f32.mrb[1].mxu1 }
  0xe2   :  { %v248_v48 = vadd.f32 %v4867_v43, %v239_v46 }
  0xe3   :  { %v474_v49 = vpop.f32.mrb[2].mxu1 }
  0xe4   :  { %v3708_v50 = vmul.f32 -1.442695, %v248_v48  ;;  %v3977_v51 = vpop.f32.mrb[3].mxu1 }
  0xe6   :  { %4493 = vpow2.f32 %v3708_v50  ;;  %v391_v53 = vpop.f32.mrb[4].mxu0 }
  0xe7   :  { %v392_v54 = vadd.f32 %v391_v53, %v321_v42  ;;  %v3970_v55 = vpop.f32.mrb[5].mxu0 }
  0xe9   :  { %v401_v56 = vadd.f32 %v4873_v52, %v392_v54 }
  0xea   :  { %v622_v57 = vpop.f32.mrb[6].mxu0 }
  0xeb   :  { %v3712_v58 = vmul.f32 -1.442695, %v401_v56  ;;  %v544_v60 = vpop.f32.mrb[4].mxu1  ;;  %v3995_v61 = vpop.f32.mrb[7].mxu0 }
  0xec   :  { %v545_v62 = vadd.f32 %v544_v60, %v474_v49  ;;  %v3988_v63 = vpop.f32.mrb[5].mxu1 }
  0xed   :  { %4495 = vpow2.f32 %v3712_v58 }
  0xee   :  { %v554_v0 = vadd.f32 %v4879_v59, %v545_v62 }
  0xf0   :  { %v4494_v1 = vpop.eup %4493  ;;  %4497 = vtanh.f32 %v554_v0 }
  0xf1   :  { %v252_v2 = vadd.f32 1.0, %v4494_v1 }
  0xf2   :  { %v692_v6 = vpop.f32.mrb[8].mxu0 }
  0xf3   :  { %4499 = vrcp.f32 %v252_v2  ;;  %v693_v9 = vadd.f32 %v692_v6, %v622_v57  ;;  %v4006_v10 = vpop.f32.mrb[9].mxu0 }
  0xf5   :  { %v702_v11 = vadd.f32 %v4885_v5, %v693_v9 }
  0xf7   :  { %v4496_v12 = vpop.eup %4495  ;;  %v3719_v15 = vmul.f32 -1.442695, %v702_v11 }
  0xf8   :  { %v405_v16 = vadd.f32 1.0, %v4496_v12 }
  0xf9   :  { %4501 = vpow2.f32 %v3719_v15 }
  0xfa   :  { %4503 = vrcp.f32 %v405_v16  ;;  %v4498_v17 = vpop.eup %4497 }
  0xfd   :  { %v4500_v18 = vpop.eup %4499 }
  0xfe   :  { %v710_v19 = vmul.f32 %v4500_v18, %v4498_v17 }
 0x103   :  { %v4502_v23 = vpop.eup %4501 }
 0x104   :  { %v4504_v24 = vpop.eup %4503  ;;  %v706_v25 = vadd.f32 1.0, %v4502_v23 }
 0x105   :  { %v709_v28 = vmul.f32 %v4504_v24, %v92_v22 }
 0x106   :  { %4505 = vrcp.f32 %v706_v25 }
 0x107   :  { %v4891_v29 = vadd.f32 %v710_v19, %v709_v28 }
 0x109   :  { %4507 = vtanh.f32 %v4891_v29 }
 0x110   :  { %v4506_v30 = vpop.eup %4505 }
 0x113   :  { %v4508_v31 = vpop.eup %4507 }
 0x114   :  { %v4894_v34 = vmul.f32 %v4508_v31, %v4506_v30 }
 0x116   :  { %4012 = vmatmul.mubr.msk.f32.vlgmr.msra.gmra.mrb[6].mxu1 %vm94_vm1, %v4894_v34  ;;  %4030 = vmatmul.mubr.msk.f32.vlgmr.msra.gmra.mrb[10].mxu0 %vm94_vm1, %v4894_v34  ;;  %v3253_v31 = vrot.slane %v4894_v34, 1 }
 0x117   :  { %4346 = vmatpush3.bf16.msra.mxu1 %v4723_v7  ;;  %4355 = vmatpush3.bf16.msra.mxu0 %v4768_v20 }
 0x118   :  { %4347 = vmatprep.subr.bf16.mxu1 %v4621_v3  ;;  %4356 = vmatprep.subr.bf16.mxu0 %v4621_v3 }
 0x119   :  { %4022 = vmatprep.mubr.msk.f32.mxu1 %vm4622_vm0, %v4623_v8  ;;  %4040 = vmatprep.mubr.msk.f32.mxu0 %vm4622_vm0, %v4623_v8 }
 0x11b   :  { %4349 = vmatpush3.bf16.msra.mxu1 %v4746_v14  ;;  %4358 = vmatpush3.bf16.msra.mxu0 %v4790_v26 }
 0x11c   :  { %4359 = vmatprep.subr.bf16.mxu1 %v4621_v3  ;;  %4368 = vmatprep.subr.bf16.mxu0 %v4621_v3 }
 0x11e   :  { %4023 = vmatmul.mubr.msk.f32.vlgmr.msra.gmra.mrb[8].mxu1 %vm168_vm2, %v3720_v35  ;;  %4041 = vmatmul.mubr.msk.f32.vlgmr.msra.gmra.mrb[12].mxu0 %vm168_vm2, %v3720_v35 }
 0x11f   :  { %4361 = vmatpush3.bf16.msra.mxu1 %v4772_v21  ;;  %4370 = vmatpush3.bf16.msra.mxu0 %v4815_v32 }
 0x120   :  { %4047 = vmatprep.mubr.msk.f32.mxu1 %vm4622_vm0, %v4623_v8  ;;  %4065 = vmatprep.mubr.msk.f32.mxu0 %vm4622_vm0, %v4623_v8 }
 0x121   :  { %4362 = vmatprep.subr.bf16.mxu1 %v4621_v3  ;;  %4371 = vmatprep.subr.bf16.mxu0 %v4621_v3 }
 0x122   :  { %4048 = vmatmul.mubr.msk.f32.vlgmr.msra.gmra.mrb[10].mxu1 %vm94_vm1, %v4894_v34  ;;  %4066 = vmatmul.mubr.msk.f32.vlgmr.msra.gmra.mrb[14].mxu0 %vm94_vm1, %v4894_v34 }
 0x123   :  { %4364 = vmatpush3.bf16.msra.mxu1 %v4794_v27  ;;  %4373 = vmatpush3.bf16.msra.mxu0 %v4834_v36 }
 0x124   :  { %4365 = vmatprep.subr.bf16.mxu1 %v4621_v3  ;;  %4374 = vmatprep.subr.bf16.mxu0 %v4621_v3 }
 0x125   :  { %4058 = vmatprep.mubr.msk.f32.mxu1 %vm4622_vm0, %v4623_v8  ;;  %4076 = vmatprep.mubr.msk.f32.mxu0 %vm4622_vm0, %v4623_v8 }
 0x127   :  { %4367 = vmatpush3.bf16.msra.mxu1 %v4819_v33  ;;  %4376 = vmatpush3.bf16.msra.mxu0 %v4848_v39 }
 0x128   :  { %4377 = vmatprep.subr.bf16.mxu1 %v4621_v3  ;;  %4386 = vmatprep.subr.bf16.mxu0 %v4621_v3 }
 0x12a   :  { %4059 = vmatmul.mubr.msk.f32.vlgmr.msra.gmra.mrb[12].mxu1 %vm168_vm2, %v3720_v35  ;;  %4077 = vmatmul.mubr.msk.f32.vlgmr.msra.gmra.mrb[16].mxu0 %vm168_vm2, %v3720_v35  ;;  %v3732_v35 = vld [vmem:[%s5348_s1 + $0x4] sm:$0x3] }
 0x12b   :  { %4379 = vmatpush3.bf16.msra.mxu1 %v4715_v4  ;;  %4388 = vmatpush3.bf16.msra.mxu0 %v4742_v13 }
 0x12c   :  { %4083 = vmatprep.mubr.msk.f32.mxu1 %vm4622_vm0, %v4623_v8  ;;  %4380 = vmatprep.subr.bf16.mxu1 %v4621_v3 }
 0x12d   :  { %4101 = vmatprep.mubr.msk.f32.mxu0 %vm4622_vm0, %v4623_v8  ;;  %4389 = vmatprep.subr.bf16.mxu0 %v4621_v3 }
 0x1e9   :  { %v785_v37 = vpop.f32.mrb[6].mxu1  ;;  %v935_v38 = vpop.f32.mrb[10].mxu0 }
 0x1ea   :  { %v4013_v40 = vpop.f32.mrb[7].mxu1  ;;  %v4031_v41 = vpop.f32.mrb[11].mxu0 }
 0x1f1   :  { %v858_v42 = vpop.f32.mrb[8].mxu1  ;;  %v1005_v44 = vpop.f32.mrb[12].mxu0 }
 0x1f2   :  { %v859_v45 = vadd.f32 %v858_v42, %v785_v37  ;;  %v1006_v46 = vadd.f32 %v1005_v44, %v935_v38  ;;  %v4024_v47 = vpop.f32.mrb[9].mxu1  ;;  %v4042_v48 = vpop.f32.mrb[13].mxu0 }
 0x1f4   :  { %v862_v49 = vadd.f32 %v4867_v43, %v859_v45  ;;  %v1009_v50 = vadd.f32 %v4873_v52, %v1006_v46 }
 0x1f5   :  { %v1082_v51 = vpop.f32.mrb[10].mxu1  ;;  %v1224_v53 = vpop.f32.mrb[14].mxu0 }
 0x1f6   :  { %v3723_v54 = vmul.f32 -1.442695, %v862_v49  ;;  %v3726_v55 = vmul.f32 -1.442695, %v1009_v50  ;;  %v4049_v56 = vpop.f32.mrb[11].mxu1  ;;  %v4067_v57 = vpop.f32.mrb[15].mxu0 }
 0x1f8   :  { %4509 = vpow2.f32 %v3723_v54 }
 0x1f9   :  { %4511 = vpow2.f32 %v3726_v55 }
 0x1fd   :  { %v1152_v58 = vpop.f32.mrb[12].mxu1  ;;  %v1294_v60 = vpop.f32.mrb[16].mxu0 }
 0x1fe   :  { %v1153_v61 = vadd.f32 %v1152_v58, %v1082_v51  ;;  %v1295_v62 = vadd.f32 %v1294_v60, %v1224_v53  ;;  %v4060_v63 = vpop.f32.mrb[13].mxu1  ;;  %v4078_v0 = vpop.f32.mrb[17].mxu0 }
 0x200   :  { %v1156_v1 = vadd.f32 %v4879_v59, %v1153_v61  ;;  %v1298_v2 = vadd.f32 %v4885_v5, %v1295_v62 }
 0x202   :  { %v4510_v6 = vpop.eup %4509  ;;  %v3731_v9 = vmul.f32 -1.442695, %v1298_v2  ;;  %4513 = vtanh.f32 %v1156_v1 }
 0x203   :  { %v4512_v10 = vpop.eup %4511  ;;  %v866_v11 = vadd.f32 1.0, %v4510_v6 }
 0x204   :  { %v1013_v12 = vadd.f32 1.0, %v4512_v10  ;;  %4515 = vpow2.f32 %v3731_v9 }
 0x205   :  { %4517 = vrcp.f32 %v866_v11 }
 0x206   :  { %4519 = vrcp.f32 %v1013_v12 }
 0x20c   :  { %v4514_v15 = vpop.eup %4513 }
 0x20e   :  { %v4516_v16 = vpop.eup %4515 }
 0x20f   :  { %v4518_v17 = vpop.eup %4517  ;;  %v1302_v22 = vadd.f32 1.0, %v4516_v16 }
 0x210   :  { %v4520_v18 = vpop.eup %4519  ;;  %v1306_v19 = vmul.f32 %v4518_v17, %v4514_v15 }
 0x211   :  { %v1305_v23 = vmul.f32 %v4520_v18, %v4891_v29  ;;  %4521 = vrcp.f32 %v1302_v22 }
 0x213   :  { %v4956_v24 = vadd.f32 %v1306_v19, %v1305_v23 }
 0x215   :  { %4523 = vtanh.f32 %v4956_v24 }
 0x21b   :  { %v4522_v25 = vpop.eup %4521 }
 0x21f   :  { %v4524_v28 = vpop.eup %4523 }
 0x220   :  { %v4959_v30 = vmul.f32 %v4524_v28, %v4522_v25 }
 0x222   :  { %4084 = vmatmul.mubr.msk.f32.vlgmr.msra.gmra.mrb[14].mxu1 %vm94_vm1, %v4959_v30  ;;  %4102 = vmatmul.mubr.msk.f32.vlgmr.msra.gmra.mrb[18].mxu0 %vm94_vm1, %v4959_v30  ;;  %v4968_v29 = vsel %vm2653_vm3, %v3253_v31, %v4959_v30  ;;  %v2646_v28 = vrot.slane %v4959_v30, 7 }
 0x223   :  { %4382 = vmatpush3.bf16.msra.mxu1 %v4723_v7  ;;  %4391 = vmatpush3.bf16.msra.mxu0 %v4768_v20 }
 0x224   :  { %4383 = vmatprep.subr.bf16.mxu1 %v4621_v3  ;;  %4392 = vmatprep.subr.bf16.mxu0 %v4621_v3 }
 0x225   :  { %4094 = vmatprep.mubr.msk.f32.mxu1 %vm4622_vm0, %v4623_v8  ;;  %4112 = vmatprep.mubr.msk.f32.mxu0 %vm4622_vm0, %v4623_v8 }
 0x227   :  { %4385 = vmatpush3.bf16.msra.mxu1 %v4746_v14  ;;  %4394 = vmatpush3.bf16.msra.mxu0 %v4790_v26 }
 0x228   :  { %4395 = vmatprep.subr.bf16.mxu1 %v4621_v3  ;;  %4404 = vmatprep.subr.bf16.mxu0 %v4621_v3 }
 0x22a   :  { %4095 = vmatmul.mubr.msk.f32.vlgmr.msra.gmra.mrb[16].mxu1 %vm168_vm2, %v3732_v35  ;;  %4113 = vmatmul.mubr.msk.f32.vlgmr.msra.gmra.mrb[20].mxu0 %vm168_vm2, %v3732_v35 }
 0x22b   :  { %4397 = vmatpush3.bf16.msra.mxu1 %v4772_v21  ;;  %4406 = vmatpush3.bf16.msra.mxu0 %v4815_v32 }
 0x22c   :  { %4119 = vmatprep.mubr.msk.f32.mxu1 %vm4622_vm0, %v4623_v8  ;;  %4137 = vmatprep.mubr.msk.f32.mxu0 %vm4622_vm0, %v4623_v8 }
 0x22d   :  { %4398 = vmatprep.subr.bf16.mxu1 %v4621_v3  ;;  %4407 = vmatprep.subr.bf16.mxu0 %v4621_v3 }
 0x22e   :  { %4120 = vmatmul.mubr.msk.f32.vlgmr.msra.gmra.mrb[18].mxu1 %vm94_vm1, %v4959_v30  ;;  %4138 = vmatmul.mubr.msk.f32.vlgmr.msra.gmra.mrb[22].mxu0 %vm94_vm1, %v4959_v30 }
 0x22f   :  { %4400 = vmatpush3.bf16.msra.mxu1 %v4794_v27  ;;  %4409 = vmatpush3.bf16.msra.mxu0 %v4834_v36 }
 0x230   :  { %4401 = vmatprep.subr.bf16.mxu1 %v4621_v3  ;;  %4410 = vmatprep.subr.bf16.mxu0 %v4621_v3 }
 0x231   :  { %4130 = vmatprep.mubr.msk.f32.mxu1 %vm4622_vm0, %v4623_v8  ;;  %4148 = vmatprep.mubr.msk.f32.mxu0 %vm4622_vm0, %v4623_v8 }
 0x233   :  { %4403 = vmatpush3.bf16.msra.mxu1 %v4819_v33  ;;  %4412 = vmatpush3.bf16.msra.mxu0 %v4848_v39 }
 0x234   :  { %4413 = vmatprep.subr.bf16.mxu1 %v4621_v3  ;;  %4422 = vmatprep.subr.bf16.mxu0 %v4621_v3 }
 0x236   :  { %4131 = vmatmul.mubr.msk.f32.vlgmr.msra.gmra.mrb[20].mxu1 %vm168_vm2, %v3732_v35  ;;  %4149 = vmatmul.mubr.msk.f32.vlgmr.msra.gmra.mrb[24].mxu0 %vm168_vm2, %v3732_v35 }
 0x237   :  { %4415 = vmatpush3.bf16.msra.mxu1 %v4715_v4  ;;  %4424 = vmatpush3.bf16.msra.mxu0 %v4742_v13 }
 0x238   :  { %4155 = vmatprep.mubr.msk.f32.mxu1 %vm4622_vm0, %v4623_v8  ;;  %4416 = vmatprep.subr.bf16.mxu1 %v4621_v3 }
 0x239   :  { %4173 = vmatprep.mubr.msk.f32.mxu0 %vm4622_vm0, %v4623_v8  ;;  %4425 = vmatprep.subr.bf16.mxu0 %v4621_v3 }
 0x2f5   :  { %v1381_v37 = vpop.f32.mrb[14].mxu1  ;;  %v1531_v38 = vpop.f32.mrb[18].mxu0 }
 0x2f6   :  { %v4085_v40 = vpop.f32.mrb[15].mxu1  ;;  %v4103_v41 = vpop.f32.mrb[19].mxu0 }
 0x2f7   :  { %v2502_v40 = vld [vmem:[%s5347_s0] sm:$0x1f] }
 0x2fd   :  { %v1454_v42 = vpop.f32.mrb[16].mxu1  ;;  %v1601_v44 = vpop.f32.mrb[20].mxu0 }
 0x2fe   :  { %v1455_v45 = vadd.f32 %v1454_v42, %v1381_v37  ;;  %v1602_v4 = vadd.f32 %v1601_v44, %v1531_v38  ;;  %v4096_v46 = vpop.f32.mrb[17].mxu1  ;;  %v4114_v13 = vpop.f32.mrb[21].mxu0  ;;  %v85_v42 = vld [vmem:[%s5358_s11 + $0x10] sm:$0xff]  ;;  %v86_v44 = vld [vmem:[%s5358_s11 + $0x18] sm:$0xff] }
 0x300   :  { %v1458_v47 = vadd.f32 %v4867_v43, %v1455_v45  ;;  %v1605_v48 = vadd.f32 %v4873_v52, %v1602_v4  ;;  %v5136_v45 = vpack.c.bf16 %v86_v44, %v85_v42 }
 0x301   :  { %v1678_v49 = vpop.f32.mrb[18].mxu1  ;;  %v1820_v50 = vpop.f32.mrb[22].mxu0 }
 0x302   :  { %v3735_v51 = vmul.f32 -1.442695, %v1458_v47  ;;  %v3738_v53 = vmul.f32 -1.442695, %v1605_v48  ;;  %v4121_v54 = vpop.f32.mrb[19].mxu1  ;;  %v4139_v55 = vpop.f32.mrb[23].mxu0 }
 0x304   :  { %4525 = vpow2.f32 %v3735_v51 }
 0x305   :  { %4527 = vpow2.f32 %v3738_v53 }
 0x309   :  { %v1748_v56 = vpop.f32.mrb[20].mxu1  ;;  %v1890_v57 = vpop.f32.mrb[24].mxu0 }
 0x30a   :  { %v1749_v58 = vadd.f32 %v1748_v56, %v1678_v49  ;;  %v1891_v60 = vadd.f32 %v1890_v57, %v1820_v50  ;;  %v4132_v61 = vpop.f32.mrb[21].mxu1  ;;  %v4150_v62 = vpop.f32.mrb[25].mxu0 }
 0x30c   :  { %v1752_v63 = vadd.f32 %v4879_v59, %v1749_v58  ;;  %v1894_v0 = vadd.f32 %v4885_v5, %v1891_v60 }
 0x30e   :  { %v4526_v1 = vpop.eup %4525  ;;  %v3743_v2 = vmul.f32 -1.442695, %v1894_v0  ;;  %4529 = vtanh.f32 %v1752_v63 }
 0x30f   :  { %v4528_v6 = vpop.eup %4527  ;;  %v1462_v9 = vadd.f32 1.0, %v4526_v1 }
 0x310   :  { %v1609_v10 = vadd.f32 1.0, %v4528_v6  ;;  %4531 = vpow2.f32 %v3743_v2 }
 0x311   :  { %4533 = vrcp.f32 %v1462_v9 }
 0x312   :  { %4535 = vrcp.f32 %v1609_v10 }
 0x318   :  { %v4530_v11 = vpop.eup %4529 }
 0x31a   :  { %v4532_v12 = vpop.eup %4531 }
 0x31b   :  { %v4534_v15 = vpop.eup %4533  ;;  %v1898_v18 = vadd.f32 1.0, %v4532_v12 }
 0x31c   :  { %v4536_v16 = vpop.eup %4535  ;;  %v1902_v17 = vmul.f32 %v4534_v15, %v4530_v11 }
 0x31d   :  { %v1901_v19 = vmul.f32 %v4536_v16, %v4956_v24  ;;  %4537 = vrcp.f32 %v1898_v18  ;;  %v2654_v24 = vsel %vm2653_vm3, %v4894_v34, %v2646_v28  ;;  %v87_v34 = vld [vmem:[%s5359_s12] sm:$0xff] }
 0x31f   :  { %v5026_v22 = vadd.f32 %v1902_v17, %v1901_v19 }
 0x321   :  { %4539 = vtanh.f32 %v5026_v22 }
 0x327   :  { %v4538_v23 = vpop.eup %4537 }
 0x32b   :  { %v4540_v25 = vpop.eup %4539 }
 0x32c   :  { %v1905_v31 = vmul.f32 %v4540_v25, %v4538_v23 }
 0x32e   :  { %4156 = vmatmul.mubr.msk.f32.vlgmr.msra.gmra.mrb[22].mxu1 %vm94_vm1, %v1905_v31  ;;  %4174 = vmatmul.mubr.msk.f32.vlgmr.msra.gmra.mrb[26].mxu0 %vm94_vm1, %v1905_v31  ;;  %v2648_v35 = vrot.slane %v1905_v31, 6  ;;  %v3255_v37 = vrot.slane %v1905_v31, 7 }
 0x32f   :  { %4418 = vmatpush3.bf16.msra.mxu1 %v4723_v7  ;;  %4427 = vmatpush3.bf16.msra.mxu0 %v4768_v20  ;;  %v3744_v7 = vld [vmem:[%s5348_s1 + $0x6] sm:$0x3]  ;;  %v77_v20 = vld [vmem:[%s5355_s8 + $0x8] sm:$0xff] }
 0x330   :  { %4419 = vmatprep.subr.bf16.mxu1 %v4621_v3  ;;  %4428 = vmatprep.subr.bf16.mxu0 %v4621_v3  ;;  %v5038_v30 = vsel %vm2655_vm4, %v2654_v24, %v2648_v35  ;;  %v5041_v38 = vsel %vm2655_vm4, %v4968_v29, %v3255_v37  ;;  %v88_v29 = vld [vmem:[%s5359_s12 + $0x8] sm:$0xff] }
 0x331   :  { %4166 = vmatprep.mubr.msk.f32.mxu1 %vm4622_vm0, %v4623_v8  ;;  %4184 = vmatprep.mubr.msk.f32.mxu0 %vm4622_vm0, %v4623_v8  ;;  %v5122_v41 = vpack.c.bf16 %v88_v29, %v87_v34  ;;  %v4624_v34 = vmov 1966171168   ;;  %v2736_v29 = vlaneseq }
 0x333   :  { %4421 = vmatpush3.bf16.msra.mxu1 %v4746_v14  ;;  %4430 = vmatpush3.bf16.msra.mxu0 %v4790_v26  ;;  %v76_v14 = vld [vmem:[%s5355_s8] sm:$0xff] }
 0x334   :  { %4431 = vmatprep.subr.bf16.mxu1 %v4621_v3  ;;  %4440 = vmatprep.subr.bf16.mxu0 %v4621_v3  ;;  %v5093_v26 = vpack.c.bf16 %v77_v20, %v76_v14 }
 0x336   :  { %4167 = vmatmul.mubr.msk.f32.vlgmr.msra.gmra.mrb[24].mxu1 %vm168_vm2, %v3744_v7  ;;  %4185 = vmatmul.mubr.msk.f32.vlgmr.msra.gmra.mrb[28].mxu0 %vm168_vm2, %v3744_v7 }
 0x337   :  { %4433 = vmatpush3.bf16.msra.mxu1 %v4772_v21  ;;  %4442 = vmatpush3.bf16.msra.mxu0 %v4815_v32  ;;  %v78_v21 = vld [vmem:[%s5355_s8 + $0x10] sm:$0xff]  ;;  %v83_v32 = vld [vmem:[%s5358_s11] sm:$0xff] }
 0x338   :  { %4191 = vmatprep.mubr.msk.f32.mxu1 %vm4622_vm0, %v4623_v8  ;;  %4209 = vmatprep.mubr.msk.f32.mxu0 %vm4622_vm0, %v4623_v8 }
 0x339   :  { %4434 = vmatprep.subr.bf16.mxu1 %v4621_v3  ;;  %4443 = vmatprep.subr.bf16.mxu0 %v4621_v3 }
 0x33a   :  { %4192 = vmatmul.mubr.msk.f32.vlgmr.msra.gmra.mrb[26].mxu1 %vm94_vm1, %v1905_v31  ;;  %4210 = vmatmul.mubr.msk.f32.vlgmr.msra.gmra.mrb[30].mxu0 %vm94_vm1, %v1905_v31 }
 0x33b   :  { %4436 = vmatpush3.bf16.msra.mxu1 %v4794_v27  ;;  %4445 = vmatpush3.bf16.msra.mxu0 %v4834_v36  ;;  %v79_v27 = vld [vmem:[%s5355_s8 + $0x18] sm:$0xff] }
 0x33c   :  { %4437 = vmatprep.subr.bf16.mxu1 %v4621_v3  ;;  %4446 = vmatprep.subr.bf16.mxu0 %v4621_v3  ;;  %v5105_v36 = vpack.c.bf16 %v79_v27, %v78_v21 }
 0x33d   :  { %4202 = vmatprep.mubr.msk.f32.mxu1 %vm4622_vm0, %v4623_v8  ;;  %4220 = vmatprep.mubr.msk.f32.mxu0 %vm4622_vm0, %v4623_v8 }
 0x33f   :  { %4439 = vmatpush3.bf16.msra.mxu1 %v4819_v33  ;;  %4448 = vmatpush3.bf16.msra.mxu0 %v4848_v39  ;;  %v84_v33 = vld [vmem:[%s5358_s11 + $0x8] sm:$0xff] }
 0x340   :  { %4449 = vmatprep.subr.bf16.mxu1 %v4621_v3  ;;  %4455 = vmatprep.subr.bf16.mxu0 %v4621_v3  ;;  %v5107_v39 = vpack.c.bf16 %v84_v33, %v83_v32 }
 0x342   :  { %4203 = vmatmul.mubr.msk.f32.vlgmr.msra.gmra.mrb[28].mxu1 %vm168_vm2, %v3744_v7  ;;  %4221 = vmatmul.mubr.msk.f32.vlgmr.msra.gmra.mrb[32].mxu0 %vm168_vm2, %v3744_v7 }
 0x343   :  { %4231 = vmatprep.mubr.msk.f32.mxu1 %vm4622_vm0, %v4623_v8  ;;  %4242 = vmatprep.mubr.msk.f32.mxu0 %vm4622_vm0, %v4623_v8 }
 0x344   :  { %4451 = vmatpush3.bf16.msra.mxu1 %v5093_v26  ;;  %4457 = vmatpush3.bf16.msra.mxu0 %v5107_v39 }
 0x345   :  { %4452 = vmatprep.subr.bf16.mxu1 %v4621_v3  ;;  %4458 = vmatprep.subr.bf16.mxu0 %v4621_v3 }
 0x348   :  { %4454 = vmatpush3.bf16.msra.mxu1 %v5105_v36  ;;  %4460 = vmatpush3.bf16.msra.mxu0 %v5136_v45 }
 0x349   :  { %4461 = vmatprep.subr.bf16.mxu1 %v4621_v3  ;;  %4464 = vmatprep.subr.bf16.mxu0 %v4621_v3 }
 0x34b   :  { %4232 = vmatmul.mubr.msk.f32.vlgmr.msra.gmra.mrb[30].mxu1 %vm168_vm2, %v2502_v40  ;;  %4243 = vmatmul.mubr.msk.f32.vlgmr.msra.gmra.mrb[34].mxu0 %vm168_vm2, %v2502_v40  ;;  %v5159_v40 = vshrl.u32 %v2736_v29, 7 }
 0x34c   :  { %4463 = vmatpush3.bf16.msra.mxu1 %v5122_v41  ;;  %4249 = vmatprep.mubr.msk.f32.mxu1 %vm4622_vm0, %v4623_v8 }
 0x34d   :  { %4252 = vmatprep.subr.mxu1 %v4623_v8  ;;  %4261 = vmatprep.mubr.msk.f32.mxu0 %vm4622_vm0, %v4623_v8 }
 0x401   :  { %v1977_v4 = vpop.f32.mrb[22].mxu1  ;;  %v2127_v46 = vpop.f32.mrb[26].mxu0 }
 0x402   :  { %v4157_v13 = vpop.f32.mrb[23].mxu1  ;;  %v4175_v47 = vpop.f32.mrb[27].mxu0 }
 0x409   :  { %v2050_v48 = vpop.f32.mrb[24].mxu1  ;;  %v2197_v49 = vpop.f32.mrb[28].mxu0 }
 0x40a   :  { %v2051_v50 = vadd.f32 %v2050_v48, %v1977_v4  ;;  %v2198_v51 = vadd.f32 %v2197_v49, %v2127_v46  ;;  %v4168_v53 = vpop.f32.mrb[25].mxu1  ;;  %v4186_v54 = vpop.f32.mrb[29].mxu0  ;;  %v5166_v46 = vsub.s32 0, %v5159_v40 }
 0x40c   :  { %v2054_v55 = vadd.f32 %v4867_v43, %v2051_v50  ;;  %v2201_v56 = vadd.f32 %v4873_v52, %v2198_v51 }
 0x40d   :  { %v2274_v57 = vpop.f32.mrb[26].mxu1  ;;  %v2416_v58 = vpop.f32.mrb[30].mxu0 }
 0x40e   :  { %v3747_v60 = vmul.f32 -1.442695, %v2054_v55  ;;  %v3750_v61 = vmul.f32 -1.442695, %v2201_v56  ;;  %v4193_v62 = vpop.f32.mrb[27].mxu1  ;;  %v4211_v63 = vpop.f32.mrb[31].mxu0 }
 0x40f   :  { %v5177_v62 = vld [vmem:[%s5360_s13] ss:$0 sm:$0xff] }
 0x410   :  { %4541 = vpow2.f32 %v3747_v60 }
 0x411   :  { %4543 = vpow2.f32 %v3750_v61 }
 0x415   :  { %v2344_v0 = vpop.f32.mrb[28].mxu1  ;;  %v2486_v1 = vpop.f32.mrb[32].mxu0 }
 0x416   :  { %v2345_v2 = vadd.f32 %v2344_v0, %v2274_v57  ;;  %v2487_v6 = vadd.f32 %v2486_v1, %v2416_v58  ;;  %v4204_v9 = vpop.f32.mrb[29].mxu1  ;;  %v4222_v10 = vpop.f32.mrb[33].mxu0 }
 0x418   :  { %v2348_v11 = vadd.f32 %v4879_v59, %v2345_v2  ;;  %v2490_v43 = vadd.f32 %v4885_v5, %v2487_v6 }
 0x41a   :  { %v4542_v12 = vpop.eup %4541  ;;  %v3755_v52 = vmul.f32 -1.442695, %v2490_v43  ;;  %4545 = vtanh.f32 %v2348_v11 }
 0x41b   :  { %v4544_v15 = vpop.eup %4543  ;;  %v2058_v16 = vadd.f32 1.0, %v4542_v12 }
 0x41c   :  { %v2205_v17 = vadd.f32 1.0, %v4544_v15  ;;  %4547 = vpow2.f32 %v3755_v52 }
 0x41d   :  { %4549 = vrcp.f32 %v2058_v16  ;;  %v90_v16 = vld [vmem:[%s5349_s2] sm:$0x3] }
 0x41e   :  { %4551 = vrcp.f32 %v2205_v17  ;;  %v2642_v32 = vpop.f32.mrb[34].mxu0  ;;  %v2820_v17 = vand.u32 127, %v2736_v29  ;;  %vm2808_vm8 = vcmp.gt.f32.partialorder %v90_v16, 0.5 }
 0x41f   :  { %v4244_v33 = vpop.f32.mrb[35].mxu0 }
 0x424   :  { %v4546_v18 = vpop.eup %4545 }
 0x426   :  { %v4548_v19 = vpop.eup %4547 }
 0x427   :  { %v4550_v23 = vpop.eup %4549  ;;  %v2494_v31 = vadd.f32 1.0, %v4548_v19  ;;  %v5191_v19 = vsub.s32 %v2820_v17, %v5159_v40 }
 0x428   :  { %v4552_v25 = vpop.eup %4551  ;;  %v2498_v28 = vmul.f32 %v4550_v23, %v4546_v18  ;;  %v4625_v23 = vmov 0  }
 0x429   :  { %v2497_v35 = vmul.f32 %v4552_v25, %v5026_v22  ;;  %4553 = vrcp.f32 %v2494_v31  ;;  %v5155_v22 = vpop.f32.mrb[30].mxu1  ;;  %v5193_v25 = vsel %vm2808_vm8, 1, %v4625_v23 }
 0x42a   :  { %v4233_v27 = vpop.f32.mrb[31].mxu1 }
 0x42b   :  { %v2499_v59 = vadd.f32 %v2498_v28, %v2497_v35  ;;  %v2813_v35 = vrot.slane %v5193_v25, %v5166_v46 }
 0x42d   :  { %4555 = vtanh.f32 %v2499_v59  ;;  %vm2814_vm12 = vcmp.eq.s32.totalorder %v2813_v35, 1 }
 0x433   :  { %v4554_v5 = vpop.eup %4553 }
 0x437   :  { %v4556_v37 = vpop.eup %4555 }
 0x438   :  { %v2501_v24 = vmul.f32 %v4556_v37, %v4554_v5 }
 0x43a   :  { %v2651_v7 = vrot.slane %v2501_v24, 5  ;;  %v3257_v14 = vrot.slane %v2501_v24, 6 }
 0x43c   :  { %v2658_v20 = vsel %vm2657_vm5, %v5038_v30, %v2651_v7  ;;  %v5150_v21 = vsel %vm2657_vm5, %v5041_v38, %v3257_v14  ;;  %v2734_v30 = vunpack.c.l.s4 %v4624_v34 }
 0x43d   :  { %4250 = vmatmul.mubr.msk.f32.vlgmr.msra.gmra.mrb[32].mxu1 %vm94_vm1, %v2658_v20 }
 0x43e   :  { %4254 = vmatprep.mubr.msk.f32.mxu1 %vm4622_vm0, %v4623_v8  ;;  %4253 = vmatpush3.msk.msra.mxu1 %vm2861_vm6, %v2642_v32  ;;  %v2735_v38 = vunpack.c.0.s8 %v2734_v30 }
 0x43f   :  { %4467 = vmatprep.subr.bf16.mxu1 %v4621_v3 }
 0x440   :  { %v5162_v42 = vsub.s32 %v2735_v38, %v5159_v40 }
 0x510   :  { %v2728_v44 = vpop.f32.mrb[32].mxu1 }
 0x511   :  { %v2739_v4 = vrot.slane %v2728_v44, %v5162_v42  ;;  %v4251_v13 = vpop.f32.mrb[33].mxu1 }
 0x512   :  { %v81_v13 = vld [vmem:[%s5356_s9 + $0x8] sm:$0xff] }
 0x513   :  { %v2740_v47 = vcombine.high %v2739_v4, %v2739_v4  ;;  %v2747_v48 = vrot.slane %v2739_v4, %v5162_v42  ;;  %v80_v4 = vld [vmem:[%s5356_s9] sm:$0xff] }
 0x515   :  { %v2754_v49 = vrot.slane %v2740_v47, %v5162_v42  ;;  %v2755_v50 = vcombine.high %v2747_v48, %v2747_v48  ;;  %v2760_v51 = vrot.slane %v2747_v48, %v5166_v46  ;;  %v4465_v47 = vpack.c.bf16 %v81_v13, %v80_v4 }
 0x517   :  { %v2756_v53 = vcombine.high %v2754_v49, %v2754_v49  ;;  %v2764_v54 = vrot.slane %v2754_v49, %v5166_v46  ;;  %v2768_v55 = vrot.slane %v2755_v50, %v5166_v46  ;;  %v2777_v56 = vadd.f32 %v2760_v51, %v2642_v32  ;;  %4466 = vmatpush3.bf16.msra.mxu0 %v4465_v47  ;;  %v3764_v51 = vld [vmem:[%s5347_s0 + $0x8] sm:$0x1f] }
 0x518   :  { %4473 = vmatprep.subr.bf16.mxu0 %v4621_v3 }
 0x519   :  { %v2772_v57 = vrot.slane %v2756_v53, %v5166_v46  ;;  %v2778_v58 = vadd.f32 %v2764_v54, %v2642_v32  ;;  %v2779_v60 = vadd.f32 %v2768_v55, %v2642_v32  ;;  %4557 = vtanh.f32 %v2777_v56 }
 0x51b   :  { %v2780_v61 = vadd.f32 %v2772_v57, %v2642_v32  ;;  %4559 = vtanh.f32 %v2778_v58 }
 0x51c   :  { %4561 = vtanh.f32 %v2779_v60 }
 0x51d   :  { %4563 = vtanh.f32 %v2780_v61 }
 0x523   :  { %v4558_v63 = vpop.eup %4557 }
 0x524   :  { %v2791_v0 = vmul.f32 %v4558_v63, %v5177_v62 }
 0x525   :  { %v4560_v1 = vpop.eup %4559 }
 0x526   :  { %v4562_v2 = vpop.eup %4561  ;;  %v2796_v6 = vsel %vm2795_vm7, %v2791_v0, 0.0  ;;  %v2792_v9 = vmul.f32 %v4560_v1, %v5177_v62 }
 0x527   :  { %v4564_v10 = vpop.eup %4563  ;;  %2797 = vadd.xlane.f32.xlu0 %v2796_v6  ;;  %v2793_v11 = vmul.f32 %v4562_v2, %v5177_v62 }
 0x528   :  { %v2794_v12 = vmul.f32 %v4564_v10, %v5177_v62  ;;  %v2799_v52 = vsel %vm2795_vm7, %v2792_v9, 0.0 }
 0x529   :  { %v2802_v43 = vsel %vm2795_vm7, %v2793_v11, 0.0 }
 0x52a   :  { %2803 = vadd.xlane.f32.xlu1 %v2802_v43  ;;  %v2805_v15 = vsel %vm2795_vm7, %v2794_v12, 0.0 }
 0x52b   :  { %2800 = vadd.xlane.f32.xlu0 %v2799_v52 }
 0x52e   :  { %2806 = vadd.xlane.f32.xlu1 %v2805_v15 }
 0x5b4   :  { %v2798_v18 = vpop.xlane.xlu0 %2797 }
 0x5b5   :  { %v2824_v59 = vrot.slane %v2798_v18, %v5191_v19 }
 0x5b7   :  { %v2804_v28 = vpop.xlane.xlu1 %2803 }
 0x5b8   :  { %v2801_v31 = vpop.xlane.xlu0 %2800  ;;  %v2832_v37 = vrot.slane %v2804_v28, %v5191_v19 }
 0x5b9   :  { %v2828_v5 = vrot.slane %v2801_v31, %v5191_v19 }
 0x5bb   :  { %v2838_v24 = vsel %vm2837_vm9, %v2828_v5, %v2824_v59  ;;  %v2807_v7 = vpop.xlane.xlu1 %2806 }
 0x5bc   :  { %v2836_v14 = vrot.slane %v2807_v7, %v5191_v19  ;;  %v2840_v20 = vsel %vm2839_vm10, %v2832_v37, %v2838_v24 }
 0x5be   :  { %v2842_v27 = vsel %vm2841_vm11, %v2836_v14, %v2840_v20 }
 0x5bf   :  { %v2844_v32 = vsel %vm2814_vm12, %v2842_v27, -1e+18 }
 0x5c0   :  { %v2846_v33 = vsel %vm2845_vm13, %v2844_v32, -inf }
 0x5c1   :  { %2847 = vmax.xlane.f32.xlu0 %v2846_v33 }
 0x64e   :  { %v2848_v34 = vpop.xlane.xlu0 %2847 }
 0x64f   :  { %v2849_v30 = vsub.f32 %v2844_v32, %v2848_v34 }
 0x651   :  { %v2850_v29 = vmul.f32 1.442695, %v2849_v30 }
 0x653   :  { %4565 = vpow2.f32 %v2850_v29 }
 0x65d   :  { %v4566_v38 = vpop.eup %4565 }
 0x65e   :  { %v2852_v44 = vsel %vm2845_vm13, %v4566_v38, 0.0 }
 0x65f   :  { %2853 = vadd.xlane.f32.xlu1 %v2852_v44  ;;  %v3406_v44 = vsub.s32 1, %v5159_v40 }
 0x6ec   :  { %v2854_v48 = vpop.xlane.xlu1 %2853 }
 0x6ed   :  { %4567 = vrcp.f32 %v2854_v48 }
 0x6f7   :  { %v4568_v49 = vpop.eup %4567 }
 0x6f8   :  { %v2856_v50 = vmul.f32 %v4568_v49, %v4566_v38  ;;  %v3407_v49 = vrot.slane %v5193_v25, %v3406_v44 }
 0x6fa   :  { %4255 = vmatmul.mubr.msk.f32.vlgmr.msra.gmra.mrb[34].mxu1 %vm2857_vm14, %v2856_v50  ;;  %vm3408_vm15 = vcmp.eq.s32.totalorder %v3407_v49, 1 }
 0x6fb   :  { %4469 = vmatpush3.bf16.msra.mxu1 %v5093_v26  ;;  %4272 = vmatprep.mubr.msk.f32.mxu1 %vm4622_vm0, %v4623_v8 }
 0x6fc   :  { %4470 = vmatprep.subr.bf16.mxu1 %v4621_v3 }
 0x6ff   :  { %4472 = vmatpush3.bf16.msra.mxu1 %v5105_v36 }
 0x700   :  { %4479 = vmatprep.subr.bf16.mxu1 %v4621_v3 }
 0x702   :  { %4273 = vmatmul.mubr.msk.f32.vlgmr.msra.gmra.mrb[36].mxu1 %vm168_vm2, %v3764_v51 }
 0x703   :  { %4481 = vmatpush3.bf16.msra.mxu1 %v5122_v41  ;;  %4290 = vmatprep.mubr.msk.f32.mxu1 %vm4622_vm0, %v4623_v8 }
 0x704   :  { %4482 = vmatprep.subr.bf16.mxu1 %v4621_v3 }
 0x706   :  { %4291 = vmatmul.mubr.msk.f32.vlgmr.msra.gmra.mrb[38].mxu1 %vm94_vm1, %v5150_v21 }
 0x707   :  { %4484 = vmatpush3.bf16.msra.mxu1 %v4465_v47  ;;  %4302 = vmatprep.mubr.msk.f32.mxu1 %vm4622_vm0, %v4623_v8 }
 0x7cd   :  { %v2931_v26 = vpop.f32.mrb[34].mxu1 }
 0x7ce   :  { %v4256_v36 = vpop.f32.mrb[35].mxu1  ;;  %4262 = vmatmul.mubr.msk.f32.vlgmr.msra.gmra.mrb[36].mxu0 %vm94_vm1, %v2931_v26 }
 0x7cf   :  { %4475 = vmatpush3.bf16.msra.mxu0 %v5107_v39  ;;  %4283 = vmatprep.mubr.msk.f32.mxu0 %vm4622_vm0, %v4623_v8 }
 0x7d0   :  { %4476 = vmatprep.subr.bf16.mxu0 %v4621_v3 }
 0x7d3   :  { %4478 = vmatpush3.bf16.msra.mxu0 %v5136_v45 }
 0x7d4   :  { %4293 = vmatprep.subr.mxu0 %v4623_v8 }
 0x7d5   :  { %v5239_v41 = vpop.f32.mrb[36].mxu1 }
 0x7d6   :  { %4284 = vmatmul.mubr.msk.f32.vlgmr.msra.gmra.mrb[38].mxu0 %vm168_vm2, %v3764_v51  ;;  %v4274_v21 = vpop.f32.mrb[37].mxu1 }
 0x7d7   :  { %4295 = vmatprep.mubr.msk.f32.mxu0 %vm4622_vm0, %v4623_v8 }
 0x7d9   :  { %v3331_v53 = vpop.f32.mrb[38].mxu1 }
 0x7da   :  { %v4292_v54 = vpop.f32.mrb[39].mxu1  ;;  %v3342_v39 = vrot.slane %v3331_v53, %v5162_v42  ;;  %v5284_v53 = vld [vmem:[%s5357_s10] ss:$0 sm:$0xff]  ;;  %s4626_s10 = smov [#allocation2]  }
 0x7db   :  { %s3694_s29 = sshll.u32 %s4626_s10, 4  ;;  %s3695_s29 = int_to_ptr.vmem [resolvable:$true] %s3694_s29 }
 0x7dc   :  { %v3343_v55 = vcombine.high %v3342_v39, %v3342_v39  ;;  %v3350_v56 = vrot.slane %v3342_v39, %v5162_v42  ;;  %s4597_s5 = scalar_lea.vmem %s3695_s29, 128  ;;  %p4602_p1 = scmp.lt.s32.totalorder %s3695_s29, %s3695_s29 }
 0x7dd   :  { %p4598_p0 = scmp.ne.s32.totalorder %s3695_s29, %s4597_s5  ;;  %p4603_p2 = scmp.lt.s32.totalorder %s4597_s5, %s4597_s5 }
 0x7de   :  { %v3357_v3 = vrot.slane %v3343_v55, %v5162_v42  ;;  %v3358_v63 = vcombine.high %v3350_v56, %v3350_v56  ;;  %v3363_v43 = vrot.slane %v3350_v56, %v5166_v46 }
 0x7df   :  { %p4604_p3 = por %p4603_p2, %p4602_p1 }
 0x7e0   :  { %v3359_v0 = vcombine.high %v3357_v3, %v3357_v3  ;;  %v3367_v12 = vrot.slane %v3357_v3, %v5166_v46  ;;  %v3371_v52 = vrot.slane %v3358_v63, %v5166_v46 }
 0x7e1   :  { %p4605_p4 = pnand %p4604_p3, %p4598_p0 }
 0x7e2   :  { %v3375_v15 = vrot.slane %v3359_v0, %v5166_v46 }
 0x8a1   :  { %v3004_v45 = vpop.f32.mrb[36].mxu0 }
 0x8a2   :  { %v3015_v57 = vrot.slane %v3004_v45, %v5162_v42  ;;  %v4263_v58 = vpop.f32.mrb[37].mxu0 }
 0x8a4   :  { %v3016_v60 = vcombine.high %v3015_v57, %v3015_v57  ;;  %v3023_v61 = vrot.slane %v3015_v57, %v5162_v42 }
 0x8a6   :  { %v3030_v8 = vrot.slane %v3016_v60, %v5162_v42  ;;  %v3031_v1 = vcombine.high %v3023_v61, %v3023_v61  ;;  %v3036_v2 = vrot.slane %v3023_v61, %v5166_v46 }
 0x8a8   :  { %v3032_v6 = vcombine.high %v3030_v8, %v3030_v8  ;;  %v3040_v9 = vrot.slane %v3030_v8, %v5166_v46  ;;  %v3044_v10 = vrot.slane %v3031_v1, %v5166_v46  ;;  %v3053_v11 = vadd.f32 %v3036_v2, %v5155_v22 }
 0x8a9   :  { %v3249_v16 = vpop.f32.mrb[38].mxu0 }
 0x8aa   :  { %v3048_v17 = vrot.slane %v3032_v6, %v5166_v46  ;;  %v3054_v18 = vadd.f32 %v3040_v9, %v5155_v22  ;;  %v3055_v23 = vadd.f32 %v3044_v10, %v5155_v22  ;;  %v4285_v28 = vpop.f32.mrb[39].mxu0  ;;  %4294 = vmatpush3.msk.msra.mxu0 %vm2861_vm6, %v3249_v16  ;;  %v3380_v31 = vadd.f32 %v3363_v43, %v3249_v16 }
 0x8ab   :  { %v3381_v35 = vadd.f32 %v3367_v12, %v3249_v16  ;;  %v3382_v59 = vadd.f32 %v3371_v52, %v3249_v16  ;;  %v3383_v5 = vadd.f32 %v3375_v15, %v3249_v16 }
 0x8ac   :  { %v5263_v37 = vadd.f32 %v3048_v17, %v5155_v22  ;;  %4569 = vtanh.f32 %v3380_v31 }
 0x8ad   :  { %4571 = vtanh.f32 %v3381_v35 }
 0x8ae   :  { %4573 = vtanh.f32 %v3382_v59 }
 0x8af   :  { %4575 = vtanh.f32 %v3383_v5 }
 0x8b0   :  { %4577 = vtanh.f32 %v3053_v11 }
 0x8b1   :  { %4579 = vtanh.f32 %v3055_v23 }
 0x8b2   :  { %4581 = vtanh.f32 %v3054_v18 }
 0x8b6   :  { %v4570_v24 = vpop.eup %4569 }
 0x8b7   :  { %v4572_v7 = vpop.eup %4571  ;;  %v3388_v14 = vmul.f32 %v4570_v24, %v5177_v62 }
 0x8b8   :  { %v4574_v20 = vpop.eup %4573  ;;  %v3389_v27 = vmul.f32 %v4572_v7, %v5177_v62 }
 0x8b9   :  { %v4576_v32 = vpop.eup %4575  ;;  %v3392_v33 = vsel %vm2795_vm7, %v3388_v14, 0.0  ;;  %v3390_v34 = vmul.f32 %v4574_v20, %v5177_v62 }
 0x8ba   :  { %3393 = vadd.xlane.f32.xlu0 %v3392_v33  ;;  %v3395_v22 = vsel %vm2795_vm7, %v3389_v27, 0.0  ;;  %v3391_v30 = vmul.f32 %v4576_v32, %v5177_v62  ;;  %v4578_v21 = vpop.eup %4577 }
 0x8bb   :  { %3396 = vadd.xlane.f32.xlu1 %v3395_v22  ;;  %v3398_v29 = vsel %vm2795_vm7, %v3390_v34, 0.0  ;;  %v3067_v55 = vmul.f32 %v4578_v21, %v5284_v53  ;;  %v4580_v56 = vpop.eup %4579 }
 0x8bc   :  { %v3401_v38 = vsel %vm2795_vm7, %v3391_v30, 0.0  ;;  %v3069_v45 = vmul.f32 %v4580_v56, %v5284_v53  ;;  %v4582_v63 = vpop.eup %4581 }
 0x8bd   :  { %v3071_v3 = vsel %vm2795_vm7, %v3067_v55, 0.0  ;;  %v3068_v1 = vmul.f32 %v4582_v63, %v5284_v53 }
 0x8be   :  { %3399 = vadd.xlane.f32.xlu0 %v3398_v29  ;;  %v3077_v57 = vsel %vm2795_vm7, %v3069_v45, 0.0 }
 0x8bf   :  { %3402 = vadd.xlane.f32.xlu1 %v3401_v38  ;;  %v3074_v2 = vsel %vm2795_vm7, %v3068_v1, 0.0 }
 0x947   :  { %v3394_v4 = vpop.xlane.xlu0 %3393 }
 0x948   :  { %v3397_v13 = vpop.xlane.xlu1 %3396  ;;  %v3416_v47 = vrot.slane %v3394_v4, %v5191_v19 }
 0x949   :  { %v3420_v48 = vrot.slane %v3397_v13, %v5191_v19 }
 0x94b   :  { %v3400_v62 = vpop.xlane.xlu0 %3399  ;;  %v3429_v26 = vsel %vm2837_vm9, %v3420_v48, %v3416_v47 }
 0x94c   :  { %v3424_v50 = vrot.slane %v3400_v62, %v5191_v19  ;;  %v3403_v51 = vpop.xlane.xlu1 %3402 }
 0x94d   :  { %v3428_v36 = vrot.slane %v3403_v51, %v5191_v19 }
 0x94e   :  { %v3430_v40 = vsel %vm2839_vm10, %v3424_v50, %v3429_v26 }
 0x94f   :  { %v3431_v54 = vsel %vm2841_vm11, %v3428_v36, %v3430_v40 }
 0x950   :  { %v3433_v25 = vsel %vm3408_vm15, %v3431_v54, -1e+18 }
 0x951   :  { %v3434_v39 = vsel %vm2845_vm13, %v3433_v25, -inf }
 0x952   :  { %3435 = vmax.xlane.f32.xlu0 %v3434_v39 }
 0x956   :  { %3072 = vadd.xlane.f32.xlu0 %v3071_v3 }
 0x95a   :  { %3078 = vadd.xlane.f32.xlu0 %v3077_v57 }
 0x9df   :  { %v3436_v58 = vpop.xlane.xlu0 %3435 }
 0x9e0   :  { %v3437_v60 = vsub.f32 %v3433_v25, %v3436_v58 }
 0x9e2   :  { %v3438_v61 = vmul.f32 1.442695, %v3437_v60 }
 0x9e3   :  { %v3073_v47 = vpop.xlane.xlu0 %3072 }
 0x9e4   :  { %4583 = vpow2.f32 %v3438_v61  ;;  %v3090_v51 = vrot.slane %v3073_v47, %v5191_v19 }
 0x9e7   :  { %v3079_v48 = vpop.xlane.xlu0 %3078 }
 0x9e8   :  { %v3098_v21 = vrot.slane %v3079_v48, %v5191_v19 }
 0x9ee   :  { %v4584_v0 = vpop.eup %4583 }
 0x9ef   :  { %v3440_v8 = vsel %vm2845_vm13, %v4584_v0, 0.0 }
 0x9f0   :  { %3441 = vadd.xlane.f32.xlu1 %v3440_v8 }
 0x9f4   :  { %3075 = vadd.xlane.f32.xlu1 %v3074_v2 }
 0xa7d   :  { %v3442_v6 = vpop.xlane.xlu1 %3441 }
 0xa7e   :  { %4585 = vrcp.f32 %v3442_v6 }
 0xa7f   :  { %4587 = vtanh.f32 %v5263_v37 }
 0xa81   :  { %v3076_v49 = vpop.xlane.xlu1 %3075 }
 0xa82   :  { %v3094_v62 = vrot.slane %v3076_v49, %v5191_v19 }
 0xa84   :  { %v3103_v36 = vsel %vm2837_vm9, %v3094_v62, %v3090_v51 }
 0xa85   :  { %v3104_v54 = vsel %vm2839_vm10, %v3098_v21, %v3103_v36 }
 0xa88   :  { %v4586_v9 = vpop.eup %4585 }
 0xa89   :  { %v3444_v10 = vmul.f32 %v4586_v9, %v4584_v0  ;;  %v4588_v20 = vpop.eup %4587 }
 0xa8a   :  { %v3070_v22 = vmul.f32 %v4588_v20, %v5284_v53 }
 0xa8b   :  { %4296 = vmatmul.mubr.msk.f32.vlgmr.msra.gmra.mrb[40].mxu0 %vm2857_vm14, %v3444_v10 }
 0xa8c   :  { %v3080_v38 = vsel %vm2795_vm7, %v3070_v22, 0.0 }
 0xb5e   :  { %v3517_v11 = vpop.f32.mrb[40].mxu0 }
 0xb5f   :  { %v4297_v43 = vpop.f32.mrb[41].mxu0  ;;  %4303 = vmatmul.mubr.msk.f32.vlgmr.msra.gmra.mrb[40].mxu1 %vm94_vm1, %v3517_v11 }
 0xc32   :  { %v3590_v12 = vpop.f32.mrb[40].mxu1 }
 0xc33   :  { %v3601_v52 = vrot.slane %v3590_v12, %v5162_v42  ;;  %v4304_v15 = vpop.f32.mrb[41].mxu1 }
 0xc35   :  { %v3602_v16 = vcombine.high %v3601_v52, %v3601_v52  ;;  %v3609_v17 = vrot.slane %v3601_v52, %v5162_v42 }
 0xc37   :  { %v3616_v18 = vrot.slane %v3602_v16, %v5162_v42  ;;  %v3617_v23 = vcombine.high %v3609_v17, %v3609_v17  ;;  %v3622_v28 = vrot.slane %v3609_v17, %v5166_v46 }
 0xc39   :  { %v3618_v31 = vcombine.high %v3616_v18, %v3616_v18  ;;  %v3626_v35 = vrot.slane %v3616_v18, %v5166_v46  ;;  %v3630_v59 = vrot.slane %v3617_v23, %v5166_v46  ;;  %v3639_v5 = vadd.f32 %v3622_v28, %v5239_v41 }
 0xc3b   :  { %v3634_v24 = vrot.slane %v3618_v31, %v5166_v46  ;;  %v3640_v7 = vadd.f32 %v3626_v35, %v5239_v41  ;;  %v3641_v14 = vadd.f32 %v3630_v59, %v5239_v41  ;;  %4589 = vtanh.f32 %v3639_v5 }
 0xc3d   :  { %v3642_v42 = vadd.f32 %v3634_v24, %v5239_v41  ;;  %4591 = vtanh.f32 %v3640_v7 }
 0xc3e   :  { %4593 = vtanh.f32 %v3641_v14 }
 0xc3f   :  { %4595 = vtanh.f32 %v3642_v42 }
 0xc45   :  { %v4590_v27 = vpop.eup %4589 }
 0xc46   :  { %v3647_v32 = vmul.f32 %v4590_v27, %v5284_v53 }
 0xc47   :  { %v4592_v33 = vpop.eup %4591 }
 0xc48   :  { %v4594_v34 = vpop.eup %4593  ;;  %v3651_v37 = vsel %vm2795_vm7, %v3647_v32, 0.0  ;;  %v3648_v46 = vmul.f32 %v4592_v33, %v5284_v53 }
 0xc49   :  { %3652 = vadd.xlane.f32.xlu0 %v3651_v37  ;;  %v3649_v41 = vmul.f32 %v4594_v34, %v5284_v53  ;;  %v4596_v29 = vpop.eup %4595 }
 0xc4a   :  { %v3654_v30 = vsel %vm2795_vm7, %v3648_v46, 0.0  ;;  %v3650_v4 = vmul.f32 %v4596_v29, %v5284_v53 }
 0xc4b   :  { %3655 = vadd.xlane.f32.xlu1 %v3654_v30  ;;  %v3657_v44 = vsel %vm2795_vm7, %v3649_v41, 0.0 }
 0xc4c   :  { %v3660_v13 = vsel %vm2795_vm7, %v3650_v4, 0.0 }
 0xc4d   :  { %3081 = vadd.xlane.f32.xlu0 %v3080_v38 }
 0xc4f   :  { %3658 = vadd.xlane.f32.xlu1 %v3657_v44 }
 0xc53   :  { %3661 = vadd.xlane.f32.xlu1 %v3660_v13 }
 0xcd6   :  { %v3653_v50 = vpop.xlane.xlu0 %3652 }
 0xcd7   :  { %v3670_v3 = vrot.slane %v3653_v50, %v5191_v19 }
 0xcd8   :  { %v3656_v26 = vpop.xlane.xlu1 %3655 }
 0xcd9   :  { %v3674_v39 = vrot.slane %v3656_v26, %v5191_v19 }
 0xcda   :  { %v3082_v40 = vpop.xlane.xlu0 %3081 }
 0xcdb   :  { %v3102_v53 = vrot.slane %v3082_v40, %v5191_v19  ;;  %v3683_v57 = vsel %vm2837_vm9, %v3674_v39, %v3670_v3 }
 0xcdc   :  { %v3659_v25 = vpop.xlane.xlu1 %3658 }
 0xcdd   :  { %v3105_v55 = vsel %vm2841_vm11, %v3102_v53, %v3104_v54  ;;  %v3678_v56 = vrot.slane %v3659_v25, %v5191_v19 }
 0xcde   :  { %3107 = vst.msk [vmem:[#allocation2] sm:$0xf] %vm2845_vm13, %v3105_v55 }
 0xcdf   :  { %v3684_v60 = vsel %vm2839_vm10, %v3678_v56, %v3683_v57 }
 0xce0   :  { %v3662_v45 = vpop.xlane.xlu1 %3661 }
 0xce1   :  { %v3682_v58 = vrot.slane %v3662_v45, %v5191_v19 }
 0xce3   :  { %v3685_v61 = vsel %vm2841_vm11, %v3682_v58, %v3684_v60 }
 0xce4   :  { %3688 = vst.msk [vmem:[#allocation2 + $0x4] sm:$0xf] %vm2845_vm13, %v3685_v61 }
 0xce5   :  { %4608 = shalt.err (!%p4605_p4)
}
 0xce6   :  { %s4609_s16 = scalar_lea.hbm %s5361_s14, 128 }
 0xce7   :  { %p4610_p5 = scmp.ne.s32.totalorder %s5361_s14, %s4609_s16  ;;  %p4613_p6 = scmp.lt.u32.totalorder %s4609_s16, %s5361_s14 }
 0xce9   :  { %p4615_p7 = pnand %p4613_p6, %p4610_p5 }
 0xceb   :  { %4618 = shalt.err (!%p4615_p7)
}
 0xcec   :  { %s4627_s8 = smov 64   ;;  %s4628_s20 = smov 4  }
 0xced   :  { %3700 = dma.vmem_to_hbm [thread:$0]  %s3695_s29, 128, %s5361_s14, [#allocation3], %s4627_s8, %s4627_s8, %s4628_s20  }
 0xcee   :  { %4619 = dma.done.wait [#allocation3], 128  }
 0xcef   :  { %4620 = vsyncadd [#allocation3], 4294967168 }
 0xcf0   :  { %3704 = vsyncpa [#allocation3], 1 }

// kernel: ptr_extract_summ_forward.4
= control target key start
LH: loop header
LB: loop body
LE: loop exit
PB: predicated region body
PF: predicated region fallthrough
CT: control target
= control target key end

     0   :  { %v8269_v0 = vmov 0.0|0.0   ;;  %vm8270_vm0 = vmmov 0   ;;  %v8271_v6 = vmov 0.0   ;;  %v8272_v12 = vmov 0   ;;  %s9482_s5 = inlined_call_operand.vmem [shape: f32[4,16,16], index: 5, kind: input, shape index: {}]   ;;  %s9483_s4 = inlined_call_operand.vmem [shape: f32[4,48,16], index: 4, kind: input, shape index: {}]   ;;  %s9484_s2 = inlined_call_operand.vmem [shape: f32[2,2,16], index: 2, kind: input, shape index: {}]   ;;  %s9485_s1 = inlined_call_operand.vmem [shape: s32[2,1], index: 1, kind: input, shape index: {}]   ;;  %s9486_s0 = inlined_call_operand.vmem [shape: f32[5,2,48], index: 0, kind: input, shape index: {}]   ;;  %s9487_s6 = inlined_call_operand.vmem [shape: f32[4,1,16], index: 6, kind: input, shape index: {}]   ;;  %s9488_s3 = inlined_call_operand.vmem [shape: f32[2,2,16], index: 3, kind: input, shape index: {}]   ;;  %s9489_s10 = inlined_call_operand.vmem [shape: f32[5,2,16], index: 10, kind: output, shape index: {0}]   ;;  %s9490_s8 = inlined_call_operand.vmem [shape: f32[4,16,16], index: 8, kind: input, shape index: {}]   ;;  %s9491_s7 = inlined_call_operand.vmem [shape: f32[4,48,16], index: 7, kind: input, shape index: {}]   ;;  %s9492_s9 = inlined_call_operand.vmem [shape: f32[4,1,16], index: 9, kind: input, shape index: {}]   ;;  %s9493_s11 = inlined_call_operand.vmem [shape: f32[5,2,16], index: 11, kind: output, shape index: {1}]  }
   0x1   :  { %7619 = vmatprep.subr.bf16.mxu1 %v8269_v0  ;;  %7631 = vmatprep.subr.bf16.mxu0 %v8269_v0  ;;  %v62_v1 = vld [vmem:[%s9482_s5] sm:$0xff]  ;;  %v63_v2 = vld [vmem:[%s9482_s5 + $0x8] sm:$0xff]  ;;  %v64_v3 = vld [vmem:[%s9482_s5 + $0x10] sm:$0xff]  ;;  %vm113_vm1 = vcmask 130048   ;;  %vm187_vm4 = vcmask 392192   ;;  %vm740_vm7 = vcmask 123904  }
   0x2   :  { %v8344_v4 = vpack.c.bf16 %v63_v2, %v62_v1  ;;  %v65_v5 = vld [vmem:[%s9482_s5 + $0x18] sm:$0xff]  ;;  %6743 = vmatprep.mubr.msk.f32.mxu1 %vm8270_vm0, %v8271_v6  ;;  %6765 = vmatprep.mubr.msk.f32.mxu0 %vm8270_vm0, %v8271_v6  ;;  %v38_v7 = vld [vmem:[%s9483_s4] sm:$0xff]  ;;  %v39_v9 = vld [vmem:[%s9483_s4 + $0x8] sm:$0xff] }
   0x3   :  { %v8356_v8 = vpack.c.bf16 %v65_v5, %v64_v3  ;;  %v44_v10 = vld [vmem:[%s9483_s4 + $0x30] sm:$0xff]  ;;  %v45_v11 = vld [vmem:[%s9483_s4 + $0x38] sm:$0xff]  ;;  %8103 = vset.pattern.permute.xlu0 %v8272_v12  ;;  %8104 = vset.pattern.permute.xlu1 %v8272_v12  ;;  %v8373_v13 = vld [vmem:[%s9484_s2] sm:$0x3]  ;;  %v8375_v14 = vpack.c.bf16 %v39_v9, %v38_v7 }
   0x4   :  { %7621 = vmatpush3.bf16.msra.mxu1 %v8344_v4  ;;  %v8379_v15 = vpack.c.bf16 %v45_v11, %v44_v10  ;;  %v40_v16 = vld [vmem:[%s9483_s4 + $0x10] sm:$0xff]  ;;  %v41_v17 = vld [vmem:[%s9483_s4 + $0x18] sm:$0xff]  ;;  %v46_v18 = vld [vmem:[%s9483_s4 + $0x40] sm:$0xff] }
   0x5   :  { %7633 = vmatpush3.bf16.msra.mxu0 %v8356_v8  ;;  %7622 = vmatprep.subr.bf16.mxu1 %v8269_v0  ;;  %v47_v19 = vld [vmem:[%s9483_s4 + $0x48] sm:$0xff]  ;;  %v8399_v20 = vpack.c.bf16 %v41_v17, %v40_v16  ;;  %v42_v22 = vld [vmem:[%s9483_s4 + $0x20] sm:$0xff]  ;;  %v48_v24 = vld [vmem:[%s9483_s4 + $0x50] sm:$0xff] }
   0x6   :  { %7634 = vmatprep.subr.bf16.mxu0 %v8269_v0  ;;  %v8403_v21 = vpack.c.bf16 %v47_v19, %v46_v18  ;;  %v43_v23 = vld [vmem:[%s9483_s4 + $0x28] sm:$0xff]  ;;  %v49_v25 = vld [vmem:[%s9483_s4 + $0x58] sm:$0xff]  ;;  %v8428_v27 = vld [vmem:[%s9485_s1] sm:$0x3] }
   0x7   :  { %6744 = vmatmul.mubr.msk.f32.vlgmr.msra.gmra.mrb[0].mxu1 %vm113_vm1, %v8373_v13  ;;  %v8423_v26 = vpack.c.bf16 %v43_v23, %v42_v22  ;;  %v8432_v28 = vpack.c.bf16 %v49_v25, %v48_v24  ;;  %v66_v29 = vld [vmem:[%s9482_s5 + $0x20] sm:$0xff]  ;;  %v67_v30 = vld [vmem:[%s9482_s5 + $0x28] sm:$0xff]  ;;  %vm733_vm2 = vcmp.gt.s32.totalorder %v8428_v27, 0  ;;  %vm1340_vm3 = vcmp.gt.s32.totalorder %v8428_v27, 1  ;;  %v68_v31 = vld [vmem:[%s9482_s5 + $0x30] sm:$0xff] }
   0x8   :  { %6766 = vmatmul.mubr.msk.f32.vlgmr.msra.gmra.mrb[0].mxu0 %vm113_vm1, %v8373_v13  ;;  %7624 = vmatpush3.bf16.msra.mxu1 %v8375_v14  ;;  %v69_v32 = vld [vmem:[%s9482_s5 + $0x38] sm:$0xff]  ;;  %v734_v33 = vsel %vm733_vm2, 1, %v8272_v12  ;;  %v112_v34 = vld [vmem:[%s9486_s0] sm:$0x3]  ;;  %v8454_v35 = vpack.c.bf16 %v67_v30, %v66_v29  ;;  %v1341_v36 = vsel %vm1340_vm3, 1, %v8272_v12  ;;  %v51_v39 = vld [vmem:[%s9483_s4 + $0x68] sm:$0xff] }
   0x9   :  { %7636 = vmatpush3.bf16.msra.mxu0 %v8379_v15  ;;  %7625 = vmatprep.subr.bf16.mxu1 %v8269_v0  ;;  %v8459_v37 = vpack.c.bf16 %v69_v32, %v68_v31  ;;  %v50_v38 = vld [vmem:[%s9483_s4 + $0x60] sm:$0xff]  ;;  %v56_v40 = vld [vmem:[%s9483_s4 + $0x90] sm:$0xff]  ;;  %v57_v41 = vld [vmem:[%s9483_s4 + $0x98] sm:$0xff]  ;;  %vm3161_vm5 = vcmp.gt.s32.totalorder %v8428_v27, 4  ;;  %vm1947_vm8 = vcmp.gt.s32.totalorder %v8428_v27, 2  ;;  %vm2554_vm9 = vcmp.gt.s32.totalorder %v8428_v27, 3 }
   0xa   :  { %7637 = vmatprep.subr.bf16.mxu0 %v8269_v0  ;;  %6758 = vmatprep.mubr.msk.f32.mxu1 %vm8270_vm0, %v8271_v6  ;;  %v8477_v42 = vpack.c.bf16 %v51_v39, %v50_v38  ;;  %v8482_v43 = vpack.c.bf16 %v57_v41, %v56_v40  ;;  %v52_v44 = vld [vmem:[%s9483_s4 + $0x70] sm:$0xff]  ;;  %v53_v45 = vld [vmem:[%s9483_s4 + $0x78] sm:$0xff]  ;;  %v58_v46 = vld [vmem:[%s9483_s4 + $0xa0] sm:$0xff]  ;;  %v3162_v49 = vsel %vm3161_vm5, 1, %v8272_v12 }
   0xb   :  { %6780 = vmatprep.mubr.msk.f32.mxu0 %vm8270_vm0, %v8271_v6  ;;  %736 = vperm.xlu0 %8103, %v734_v33   ;;  %v59_v47 = vld [vmem:[%s9483_s4 + $0xa8] sm:$0xff]  ;;  %v8506_v48 = vpack.c.bf16 %v53_v45, %v52_v44  ;;  %v54_v51 = vld [vmem:[%s9483_s4 + $0x80] sm:$0xff]  ;;  %v60_v53 = vld [vmem:[%s9483_s4 + $0xb0] sm:$0xff] }
   0xc   :  { %7627 = vmatpush3.bf16.msra.mxu1 %v8399_v20  ;;  %v8511_v50 = vpack.c.bf16 %v59_v47, %v58_v46  ;;  %v55_v52 = vld [vmem:[%s9483_s4 + $0x88] sm:$0xff]  ;;  %v61_v54 = vld [vmem:[%s9483_s4 + $0xb8] sm:$0xff]  ;;  %v8555_v61 = vld [vmem:[%s9487_s6] ss:$0 sm:$0xff] }
   0xd   :  { %7639 = vmatpush3.bf16.msra.mxu0 %v8403_v21  ;;  %7628 = vmatprep.subr.bf16.mxu1 %v8269_v0  ;;  %v8531_v55 = vpack.c.bf16 %v55_v52, %v54_v51  ;;  %v8535_v56 = vpack.c.bf16 %v61_v54, %v60_v53  ;;  %v8560_v1 = vld [vmem:[%s9487_s6 + $0x1] ss:$0 sm:$0xff]  ;;  %v8567_v23 = vld [vmem:[%s9487_s6 + $0x2] ss:$0 sm:$0xff]  ;;  %v8572_v30 = vld [vmem:[%s9487_s6 + $0x3] ss:$0 sm:$0xff] }
   0xe   :  { %7640 = vmatprep.subr.bf16.mxu0 %v8269_v0  ;;  %v111_v45 = vld [vmem:[%s9488_s3] sm:$0x3] }
   0xf   :  { %1343 = vperm.xlu0 %8103, %v1341_v36  }
  0x10   :  { %7630 = vmatpush3.bf16.msra.mxu1 %v8423_v26 }
  0x11   :  { %7642 = vmatpush3.bf16.msra.mxu0 %v8432_v28  ;;  %7643 = vmatprep.subr.bf16.mxu1 %v8269_v0 }
  0x12   :  { %7655 = vmatprep.subr.bf16.mxu0 %v8269_v0 }
  0x13   :  { %6759 = vmatmul.mubr.msk.f32.vlgmr.msra.gmra.mrb[2].mxu1 %vm187_vm4, %v112_v34  ;;  %3164 = vperm.xlu0 %8103, %v3162_v49  }
  0x14   :  { %6781 = vmatmul.mubr.msk.f32.vlgmr.msra.gmra.mrb[2].mxu0 %vm187_vm4, %v112_v34  ;;  %7645 = vmatpush3.bf16.msra.mxu1 %v8454_v35 }
  0x15   :  { %7657 = vmatpush3.bf16.msra.mxu0 %v8459_v37  ;;  %6787 = vmatprep.mubr.msk.f32.mxu1 %vm8270_vm0, %v8271_v6 }
  0x16   :  { %6809 = vmatprep.mubr.msk.f32.mxu0 %vm8270_vm0, %v8271_v6  ;;  %7646 = vmatprep.subr.bf16.mxu1 %v8269_v0 }
  0x17   :  { %6788 = vmatmul.mubr.msk.f32.vlgmr.msra.gmra.mrb[4].mxu1 %vm113_vm1, %v8373_v13  ;;  %7658 = vmatprep.subr.bf16.mxu0 %v8269_v0 }
  0x18   :  { %6810 = vmatmul.mubr.msk.f32.vlgmr.msra.gmra.mrb[4].mxu0 %vm113_vm1, %v8373_v13  ;;  %7648 = vmatpush3.bf16.msra.mxu1 %v8477_v42 }
  0x19   :  { %7660 = vmatpush3.bf16.msra.mxu0 %v8482_v43  ;;  %7649 = vmatprep.subr.bf16.mxu1 %v8269_v0 }
  0x1a   :  { %7661 = vmatprep.subr.bf16.mxu0 %v8269_v0  ;;  %6802 = vmatprep.mubr.msk.f32.mxu1 %vm8270_vm0, %v8271_v6 }
  0x1b   :  { %6824 = vmatprep.mubr.msk.f32.mxu0 %vm8270_vm0, %v8271_v6 }
  0x1c   :  { %7651 = vmatpush3.bf16.msra.mxu1 %v8506_v48 }
  0x1d   :  { %7663 = vmatpush3.bf16.msra.mxu0 %v8511_v50  ;;  %7652 = vmatprep.subr.bf16.mxu1 %v8269_v0 }
  0x1e   :  { %7664 = vmatprep.subr.bf16.mxu0 %v8269_v0 }
  0x20   :  { %7654 = vmatpush3.bf16.msra.mxu1 %v8531_v55 }
  0x21   :  { %7666 = vmatpush3.bf16.msra.mxu0 %v8535_v56  ;;  %7667 = vmatprep.subr.bf16.mxu1 %v8269_v0 }
  0x22   :  { %7679 = vmatprep.subr.bf16.mxu0 %v8269_v0 }
  0x23   :  { %6803 = vmatmul.mubr.msk.f32.vlgmr.msra.gmra.mrb[6].mxu1 %vm187_vm4, %v112_v34 }
  0x24   :  { %6825 = vmatmul.mubr.msk.f32.vlgmr.msra.gmra.mrb[6].mxu0 %vm187_vm4, %v112_v34  ;;  %7669 = vmatpush3.bf16.msra.mxu1 %v8344_v4 }
  0x25   :  { %7681 = vmatpush3.bf16.msra.mxu0 %v8356_v8  ;;  %6831 = vmatprep.mubr.msk.f32.mxu1 %vm8270_vm0, %v8271_v6 }
  0x26   :  { %7670 = vmatprep.subr.bf16.mxu1 %v8269_v0  ;;  %6853 = vmatprep.mubr.msk.f32.mxu0 %vm8270_vm0, %v8271_v6 }
  0x27   :  { %7682 = vmatprep.subr.bf16.mxu0 %v8269_v0 }
  0x8a   :  { %v8579_v49 = vpop.permute.xlu0 %736 }
  0x8b   :  { %vm738_vm6 = vcmp.eq.s32.totalorder %v8579_v49, 1 }
  0xda   :  { %v183_v57 = vpop.f32.mrb[0].mxu1 }
  0xdb   :  { %v340_v58 = vpop.f32.mrb[0].mxu0  ;;  %v6745_v59 = vpop.f32.mrb[1].mxu1 }
  0xdc   :  { %v6767_v60 = vpop.f32.mrb[1].mxu0 }
  0xe6   :  { %v257_v62 = vpop.f32.mrb[2].mxu1 }
  0xe7   :  { %v258_v63 = vadd.f32 %v257_v62, %v183_v57  ;;  %v410_v2 = vpop.f32.mrb[2].mxu0  ;;  %v6760_v3 = vpop.f32.mrb[3].mxu1 }
  0xe8   :  { %v411_v5 = vadd.f32 %v410_v2, %v340_v58  ;;  %v6782_v7 = vpop.f32.mrb[3].mxu0 }
  0xe9   :  { %v267_v9 = vadd.f32 %v8555_v61, %v258_v63  ;;  %v2555_v7 = vsel %vm2554_vm9, 1, %v8272_v12 }
  0xea   :  { %v420_v10 = vadd.f32 %v8560_v1, %v411_v5  ;;  %v493_v11 = vpop.f32.mrb[4].mxu1  ;;  %v1948_v5 = vsel %vm1947_vm8, 1, %v8272_v12 }
  0xeb   :  { %v6206_v16 = vmul.f32 -1.442695, %v267_v9  ;;  %v641_v17 = vpop.f32.mrb[4].mxu0  ;;  %v6789_v18 = vpop.f32.mrb[5].mxu1  ;;  %1950 = vperm.xlu1 %8104, %v1948_v5  }
  0xec   :  { %v6210_v19 = vmul.f32 -1.442695, %v420_v10  ;;  %v6811_v22 = vpop.f32.mrb[5].mxu0 }
  0xed   :  { %8105 = vpow2.f32 %v6206_v16 }
  0xee   :  { %8107 = vpow2.f32 %v6210_v19 }
  0xef   :  { %2557 = vperm.xlu1 %8104, %v2555_v7   ;;  %v8669_v7 = vpop.permute.xlu0 %1343 }
  0xf0   :  { %vm1345_vm10 = vcmp.eq.s32.totalorder %v8669_v7, 1  ;;  %v5598_v7 = vld [vmem:[%s9486_s0] sm:$0x3] }
  0xf6   :  { %v563_v24 = vpop.f32.mrb[6].mxu1 }
  0xf7   :  { %v8106_v25 = vpop.eup %8105  ;;  %v564_v29 = vadd.f32 %v563_v24, %v493_v11  ;;  %v711_v31 = vpop.f32.mrb[6].mxu0 }
  0xf8   :  { %v6804_v32 = vpop.f32.mrb[7].mxu1  ;;  %v8108_v33 = vpop.eup %8107  ;;  %v271_v34 = vadd.f32 1.0, %v8106_v25  ;;  %v712_v36 = vadd.f32 %v711_v31, %v641_v17 }
  0xf9   :  { %v6826_v38 = vpop.f32.mrb[7].mxu0  ;;  %v424_v39 = vadd.f32 1.0, %v8108_v33  ;;  %v573_v40 = vadd.f32 %v8567_v23, %v564_v29 }
  0xfa   :  { %8109 = vrcp.f32 %v271_v34  ;;  %v721_v41 = vadd.f32 %v8572_v30, %v712_v36 }
  0xfb   :  { %8111 = vrcp.f32 %v424_v39 }
  0xfc   :  { %8113 = vtanh.f32 %v573_v40  ;;  %v6217_v44 = vmul.f32 -1.442695, %v721_v41 }
  0xfe   :  { %8115 = vpow2.f32 %v6217_v44 }
 0x104   :  { %v8110_v46 = vpop.eup %8109 }
 0x105   :  { %v8112_v47 = vpop.eup %8111 }
 0x106   :  { %v8114_v51 = vpop.eup %8113  ;;  %v728_v52 = vmul.f32 %v8112_v47, %v111_v45 }
 0x107   :  { %v729_v53 = vmul.f32 %v8114_v51, %v8110_v46 }
 0x108   :  { %v8116_v54 = vpop.eup %8115 }
 0x109   :  { %v725_v57 = vadd.f32 1.0, %v8116_v54  ;;  %v730_v58 = vadd.f32 %v729_v53, %v728_v52 }
 0x10b   :  { %8117 = vrcp.f32 %v725_v57  ;;  %v8584_v59 = vsel %vm738_vm6, %v730_v58, %v111_v45 }
 0x10c   :  { %8119 = vtanh.f32 %v730_v58 }
 0x115   :  { %v8118_v60 = vpop.eup %8117 }
 0x116   :  { %v8120_v62 = vpop.eup %8119 }
 0x117   :  { %v732_v63 = vmul.f32 %v8120_v62, %v8118_v60 }
 0x119   :  { %v739_v2 = vsel %vm738_vm6, %v732_v63, 0.0  ;;  %v8591_v3 = vsel %vm738_vm6, %v732_v63, %v8373_v13  ;;  %v6218_v13 = vld [vmem:[%s9486_s0 + $0x2] sm:$0x3] }
 0x11a   :  { %741 = vst.msk [vmem:[%s9489_s10] sm:$0x3] %vm740_vm7, %v739_v2  ;;  %6832 = vmatmul.mubr.msk.f32.vlgmr.msra.gmra.mrb[8].mxu1 %vm113_vm1, %v8591_v3  ;;  %6854 = vmatmul.mubr.msk.f32.vlgmr.msra.gmra.mrb[8].mxu0 %vm113_vm1, %v8591_v3 }
 0x11b   :  { %7672 = vmatpush3.bf16.msra.mxu1 %v8375_v14  ;;  %7684 = vmatpush3.bf16.msra.mxu0 %v8379_v15 }
 0x11c   :  { %7673 = vmatprep.subr.bf16.mxu1 %v8269_v0  ;;  %7685 = vmatprep.subr.bf16.mxu0 %v8269_v0 }
 0x11d   :  { %6846 = vmatprep.mubr.msk.f32.mxu1 %vm8270_vm0, %v8271_v6  ;;  %6868 = vmatprep.mubr.msk.f32.mxu0 %vm8270_vm0, %v8271_v6 }
 0x11f   :  { %7675 = vmatpush3.bf16.msra.mxu1 %v8399_v20  ;;  %7687 = vmatpush3.bf16.msra.mxu0 %v8403_v21 }
 0x120   :  { %7676 = vmatprep.subr.bf16.mxu1 %v8269_v0  ;;  %7688 = vmatprep.subr.bf16.mxu0 %v8269_v0 }
 0x123   :  { %7678 = vmatpush3.bf16.msra.mxu1 %v8423_v26  ;;  %7690 = vmatpush3.bf16.msra.mxu0 %v8432_v28 }
 0x124   :  { %7691 = vmatprep.subr.bf16.mxu1 %v8269_v0  ;;  %7703 = vmatprep.subr.bf16.mxu0 %v8269_v0 }
 0x126   :  { %6847 = vmatmul.mubr.msk.f32.vlgmr.msra.gmra.mrb[10].mxu1 %vm187_vm4, %v6218_v13  ;;  %6869 = vmatmul.mubr.msk.f32.vlgmr.msra.gmra.mrb[10].mxu0 %vm187_vm4, %v6218_v13 }
 0x127   :  { %7693 = vmatpush3.bf16.msra.mxu1 %v8454_v35  ;;  %7705 = vmatpush3.bf16.msra.mxu0 %v8459_v37 }
 0x128   :  { %6875 = vmatprep.mubr.msk.f32.mxu1 %vm8270_vm0, %v8271_v6  ;;  %6897 = vmatprep.mubr.msk.f32.mxu0 %vm8270_vm0, %v8271_v6 }
 0x129   :  { %7694 = vmatprep.subr.bf16.mxu1 %v8269_v0  ;;  %7706 = vmatprep.subr.bf16.mxu0 %v8269_v0 }
 0x12a   :  { %6876 = vmatmul.mubr.msk.f32.vlgmr.msra.gmra.mrb[12].mxu1 %vm113_vm1, %v8591_v3  ;;  %6898 = vmatmul.mubr.msk.f32.vlgmr.msra.gmra.mrb[12].mxu0 %vm113_vm1, %v8591_v3 }
 0x12b   :  { %7696 = vmatpush3.bf16.msra.mxu1 %v8477_v42  ;;  %7708 = vmatpush3.bf16.msra.mxu0 %v8482_v43 }
 0x12c   :  { %7697 = vmatprep.subr.bf16.mxu1 %v8269_v0  ;;  %7709 = vmatprep.subr.bf16.mxu0 %v8269_v0 }
 0x12d   :  { %6890 = vmatprep.mubr.msk.f32.mxu1 %vm8270_vm0, %v8271_v6  ;;  %6912 = vmatprep.mubr.msk.f32.mxu0 %vm8270_vm0, %v8271_v6 }
 0x12f   :  { %7699 = vmatpush3.bf16.msra.mxu1 %v8506_v48  ;;  %7711 = vmatpush3.bf16.msra.mxu0 %v8511_v50 }
 0x130   :  { %7700 = vmatprep.subr.bf16.mxu1 %v8269_v0  ;;  %7712 = vmatprep.subr.bf16.mxu0 %v8269_v0 }
 0x133   :  { %7702 = vmatpush3.bf16.msra.mxu1 %v8531_v55  ;;  %7714 = vmatpush3.bf16.msra.mxu0 %v8535_v56 }
 0x134   :  { %7715 = vmatprep.subr.bf16.mxu1 %v8269_v0  ;;  %7727 = vmatprep.subr.bf16.mxu0 %v8269_v0 }
 0x136   :  { %6891 = vmatmul.mubr.msk.f32.vlgmr.msra.gmra.mrb[14].mxu1 %vm187_vm4, %v6218_v13  ;;  %6913 = vmatmul.mubr.msk.f32.vlgmr.msra.gmra.mrb[14].mxu0 %vm187_vm4, %v6218_v13 }
 0x137   :  { %7717 = vmatpush3.bf16.msra.mxu1 %v8344_v4  ;;  %7729 = vmatpush3.bf16.msra.mxu0 %v8356_v8 }
 0x138   :  { %6919 = vmatprep.mubr.msk.f32.mxu1 %vm8270_vm0, %v8271_v6  ;;  %7718 = vmatprep.subr.bf16.mxu1 %v8269_v0 }
 0x139   :  { %6941 = vmatprep.mubr.msk.f32.mxu0 %vm8270_vm0, %v8271_v6  ;;  %7730 = vmatprep.subr.bf16.mxu0 %v8269_v0 }
 0x1ed   :  { %v815_v9 = vpop.f32.mrb[8].mxu1  ;;  %v965_v10 = vpop.f32.mrb[8].mxu0 }
 0x1ee   :  { %v6833_v11 = vpop.f32.mrb[9].mxu1  ;;  %v6855_v16 = vpop.f32.mrb[9].mxu0 }
 0x1f9   :  { %v888_v17 = vpop.f32.mrb[10].mxu1  ;;  %v1035_v18 = vpop.f32.mrb[10].mxu0 }
 0x1fa   :  { %v889_v19 = vadd.f32 %v888_v17, %v815_v9  ;;  %v1036_v22 = vadd.f32 %v1035_v18, %v965_v10  ;;  %v6848_v24 = vpop.f32.mrb[11].mxu1  ;;  %v6870_v25 = vpop.f32.mrb[11].mxu0 }
 0x1fc   :  { %v892_v29 = vadd.f32 %v8555_v61, %v889_v19  ;;  %v1039_v27 = vadd.f32 %v8560_v1, %v1036_v22 }
 0x1fd   :  { %v1112_v31 = vpop.f32.mrb[12].mxu1  ;;  %v1254_v32 = vpop.f32.mrb[12].mxu0 }
 0x1fe   :  { %v6221_v33 = vmul.f32 -1.442695, %v892_v29  ;;  %v6224_v34 = vmul.f32 -1.442695, %v1039_v27  ;;  %v6877_v12 = vpop.f32.mrb[13].mxu1  ;;  %v6899_v36 = vpop.f32.mrb[13].mxu0 }
 0x200   :  { %8121 = vpow2.f32 %v6221_v33 }
 0x201   :  { %8123 = vpow2.f32 %v6224_v34 }
 0x209   :  { %v1182_v38 = vpop.f32.mrb[14].mxu1  ;;  %v1324_v39 = vpop.f32.mrb[14].mxu0 }
 0x20a   :  { %v8122_v40 = vpop.eup %8121  ;;  %v1183_v41 = vadd.f32 %v1182_v38, %v1112_v31  ;;  %v1325_v44 = vadd.f32 %v1324_v39, %v1254_v32  ;;  %v6892_v45 = vpop.f32.mrb[15].mxu1 }
 0x20b   :  { %v6914_v46 = vpop.f32.mrb[15].mxu0  ;;  %v8124_v47 = vpop.eup %8123  ;;  %v896_v51 = vadd.f32 1.0, %v8122_v40 }
 0x20c   :  { %v1043_v52 = vadd.f32 1.0, %v8124_v47  ;;  %v1186_v53 = vadd.f32 %v8567_v23, %v1183_v41  ;;  %v1328_v54 = vadd.f32 %v8572_v30, %v1325_v44 }
 0x20d   :  { %8125 = vrcp.f32 %v896_v51 }
 0x20e   :  { %8127 = vrcp.f32 %v1043_v52  ;;  %v6229_v57 = vmul.f32 -1.442695, %v1328_v54 }
 0x20f   :  { %8129 = vtanh.f32 %v1186_v53 }
 0x210   :  { %8131 = vpow2.f32 %v6229_v57 }
 0x217   :  { %v8126_v58 = vpop.eup %8125 }
 0x218   :  { %v8128_v60 = vpop.eup %8127 }
 0x219   :  { %v8130_v62 = vpop.eup %8129  ;;  %v1335_v63 = vmul.f32 %v8128_v60, %v8584_v59 }
 0x21a   :  { %v8132_v2 = vpop.eup %8131  ;;  %v1336_v13 = vmul.f32 %v8130_v62, %v8126_v58 }
 0x21b   :  { %v1332_v5 = vadd.f32 1.0, %v8132_v2 }
 0x21c   :  { %v1337_v9 = vadd.f32 %v1336_v13, %v1335_v63 }
 0x21d   :  { %8133 = vrcp.f32 %v1332_v5 }
 0x21e   :  { %8135 = vtanh.f32 %v1337_v9  ;;  %v8675_v10 = vsel %vm1345_vm10, %v1337_v9, %v8584_v59  ;;  %v6231_v59 = vld [vmem:[%s9486_s0 + $0x4] sm:$0x3] }
 0x227   :  { %v8134_v11 = vpop.eup %8133 }
 0x228   :  { %v8136_v16 = vpop.eup %8135 }
 0x229   :  { %v1339_v17 = vmul.f32 %v8136_v16, %v8134_v11  ;;  %v8755_v11 = vpop.permute.xlu1 %1950 }
 0x22a   :  { %vm1952_vm11 = vcmp.eq.s32.totalorder %v8755_v11, 1  ;;  %v6315_v11 = vld [vmem:[%s9486_s0 + $0x2] sm:$0x3] }
 0x22b   :  { %v1346_v18 = vsel %vm1345_vm10, %v1339_v17, 0.0  ;;  %v8682_v19 = vsel %vm1345_vm10, %v1339_v17, %v8591_v3 }
 0x22c   :  { %6230 = vst.msk [vmem:[%s9489_s10 + $0x2] sm:$0x3] %vm740_vm7, %v1346_v18  ;;  %6920 = vmatmul.mubr.msk.f32.vlgmr.msra.gmra.mrb[16].mxu1 %vm113_vm1, %v8682_v19  ;;  %6942 = vmatmul.mubr.msk.f32.vlgmr.msra.gmra.mrb[16].mxu0 %vm113_vm1, %v8682_v19 }
 0x22d   :  { %7720 = vmatpush3.bf16.msra.mxu1 %v8375_v14  ;;  %7732 = vmatpush3.bf16.msra.mxu0 %v8379_v15 }
 0x22e   :  { %7721 = vmatprep.subr.bf16.mxu1 %v8269_v0  ;;  %7733 = vmatprep.subr.bf16.mxu0 %v8269_v0 }
 0x22f   :  { %6934 = vmatprep.mubr.msk.f32.mxu1 %vm8270_vm0, %v8271_v6  ;;  %6956 = vmatprep.mubr.msk.f32.mxu0 %vm8270_vm0, %v8271_v6 }
 0x231   :  { %7723 = vmatpush3.bf16.msra.mxu1 %v8399_v20  ;;  %7735 = vmatpush3.bf16.msra.mxu0 %v8403_v21 }
 0x232   :  { %7724 = vmatprep.subr.bf16.mxu1 %v8269_v0  ;;  %7736 = vmatprep.subr.bf16.mxu0 %v8269_v0 }
 0x235   :  { %7726 = vmatpush3.bf16.msra.mxu1 %v8423_v26  ;;  %7738 = vmatpush3.bf16.msra.mxu0 %v8432_v28 }
 0x236   :  { %7739 = vmatprep.subr.bf16.mxu1 %v8269_v0  ;;  %7751 = vmatprep.subr.bf16.mxu0 %v8269_v0 }
 0x238   :  { %6935 = vmatmul.mubr.msk.f32.vlgmr.msra.gmra.mrb[18].mxu1 %vm187_vm4, %v6231_v59  ;;  %6957 = vmatmul.mubr.msk.f32.vlgmr.msra.gmra.mrb[18].mxu0 %vm187_vm4, %v6231_v59 }
 0x239   :  { %7741 = vmatpush3.bf16.msra.mxu1 %v8454_v35  ;;  %7753 = vmatpush3.bf16.msra.mxu0 %v8459_v37 }
 0x23a   :  { %6963 = vmatprep.mubr.msk.f32.mxu1 %vm8270_vm0, %v8271_v6  ;;  %6985 = vmatprep.mubr.msk.f32.mxu0 %vm8270_vm0, %v8271_v6 }
 0x23b   :  { %7742 = vmatprep.subr.bf16.mxu1 %v8269_v0  ;;  %7754 = vmatprep.subr.bf16.mxu0 %v8269_v0 }
 0x23c   :  { %6964 = vmatmul.mubr.msk.f32.vlgmr.msra.gmra.mrb[20].mxu1 %vm113_vm1, %v8682_v19  ;;  %6986 = vmatmul.mubr.msk.f32.vlgmr.msra.gmra.mrb[20].mxu0 %vm113_vm1, %v8682_v19 }
 0x23d   :  { %7744 = vmatpush3.bf16.msra.mxu1 %v8477_v42  ;;  %7756 = vmatpush3.bf16.msra.mxu0 %v8482_v43 }
 0x23e   :  { %7745 = vmatprep.subr.bf16.mxu1 %v8269_v0  ;;  %7757 = vmatprep.subr.bf16.mxu0 %v8269_v0 }
 0x23f   :  { %6978 = vmatprep.mubr.msk.f32.mxu1 %vm8270_vm0, %v8271_v6  ;;  %7000 = vmatprep.mubr.msk.f32.mxu0 %vm8270_vm0, %v8271_v6 }
 0x241   :  { %7747 = vmatpush3.bf16.msra.mxu1 %v8506_v48  ;;  %7759 = vmatpush3.bf16.msra.mxu0 %v8511_v50 }
 0x242   :  { %7748 = vmatprep.subr.bf16.mxu1 %v8269_v0  ;;  %7760 = vmatprep.subr.bf16.mxu0 %v8269_v0 }
 0x245   :  { %7750 = vmatpush3.bf16.msra.mxu1 %v8531_v55  ;;  %7762 = vmatpush3.bf16.msra.mxu0 %v8535_v56 }
 0x246   :  { %7763 = vmatprep.subr.bf16.mxu1 %v8269_v0  ;;  %7775 = vmatprep.subr.bf16.mxu0 %v8269_v0 }
 0x248   :  { %6979 = vmatmul.mubr.msk.f32.vlgmr.msra.gmra.mrb[22].mxu1 %vm187_vm4, %v6231_v59  ;;  %7001 = vmatmul.mubr.msk.f32.vlgmr.msra.gmra.mrb[22].mxu0 %vm187_vm4, %v6231_v59 }
 0x249   :  { %7765 = vmatpush3.bf16.msra.mxu1 %v8344_v4  ;;  %7777 = vmatpush3.bf16.msra.mxu0 %v8356_v8 }
 0x24a   :  { %7007 = vmatprep.mubr.msk.f32.mxu1 %vm8270_vm0, %v8271_v6  ;;  %7766 = vmatprep.subr.bf16.mxu1 %v8269_v0 }
 0x24b   :  { %7029 = vmatprep.mubr.msk.f32.mxu0 %vm8270_vm0, %v8271_v6  ;;  %7778 = vmatprep.subr.bf16.mxu0 %v8269_v0 }
 0x2ff   :  { %v1422_v3 = vpop.f32.mrb[16].mxu1  ;;  %v1572_v22 = vpop.f32.mrb[16].mxu0 }
 0x300   :  { %v6921_v24 = vpop.f32.mrb[17].mxu1  ;;  %v6943_v25 = vpop.f32.mrb[17].mxu0 }
 0x30b   :  { %v1495_v29 = vpop.f32.mrb[18].mxu1  ;;  %v1642_v27 = vpop.f32.mrb[18].mxu0 }
 0x30c   :  { %v1496_v31 = vadd.f32 %v1495_v29, %v1422_v3  ;;  %v1643_v32 = vadd.f32 %v1642_v27, %v1572_v22  ;;  %v6936_v33 = vpop.f32.mrb[19].mxu1  ;;  %v6958_v34 = vpop.f32.mrb[19].mxu0 }
 0x30e   :  { %v1499_v12 = vadd.f32 %v8555_v61, %v1496_v31  ;;  %v1646_v36 = vadd.f32 %v8560_v1, %v1643_v32 }
 0x30f   :  { %v1719_v38 = vpop.f32.mrb[20].mxu1  ;;  %v1861_v39 = vpop.f32.mrb[20].mxu0 }
 0x310   :  { %v6234_v40 = vmul.f32 -1.442695, %v1499_v12  ;;  %v6237_v41 = vmul.f32 -1.442695, %v1646_v36  ;;  %v6965_v44 = vpop.f32.mrb[21].mxu1  ;;  %v6987_v45 = vpop.f32.mrb[21].mxu0 }
 0x312   :  { %8137 = vpow2.f32 %v6234_v40 }
 0x313   :  { %8139 = vpow2.f32 %v6237_v41 }
 0x31b   :  { %v1789_v46 = vpop.f32.mrb[22].mxu1  ;;  %v1931_v47 = vpop.f32.mrb[22].mxu0 }
 0x31c   :  { %v8138_v51 = vpop.eup %8137  ;;  %v1790_v52 = vadd.f32 %v1789_v46, %v1719_v38  ;;  %v1932_v53 = vadd.f32 %v1931_v47, %v1861_v39  ;;  %v6980_v54 = vpop.f32.mrb[23].mxu1 }
 0x31d   :  { %v7002_v57 = vpop.f32.mrb[23].mxu0  ;;  %v8140_v58 = vpop.eup %8139  ;;  %v1503_v60 = vadd.f32 1.0, %v8138_v51 }
 0x31e   :  { %v1650_v62 = vadd.f32 1.0, %v8140_v58  ;;  %v1793_v63 = vadd.f32 %v8567_v23, %v1790_v52  ;;  %v1935_v2 = vadd.f32 %v8572_v30, %v1932_v53 }
 0x31f   :  { %8141 = vrcp.f32 %v1503_v60 }
 0x320   :  { %8143 = vrcp.f32 %v1650_v62  ;;  %v6242_v13 = vmul.f32 -1.442695, %v1935_v2 }
 0x321   :  { %8145 = vtanh.f32 %v1793_v63 }
 0x322   :  { %8147 = vpow2.f32 %v6242_v13 }
 0x329   :  { %v8142_v5 = vpop.eup %8141 }
 0x32a   :  { %v8144_v9 = vpop.eup %8143 }
 0x32b   :  { %v8146_v16 = vpop.eup %8145  ;;  %v1942_v17 = vmul.f32 %v8144_v9, %v8675_v10 }
 0x32c   :  { %v8148_v18 = vpop.eup %8147  ;;  %v1943_v59 = vmul.f32 %v8146_v16, %v8142_v5 }
 0x32d   :  { %v1939_v3 = vadd.f32 1.0, %v8148_v18 }
 0x32e   :  { %v1944_v22 = vadd.f32 %v1943_v59, %v1942_v17 }
 0x32f   :  { %8149 = vrcp.f32 %v1939_v3 }
 0x330   :  { %8151 = vtanh.f32 %v1944_v22  ;;  %v8762_v24 = vsel %vm1952_vm11, %v1944_v22, %v8675_v10  ;;  %v6244_v10 = vld [vmem:[%s9486_s0 + $0x6] sm:$0x3] }
 0x339   :  { %v8150_v25 = vpop.eup %8149 }
 0x33a   :  { %v8152_v29 = vpop.eup %8151 }
 0x33b   :  { %v1946_v27 = vmul.f32 %v8152_v29, %v8150_v25  ;;  %v8843_v25 = vpop.permute.xlu1 %2557 }
 0x33c   :  { %vm2559_vm12 = vcmp.eq.s32.totalorder %v8843_v25, 1  ;;  %v6302_v25 = vld [vmem:[%s9486_s0 + $0x4] sm:$0x3] }
 0x33d   :  { %v1953_v31 = vsel %vm1952_vm11, %v1946_v27, 0.0  ;;  %v8769_v32 = vsel %vm1952_vm11, %v1946_v27, %v8682_v19 }
 0x33e   :  { %6243 = vst.msk [vmem:[%s9489_s10 + $0x4] sm:$0x3] %vm740_vm7, %v1953_v31  ;;  %7008 = vmatmul.mubr.msk.f32.vlgmr.msra.gmra.mrb[24].mxu1 %vm113_vm1, %v8769_v32  ;;  %7030 = vmatmul.mubr.msk.f32.vlgmr.msra.gmra.mrb[24].mxu0 %vm113_vm1, %v8769_v32 }
 0x33f   :  { %7768 = vmatpush3.bf16.msra.mxu1 %v8375_v14  ;;  %7780 = vmatpush3.bf16.msra.mxu0 %v8379_v15 }
 0x340   :  { %7769 = vmatprep.subr.bf16.mxu1 %v8269_v0  ;;  %7781 = vmatprep.subr.bf16.mxu0 %v8269_v0 }
 0x341   :  { %7022 = vmatprep.mubr.msk.f32.mxu1 %vm8270_vm0, %v8271_v6  ;;  %7044 = vmatprep.mubr.msk.f32.mxu0 %vm8270_vm0, %v8271_v6 }
 0x343   :  { %7771 = vmatpush3.bf16.msra.mxu1 %v8399_v20  ;;  %7783 = vmatpush3.bf16.msra.mxu0 %v8403_v21 }
 0x344   :  { %7772 = vmatprep.subr.bf16.mxu1 %v8269_v0  ;;  %7784 = vmatprep.subr.bf16.mxu0 %v8269_v0 }
 0x347   :  { %7774 = vmatpush3.bf16.msra.mxu1 %v8423_v26  ;;  %7786 = vmatpush3.bf16.msra.mxu0 %v8432_v28 }
 0x348   :  { %7787 = vmatprep.subr.bf16.mxu1 %v8269_v0  ;;  %7799 = vmatprep.subr.bf16.mxu0 %v8269_v0 }
 0x34a   :  { %7023 = vmatmul.mubr.msk.f32.vlgmr.msra.gmra.mrb[26].mxu1 %vm187_vm4, %v6244_v10  ;;  %7045 = vmatmul.mubr.msk.f32.vlgmr.msra.gmra.mrb[26].mxu0 %vm187_vm4, %v6244_v10 }
 0x34b   :  { %7789 = vmatpush3.bf16.msra.mxu1 %v8454_v35  ;;  %7801 = vmatpush3.bf16.msra.mxu0 %v8459_v37 }
 0x34c   :  { %7051 = vmatprep.mubr.msk.f32.mxu1 %vm8270_vm0, %v8271_v6  ;;  %7073 = vmatprep.mubr.msk.f32.mxu0 %vm8270_vm0, %v8271_v6 }
 0x34d   :  { %7790 = vmatprep.subr.bf16.mxu1 %v8269_v0  ;;  %7802 = vmatprep.subr.bf16.mxu0 %v8269_v0 }
 0x34e   :  { %7052 = vmatmul.mubr.msk.f32.vlgmr.msra.gmra.mrb[28].mxu1 %vm113_vm1, %v8769_v32  ;;  %7074 = vmatmul.mubr.msk.f32.vlgmr.msra.gmra.mrb[28].mxu0 %vm113_vm1, %v8769_v32 }
 0x34f   :  { %7792 = vmatpush3.bf16.msra.mxu1 %v8477_v42  ;;  %7804 = vmatpush3.bf16.msra.mxu0 %v8482_v43 }
 0x350   :  { %7793 = vmatprep.subr.bf16.mxu1 %v8269_v0  ;;  %7805 = vmatprep.subr.bf16.mxu0 %v8269_v0 }
 0x351   :  { %7066 = vmatprep.mubr.msk.f32.mxu1 %vm8270_vm0, %v8271_v6  ;;  %7088 = vmatprep.mubr.msk.f32.mxu0 %vm8270_vm0, %v8271_v6 }
 0x353   :  { %7795 = vmatpush3.bf16.msra.mxu1 %v8506_v48  ;;  %7807 = vmatpush3.bf16.msra.mxu0 %v8511_v50 }
 0x354   :  { %7796 = vmatprep.subr.bf16.mxu1 %v8269_v0  ;;  %7808 = vmatprep.subr.bf16.mxu0 %v8269_v0 }
 0x357   :  { %7798 = vmatpush3.bf16.msra.mxu1 %v8531_v55  ;;  %7810 = vmatpush3.bf16.msra.mxu0 %v8535_v56 }
 0x358   :  { %7811 = vmatprep.subr.bf16.mxu1 %v8269_v0  ;;  %7823 = vmatprep.subr.bf16.mxu0 %v8269_v0 }
 0x35a   :  { %7067 = vmatmul.mubr.msk.f32.vlgmr.msra.gmra.mrb[30].mxu1 %vm187_vm4, %v6244_v10  ;;  %7089 = vmatmul.mubr.msk.f32.vlgmr.msra.gmra.mrb[30].mxu0 %vm187_vm4, %v6244_v10 }
 0x35b   :  { %7813 = vmatpush3.bf16.msra.mxu1 %v8344_v4  ;;  %7825 = vmatpush3.bf16.msra.mxu0 %v8356_v8 }
 0x35c   :  { %7095 = vmatprep.mubr.msk.f32.mxu1 %vm8270_vm0, %v8271_v6  ;;  %7814 = vmatprep.subr.bf16.mxu1 %v8269_v0 }
 0x35d   :  { %7117 = vmatprep.mubr.msk.f32.mxu0 %vm8270_vm0, %v8271_v6  ;;  %7826 = vmatprep.subr.bf16.mxu0 %v8269_v0 }
 0x411   :  { %v2029_v19 = vpop.f32.mrb[24].mxu1  ;;  %v2179_v33 = vpop.f32.mrb[24].mxu0 }
 0x412   :  { %v7009_v34 = vpop.f32.mrb[25].mxu1  ;;  %v7031_v12 = vpop.f32.mrb[25].mxu0 }
 0x413   :  { %v82_v12 = vld [vmem:[%s9491_s7 + $0x40] sm:$0xff] }
 0x41d   :  { %v2102_v36 = vpop.f32.mrb[26].mxu1  ;;  %v2249_v38 = vpop.f32.mrb[26].mxu0 }
 0x41e   :  { %v2103_v39 = vadd.f32 %v2102_v36, %v2029_v19  ;;  %v2250_v4 = vadd.f32 %v2249_v38, %v2179_v33  ;;  %v7024_v40 = vpop.f32.mrb[27].mxu1  ;;  %v7046_v8 = vpop.f32.mrb[27].mxu0  ;;  %v83_v36 = vld [vmem:[%s9491_s7 + $0x48] sm:$0xff] }
 0x41f   :  { %v79_v40 = vld [vmem:[%s9491_s7 + $0x28] sm:$0xff]  ;;  %v84_v8 = vld [vmem:[%s9491_s7 + $0x50] sm:$0xff] }
 0x420   :  { %v2106_v41 = vadd.f32 %v8555_v61, %v2103_v39  ;;  %v2253_v44 = vadd.f32 %v8560_v1, %v2250_v4  ;;  %v8976_v39 = vpack.c.bf16 %v83_v36, %v82_v12  ;;  %v78_v4 = vld [vmem:[%s9491_s7 + $0x20] sm:$0xff] }
 0x421   :  { %v2326_v45 = vpop.f32.mrb[28].mxu1  ;;  %v2468_v46 = vpop.f32.mrb[28].mxu0 }
 0x422   :  { %v6247_v47 = vmul.f32 -1.442695, %v2106_v41  ;;  %v6250_v51 = vmul.f32 -1.442695, %v2253_v44  ;;  %v7053_v52 = vpop.f32.mrb[29].mxu1  ;;  %v7075_v53 = vpop.f32.mrb[29].mxu0  ;;  %v8998_v44 = vpack.c.bf16 %v79_v40, %v78_v4 }
 0x423   :  { %v85_v41 = vld [vmem:[%s9491_s7 + $0x58] sm:$0xff]  ;;  %v6272_v53 = vld [vmem:[%s9486_s0 + $0x8] sm:$0x3] }
 0x424   :  { %8153 = vpow2.f32 %v6247_v47  ;;  %v103_v47 = vld [vmem:[%s9490_s8 + $0x28] sm:$0xff]  ;;  %v105_v52 = vld [vmem:[%s9490_s8 + $0x38] sm:$0xff] }
 0x425   :  { %8155 = vpow2.f32 %v6250_v51  ;;  %v104_v51 = vld [vmem:[%s9490_s8 + $0x30] sm:$0xff] }
 0x42d   :  { %v2396_v54 = vpop.f32.mrb[30].mxu1  ;;  %v2538_v57 = vpop.f32.mrb[30].mxu0 }
 0x42e   :  { %v8154_v58 = vpop.eup %8153  ;;  %v2397_v60 = vadd.f32 %v2396_v54, %v2326_v45  ;;  %v2539_v62 = vadd.f32 %v2538_v57, %v2468_v46  ;;  %v7068_v63 = vpop.f32.mrb[31].mxu1  ;;  %v9000_v45 = vpack.c.bf16 %v85_v41, %v84_v8  ;;  %v102_v46 = vld [vmem:[%s9490_s8 + $0x20] sm:$0xff]  ;;  %v9023_v57 = vpack.c.bf16 %v105_v52, %v104_v51 }
 0x42f   :  { %v7090_v2 = vpop.f32.mrb[31].mxu0  ;;  %v8156_v13 = vpop.eup %8155  ;;  %v2110_v5 = vadd.f32 1.0, %v8154_v58  ;;  %v9021_v54 = vpack.c.bf16 %v103_v47, %v102_v46  ;;  %v86_v58 = vld [vmem:[%s9491_s7 + $0x60] sm:$0xff]  ;;  %v93_v63 = vld [vmem:[%s9491_s7 + $0x98] sm:$0xff] }
 0x430   :  { %v2257_v61 = vadd.f32 1.0, %v8156_v13  ;;  %v2400_v1 = vadd.f32 %v8567_v23, %v2397_v60  ;;  %v2542_v9 = vadd.f32 %v8572_v30, %v2539_v62  ;;  %v87_v60 = vld [vmem:[%s9491_s7 + $0x68] sm:$0xff]  ;;  %v92_v62 = vld [vmem:[%s9491_s7 + $0x90] sm:$0xff] }
 0x431   :  { %8157 = vrcp.f32 %v2110_v5  ;;  %v9043_v2 = vpack.c.bf16 %v87_v60, %v86_v58  ;;  %v9045_v13 = vpack.c.bf16 %v93_v63, %v92_v62  ;;  %v88_v5 = vld [vmem:[%s9491_s7 + $0x70] sm:$0xff]  ;;  %v8267_v62 = vld [vmem:[%s9487_s6 + $0x2] ss:$0 sm:$0xff] }
 0x432   :  { %8159 = vrcp.f32 %v2257_v61  ;;  %v6255_v16 = vmul.f32 -1.442695, %v2542_v9  ;;  %v89_v61 = vld [vmem:[%s9491_s7 + $0x78] sm:$0xff]  ;;  %v95_v9 = vld [vmem:[%s9491_s7 + $0xa8] sm:$0xff] }
 0x433   :  { %8161 = vtanh.f32 %v2400_v1  ;;  %v94_v1 = vld [vmem:[%s9491_s7 + $0xa0] sm:$0xff] }
 0x434   :  { %8163 = vpow2.f32 %v6255_v16  ;;  %v9071_v16 = vpack.c.bf16 %v89_v61, %v88_v5  ;;  %v8268_v5 = vld [vmem:[%s9487_s6 + $0x3] ss:$0 sm:$0xff] }
 0x43b   :  { %v8158_v17 = vpop.eup %8157 }
 0x43c   :  { %v8160_v18 = vpop.eup %8159 }
 0x43d   :  { %v8162_v59 = vpop.eup %8161  ;;  %v2549_v3 = vmul.f32 %v8160_v18, %v8762_v24  ;;  %v90_v18 = vld [vmem:[%s9491_s7 + $0x80] sm:$0xff] }
 0x43e   :  { %v8164_v22 = vpop.eup %8163  ;;  %v2550_v29 = vmul.f32 %v8162_v59, %v8158_v17  ;;  %v9073_v17 = vpack.c.bf16 %v95_v9, %v94_v1  ;;  %v91_v59 = vld [vmem:[%s9491_s7 + $0x88] sm:$0xff] }
 0x43f   :  { %v2546_v27 = vadd.f32 1.0, %v8164_v22  ;;  %v97_v22 = vld [vmem:[%s9491_s7 + $0xb8] sm:$0xff] }
 0x440   :  { %v2551_v31 = vadd.f32 %v2550_v29, %v2549_v3  ;;  %v96_v3 = vld [vmem:[%s9491_s7 + $0xb0] sm:$0xff]  ;;  %v9095_v29 = vpack.c.bf16 %v91_v59, %v90_v18 }
 0x441   :  { %8165 = vrcp.f32 %v2546_v27  ;;  %v9097_v27 = vpack.c.bf16 %v97_v22, %v96_v3 }
 0x442   :  { %8167 = vtanh.f32 %v2551_v31  ;;  %v8849_v23 = vsel %vm2559_vm12, %v2551_v31, %v8762_v24  ;;  %v76_v24 = vld [vmem:[%s9491_s7 + $0x10] sm:$0xff] }
 0x44b   :  { %v8166_v30 = vpop.eup %8165 }
 0x44c   :  { %v8168_v10 = vpop.eup %8167 }
 0x44d   :  { %v2553_v19 = vmul.f32 %v8168_v10, %v8166_v30 }
 0x44f   :  { %v2560_v33 = vsel %vm2559_vm12, %v2553_v19, 0.0  ;;  %v2563_v34 = vsel %vm2559_vm12, %v2553_v19, %v8769_v32  ;;  %v77_v32 = vld [vmem:[%s9491_s7 + $0x18] sm:$0xff] }
 0x450   :  { %6256 = vst.msk [vmem:[%s9489_s10 + $0x6] sm:$0x3] %vm740_vm7, %v2560_v33  ;;  %7096 = vmatmul.mubr.msk.f32.vlgmr.msra.gmra.mrb[32].mxu1 %vm113_vm1, %v2563_v34  ;;  %7118 = vmatmul.mubr.msk.f32.vlgmr.msra.gmra.mrb[32].mxu0 %vm113_vm1, %v2563_v34  ;;  %v8974_v38 = vpack.c.bf16 %v77_v32, %v76_v24 }
 0x451   :  { %7816 = vmatpush3.bf16.msra.mxu1 %v8375_v14  ;;  %7828 = vmatpush3.bf16.msra.mxu0 %v8379_v15  ;;  %v6257_v14 = vld [vmem:[%s9486_s0 + $0x8] sm:$0x3]  ;;  %v98_v15 = vld [vmem:[%s9490_s8] sm:$0xff] }
 0x452   :  { %7817 = vmatprep.subr.bf16.mxu1 %v8269_v0  ;;  %7829 = vmatprep.subr.bf16.mxu0 %v8269_v0 }
 0x453   :  { %7110 = vmatprep.mubr.msk.f32.mxu1 %vm8270_vm0, %v8271_v6  ;;  %7132 = vmatprep.mubr.msk.f32.mxu0 %vm8270_vm0, %v8271_v6 }
 0x455   :  { %7819 = vmatpush3.bf16.msra.mxu1 %v8399_v20  ;;  %7831 = vmatpush3.bf16.msra.mxu0 %v8403_v21  ;;  %v99_v20 = vld [vmem:[%s9490_s8 + $0x8] sm:$0xff]  ;;  %v100_v21 = vld [vmem:[%s9490_s8 + $0x10] sm:$0xff] }
 0x456   :  { %7820 = vmatprep.subr.bf16.mxu1 %v8269_v0  ;;  %7832 = vmatprep.subr.bf16.mxu0 %v8269_v0 }
 0x459   :  { %7822 = vmatpush3.bf16.msra.mxu1 %v8423_v26  ;;  %7834 = vmatpush3.bf16.msra.mxu0 %v8432_v28  ;;  %v101_v26 = vld [vmem:[%s9490_s8 + $0x18] sm:$0xff]  ;;  %v8919_v28 = vpack.c.bf16 %v99_v20, %v98_v15 }
 0x45a   :  { %7835 = vmatprep.subr.bf16.mxu1 %v8269_v0  ;;  %7847 = vmatprep.subr.bf16.mxu0 %v8269_v0 }
 0x45c   :  { %7111 = vmatmul.mubr.msk.f32.vlgmr.msra.gmra.mrb[34].mxu1 %vm187_vm4, %v6257_v14  ;;  %7133 = vmatmul.mubr.msk.f32.vlgmr.msra.gmra.mrb[34].mxu0 %vm187_vm4, %v6257_v14 }
 0x45d   :  { %7837 = vmatpush3.bf16.msra.mxu1 %v8454_v35  ;;  %7849 = vmatpush3.bf16.msra.mxu0 %v8459_v37  ;;  %v8921_v35 = vpack.c.bf16 %v101_v26, %v100_v21  ;;  %v74_v37 = vld [vmem:[%s9491_s7] sm:$0xff] }
 0x45e   :  { %7139 = vmatprep.mubr.msk.f32.mxu1 %vm8270_vm0, %v8271_v6  ;;  %7161 = vmatprep.mubr.msk.f32.mxu0 %vm8270_vm0, %v8271_v6  ;;  %v8265_v26 = vld [vmem:[%s9487_s6] ss:$0 sm:$0xff] }
 0x45f   :  { %7838 = vmatprep.subr.bf16.mxu1 %v8269_v0  ;;  %7850 = vmatprep.subr.bf16.mxu0 %v8269_v0 }
 0x460   :  { %7140 = vmatmul.mubr.msk.f32.vlgmr.msra.gmra.mrb[36].mxu1 %vm113_vm1, %v2563_v34  ;;  %7162 = vmatmul.mubr.msk.f32.vlgmr.msra.gmra.mrb[36].mxu0 %vm113_vm1, %v2563_v34 }
 0x461   :  { %7840 = vmatpush3.bf16.msra.mxu1 %v8477_v42  ;;  %7852 = vmatpush3.bf16.msra.mxu0 %v8482_v43  ;;  %v75_v42 = vld [vmem:[%s9491_s7 + $0x8] sm:$0xff]  ;;  %v80_v43 = vld [vmem:[%s9491_s7 + $0x30] sm:$0xff] }
 0x462   :  { %7841 = vmatprep.subr.bf16.mxu1 %v8269_v0  ;;  %7853 = vmatprep.subr.bf16.mxu0 %v8269_v0 }
 0x463   :  { %7154 = vmatprep.mubr.msk.f32.mxu1 %vm8270_vm0, %v8271_v6  ;;  %7176 = vmatprep.mubr.msk.f32.mxu0 %vm8270_vm0, %v8271_v6 }
 0x465   :  { %7843 = vmatpush3.bf16.msra.mxu1 %v8506_v48  ;;  %7855 = vmatpush3.bf16.msra.mxu0 %v8511_v50  ;;  %v81_v48 = vld [vmem:[%s9491_s7 + $0x38] sm:$0xff]  ;;  %v8944_v50 = vld [vmem:[%s9484_s2 + $0x2] sm:$0x3] }
 0x466   :  { %7844 = vmatprep.subr.bf16.mxu1 %v8269_v0  ;;  %7856 = vmatprep.subr.bf16.mxu0 %v8269_v0 }
 0x469   :  { %7846 = vmatpush3.bf16.msra.mxu1 %v8531_v55  ;;  %7858 = vmatpush3.bf16.msra.mxu0 %v8535_v56  ;;  %v8946_v55 = vpack.c.bf16 %v75_v42, %v74_v37  ;;  %v8948_v56 = vpack.c.bf16 %v81_v48, %v80_v43  ;;  %v8266_v42 = vld [vmem:[%s9487_s6 + $0x1] ss:$0 sm:$0xff] }
 0x46a   :  { %7859 = vmatprep.subr.bf16.mxu1 %v8269_v0  ;;  %7871 = vmatprep.subr.bf16.mxu0 %v8269_v0 }
 0x46c   :  { %7155 = vmatmul.mubr.msk.f32.vlgmr.msra.gmra.mrb[38].mxu1 %vm187_vm4, %v6257_v14  ;;  %7177 = vmatmul.mubr.msk.f32.vlgmr.msra.gmra.mrb[38].mxu0 %vm187_vm4, %v6257_v14 }
 0x46d   :  { %7861 = vmatpush3.bf16.msra.mxu1 %v8919_v28  ;;  %7873 = vmatpush3.bf16.msra.mxu0 %v8921_v35 }
 0x46e   :  { %7183 = vmatprep.mubr.msk.f32.mxu1 %vm8270_vm0, %v8271_v6  ;;  %7205 = vmatprep.mubr.msk.f32.mxu0 %vm8270_vm0, %v8271_v6 }
 0x46f   :  { %7862 = vmatprep.subr.bf16.mxu1 %v8269_v0  ;;  %7874 = vmatprep.subr.bf16.mxu0 %v8269_v0 }
 0x470   :  { %7184 = vmatmul.mubr.msk.f32.vlgmr.msra.gmra.mrb[40].mxu1 %vm113_vm1, %v8944_v50  ;;  %7206 = vmatmul.mubr.msk.f32.vlgmr.msra.gmra.mrb[40].mxu0 %vm113_vm1, %v8944_v50 }
 0x471   :  { %7864 = vmatpush3.bf16.msra.mxu1 %v8946_v55  ;;  %7876 = vmatpush3.bf16.msra.mxu0 %v8948_v56 }
 0x472   :  { %7865 = vmatprep.subr.bf16.mxu1 %v8269_v0  ;;  %7877 = vmatprep.subr.bf16.mxu0 %v8269_v0 }
 0x473   :  { %7198 = vmatprep.mubr.msk.f32.mxu1 %vm8270_vm0, %v8271_v6  ;;  %7220 = vmatprep.mubr.msk.f32.mxu0 %vm8270_vm0, %v8271_v6 }
 0x475   :  { %7867 = vmatpush3.bf16.msra.mxu1 %v8974_v38  ;;  %7879 = vmatpush3.bf16.msra.mxu0 %v8976_v39 }
 0x476   :  { %7868 = vmatprep.subr.bf16.mxu1 %v8269_v0  ;;  %7880 = vmatprep.subr.bf16.mxu0 %v8269_v0 }
 0x479   :  { %7870 = vmatpush3.bf16.msra.mxu1 %v8998_v44  ;;  %7882 = vmatpush3.bf16.msra.mxu0 %v9000_v45 }
 0x47a   :  { %7883 = vmatprep.subr.bf16.mxu1 %v8269_v0  ;;  %7895 = vmatprep.subr.bf16.mxu0 %v8269_v0 }
 0x47c   :  { %7199 = vmatmul.mubr.msk.f32.vlgmr.msra.gmra.mrb[42].mxu1 %vm187_vm4, %v6272_v53  ;;  %7221 = vmatmul.mubr.msk.f32.vlgmr.msra.gmra.mrb[42].mxu0 %vm187_vm4, %v6272_v53 }
 0x47d   :  { %7885 = vmatpush3.bf16.msra.mxu1 %v9021_v54  ;;  %7897 = vmatpush3.bf16.msra.mxu0 %v9023_v57 }
 0x47e   :  { %7227 = vmatprep.mubr.msk.f32.mxu1 %vm8270_vm0, %v8271_v6  ;;  %7249 = vmatprep.mubr.msk.f32.mxu0 %vm8270_vm0, %v8271_v6 }
 0x47f   :  { %7886 = vmatprep.subr.bf16.mxu1 %v8269_v0  ;;  %7898 = vmatprep.subr.bf16.mxu0 %v8269_v0 }
 0x480   :  { %7228 = vmatmul.mubr.msk.f32.vlgmr.msra.gmra.mrb[44].mxu1 %vm113_vm1, %v8944_v50  ;;  %7250 = vmatmul.mubr.msk.f32.vlgmr.msra.gmra.mrb[44].mxu0 %vm113_vm1, %v8944_v50 }
 0x481   :  { %7888 = vmatpush3.bf16.msra.mxu1 %v9043_v2  ;;  %7900 = vmatpush3.bf16.msra.mxu0 %v9045_v13 }
 0x482   :  { %7889 = vmatprep.subr.bf16.mxu1 %v8269_v0  ;;  %7901 = vmatprep.subr.bf16.mxu0 %v8269_v0 }
 0x483   :  { %7242 = vmatprep.mubr.msk.f32.mxu1 %vm8270_vm0, %v8271_v6  ;;  %7264 = vmatprep.mubr.msk.f32.mxu0 %vm8270_vm0, %v8271_v6 }
 0x485   :  { %7891 = vmatpush3.bf16.msra.mxu1 %v9071_v16  ;;  %7903 = vmatpush3.bf16.msra.mxu0 %v9073_v17 }
 0x486   :  { %7892 = vmatprep.subr.bf16.mxu1 %v8269_v0  ;;  %7904 = vmatprep.subr.bf16.mxu0 %v8269_v0 }
 0x489   :  { %7894 = vmatpush3.bf16.msra.mxu1 %v9095_v29  ;;  %7906 = vmatpush3.bf16.msra.mxu0 %v9097_v27 }
 0x48a   :  { %7907 = vmatprep.subr.bf16.mxu1 %v8269_v0  ;;  %7919 = vmatprep.subr.bf16.mxu0 %v8269_v0 }
 0x48c   :  { %7243 = vmatmul.mubr.msk.f32.vlgmr.msra.gmra.mrb[46].mxu1 %vm187_vm4, %v6272_v53  ;;  %7265 = vmatmul.mubr.msk.f32.vlgmr.msra.gmra.mrb[46].mxu0 %vm187_vm4, %v6272_v53 }
 0x48d   :  { %7909 = vmatpush3.bf16.msra.mxu1 %v8919_v28  ;;  %7921 = vmatpush3.bf16.msra.mxu0 %v8921_v35 }
 0x48e   :  { %7271 = vmatprep.mubr.msk.f32.mxu1 %vm8270_vm0, %v8271_v6  ;;  %7910 = vmatprep.subr.bf16.mxu1 %v8269_v0 }
 0x48f   :  { %7293 = vmatprep.mubr.msk.f32.mxu0 %vm8270_vm0, %v8271_v6  ;;  %7922 = vmatprep.subr.bf16.mxu0 %v8269_v0 }
 0x523   :  { %v2636_v31 = vpop.f32.mrb[32].mxu1  ;;  %v2786_v30 = vpop.f32.mrb[32].mxu0 }
 0x524   :  { %v7097_v10 = vpop.f32.mrb[33].mxu1  ;;  %v7119_v19 = vpop.f32.mrb[33].mxu0 }
 0x525   :  { %v9131_v19 = vld [vmem:[%s9492_s9] ss:$0 sm:$0xff] }
 0x52f   :  { %v2709_v33 = vpop.f32.mrb[34].mxu1  ;;  %v2856_v34 = vpop.f32.mrb[34].mxu0 }
 0x530   :  { %v2710_v14 = vadd.f32 %v2709_v33, %v2636_v31  ;;  %v2857_v15 = vadd.f32 %v2856_v34, %v2786_v30  ;;  %v7112_v20 = vpop.f32.mrb[35].mxu1  ;;  %v7134_v21 = vpop.f32.mrb[35].mxu0  ;;  %v9136_v34 = vld [vmem:[%s9492_s9 + $0x1] ss:$0 sm:$0xff] }
 0x532   :  { %v2713_v37 = vadd.f32 %v8265_v26, %v2710_v14  ;;  %v2860_v43 = vadd.f32 %v8266_v42, %v2857_v15 }
 0x533   :  { %v2933_v48 = vpop.f32.mrb[36].mxu1  ;;  %v3075_v24 = vpop.f32.mrb[36].mxu0 }
 0x534   :  { %v6260_v32 = vmul.f32 -1.442695, %v2713_v37  ;;  %v6263_v12 = vmul.f32 -1.442695, %v2860_v43  ;;  %v7141_v36 = vpop.f32.mrb[37].mxu1  ;;  %v7163_v4 = vpop.f32.mrb[37].mxu0 }
 0x536   :  { %8169 = vpow2.f32 %v6260_v32 }
 0x537   :  { %8171 = vpow2.f32 %v6263_v12 }
 0x53f   :  { %v3003_v40 = vpop.f32.mrb[38].mxu1  ;;  %v3145_v8 = vpop.f32.mrb[38].mxu0 }
 0x540   :  { %v8170_v41 = vpop.eup %8169  ;;  %v3004_v46 = vadd.f32 %v3003_v40, %v2933_v48  ;;  %v3146_v47 = vadd.f32 %v3145_v8, %v3075_v24  ;;  %v7156_v51 = vpop.f32.mrb[39].mxu1 }
 0x541   :  { %v7178_v52 = vpop.f32.mrb[39].mxu0  ;;  %v8172_v53 = vpop.eup %8171  ;;  %v2717_v58 = vadd.f32 1.0, %v8170_v41 }
 0x542   :  { %v2864_v60 = vadd.f32 1.0, %v8172_v53  ;;  %v3007_v63 = vadd.f32 %v8267_v62, %v3004_v46  ;;  %v3149_v61 = vadd.f32 %v8268_v5, %v3146_v47  ;;  %v3165_v46 = vpop.permute.xlu0 %3164  ;;  %v9143_v52 = vld [vmem:[%s9492_s9 + $0x2] ss:$0 sm:$0xff] }
 0x543   :  { %8173 = vrcp.f32 %v2717_v58  ;;  %v3244_v1 = vpop.f32.mrb[40].mxu1  ;;  %v3400_v9 = vpop.f32.mrb[40].mxu0  ;;  %v9148_v58 = vld [vmem:[%s9492_s9 + $0x3] ss:$0 sm:$0xff]  ;;  %vm3166_vm13 = vcmp.eq.s32.totalorder %v3165_v46, 1 }
 0x544   :  { %8175 = vrcp.f32 %v2864_v60  ;;  %v6268_v18 = vmul.f32 -1.442695, %v3149_v61  ;;  %v7185_v59 = vpop.f32.mrb[41].mxu1  ;;  %v7207_v3 = vpop.f32.mrb[41].mxu0 }
 0x545   :  { %8177 = vtanh.f32 %v3007_v63 }
 0x546   :  { %8179 = vpow2.f32 %v6268_v18 }
 0x54d   :  { %v8174_v22 = vpop.eup %8173 }
 0x54e   :  { %v8176_v31 = vpop.eup %8175 }
 0x54f   :  { %v8178_v30 = vpop.eup %8177  ;;  %v3156_v10 = vmul.f32 %v8176_v31, %v8849_v23  ;;  %v3317_v33 = vpop.f32.mrb[42].mxu1 }
 0x550   :  { %v3470_v14 = vpop.f32.mrb[42].mxu0  ;;  %v8180_v15 = vpop.eup %8179  ;;  %v3157_v20 = vmul.f32 %v8178_v30, %v8174_v22  ;;  %v3318_v21 = vadd.f32 %v3317_v33, %v3244_v1 }
 0x551   :  { %v3471_v26 = vadd.f32 %v3470_v14, %v3400_v9  ;;  %v7200_v37 = vpop.f32.mrb[43].mxu1  ;;  %v7222_v42 = vpop.f32.mrb[43].mxu0  ;;  %v3153_v43 = vadd.f32 1.0, %v8180_v15 }
 0x552   :  { %v3158_v23 = vadd.f32 %v3157_v20, %v3156_v10  ;;  %v3327_v48 = vadd.f32 %v9131_v19, %v3318_v21  ;;  %v6271_v10 = vld [vmem:[%s9488_s3 + $0x2] sm:$0x3] }
 0x553   :  { %v3480_v24 = vadd.f32 %v9136_v34, %v3471_v26  ;;  %8181 = vrcp.f32 %v3153_v43  ;;  %v3553_v32 = vpop.f32.mrb[44].mxu1  ;;  %v3701_v12 = vpop.f32.mrb[44].mxu0 }
 0x554   :  { %8183 = vtanh.f32 %v3158_v23  ;;  %v6276_v36 = vmul.f32 -1.442695, %v3327_v48  ;;  %v7229_v40 = vpop.f32.mrb[45].mxu1  ;;  %v7251_v8 = vpop.f32.mrb[45].mxu0 }
 0x555   :  { %v6280_v4 = vmul.f32 -1.442695, %v3480_v24 }
 0x556   :  { %8185 = vpow2.f32 %v6276_v36 }
 0x557   :  { %8187 = vpow2.f32 %v6280_v4 }
 0x55d   :  { %v8182_v41 = vpop.eup %8181 }
 0x55e   :  { %v8184_v47 = vpop.eup %8183 }
 0x55f   :  { %v3160_v51 = vmul.f32 %v8184_v47, %v8182_v41  ;;  %v3623_v53 = vpop.f32.mrb[46].mxu1  ;;  %v3771_v60 = vpop.f32.mrb[46].mxu0 }
 0x560   :  { %v8186_v62 = vpop.eup %8185  ;;  %v3624_v63 = vadd.f32 %v3623_v53, %v3553_v32  ;;  %v3772_v5 = vadd.f32 %v3771_v60, %v3701_v12  ;;  %v7244_v61 = vpop.f32.mrb[47].mxu1 }
 0x561   :  { %v7266_v1 = vpop.f32.mrb[47].mxu0  ;;  %v8188_v9 = vpop.eup %8187  ;;  %v3167_v18 = vsel %vm3166_vm13, %v3160_v51, 0.0  ;;  %v3331_v59 = vadd.f32 1.0, %v8186_v62 }
 0x562   :  { %6269 = vst.msk [vmem:[%s9489_s10 + $0x8] sm:$0x3] %vm740_vm7, %v3167_v18  ;;  %v3484_v3 = vadd.f32 1.0, %v8188_v9  ;;  %v3633_v22 = vadd.f32 %v9143_v52, %v3624_v63  ;;  %v3781_v31 = vadd.f32 %v9148_v58, %v3772_v5 }
 0x563   :  { %8189 = vrcp.f32 %v3331_v59 }
 0x564   :  { %8191 = vrcp.f32 %v3484_v3  ;;  %v6287_v30 = vmul.f32 -1.442695, %v3781_v31 }
 0x565   :  { %8193 = vtanh.f32 %v3633_v22 }
 0x566   :  { %8195 = vpow2.f32 %v6287_v30 }
 0x56d   :  { %v8190_v33 = vpop.eup %8189 }
 0x56e   :  { %v8192_v14 = vpop.eup %8191 }
 0x56f   :  { %v8194_v15 = vpop.eup %8193  ;;  %v3788_v20 = vmul.f32 %v8192_v14, %v6271_v10 }
 0x570   :  { %v8196_v21 = vpop.eup %8195  ;;  %v3789_v26 = vmul.f32 %v8194_v15, %v8190_v33 }
 0x571   :  { %v3785_v37 = vadd.f32 1.0, %v8196_v21 }
 0x572   :  { %v3790_v42 = vadd.f32 %v3789_v26, %v3788_v20 }
 0x573   :  { %8197 = vrcp.f32 %v3785_v37 }
 0x574   :  { %8199 = vtanh.f32 %v3790_v42  ;;  %v9161_v43 = vsel %vm3166_vm13, %v3790_v42, %v6271_v10 }
 0x57d   :  { %v8198_v23 = vpop.eup %8197 }
 0x57e   :  { %v8200_v48 = vpop.eup %8199 }
 0x57f   :  { %v3792_v24 = vmul.f32 %v8200_v48, %v8198_v23 }
 0x581   :  { %v3793_v32 = vsel %vm3166_vm13, %v3792_v24, 0.0  ;;  %v9166_v12 = vsel %vm3166_vm13, %v3792_v24, %v8944_v50  ;;  %v6289_v50 = vld [vmem:[%s9486_s0 + $0x6] sm:$0x3] }
 0x582   :  { %6288 = vst.msk [vmem:[%s9493_s11 + $0x8] sm:$0x3] %vm740_vm7, %v3793_v32  ;;  %7272 = vmatmul.mubr.msk.f32.vlgmr.msra.gmra.mrb[48].mxu1 %vm113_vm1, %v9166_v12  ;;  %7294 = vmatmul.mubr.msk.f32.vlgmr.msra.gmra.mrb[48].mxu0 %vm113_vm1, %v9166_v12 }
 0x583   :  { %7912 = vmatpush3.bf16.msra.mxu1 %v8946_v55  ;;  %7924 = vmatpush3.bf16.msra.mxu0 %v8948_v56 }
 0x584   :  { %7913 = vmatprep.subr.bf16.mxu1 %v8269_v0  ;;  %7925 = vmatprep.subr.bf16.mxu0 %v8269_v0 }
 0x585   :  { %7286 = vmatprep.mubr.msk.f32.mxu1 %vm8270_vm0, %v8271_v6  ;;  %7308 = vmatprep.mubr.msk.f32.mxu0 %vm8270_vm0, %v8271_v6 }
 0x587   :  { %7915 = vmatpush3.bf16.msra.mxu1 %v8974_v38  ;;  %7927 = vmatpush3.bf16.msra.mxu0 %v8976_v39 }
 0x588   :  { %7916 = vmatprep.subr.bf16.mxu1 %v8269_v0  ;;  %7928 = vmatprep.subr.bf16.mxu0 %v8269_v0 }
 0x58b   :  { %7918 = vmatpush3.bf16.msra.mxu1 %v8998_v44  ;;  %7930 = vmatpush3.bf16.msra.mxu0 %v9000_v45 }
 0x58c   :  { %7931 = vmatprep.subr.bf16.mxu1 %v8269_v0  ;;  %7943 = vmatprep.subr.bf16.mxu0 %v8269_v0 }
 0x58e   :  { %7287 = vmatmul.mubr.msk.f32.vlgmr.msra.gmra.mrb[50].mxu1 %vm187_vm4, %v6289_v50  ;;  %7309 = vmatmul.mubr.msk.f32.vlgmr.msra.gmra.mrb[50].mxu0 %vm187_vm4, %v6289_v50 }
 0x58f   :  { %7933 = vmatpush3.bf16.msra.mxu1 %v9021_v54  ;;  %7945 = vmatpush3.bf16.msra.mxu0 %v9023_v57 }
 0x590   :  { %7315 = vmatprep.mubr.msk.f32.mxu1 %vm8270_vm0, %v8271_v6  ;;  %7337 = vmatprep.mubr.msk.f32.mxu0 %vm8270_vm0, %v8271_v6 }
 0x591   :  { %7934 = vmatprep.subr.bf16.mxu1 %v8269_v0  ;;  %7946 = vmatprep.subr.bf16.mxu0 %v8269_v0 }
 0x592   :  { %7316 = vmatmul.mubr.msk.f32.vlgmr.msra.gmra.mrb[52].mxu1 %vm113_vm1, %v9166_v12  ;;  %7338 = vmatmul.mubr.msk.f32.vlgmr.msra.gmra.mrb[52].mxu0 %vm113_vm1, %v9166_v12 }
 0x593   :  { %7936 = vmatpush3.bf16.msra.mxu1 %v9043_v2  ;;  %7948 = vmatpush3.bf16.msra.mxu0 %v9045_v13 }
 0x594   :  { %7937 = vmatprep.subr.bf16.mxu1 %v8269_v0  ;;  %7949 = vmatprep.subr.bf16.mxu0 %v8269_v0 }
 0x595   :  { %7330 = vmatprep.mubr.msk.f32.mxu1 %vm8270_vm0, %v8271_v6  ;;  %7352 = vmatprep.mubr.msk.f32.mxu0 %vm8270_vm0, %v8271_v6 }
 0x597   :  { %7939 = vmatpush3.bf16.msra.mxu1 %v9071_v16  ;;  %7951 = vmatpush3.bf16.msra.mxu0 %v9073_v17 }
 0x598   :  { %7940 = vmatprep.subr.bf16.mxu1 %v8269_v0  ;;  %7952 = vmatprep.subr.bf16.mxu0 %v8269_v0 }
 0x59b   :  { %7942 = vmatpush3.bf16.msra.mxu1 %v9095_v29  ;;  %7954 = vmatpush3.bf16.msra.mxu0 %v9097_v27 }
 0x59c   :  { %7955 = vmatprep.subr.bf16.mxu1 %v8269_v0  ;;  %7967 = vmatprep.subr.bf16.mxu0 %v8269_v0 }
 0x59e   :  { %7331 = vmatmul.mubr.msk.f32.vlgmr.msra.gmra.mrb[54].mxu1 %vm187_vm4, %v6289_v50  ;;  %7353 = vmatmul.mubr.msk.f32.vlgmr.msra.gmra.mrb[54].mxu0 %vm187_vm4, %v6289_v50 }
 0x59f   :  { %7957 = vmatpush3.bf16.msra.mxu1 %v8919_v28  ;;  %7969 = vmatpush3.bf16.msra.mxu0 %v8921_v35 }
 0x5a0   :  { %7359 = vmatprep.mubr.msk.f32.mxu1 %vm8270_vm0, %v8271_v6  ;;  %7958 = vmatprep.subr.bf16.mxu1 %v8269_v0 }
 0x5a1   :  { %7381 = vmatprep.mubr.msk.f32.mxu0 %vm8270_vm0, %v8271_v6  ;;  %7970 = vmatprep.subr.bf16.mxu0 %v8269_v0 }
 0x655   :  { %v3868_v36 = vpop.f32.mrb[48].mxu1  ;;  %v4018_v4 = vpop.f32.mrb[48].mxu0 }
 0x656   :  { %v7273_v40 = vpop.f32.mrb[49].mxu1  ;;  %v7295_v8 = vpop.f32.mrb[49].mxu0 }
 0x661   :  { %v3941_v41 = vpop.f32.mrb[50].mxu1  ;;  %v4088_v46 = vpop.f32.mrb[50].mxu0 }
 0x662   :  { %v3942_v47 = vadd.f32 %v3941_v41, %v3868_v36  ;;  %v4089_v51 = vadd.f32 %v4088_v46, %v4018_v4  ;;  %v7288_v53 = vpop.f32.mrb[51].mxu1  ;;  %v7310_v60 = vpop.f32.mrb[51].mxu0 }
 0x664   :  { %v3945_v62 = vadd.f32 %v9131_v19, %v3942_v47  ;;  %v4092_v63 = vadd.f32 %v9136_v34, %v4089_v51 }
 0x665   :  { %v4165_v5 = vpop.f32.mrb[52].mxu1  ;;  %v4307_v61 = vpop.f32.mrb[52].mxu0 }
 0x666   :  { %v6292_v1 = vmul.f32 -1.442695, %v3945_v62  ;;  %v6295_v9 = vmul.f32 -1.442695, %v4092_v63  ;;  %v7317_v18 = vpop.f32.mrb[53].mxu1  ;;  %v7339_v59 = vpop.f32.mrb[53].mxu0 }
 0x668   :  { %8201 = vpow2.f32 %v6292_v1 }
 0x669   :  { %8203 = vpow2.f32 %v6295_v9 }
 0x671   :  { %v4235_v3 = vpop.f32.mrb[54].mxu1  ;;  %v4377_v22 = vpop.f32.mrb[54].mxu0 }
 0x672   :  { %v8202_v31 = vpop.eup %8201  ;;  %v4236_v30 = vadd.f32 %v4235_v3, %v4165_v5  ;;  %v4378_v10 = vadd.f32 %v4377_v22, %v4307_v61  ;;  %v7332_v33 = vpop.f32.mrb[55].mxu1 }
 0x673   :  { %v7354_v14 = vpop.f32.mrb[55].mxu0  ;;  %v8204_v15 = vpop.eup %8203  ;;  %v3949_v20 = vadd.f32 1.0, %v8202_v31 }
 0x674   :  { %v4096_v21 = vadd.f32 1.0, %v8204_v15  ;;  %v4239_v26 = vadd.f32 %v9143_v52, %v4236_v30  ;;  %v4381_v37 = vadd.f32 %v9148_v58, %v4378_v10 }
 0x675   :  { %8205 = vrcp.f32 %v3949_v20 }
 0x676   :  { %8207 = vrcp.f32 %v4096_v21  ;;  %v6300_v42 = vmul.f32 -1.442695, %v4381_v37 }
 0x677   :  { %8209 = vtanh.f32 %v4239_v26 }
 0x678   :  { %8211 = vpow2.f32 %v6300_v42 }
 0x67f   :  { %v8206_v23 = vpop.eup %8205 }
 0x680   :  { %v8208_v48 = vpop.eup %8207 }
 0x681   :  { %v8210_v24 = vpop.eup %8209  ;;  %v4388_v32 = vmul.f32 %v8208_v48, %v9161_v43 }
 0x682   :  { %v8212_v50 = vpop.eup %8211  ;;  %v4389_v36 = vmul.f32 %v8210_v24, %v8206_v23 }
 0x683   :  { %v4385_v4 = vadd.f32 1.0, %v8212_v50 }
 0x684   :  { %v4390_v40 = vadd.f32 %v4389_v36, %v4388_v32 }
 0x685   :  { %8213 = vrcp.f32 %v4385_v4 }
 0x686   :  { %8215 = vtanh.f32 %v4390_v40  ;;  %v9243_v8 = vsel %vm2559_vm12, %v4390_v40, %v9161_v43 }
 0x68f   :  { %v8214_v41 = vpop.eup %8213 }
 0x690   :  { %v8216_v46 = vpop.eup %8215 }
 0x691   :  { %v4392_v47 = vmul.f32 %v8216_v46, %v8214_v41 }
 0x693   :  { %v4393_v51 = vsel %vm2559_vm12, %v4392_v47, 0.0  ;;  %v9250_v53 = vsel %vm2559_vm12, %v4392_v47, %v9166_v12 }
 0x694   :  { %6301 = vst.msk [vmem:[%s9493_s11 + $0x6] sm:$0x3] %vm740_vm7, %v4393_v51  ;;  %7360 = vmatmul.mubr.msk.f32.vlgmr.msra.gmra.mrb[56].mxu1 %vm113_vm1, %v9250_v53  ;;  %7382 = vmatmul.mubr.msk.f32.vlgmr.msra.gmra.mrb[56].mxu0 %vm113_vm1, %v9250_v53 }
 0x695   :  { %7960 = vmatpush3.bf16.msra.mxu1 %v8946_v55  ;;  %7972 = vmatpush3.bf16.msra.mxu0 %v8948_v56 }
 0x696   :  { %7961 = vmatprep.subr.bf16.mxu1 %v8269_v0  ;;  %7973 = vmatprep.subr.bf16.mxu0 %v8269_v0 }
 0x697   :  { %7374 = vmatprep.mubr.msk.f32.mxu1 %vm8270_vm0, %v8271_v6  ;;  %7396 = vmatprep.mubr.msk.f32.mxu0 %vm8270_vm0, %v8271_v6 }
 0x699   :  { %7963 = vmatpush3.bf16.msra.mxu1 %v8974_v38  ;;  %7975 = vmatpush3.bf16.msra.mxu0 %v8976_v39 }
 0x69a   :  { %7964 = vmatprep.subr.bf16.mxu1 %v8269_v0  ;;  %7976 = vmatprep.subr.bf16.mxu0 %v8269_v0 }
 0x69d   :  { %7966 = vmatpush3.bf16.msra.mxu1 %v8998_v44  ;;  %7978 = vmatpush3.bf16.msra.mxu0 %v9000_v45 }
 0x69e   :  { %7979 = vmatprep.subr.bf16.mxu1 %v8269_v0  ;;  %7991 = vmatprep.subr.bf16.mxu0 %v8269_v0 }
 0x6a0   :  { %7375 = vmatmul.mubr.msk.f32.vlgmr.msra.gmra.mrb[58].mxu1 %vm187_vm4, %v6302_v25  ;;  %7397 = vmatmul.mubr.msk.f32.vlgmr.msra.gmra.mrb[58].mxu0 %vm187_vm4, %v6302_v25 }
 0x6a1   :  { %7981 = vmatpush3.bf16.msra.mxu1 %v9021_v54  ;;  %7993 = vmatpush3.bf16.msra.mxu0 %v9023_v57 }
 0x6a2   :  { %7403 = vmatprep.mubr.msk.f32.mxu1 %vm8270_vm0, %v8271_v6  ;;  %7425 = vmatprep.mubr.msk.f32.mxu0 %vm8270_vm0, %v8271_v6 }
 0x6a3   :  { %7982 = vmatprep.subr.bf16.mxu1 %v8269_v0  ;;  %7994 = vmatprep.subr.bf16.mxu0 %v8269_v0 }
 0x6a4   :  { %7404 = vmatmul.mubr.msk.f32.vlgmr.msra.gmra.mrb[60].mxu1 %vm113_vm1, %v9250_v53  ;;  %7426 = vmatmul.mubr.msk.f32.vlgmr.msra.gmra.mrb[60].mxu0 %vm113_vm1, %v9250_v53 }
 0x6a5   :  { %7984 = vmatpush3.bf16.msra.mxu1 %v9043_v2  ;;  %7996 = vmatpush3.bf16.msra.mxu0 %v9045_v13 }
 0x6a6   :  { %7985 = vmatprep.subr.bf16.mxu1 %v8269_v0  ;;  %7997 = vmatprep.subr.bf16.mxu0 %v8269_v0 }
 0x6a7   :  { %7418 = vmatprep.mubr.msk.f32.mxu1 %vm8270_vm0, %v8271_v6  ;;  %7440 = vmatprep.mubr.msk.f32.mxu0 %vm8270_vm0, %v8271_v6 }
 0x6a9   :  { %7987 = vmatpush3.bf16.msra.mxu1 %v9071_v16  ;;  %7999 = vmatpush3.bf16.msra.mxu0 %v9073_v17 }
 0x6aa   :  { %7988 = vmatprep.subr.bf16.mxu1 %v8269_v0  ;;  %8000 = vmatprep.subr.bf16.mxu0 %v8269_v0 }
 0x6ad   :  { %7990 = vmatpush3.bf16.msra.mxu1 %v9095_v29  ;;  %8002 = vmatpush3.bf16.msra.mxu0 %v9097_v27 }
 0x6ae   :  { %8003 = vmatprep.subr.bf16.mxu1 %v8269_v0  ;;  %8015 = vmatprep.subr.bf16.mxu0 %v8269_v0 }
 0x6b0   :  { %7419 = vmatmul.mubr.msk.f32.vlgmr.msra.gmra.mrb[62].mxu1 %vm187_vm4, %v6302_v25  ;;  %7441 = vmatmul.mubr.msk.f32.vlgmr.msra.gmra.mrb[62].mxu0 %vm187_vm4, %v6302_v25 }
 0x6b1   :  { %8005 = vmatpush3.bf16.msra.mxu1 %v8919_v28  ;;  %8017 = vmatpush3.bf16.msra.mxu0 %v8921_v35 }
 0x6b2   :  { %7447 = vmatprep.mubr.msk.f32.mxu1 %vm8270_vm0, %v8271_v6  ;;  %8006 = vmatprep.subr.bf16.mxu1 %v8269_v0 }
 0x6b3   :  { %7469 = vmatprep.mubr.msk.f32.mxu0 %vm8270_vm0, %v8271_v6  ;;  %8018 = vmatprep.subr.bf16.mxu0 %v8269_v0 }
 0x767   :  { %v4468_v43 = vpop.f32.mrb[56].mxu1  ;;  %v4618_v12 = vpop.f32.mrb[56].mxu0 }
 0x768   :  { %v7361_v60 = vpop.f32.mrb[57].mxu1  ;;  %v7383_v62 = vpop.f32.mrb[57].mxu0 }
 0x773   :  { %v4541_v63 = vpop.f32.mrb[58].mxu1  ;;  %v4688_v5 = vpop.f32.mrb[58].mxu0 }
 0x774   :  { %v4542_v61 = vadd.f32 %v4541_v63, %v4468_v43  ;;  %v4689_v1 = vadd.f32 %v4688_v5, %v4618_v12  ;;  %v7376_v9 = vpop.f32.mrb[59].mxu1  ;;  %v7398_v18 = vpop.f32.mrb[59].mxu0 }
 0x776   :  { %v4545_v59 = vadd.f32 %v9131_v19, %v4542_v61  ;;  %v4692_v3 = vadd.f32 %v9136_v34, %v4689_v1 }
 0x777   :  { %v4765_v22 = vpop.f32.mrb[60].mxu1  ;;  %v4907_v31 = vpop.f32.mrb[60].mxu0 }
 0x778   :  { %v6305_v30 = vmul.f32 -1.442695, %v4545_v59  ;;  %v6308_v10 = vmul.f32 -1.442695, %v4692_v3  ;;  %v7405_v33 = vpop.f32.mrb[61].mxu1  ;;  %v7427_v14 = vpop.f32.mrb[61].mxu0 }
 0x77a   :  { %8217 = vpow2.f32 %v6305_v30 }
 0x77b   :  { %8219 = vpow2.f32 %v6308_v10 }
 0x783   :  { %v4835_v15 = vpop.f32.mrb[62].mxu1  ;;  %v4977_v20 = vpop.f32.mrb[62].mxu0 }
 0x784   :  { %v8218_v21 = vpop.eup %8217  ;;  %v4836_v26 = vadd.f32 %v4835_v15, %v4765_v22  ;;  %v4978_v37 = vadd.f32 %v4977_v20, %v4907_v31  ;;  %v7420_v42 = vpop.f32.mrb[63].mxu1 }
 0x785   :  { %v7442_v23 = vpop.f32.mrb[63].mxu0  ;;  %v8220_v48 = vpop.eup %8219  ;;  %v4549_v24 = vadd.f32 1.0, %v8218_v21 }
 0x786   :  { %v4696_v32 = vadd.f32 1.0, %v8220_v48  ;;  %v4839_v50 = vadd.f32 %v9143_v52, %v4836_v26  ;;  %v4981_v36 = vadd.f32 %v9148_v58, %v4978_v37 }
 0x787   :  { %8221 = vrcp.f32 %v4549_v24 }
 0x788   :  { %8223 = vrcp.f32 %v4696_v32  ;;  %v6313_v4 = vmul.f32 -1.442695, %v4981_v36 }
 0x789   :  { %8225 = vtanh.f32 %v4839_v50 }
 0x78a   :  { %8227 = vpow2.f32 %v6313_v4 }
 0x791   :  { %v8222_v40 = vpop.eup %8221 }
 0x792   :  { %v8224_v41 = vpop.eup %8223 }
 0x793   :  { %v8226_v46 = vpop.eup %8225  ;;  %v4988_v47 = vmul.f32 %v8224_v41, %v9243_v8 }
 0x794   :  { %v8228_v51 = vpop.eup %8227  ;;  %v4989_v25 = vmul.f32 %v8226_v46, %v8222_v40 }
 0x795   :  { %v4985_v43 = vadd.f32 1.0, %v8228_v51 }
 0x796   :  { %v4990_v12 = vadd.f32 %v4989_v25, %v4988_v47 }
 0x797   :  { %8229 = vrcp.f32 %v4985_v43 }
 0x798   :  { %8231 = vtanh.f32 %v4990_v12  ;;  %v9327_v60 = vsel %vm1952_vm11, %v4990_v12, %v9243_v8 }
 0x7a1   :  { %v8230_v62 = vpop.eup %8229 }
 0x7a2   :  { %v8232_v63 = vpop.eup %8231 }
 0x7a3   :  { %v4992_v5 = vmul.f32 %v8232_v63, %v8230_v62 }
 0x7a5   :  { %v4993_v61 = vsel %vm1952_vm11, %v4992_v5, 0.0  ;;  %v9334_v1 = vsel %vm1952_vm11, %v4992_v5, %v9250_v53 }
 0x7a6   :  { %6314 = vst.msk [vmem:[%s9493_s11 + $0x4] sm:$0x3] %vm740_vm7, %v4993_v61  ;;  %7448 = vmatmul.mubr.msk.f32.vlgmr.msra.gmra.mrb[64].mxu1 %vm113_vm1, %v9334_v1  ;;  %7470 = vmatmul.mubr.msk.f32.vlgmr.msra.gmra.mrb[64].mxu0 %vm113_vm1, %v9334_v1 }
 0x7a7   :  { %8008 = vmatpush3.bf16.msra.mxu1 %v8946_v55  ;;  %8020 = vmatpush3.bf16.msra.mxu0 %v8948_v56 }
 0x7a8   :  { %8009 = vmatprep.subr.bf16.mxu1 %v8269_v0  ;;  %8021 = vmatprep.subr.bf16.mxu0 %v8269_v0 }
 0x7a9   :  { %7462 = vmatprep.mubr.msk.f32.mxu1 %vm8270_vm0, %v8271_v6  ;;  %7484 = vmatprep.mubr.msk.f32.mxu0 %vm8270_vm0, %v8271_v6 }
 0x7ab   :  { %8011 = vmatpush3.bf16.msra.mxu1 %v8974_v38  ;;  %8023 = vmatpush3.bf16.msra.mxu0 %v8976_v39 }
 0x7ac   :  { %8012 = vmatprep.subr.bf16.mxu1 %v8269_v0  ;;  %8024 = vmatprep.subr.bf16.mxu0 %v8269_v0 }
 0x7af   :  { %8014 = vmatpush3.bf16.msra.mxu1 %v8998_v44  ;;  %8026 = vmatpush3.bf16.msra.mxu0 %v9000_v45 }
 0x7b0   :  { %8027 = vmatprep.subr.bf16.mxu1 %v8269_v0  ;;  %8039 = vmatprep.subr.bf16.mxu0 %v8269_v0 }
 0x7b2   :  { %7463 = vmatmul.mubr.msk.f32.vlgmr.msra.gmra.mrb[66].mxu1 %vm187_vm4, %v6315_v11  ;;  %7485 = vmatmul.mubr.msk.f32.vlgmr.msra.gmra.mrb[66].mxu0 %vm187_vm4, %v6315_v11 }
 0x7b3   :  { %8029 = vmatpush3.bf16.msra.mxu1 %v9021_v54  ;;  %8041 = vmatpush3.bf16.msra.mxu0 %v9023_v57 }
 0x7b4   :  { %7491 = vmatprep.mubr.msk.f32.mxu1 %vm8270_vm0, %v8271_v6  ;;  %7513 = vmatprep.mubr.msk.f32.mxu0 %vm8270_vm0, %v8271_v6 }
 0x7b5   :  { %8030 = vmatprep.subr.bf16.mxu1 %v8269_v0  ;;  %8042 = vmatprep.subr.bf16.mxu0 %v8269_v0 }
 0x7b6   :  { %7492 = vmatmul.mubr.msk.f32.vlgmr.msra.gmra.mrb[68].mxu1 %vm113_vm1, %v9334_v1  ;;  %7514 = vmatmul.mubr.msk.f32.vlgmr.msra.gmra.mrb[68].mxu0 %vm113_vm1, %v9334_v1 }
 0x7b7   :  { %8032 = vmatpush3.bf16.msra.mxu1 %v9043_v2  ;;  %8044 = vmatpush3.bf16.msra.mxu0 %v9045_v13 }
 0x7b8   :  { %8033 = vmatprep.subr.bf16.mxu1 %v8269_v0  ;;  %8045 = vmatprep.subr.bf16.mxu0 %v8269_v0 }
 0x7b9   :  { %7506 = vmatprep.mubr.msk.f32.mxu1 %vm8270_vm0, %v8271_v6  ;;  %7528 = vmatprep.mubr.msk.f32.mxu0 %vm8270_vm0, %v8271_v6 }
 0x7bb   :  { %8035 = vmatpush3.bf16.msra.mxu1 %v9071_v16  ;;  %8047 = vmatpush3.bf16.msra.mxu0 %v9073_v17 }
 0x7bc   :  { %8036 = vmatprep.subr.bf16.mxu1 %v8269_v0  ;;  %8048 = vmatprep.subr.bf16.mxu0 %v8269_v0 }
 0x7bf   :  { %8038 = vmatpush3.bf16.msra.mxu1 %v9095_v29  ;;  %8050 = vmatpush3.bf16.msra.mxu0 %v9097_v27 }
 0x7c0   :  { %8051 = vmatprep.subr.bf16.mxu1 %v8269_v0  ;;  %8063 = vmatprep.subr.bf16.mxu0 %v8269_v0 }
 0x7c2   :  { %7507 = vmatmul.mubr.msk.f32.vlgmr.msra.gmra.mrb[70].mxu1 %vm187_vm4, %v6315_v11  ;;  %7529 = vmatmul.mubr.msk.f32.vlgmr.msra.gmra.mrb[70].mxu0 %vm187_vm4, %v6315_v11 }
 0x7c3   :  { %8053 = vmatpush3.bf16.msra.mxu1 %v8919_v28  ;;  %8065 = vmatpush3.bf16.msra.mxu0 %v8921_v35 }
 0x7c4   :  { %7535 = vmatprep.mubr.msk.f32.mxu1 %vm8270_vm0, %v8271_v6  ;;  %8054 = vmatprep.subr.bf16.mxu1 %v8269_v0 }
 0x7c5   :  { %7557 = vmatprep.mubr.msk.f32.mxu0 %vm8270_vm0, %v8271_v6  ;;  %8066 = vmatprep.subr.bf16.mxu0 %v8269_v0 }
 0x879   :  { %v5068_v8 = vpop.f32.mrb[64].mxu1  ;;  %v5218_v53 = vpop.f32.mrb[64].mxu0 }
 0x87a   :  { %v7449_v9 = vpop.f32.mrb[65].mxu1  ;;  %v7471_v18 = vpop.f32.mrb[65].mxu0 }
 0x885   :  { %v5141_v59 = vpop.f32.mrb[66].mxu1  ;;  %v5288_v3 = vpop.f32.mrb[66].mxu0 }
 0x886   :  { %v5142_v22 = vadd.f32 %v5141_v59, %v5068_v8  ;;  %v5289_v28 = vadd.f32 %v5288_v3, %v5218_v53  ;;  %v7464_v31 = vpop.f32.mrb[67].mxu1  ;;  %v7486_v35 = vpop.f32.mrb[67].mxu0 }
 0x888   :  { %v5145_v30 = vadd.f32 %v9131_v19, %v5142_v22  ;;  %v5292_v10 = vadd.f32 %v9136_v34, %v5289_v28 }
 0x889   :  { %v5365_v33 = vpop.f32.mrb[68].mxu1  ;;  %v5507_v14 = vpop.f32.mrb[68].mxu0 }
 0x88a   :  { %v6318_v15 = vmul.f32 -1.442695, %v5145_v30  ;;  %v6321_v20 = vmul.f32 -1.442695, %v5292_v10  ;;  %v7493_v21 = vpop.f32.mrb[69].mxu1  ;;  %v7515_v26 = vpop.f32.mrb[69].mxu0 }
 0x88c   :  { %8233 = vpow2.f32 %v6318_v15 }
 0x88d   :  { %8235 = vpow2.f32 %v6321_v20 }
 0x895   :  { %v5435_v37 = vpop.f32.mrb[70].mxu1  ;;  %v5577_v42 = vpop.f32.mrb[70].mxu0 }
 0x896   :  { %v8234_v23 = vpop.eup %8233  ;;  %v5436_v48 = vadd.f32 %v5435_v37, %v5365_v33  ;;  %v5578_v24 = vadd.f32 %v5577_v42, %v5507_v14  ;;  %v7508_v32 = vpop.f32.mrb[71].mxu1 }
 0x897   :  { %v7530_v50 = vpop.f32.mrb[71].mxu0  ;;  %v8236_v36 = vpop.eup %8235  ;;  %v5149_v4 = vadd.f32 1.0, %v8234_v23 }
 0x898   :  { %v5296_v40 = vadd.f32 1.0, %v8236_v36  ;;  %v5439_v41 = vadd.f32 %v9143_v52, %v5436_v48  ;;  %v5581_v46 = vadd.f32 %v9148_v58, %v5578_v24 }
 0x899   :  { %8237 = vrcp.f32 %v5149_v4 }
 0x89a   :  { %8239 = vrcp.f32 %v5296_v40  ;;  %v6326_v47 = vmul.f32 -1.442695, %v5581_v46 }
 0x89b   :  { %8241 = vtanh.f32 %v5439_v41 }
 0x89c   :  { %8243 = vpow2.f32 %v6326_v47 }
 0x8a3   :  { %v8238_v51 = vpop.eup %8237 }
 0x8a4   :  { %v8240_v25 = vpop.eup %8239 }
 0x8a5   :  { %v8242_v43 = vpop.eup %8241  ;;  %v5588_v12 = vmul.f32 %v8240_v25, %v9327_v60 }
 0x8a6   :  { %v8244_v62 = vpop.eup %8243  ;;  %v5589_v63 = vmul.f32 %v8242_v43, %v8238_v51 }
 0x8a7   :  { %v5585_v5 = vadd.f32 1.0, %v8244_v62 }
 0x8a8   :  { %v5590_v61 = vadd.f32 %v5589_v63, %v5588_v12 }
 0x8a9   :  { %8245 = vrcp.f32 %v5585_v5 }
 0x8aa   :  { %8247 = vtanh.f32 %v5590_v61  ;;  %v9411_v11 = vsel %vm1345_vm10, %v5590_v61, %v9327_v60 }
 0x8b3   :  { %v8246_v8 = vpop.eup %8245 }
 0x8b4   :  { %v8248_v53 = vpop.eup %8247 }
 0x8b5   :  { %v5592_v9 = vmul.f32 %v8248_v53, %v8246_v8 }
 0x8b7   :  { %v5593_v18 = vsel %vm1345_vm10, %v5592_v9, 0.0  ;;  %v5596_v59 = vsel %vm1345_vm10, %v5592_v9, %v9334_v1 }
 0x8b8   :  { %6327 = vst.msk [vmem:[%s9493_s11 + $0x2] sm:$0x3] %vm740_vm7, %v5593_v18  ;;  %7536 = vmatmul.mubr.msk.f32.vlgmr.msra.gmra.mrb[72].mxu1 %vm113_vm1, %v5596_v59  ;;  %7558 = vmatmul.mubr.msk.f32.vlgmr.msra.gmra.mrb[72].mxu0 %vm113_vm1, %v5596_v59 }
 0x8b9   :  { %8056 = vmatpush3.bf16.msra.mxu1 %v8946_v55  ;;  %8068 = vmatpush3.bf16.msra.mxu0 %v8948_v56 }
 0x8ba   :  { %8057 = vmatprep.subr.bf16.mxu1 %v8269_v0  ;;  %8069 = vmatprep.subr.bf16.mxu0 %v8269_v0 }
 0x8bb   :  { %7550 = vmatprep.mubr.msk.f32.mxu1 %vm8270_vm0, %v8271_v6  ;;  %7572 = vmatprep.mubr.msk.f32.mxu0 %vm8270_vm0, %v8271_v6 }
 0x8bd   :  { %8059 = vmatpush3.bf16.msra.mxu1 %v8974_v38  ;;  %8071 = vmatpush3.bf16.msra.mxu0 %v8976_v39 }
 0x8be   :  { %8060 = vmatprep.subr.bf16.mxu1 %v8269_v0  ;;  %8072 = vmatprep.subr.bf16.mxu0 %v8269_v0 }
 0x8c1   :  { %8062 = vmatpush3.bf16.msra.mxu1 %v8998_v44  ;;  %8074 = vmatpush3.bf16.msra.mxu0 %v9000_v45 }
 0x8c2   :  { %8075 = vmatprep.subr.bf16.mxu1 %v8269_v0  ;;  %8087 = vmatprep.subr.bf16.mxu0 %v8269_v0 }
 0x8c4   :  { %7551 = vmatmul.mubr.msk.f32.vlgmr.msra.gmra.mrb[74].mxu1 %vm187_vm4, %v5598_v7  ;;  %7573 = vmatmul.mubr.msk.f32.vlgmr.msra.gmra.mrb[74].mxu0 %vm187_vm4, %v5598_v7 }
 0x8c5   :  { %8077 = vmatpush3.bf16.msra.mxu1 %v9021_v54  ;;  %8089 = vmatpush3.bf16.msra.mxu0 %v9023_v57 }
 0x8c6   :  { %7579 = vmatprep.mubr.msk.f32.mxu1 %vm8270_vm0, %v8271_v6  ;;  %7601 = vmatprep.mubr.msk.f32.mxu0 %vm8270_vm0, %v8271_v6 }
 0x8c7   :  { %8078 = vmatprep.subr.bf16.mxu1 %v8269_v0  ;;  %8090 = vmatprep.subr.bf16.mxu0 %v8269_v0 }
 0x8c8   :  { %7580 = vmatmul.mubr.msk.f32.vlgmr.msra.gmra.mrb[76].mxu1 %vm113_vm1, %v5596_v59  ;;  %7602 = vmatmul.mubr.msk.f32.vlgmr.msra.gmra.mrb[76].mxu0 %vm113_vm1, %v5596_v59 }
 0x8c9   :  { %8080 = vmatpush3.bf16.msra.mxu1 %v9043_v2  ;;  %8092 = vmatpush3.bf16.msra.mxu0 %v9045_v13 }
 0x8ca   :  { %8081 = vmatprep.subr.bf16.mxu1 %v8269_v0  ;;  %8093 = vmatprep.subr.bf16.mxu0 %v8269_v0 }
 0x8cb   :  { %7594 = vmatprep.mubr.msk.f32.mxu1 %vm8270_vm0, %v8271_v6  ;;  %7616 = vmatprep.mubr.msk.f32.mxu0 %vm8270_vm0, %v8271_v6 }
 0x8cd   :  { %8083 = vmatpush3.bf16.msra.mxu1 %v9071_v16  ;;  %8095 = vmatpush3.bf16.msra.mxu0 %v9073_v17 }
 0x8ce   :  { %8084 = vmatprep.subr.bf16.mxu1 %v8269_v0  ;;  %8096 = vmatprep.subr.bf16.mxu0 %v8269_v0 }
 0x8d1   :  { %8086 = vmatpush3.bf16.msra.mxu1 %v9095_v29  ;;  %8098 = vmatpush3.bf16.msra.mxu0 %v9097_v27 }
 0x8d4   :  { %7595 = vmatmul.mubr.msk.f32.vlgmr.msra.gmra.mrb[78].mxu1 %vm187_vm4, %v5598_v7  ;;  %7617 = vmatmul.mubr.msk.f32.vlgmr.msra.gmra.mrb[78].mxu0 %vm187_vm4, %v5598_v7 }
 0x98b   :  { %v5668_v55 = vpop.f32.mrb[72].mxu1  ;;  %v5818_v56 = vpop.f32.mrb[72].mxu0 }
 0x98c   :  { %v7537_v38 = vpop.f32.mrb[73].mxu1  ;;  %v7559_v6 = vpop.f32.mrb[73].mxu0 }
 0x997   :  { %v5741_v39 = vpop.f32.mrb[74].mxu1  ;;  %v5888_v44 = vpop.f32.mrb[74].mxu0 }
 0x998   :  { %v5742_v45 = vadd.f32 %v5741_v39, %v5668_v55  ;;  %v5889_v54 = vadd.f32 %v5888_v44, %v5818_v56  ;;  %v7552_v57 = vpop.f32.mrb[75].mxu1  ;;  %v7574_v2 = vpop.f32.mrb[75].mxu0 }
 0x99a   :  { %v5745_v0 = vadd.f32 %v9131_v19, %v5742_v45  ;;  %v5892_v13 = vadd.f32 %v9136_v34, %v5889_v54 }
 0x99b   :  { %v5965_v16 = vpop.f32.mrb[76].mxu1  ;;  %v6107_v17 = vpop.f32.mrb[76].mxu0 }
 0x99c   :  { %v6330_v29 = vmul.f32 -1.442695, %v5745_v0  ;;  %v6333_v27 = vmul.f32 -1.442695, %v5892_v13  ;;  %v7581_v60 = vpop.f32.mrb[77].mxu1  ;;  %v7603_v1 = vpop.f32.mrb[77].mxu0 }
 0x99e   :  { %8249 = vpow2.f32 %v6330_v29 }
 0x99f   :  { %8251 = vpow2.f32 %v6333_v27 }
 0x9a7   :  { %v6035_v3 = vpop.f32.mrb[78].mxu1  ;;  %v6177_v22 = vpop.f32.mrb[78].mxu0 }
 0x9a8   :  { %v8250_v28 = vpop.eup %8249  ;;  %v6036_v31 = vadd.f32 %v6035_v3, %v5965_v16  ;;  %v6178_v35 = vadd.f32 %v6177_v22, %v6107_v17  ;;  %v7596_v30 = vpop.f32.mrb[79].mxu1 }
 0x9a9   :  { %v7618_v10 = vpop.f32.mrb[79].mxu0  ;;  %v8252_v33 = vpop.eup %8251  ;;  %v5749_v14 = vadd.f32 1.0, %v8250_v28 }
 0x9aa   :  { %v5896_v19 = vadd.f32 1.0, %v8252_v33  ;;  %v6039_v34 = vadd.f32 %v9143_v52, %v6036_v31  ;;  %v6181_v15 = vadd.f32 %v9148_v58, %v6178_v35 }
 0x9ab   :  { %8253 = vrcp.f32 %v5749_v14 }
 0x9ac   :  { %8255 = vrcp.f32 %v5896_v19  ;;  %v6338_v20 = vmul.f32 -1.442695, %v6181_v15 }
 0x9ad   :  { %8257 = vtanh.f32 %v6039_v34 }
 0x9ae   :  { %8259 = vpow2.f32 %v6338_v20 }
 0x9b5   :  { %v8254_v21 = vpop.eup %8253 }
 0x9b6   :  { %v8256_v26 = vpop.eup %8255 }
 0x9b7   :  { %v8258_v37 = vpop.eup %8257  ;;  %v6188_v42 = vmul.f32 %v8256_v26, %v9411_v11 }
 0x9b8   :  { %v8260_v23 = vpop.eup %8259  ;;  %v6189_v48 = vmul.f32 %v8258_v37, %v8254_v21 }
 0x9b9   :  { %v6185_v24 = vadd.f32 1.0, %v8260_v23 }
 0x9ba   :  { %v6190_v32 = vadd.f32 %v6189_v48, %v6188_v42 }
 0x9bb   :  { %8261 = vrcp.f32 %v6185_v24 }
 0x9bc   :  { %8263 = vtanh.f32 %v6190_v32 }
 0x9c5   :  { %v8262_v50 = vpop.eup %8261 }
 0x9c6   :  { %v8264_v52 = vpop.eup %8263 }
 0x9c7   :  { %v6192_v36 = vmul.f32 %v8264_v52, %v8262_v50 }
 0x9c9   :  { %v6193_v58 = vsel %vm738_vm6, %v6192_v36, 0.0 }
 0x9ca   :  { %6194 = vst.msk [vmem:[%s9493_s11] sm:$0x3] %vm740_vm7, %v6193_v58 }

</bundles_post_ra>
